<compile_context>
chip_gen: v6e
topology: v6e:2x2x1
jax: 0.10.0
libtpu: 0.0.40
codegen_flags: <defaults>
</compile_context>

<pallas_src>
import functools
import math

import jax
import jax.numpy as jnp
from jax.experimental import pallas as pl
from jax.experimental.pallas import tpu as pltpu

VMEM_LIMIT = 32 * 1024 * 1024  # safe on v5e/v6e (128 MiB) and v7x (64 MiB physical)


def _parallel_params():
    return pltpu.CompilerParams(dimension_semantics=("parallel",),
                                vmem_limit_bytes=VMEM_LIMIT)


def _arbitrary_params():
    return pltpu.CompilerParams(dimension_semantics=("arbitrary",),
                                vmem_limit_bytes=VMEM_LIMIT)


# ----------------------------- generic row-tiled linear -----------------------

def _linear_kernel(x_ref, w_ref, b_ref, o_ref, *, act, pre_relu):
    x = x_ref[...]
    if pre_relu:
        x = jnp.maximum(x, 0.0)
    y = jnp.dot(x.astype(jnp.bfloat16), w_ref[...],
                preferred_element_type=jnp.float32) + b_ref[...]
    if act == "relu":
        y = jnp.maximum(y, 0.0)
    o_ref[...] = y.astype(o_ref.dtype)


def pallas_linear(x2, w, b, act=None, pre_relu=False):
    """y = act((relu(x) if pre_relu else x) @ w + b).  x2: (M, K), w: (K, N) bf16."""
    M, K = x2.shape
    N = w.shape[1]
    tm = M if M <= 512 else 512                       # row tile (demo: full rows)
    return pl.pallas_call(
        functools.partial(_linear_kernel, act=act, pre_relu=pre_relu),
        grid=(pl.cdiv(M, tm),),
        in_specs=[pl.BlockSpec((tm, K), lambda i: (i, 0)),
                  pl.BlockSpec((K, N), lambda i: (0, 0)),
                  pl.BlockSpec((1, N), lambda i: (0, 0))],
        out_specs=pl.BlockSpec((tm, N), lambda i: (i, 0)),
        out_shape=jax.ShapeDtypeStruct((M, N), jnp.float32),
        compiler_params=_parallel_params(),
    )(x2, w, b.reshape(1, N))


# ----------------------------- fused ConvLayer kernel -------------------------

def _conv_kernel(atom_ref, gath_ref, srep_ref, pool_ref, edge_ref,
                 wfs_ref, wfn_ref, wfe_ref, bf_ref,
                 wcs_ref, wcn_ref, wce_ref, bc_ref,
                 bnfg_ref, bnfb_ref, bncg_ref, bncb_ref, bnog_ref, bnob_ref,
                 o_ref, *, eps):
    f32 = jnp.float32
    atom = atom_ref[...]                                            # (B*N, H) f32
    atom_bf = atom.astype(jnp.bfloat16)

    # In-kernel neighbor gather: block-diagonal one-hot matmul (exact in f32).
    gathered = jnp.dot(gath_ref[...], atom, preferred_element_type=f32)   # (B*P, H)
    gathered_bf = gathered.astype(jnp.bfloat16)
    edge_bf = edge_ref[...].astype(jnp.bfloat16)

    def branch(ws_ref, wn_ref, we_ref, b_ref):
        # "self" contribution computed once per atom, then replicated M times.
        self_p = jnp.dot(atom_bf, ws_ref[...], preferred_element_type=f32)   # (B*N, H)
        rep = jnp.dot(srep_ref[...], self_p, preferred_element_type=f32)     # (B*P, H)
        return (rep
                + jnp.dot(gathered_bf, wn_ref[...], preferred_element_type=f32)
                + jnp.dot(edge_bf, we_ref[...], preferred_element_type=f32)
                + b_ref[...])

    def bn(x, g_ref, b_ref):                                        # train-mode BN
        mu = jnp.mean(x, axis=0, keepdims=True)
        var = jnp.mean((x - mu) ** 2, axis=0, keepdims=True)
        return (x - mu) * jax.lax.rsqrt(var + eps) * g_ref[...] + b_ref[...]

    filt = bn(branch(wfs_ref, wfn_ref, wfe_ref, bf_ref), bnfg_ref, bnfb_ref)
    core = bn(branch(wcs_ref, wcn_ref, wce_ref, bc_ref), bncg_ref, bncb_ref)
    gated = jax.nn.sigmoid(filt) * jnp.maximum(core, 0.0)           # (B*P, H)

    # Sum over the M neighbors of each atom (pooling matmul, exact in f32).
    nbr_sumed = jnp.dot(pool_ref[...], gated, preferred_element_type=f32)    # (B*N, H)
    o_ref[...] = jnp.maximum(atom + bn(nbr_sumed, bnog_ref, bnob_ref), 0.0)


def conv_layer(cp, atom2, edge2, gath, srep, pool, eps=1e-5):
    BN_, H = atom2.shape
    full = lambda a: pl.BlockSpec(a.shape, lambda i: (0, 0))
    args = (atom2, gath, srep, pool, edge2,
            cp["wf_s"], cp["wf_n"], cp["wf_e"], cp["bf"],
            cp["wc_s"], cp["wc_n"], cp["wc_e"], cp["bc"],
            cp["bnf_g"], cp["bnf_b"], cp["bnc_g"], cp["bnc_b"],
            cp["bno_g"], cp["bno_b"])
    return pl.pallas_call(
        functools.partial(_conv_kernel, eps=eps),
        grid=(1,),                                   # BN needs all rows (batch stats)
        in_specs=[full(a) for a in args],
        out_specs=full(atom2),
        out_shape=jax.ShapeDtypeStruct((BN_, H), jnp.float32),
        compiler_params=_arbitrary_params(),
    )(*args)


def build_gather_mats(nbr_adj_list):
    """Block-diagonal one-hot matrices so gather / self-repeat / pool are matmuls."""
    B, N, M = nbr_adj_list.shape
    P = N * M
    row_b = jnp.repeat(jnp.arange(B, dtype=jnp.int32), P)                 # (B*P,)
    flat_adj = nbr_adj_list.reshape(B * P).astype(jnp.int32)
    gath = jax.nn.one_hot(row_b * N + flat_adj, B * N, dtype=jnp.float32)  # (B*P, B*N)
    self_n = jnp.tile(jnp.repeat(jnp.arange(N, dtype=jnp.int32), M), B)
    srep = jax.nn.one_hot(row_b * N + self_n, B * N, dtype=jnp.float32)    # (B*P, B*N)
    pool = srep.T                                                          # (B*N, B*P)
    return gath, srep, pool


# ----------------------------- fused VAE head kernel --------------------------

def _vae_head_kernel(x_ref, noise_ref, wmu_ref, bmu_ref, wvar_ref, bvar_ref,
                     wfc_ref, bfc_ref, mu_ref, lv_ref, fc_ref):
    x = jnp.maximum(x_ref[...], 0.0).astype(jnp.bfloat16)          # shared pre-ReLU
    mu = jnp.dot(x, wmu_ref[...], preferred_element_type=jnp.float32) + bmu_ref[...]
    lv = jnp.dot(x, wvar_ref[...], preferred_element_type=jnp.float32) + bvar_ref[...]
    z = mu + noise_ref[...] * jnp.exp(0.5 * lv)                    # reparameterize
    fc = jnp.dot(z.astype(jnp.bfloat16), wfc_ref[...],
                 preferred_element_type=jnp.float32) + bfc_ref[...]
    mu_ref[...] = mu
    lv_ref[...] = lv
    fc_ref[...] = fc


def vae_head(prep, atom3, noise2):
    R, K = atom3.shape
    G = prep["w_mu"].shape[1]
    F = prep["w_fc"].shape[1]
    tm = R if R <= 512 else 512
    row = lambda c: pl.BlockSpec((tm, c), lambda i: (i, 0))
    full = lambda a: pl.BlockSpec(a.shape, lambda i: (0, 0))
    return pl.pallas_call(
        _vae_head_kernel,
        grid=(pl.cdiv(R, tm),),
        in_specs=[row(K), row(G),
                  full(prep["w_mu"]), full(prep["b_mu"]),
                  full(prep["w_var"]), full(prep["b_var"]),
                  full(prep["w_fc"]), full(prep["b_fc"])],
        out_specs=(row(G), row(G), row(F)),
        out_shape=(jax.ShapeDtypeStruct((R, G), jnp.float32),
                   jax.ShapeDtypeStruct((R, G), jnp.float32),
                   jax.ShapeDtypeStruct((R, F), jnp.float32)),
        compiler_params=_parallel_params(),
    )(atom3, noise2, prep["w_mu"], prep["b_mu"], prep["w_var"], prep["b_var"],
      prep["w_fc"], prep["b_fc"])


# ----------------------------- fused IdpGAN transformer block -----------------

def _idpgan_block_kernel(x_ref, wq_ref, bq_ref, wk_ref, bk_ref, wv_ref, bv_ref,
                         wo_ref, bo_ref, w1_ref, b1_ref, w2_ref, b2_ref,
                         ln1g_ref, ln1b_ref, ln2g_ref, ln2b_ref, o_ref,
                         *, nhead, scale, eps):
    f32 = jnp.float32
    x = x_ref[...]                                   # (L, E) f32 — one batch element
    xb = x.astype(jnp.bfloat16)

    # Multi-head attention: per-head weights stacked on a leading axis; summing
    # each head's (L, hd) @ Wo_h is exactly concat(heads) @ Wo.
    attn = jnp.zeros(x.shape, f32)
    for h in range(nhead):
        q = jnp.dot(xb, wq_ref[h], preferred_element_type=f32) + bq_ref[h]   # (L, hd)
        k = jnp.dot(xb, wk_ref[h], preferred_element_type=f32) + bk_ref[h]
        v = jnp.dot(xb, wv_ref[h], preferred_element_type=f32) + bv_ref[h]
        s = jax.lax.dot_general(q, k, (((1,), (1,)), ((), ())),
                                preferred_element_type=f32) * scale          # (L, L)
        m = jnp.max(s, axis=-1, keepdims=True)
        p = jnp.exp(s - m)
        p = p * pl.reciprocal(jnp.sum(p, axis=-1, keepdims=True), approx=True)
        oh = jnp.dot(p, v, preferred_element_type=f32)                       # (L, hd)
        attn = attn + jnp.dot(oh.astype(jnp.bfloat16), wo_ref[h],
                              preferred_element_type=f32)
    attn = attn + bo_ref[...]

    def layernorm(z, g_ref, b_ref):
        mu = jnp.mean(z, axis=-1, keepdims=True)
        var = jnp.mean((z - mu) ** 2, axis=-1, keepdims=True)
        return (z - mu) * jax.lax.rsqrt(var + eps) * g_ref[...] + b_ref[...]

    y = layernorm(x + attn, ln1g_ref, ln1b_ref)                              # post-norm
    hdn = jnp.maximum(jnp.dot(y.astype(jnp.bfloat16), w1_ref[...],
                              preferred_element_type=f32) + b1_ref[...], 0.0)
    f = jnp.dot(hdn.astype(jnp.bfloat16), w2_ref[...],
                preferred_element_type=f32) + b2_ref[...]
    o_ref[...] = layernorm(y + f, ln2g_ref, ln2b_ref)


def idpgan_block(tp, s, *, nhead=8, d_model=128, eps=1e-5):
    B, L, E = s.shape
    scale = 1.0 / math.sqrt(d_model)        # dp_attn_norm='d_model' reconstruction
    full3 = lambda a: pl.BlockSpec(a.shape, lambda b: (0, 0, 0))
    full2 = lambda a: pl.BlockSpec(a.shape, lambda b: (0, 0))
    return pl.pallas_call(
        functools.partial(_idpgan_block_kernel, nhead=nhead, scale=scale, eps=eps),
        grid=(B,),                           # batch-parallel (2 TCs on v7x)
        in_specs=[pl.BlockSpec((None, L, E), lambda b: (b, 0, 0)),
                  full3(tp["wq"]), full3(tp["bq"]),
                  full3(tp["wk"]), full3(tp["bk"]),
                  full3(tp["wv"]), full3(tp["bv"]),
                  full3(tp["wo"]), full2(tp["bo"]),
                  full2(tp["w1"]), full2(tp["b1"]),
                  full2(tp["w2"]), full2(tp["b2"]),
                  full2(tp["ln1_g"]), full2(tp["ln1_b"]),
                  full2(tp["ln2_g"]), full2(tp["ln2_b"])],
        out_specs=pl.BlockSpec((None, L, E), lambda b: (b, 0, 0)),
        out_shape=jax.ShapeDtypeStruct((B, L, E), jnp.float32),
        compiler_params=_parallel_params(),
    )(s, tp["wq"], tp["bq"], tp["wk"], tp["bk"], tp["wv"], tp["bv"],
      tp["wo"], tp["bo"], tp["w1"], tp["b1"], tp["w2"], tp["b2"],
      tp["ln1_g"], tp["ln1_b"], tp["ln2_g"], tp["ln2_b"])


# ----------------------------- forward pass ------------------------------------

def phanto_idp_forward(prep, atom_emb_idx, nbr_emb, nbr_adj_list, noise):
    B, N = atom_emb_idx.shape
    M = nbr_adj_list.shape[-1]
    lookup = jnp.take(prep["atom_embeddings"], atom_emb_idx, axis=0)      # (B, N, h_init)
    atom2 = pallas_linear(lookup.reshape(B * N, lookup.shape[-1]),
                          prep["w_embed"], prep["b_embed"])               # (B*N, h_a)
    H = atom2.shape[-1]

    gath, srep, pool = build_gather_mats(nbr_adj_list)
    edge2 = nbr_emb.reshape(B * N * M, nbr_emb.shape[-1])
    for cp in prep["convs"]:
        atom2 = conv_layer(cp, atom2, edge2, gath, srep, pool)            # (B*N, h_a)

    Lr = N // 3
    atom3 = atom2.reshape(B * Lr, 3 * H)                                  # (B*Lr, 3*h_a)
    amino_mu, amino_logvar, amino_fc = vae_head(prep, atom3,
                                                noise.reshape(B * Lr, -1))

    s = amino_fc.reshape(B, Lr, amino_fc.shape[-1])                       # batch-first
    for tp in prep["transformers"]:
        s = idpgan_block(tp, s)

    # Lane-dense (128-wide) output projection, sliced to 9 in the wrapper.
    out_p = pallas_linear(s.reshape(B * Lr, s.shape[-1]),
                          prep["w_out"], prep["b_out"])
    out = out_p[:, :9].reshape(B, Lr, 3, 3)
    return out, amino_mu.reshape(B, Lr, -1), amino_logvar.reshape(B, Lr, -1)


# ----------------------------- parameter init / prep ---------------------------

def init_params(key, *, num_atom_types, h_init, h_a, h_b, h_g, n_conv):
    keys = iter(jax.random.split(key, 128))

    def lin(fan_in, fan_out):
        k1, k2 = jax.random.split(next(keys))
        bound = 1.0 / math.sqrt(fan_in)
        w = jax.random.uniform(k1, (fan_in, fan_out), jnp.float32, -bound, bound)
        b = jax.random.uniform(k2, (fan_out,), jnp.float32, -bound, bound)
        return w, b

    params = {"atom_embeddings": jax.random.normal(next(keys), (num_atom_types, h_init),
                                                   jnp.float32)}
    params["w_embed"], params["b_embed"] = lin(h_init, h_a)

    convs = []
    for _ in range(n_conv):
        w_full, b_full = lin(2 * h_a + h_b, 2 * h_a)
        convs.append(dict(
            w_full=w_full, b_full=b_full,
            bn_h_g=jnp.ones((2 * h_a,), jnp.float32), bn_h_b=jnp.zeros((2 * h_a,), jnp.float32),
            bn_o_g=jnp.ones((h_a,), jnp.float32), bn_o_b=jnp.zeros((h_a,), jnp.float32)))
    params["convs"] = convs

    params["w_mu"], params["b_mu"] = lin(h_a * 3, h_g)
    params["w_var"], params["b_var"] = lin(h_a * 3, h_g)
    params["w_fc"], params["b_fc"] = lin(h_g, 32)
    params["w_out"], params["b_out"] = lin(32, 9)

    embed_dim, d_model, dff = 32, 128, 128
    trs = []
    for _ in range(n_conv):
        wq, bq = lin(embed_dim, d_model)
        wk, bk = lin(embed_dim, d_model)
        wv, bv = lin(embed_dim, d_model)
        wo, bo = lin(d_model, embed_dim)
        w1, b1 = lin(embed_dim, dff)
        w2, b2 = lin(dff, embed_dim)
        trs.append(dict(
            wq=wq, bq=bq, wk=wk, bk=bk, wv=wv, bv=bv, wo=wo, bo=bo,
            w1=w1, b1=b1, w2=w2, b2=b2,
            ln1_g=jnp.ones((embed_dim,), jnp.float32), ln1_b=jnp.zeros((embed_dim,), jnp.float32),
            ln2_g=jnp.ones((embed_dim,), jnp.float32), ln2_b=jnp.zeros((embed_dim,), jnp.float32)))
    params["transformers"] = trs
    return params


def _prep_conv(cp, H):
    bf16 = jnp.bfloat16
    w, b = cp["w_full"], cp["b_full"]
    return dict(
        wf_s=w[:H, :H].astype(bf16), wf_n=w[H:2 * H, :H].astype(bf16),
        wf_e=w[2 * H:, :H].astype(bf16),
        wc_s=w[:H, H:].astype(bf16), wc_n=w[H:2 * H, H:].astype(bf16),
        wc_e=w[2 * H:, H:].astype(bf16),
        bf=b[:H].reshape(1, H), bc=b[H:].reshape(1, H),
        bnf_g=cp["bn_h_g"][:H].reshape(1, H), bnf_b=cp["bn_h_b"][:H].reshape(1, H),
        bnc_g=cp["bn_h_g"][H:].reshape(1, H), bnc_b=cp["bn_h_b"][H:].reshape(1, H),
        bno_g=cp["bn_o_g"].reshape(1, H), bno_b=cp["bn_o_b"].reshape(1, H))


def _prep_transformer(tp, nhead=8):
    E, d_model = tp["wq"].shape
    hd = d_model // nhead
    bf16 = jnp.bfloat16
    per_head_w = lambda w: jnp.transpose(w.reshape(E, nhead, hd), (1, 0, 2)).astype(bf16)
    per_head_b = lambda b: b.reshape(nhead, 1, hd).astype(jnp.float32)
    return dict(
        wq=per_head_w(tp["wq"]), bq=per_head_b(tp["bq"]),
        wk=per_head_w(tp["wk"]), bk=per_head_b(tp["bk"]),
        wv=per_head_w(tp["wv"]), bv=per_head_b(tp["bv"]),
        wo=tp["wo"].reshape(nhead, hd, E).astype(bf16), bo=tp["bo"].reshape(1, E),
        w1=tp["w1"].astype(bf16), b1=tp["b1"].reshape(1, -1),
        w2=tp["w2"].astype(bf16), b2=tp["b2"].reshape(1, -1),
        ln1_g=tp["ln1_g"].reshape(1, E), ln1_b=tp["ln1_b"].reshape(1, E),
        ln2_g=tp["ln2_g"].reshape(1, E), ln2_b=tp["ln2_b"].reshape(1, E))


def prepare_params(params):
    h_a = params["convs"][0]["bn_o_g"].shape[0]
    bf16 = jnp.bfloat16
    w_out, b_out = params["w_out"], params["b_out"]
    n_out = w_out.shape[1]
    w_out_pad = jnp.zeros((w_out.shape[0], 128), jnp.float32).at[:, :n_out].set(w_out)
    b_out_pad = jnp.zeros((128,), jnp.float32).at[:n_out].set(b_out)
    return dict(
        atom_embeddings=params["atom_embeddings"],
        w_embed=params["w_embed"].astype(bf16), b_embed=params["b_embed"].reshape(1, -1),
        convs=[_prep_conv(cp, h_a) for cp in params["convs"]],
        w_mu=params["w_mu"].astype(bf16), b_mu=params["b_mu"].reshape(1, -1),
        w_var=params["w_var"].astype(bf16), b_var=params["b_var"].reshape(1, -1),
        w_fc=params["w_fc"].astype(bf16), b_fc=params["b_fc"].reshape(1, -1),
        w_out=w_out_pad.astype(bf16), b_out=b_out_pad.reshape(1, -1),
        transformers=[_prep_transformer(tp) for tp in params["transformers"]])


# ----------------------------------- Main ---------------------------------------

if __name__ == "__main__":
    # Small shapes: 2 proteins, 24 atoms (= 8 residues x 3 backbone atoms), 4 neighbors.
    B, N_atoms, M_nbr = 2, 24, 4
    num_atom_types, h_init, h_a, h_b, h_g, n_conv = 8, 16, 64, 8, 32, 4

    key = jax.random.PRNGKey(0)
    kp, k1, k2, k3, kn = jax.random.split(key, 5)
    params = init_params(kp, num_atom_types=num_atom_types, h_init=h_init,
                         h_a=h_a, h_b=h_b, h_g=h_g, n_conv=n_conv)
    prep = prepare_params(params)

    atom_emb_idx = jax.random.randint(k1, (B, N_atoms), 0, num_atom_types, dtype=jnp.int32)
    nbr_emb = jax.random.normal(k2, (B, N_atoms, M_nbr, h_b), jnp.float32)
    nbr_adj_list = jax.random.randint(k3, (B, N_atoms, M_nbr), 0, N_atoms, dtype=jnp.int32)
    noise = jax.random.normal(kn, (B, N_atoms // 3, h_g), jnp.float32)  # reparameterize eps

    fwd = jax.jit(phanto_idp_forward)
    out, amino_mu, amino_logvar = fwd(prep, atom_emb_idx, nbr_emb, nbr_adj_list, noise)
    jax.block_until_ready((out, amino_mu, amino_logvar))

    assert out.shape == (B, N_atoms // 3, 3, 3)
    assert amino_mu.shape == (B, N_atoms // 3, h_g)
    assert amino_logvar.shape == (B, N_atoms // 3, h_g)
    assert bool(jnp.all(jnp.isfinite(out)))
    print("KERNEL_OK")
</pallas_src>

<mosaic_0001>
module attributes {stable_mosaic.version = 11 : i64} {
  func.func @_linear_kernel(%arg0: i32, %arg1: memref<48x16xf32, #tpu.memory_space<vmem>>, %arg2: memref<16x64xbf16, #tpu.memory_space<vmem>>, %arg3: memref<1x64xf32, #tpu.memory_space<vmem>>, %arg4: memref<48x64xf32, #tpu.memory_space<vmem>>) attributes {dimension_semantics = [#tpu.dimension_semantics<parallel>], iteration_bounds = array<i64: 1>, scalar_prefetch = 0 : i64, scratch_operands = 0 : i64, tpu.core_type = #tpu.core_type<tc>, window_params = [{transform_indices = @transform_0, window_bounds = array<i64: 48, 16>}, {pipeline_mode = #tpu.pipeline_mode<synchronous>, transform_indices = @transform_1, window_bounds = array<i64: 16, 64>}, {pipeline_mode = #tpu.pipeline_mode<synchronous>, transform_indices = @transform_2, window_bounds = array<i64: 1, 64>}, {transform_indices = @transform_3, window_bounds = array<i64: 48, 64>}]} {
    %c0 = arith.constant 0 : index
    %c0_0 = arith.constant 0 : index
    %0 = vector.load %arg1[%c0, %c0_0] : memref<48x16xf32, #tpu.memory_space<vmem>>, vector<48x16xf32>
    %1 = arith.truncf %0 : vector<48x16xf32> to vector<48x16xbf16>
    %c0_1 = arith.constant 0 : index
    %c0_2 = arith.constant 0 : index
    %2 = vector.load %arg2[%c0_1, %c0_2] : memref<16x64xbf16, #tpu.memory_space<vmem>>, vector<16x64xbf16>
    %cst = arith.constant dense<0.000000e+00> : vector<48x64xf32>
    %3 = tpu.matmul %1, %2, %cst {dimension_numbers = #tpu.dot_dimension_numbers<[1], [0], [0], [1], [0, 0, 1, 1], [], []>} : vector<48x16xbf16>, vector<16x64xbf16>, vector<48x64xf32> -> vector<48x64xf32>
    %c0_3 = arith.constant 0 : index
    %c0_4 = arith.constant 0 : index
    %4 = vector.load %arg3[%c0_3, %c0_4] : memref<1x64xf32, #tpu.memory_space<vmem>>, vector<1x64xf32>
    %5 = vector.broadcast %4 : vector<1x64xf32> to vector<48x64xf32>
    %6 = arith.addf %3, %5 : vector<48x64xf32>
    %c0_5 = arith.constant 0 : index
    %c0_6 = arith.constant 0 : index
    %7 = vector.load %arg4[%c0_5, %c0_6] : memref<48x64xf32, #tpu.memory_space<vmem>>, vector<48x64xf32>
    tpu.vector_store %arg4[%c0_5, %c0_6], %6 {strides = array<i32>} : memref<48x64xf32, #tpu.memory_space<vmem>>, vector<48x64xf32>,
    return
  }
  func.func @transform_0(%arg0: i32) -> (i32, i32) {
    %c0_i32 = arith.constant 0 : i32
    %c0_i32_0 = arith.constant 0 : i32
    return %arg0, %c0_i32 : i32, i32
  }
  func.func @transform_1(%arg0: i32) -> (i32, i32) {
    %c0_i32 = arith.constant 0 : i32
    %c0_i32_0 = arith.constant 0 : i32
    %c0_i32_1 = arith.constant 0 : i32
    return %c0_i32, %c0_i32_0 : i32, i32
  }
  func.func @transform_2(%arg0: i32) -> (i32, i32) {
    %c0_i32 = arith.constant 0 : i32
    %c0_i32_0 = arith.constant 0 : i32
    %c0_i32_1 = arith.constant 0 : i32
    return %c0_i32, %c0_i32_0 : i32, i32
  }
  func.func @transform_3(%arg0: i32) -> (i32, i32) {
    %c0_i32 = arith.constant 0 : i32
    %c0_i32_0 = arith.constant 0 : i32
    return %arg0, %c0_i32 : i32, i32
  }
}

module attributes {stable_mosaic.version = 11 : i64} {
  func.func @_conv_kernel(%arg0: i32, %arg1: memref<48x64xf32, #tpu.memory_space<vmem>>, %arg2: memref<192x48xf32, #tpu.memory_space<vmem>>, %arg3: memref<192x48xf32, #tpu.memory_space<vmem>>, %arg4: memref<48x192xf32, #tpu.memory_space<vmem>>, %arg5: memref<192x8xf32, #tpu.memory_space<vmem>>, %arg6: memref<64x64xbf16, #tpu.memory_space<vmem>>, %arg7: memref<64x64xbf16, #tpu.memory_space<vmem>>, %arg8: memref<8x64xbf16, #tpu.memory_space<vmem>>, %arg9: memref<1x64xf32, #tpu.memory_space<vmem>>, %arg10: memref<64x64xbf16, #tpu.memory_space<vmem>>, %arg11: memref<64x64xbf16, #tpu.memory_space<vmem>>, %arg12: memref<8x64xbf16, #tpu.memory_space<vmem>>, %arg13: memref<1x64xf32, #tpu.memory_space<vmem>>, %arg14: memref<1x64xf32, #tpu.memory_space<vmem>>, %arg15: memref<1x64xf32, #tpu.memory_space<vmem>>, %arg16: memref<1x64xf32, #tpu.memory_space<vmem>>, %arg17: memref<1x64xf32, #tpu.memory_space<vmem>>, %arg18: memref<1x64xf32, #tpu.memory_space<vmem>>, %arg19: memref<1x64xf32, #tpu.memory_space<vmem>>, %arg20: memref<48x64xf32, #tpu.memory_space<vmem>>) attributes {dimension_semantics = [#tpu.dimension_semantics<arbitrary>], iteration_bounds = array<i64: 1>, scalar_prefetch = 0 : i64, scratch_operands = 0 : i64, tpu.core_type = #tpu.core_type<tc>, window_params = [{pipeline_mode = #tpu.pipeline_mode<synchronous>, transform_indices = @transform_0, window_bounds = array<i64: 48, 64>}, {pipeline_mode = #tpu.pipeline_mode<synchronous>, transform_indices = @transform_1, window_bounds = array<i64: 192, 48>}, {pipeline_mode = #tpu.pipeline_mode<synchronous>, transform_indices = @transform_2, window_bounds = array<i64: 192, 48>}, {pipeline_mode = #tpu.pipeline_mode<synchronous>, transform_indices = @transform_3, window_bounds = array<i64: 48, 192>}, {pipeline_mode = #tpu.pipeline_mode<synchronous>, transform_indices = @transform_4, window_bounds = array<i64: 192, 8>}, {pipeline_mode = #tpu.pipeline_mode<synchronous>, transform_indices = @transform_5, window_bounds = array<i64: 64, 64>}, {pipeline_mode = #tpu.pipeline_mode<synchronous>, transform_indices = @transform_6, window_bounds = array<i64: 64, 64>}, {pipeline_mode = #tpu.pipeline_mode<synchronous>, transform_indices = @transform_7, window_bounds = array<i64: 8, 64>}, {pipeline_mode = #tpu.pipeline_mode<synchronous>, transform_indices = @transform_8, window_bounds = array<i64: 1, 64>}, {pipeline_mode = #tpu.pipeline_mode<synchronous>, transform_indices = @transform_9, window_bounds = array<i64: 64, 64>}, {pipeline_mode = #tpu.pipeline_mode<synchronous>, transform_indices = @transform_10, window_bounds = array<i64: 64, 64>}, {pipeline_mode = #tpu.pipeline_mode<synchronous>, transform_indices = @transform_11, window_bounds = array<i64: 8, 64>}, {pipeline_mode = #tpu.pipeline_mode<synchronous>, transform_indices = @transform_12, window_bounds = array<i64: 1, 64>}, {pipeline_mode = #tpu.pipeline_mode<synchronous>, transform_indices = @transform_13, window_bounds = array<i64: 1, 64>}, {pipeline_mode = #tpu.pipeline_mode<synchronous>, transform_indices = @transform_14, window_bounds = array<i64: 1, 64>}, {pipeline_mode = #tpu.pipeline_mode<synchronous>, transform_indices = @transform_15, window_bounds = array<i64: 1, 64>}, {pipeline_mode = #tpu.pipeline_mode<synchronous>, transform_indices = @transform_16, window_bounds = array<i64: 1, 64>}, {pipeline_mode = #tpu.pipeline_mode<synchronous>, transform_indices = @transform_17, window_bounds = array<i64: 1, 64>}, {pipeline_mode = #tpu.pipeline_mode<synchronous>, transform_indices = @transform_18, window_bounds = array<i64: 1, 64>}, {pipeline_mode = #tpu.pipeline_mode<synchronous>, transform_indices = @transform_19, window_bounds = array<i64: 48, 64>}]} {
    %c0 = arith.constant 0 : index
    %c0_0 = arith.constant 0 : index
    %0 = vector.load %arg1[%c0, %c0_0] : memref<48x64xf32, #tpu.memory_space<vmem>>, vector<48x64xf32>
    %1 = arith.truncf %0 : vector<48x64xf32> to vector<48x64xbf16>
    %c0_1 = arith.constant 0 : index
    %c0_2 = arith.constant 0 : index
    %2 = vector.load %arg2[%c0_1, %c0_2] : memref<192x48xf32, #tpu.memory_space<vmem>>, vector<192x48xf32>
    %cst = arith.constant dense<0.000000e+00> : vector<192x64xf32>
    %3 = tpu.matmul %2, %0, %cst {dimension_numbers = #tpu.dot_dimension_numbers<[1], [0], [0], [1], [0, 0, 1, 1], [], []>} : vector<192x48xf32>, vector<48x64xf32>, vector<192x64xf32> -> vector<192x64xf32>
    %4 = arith.truncf %3 : vector<192x64xf32> to vector<192x64xbf16>
    %c0_3 = arith.constant 0 : index
    %c0_4 = arith.constant 0 : index
    %5 = vector.load %arg5[%c0_3, %c0_4] : memref<192x8xf32, #tpu.memory_space<vmem>>, vector<192x8xf32>
    %6 = arith.truncf %5 : vector<192x8xf32> to vector<192x8xbf16>
    %c0_5 = arith.constant 0 : index
    %c0_6 = arith.constant 0 : index
    %7 = vector.load %arg6[%c0_5, %c0_6] : memref<64x64xbf16, #tpu.memory_space<vmem>>, vector<64x64xbf16>
    %cst_7 = arith.constant dense<0.000000e+00> : vector<48x64xf32>
    %8 = tpu.matmul %1, %7, %cst_7 {dimension_numbers = #tpu.dot_dimension_numbers<[1], [0], [0], [1], [0, 0, 1, 1], [], []>} : vector<48x64xbf16>, vector<64x64xbf16>, vector<48x64xf32> -> vector<48x64xf32>
    %c0_8 = arith.constant 0 : index
    %c0_9 = arith.constant 0 : index
    %9 = vector.load %arg3[%c0_8, %c0_9] : memref<192x48xf32, #tpu.memory_space<vmem>>, vector<192x48xf32>
    %cst_10 = arith.constant dense<0.000000e+00> : vector<192x64xf32>
    %10 = tpu.matmul %9, %8, %cst_10 {dimension_numbers = #tpu.dot_dimension_numbers<[1], [0], [0], [1], [0, 0, 1, 1], [], []>} : vector<192x48xf32>, vector<48x64xf32>, vector<192x64xf32> -> vector<192x64xf32>
    %c0_11 = arith.constant 0 : index
    %c0_12 = arith.constant 0 : index
    %11 = vector.load %arg7[%c0_11, %c0_12] : memref<64x64xbf16, #tpu.memory_space<vmem>>, vector<64x64xbf16>
    %cst_13 = arith.constant dense<0.000000e+00> : vector<192x64xf32>
    %12 = tpu.matmul %4, %11, %cst_13 {dimension_numbers = #tpu.dot_dimension_numbers<[1], [0], [0], [1], [0, 0, 1, 1], [], []>} : vector<192x64xbf16>, vector<64x64xbf16>, vector<192x64xf32> -> vector<192x64xf32>
    %13 = arith.addf %10, %12 : vector<192x64xf32>
    %c0_14 = arith.constant 0 : index
    %c0_15 = arith.constant 0 : index
    %14 = vector.load %arg8[%c0_14, %c0_15] : memref<8x64xbf16, #tpu.memory_space<vmem>>, vector<8x64xbf16>
    %cst_16 = arith.constant dense<0.000000e+00> : vector<192x64xf32>
    %15 = tpu.matmul %6, %14, %cst_16 {dimension_numbers = #tpu.dot_dimension_numbers<[1], [0], [0], [1], [0, 0, 1, 1], [], []>} : vector<192x8xbf16>, vector<8x64xbf16>, vector<192x64xf32> -> vector<192x64xf32>
    %16 = arith.addf %13, %15 : vector<192x64xf32>
    %c0_17 = arith.constant 0 : index
    %c0_18 = arith.constant 0 : index
    %17 = vector.load %arg9[%c0_17, %c0_18] : memref<1x64xf32, #tpu.memory_space<vmem>>, vector<1x64xf32>
    %18 = vector.broadcast %17 : vector<1x64xf32> to vector<192x64xf32>
    %19 = arith.addf %16, %18 : vector<192x64xf32>
    %cst_19 = arith.constant dense<0.000000e+00> : vector<64xf32>
    %20 = vector.multi_reduction <add>, %19, %cst_19 [0] : vector<192x64xf32> to vector<64xf32>
    %21 = vector.shape_cast %20 : vector<64xf32> to vector<1x64xf32>
    %cst_20 = arith.constant 1.920000e+02 : f32
    %22 = vector.broadcast %cst_20 : f32 to vector<1x64xf32>
    %23 = arith.divf %21, %22 : vector<1x64xf32>
    %24 = vector.broadcast %23 : vector<1x64xf32> to vector<192x64xf32>
    %25 = arith.subf %19, %24 : vector<192x64xf32>
    %26 = arith.mulf %25, %25 : vector<192x64xf32>
    %cst_21 = arith.constant dense<0.000000e+00> : vector<64xf32>
    %27 = vector.multi_reduction <add>, %26, %cst_21 [0] : vector<192x64xf32> to vector<64xf32>
    %28 = vector.shape_cast %27 : vector<64xf32> to vector<1x64xf32>
    %cst_22 = arith.constant 1.920000e+02 : f32
    %29 = vector.broadcast %cst_22 : f32 to vector<1x64xf32>
    %30 = arith.divf %28, %29 : vector<1x64xf32>
    %31 = vector.broadcast %23 : vector<1x64xf32> to vector<192x64xf32>
    %32 = arith.subf %19, %31 : vector<192x64xf32>
    %cst_23 = arith.constant 9.99999974E-6 : f32
    %33 = vector.broadcast %cst_23 : f32 to vector<1x64xf32>
    %34 = arith.addf %30, %33 : vector<1x64xf32>
    %35 = math.rsqrt %34 : vector<1x64xf32>
    %36 = vector.broadcast %35 : vector<1x64xf32> to vector<192x64xf32>
    %37 = arith.mulf %32, %36 : vector<192x64xf32>
    %c0_24 = arith.constant 0 : index
    %c0_25 = arith.constant 0 : index
    %38 = vector.load %arg14[%c0_24, %c0_25] : memref<1x64xf32, #tpu.memory_space<vmem>>, vector<1x64xf32>
    %39 = vector.broadcast %38 : vector<1x64xf32> to vector<192x64xf32>
    %40 = arith.mulf %37, %39 : vector<192x64xf32>
    %c0_26 = arith.constant 0 : index
    %c0_27 = arith.constant 0 : index
    %41 = vector.load %arg15[%c0_26, %c0_27] : memref<1x64xf32, #tpu.memory_space<vmem>>, vector<1x64xf32>
    %42 = vector.broadcast %41 : vector<1x64xf32> to vector<192x64xf32>
    %43 = arith.addf %40, %42 : vector<192x64xf32>
    %c0_28 = arith.constant 0 : index
    %c0_29 = arith.constant 0 : index
    %44 = vector.load %arg10[%c0_28, %c0_29] : memref<64x64xbf16, #tpu.memory_space<vmem>>, vector<64x64xbf16>
    %cst_30 = arith.constant dense<0.000000e+00> : vector<48x64xf32>
    %45 = tpu.matmul %1, %44, %cst_30 {dimension_numbers = #tpu.dot_dimension_numbers<[1], [0], [0], [1], [0, 0, 1, 1], [], []>} : vector<48x64xbf16>, vector<64x64xbf16>, vector<48x64xf32> -> vector<48x64xf32>
    %c0_31 = arith.constant 0 : index
    %c0_32 = arith.constant 0 : index
    %46 = vector.load %arg3[%c0_31, %c0_32] : memref<192x48xf32, #tpu.memory_space<vmem>>, vector<192x48xf32>
    %cst_33 = arith.constant dense<0.000000e+00> : vector<192x64xf32>
    %47 = tpu.matmul %46, %45, %cst_33 {dimension_numbers = #tpu.dot_dimension_numbers<[1], [0], [0], [1], [0, 0, 1, 1], [], []>} : vector<192x48xf32>, vector<48x64xf32>, vector<192x64xf32> -> vector<192x64xf32>
    %c0_34 = arith.constant 0 : index
    %c0_35 = arith.constant 0 : index
    %48 = vector.load %arg11[%c0_34, %c0_35] : memref<64x64xbf16, #tpu.memory_space<vmem>>, vector<64x64xbf16>
    %cst_36 = arith.constant dense<0.000000e+00> : vector<192x64xf32>
    %49 = tpu.matmul %4, %48, %cst_36 {dimension_numbers = #tpu.dot_dimension_numbers<[1], [0], [0], [1], [0, 0, 1, 1], [], []>} : vector<192x64xbf16>, vector<64x64xbf16>, vector<192x64xf32> -> vector<192x64xf32>
    %50 = arith.addf %47, %49 : vector<192x64xf32>
    %c0_37 = arith.constant 0 : index
    %c0_38 = arith.constant 0 : index
    %51 = vector.load %arg12[%c0_37, %c0_38] : memref<8x64xbf16, #tpu.memory_space<vmem>>, vector<8x64xbf16>
    %cst_39 = arith.constant dense<0.000000e+00> : vector<192x64xf32>
    %52 = tpu.matmul %6, %51, %cst_39 {dimension_numbers = #tpu.dot_dimension_numbers<[1], [0], [0], [1], [0, 0, 1, 1], [], []>} : vector<192x8xbf16>, vector<8x64xbf16>, vector<192x64xf32> -> vector<192x64xf32>
    %53 = arith.addf %50, %52 : vector<192x64xf32>
    %c0_40 = arith.constant 0 : index
    %c0_41 = arith.constant 0 : index
    %54 = vector.load %arg13[%c0_40, %c0_41] : memref<1x64xf32, #tpu.memory_space<vmem>>, vector<1x64xf32>
    %55 = vector.broadcast %54 : vector<1x64xf32> to vector<192x64xf32>
    %56 = arith.addf %53, %55 : vector<192x64xf32>
    %cst_42 = arith.constant dense<0.000000e+00> : vector<64xf32>
    %57 = vector.multi_reduction <add>, %56, %cst_42 [0] : vector<192x64xf32> to vector<64xf32>
    %58 = vector.shape_cast %57 : vector<64xf32> to vector<1x64xf32>
    %cst_43 = arith.constant 1.920000e+02 : f32
    %59 = vector.broadcast %cst_43 : f32 to vector<1x64xf32>
    %60 = arith.divf %58, %59 : vector<1x64xf32>
    %61 = vector.broadcast %60 : vector<1x64xf32> to vector<192x64xf32>
    %62 = arith.subf %56, %61 : vector<192x64xf32>
    %63 = arith.mulf %62, %62 : vector<192x64xf32>
    %cst_44 = arith.constant dense<0.000000e+00> : vector<64xf32>
    %64 = vector.multi_reduction <add>, %63, %cst_44 [0] : vector<192x64xf32> to vector<64xf32>
    %65 = vector.shape_cast %64 : vector<64xf32> to vector<1x64xf32>
    %cst_45 = arith.constant 1.920000e+02 : f32
    %66 = vector.broadcast %cst_45 : f32 to vector<1x64xf32>
    %67 = arith.divf %65, %66 : vector<1x64xf32>
    %68 = vector.broadcast %60 : vector<1x64xf32> to vector<192x64xf32>
    %69 = arith.subf %56, %68 : vector<192x64xf32>
    %cst_46 = arith.constant 9.99999974E-6 : f32
    %70 = vector.broadcast %cst_46 : f32 to vector<1x64xf32>
    %71 = arith.addf %67, %70 : vector<1x64xf32>
    %72 = math.rsqrt %71 : vector<1x64xf32>
    %73 = vector.broadcast %72 : vector<1x64xf32> to vector<192x64xf32>
    %74 = arith.mulf %69, %73 : vector<192x64xf32>
    %c0_47 = arith.constant 0 : index
    %c0_48 = arith.constant 0 : index
    %75 = vector.load %arg16[%c0_47, %c0_48] : memref<1x64xf32, #tpu.memory_space<vmem>>, vector<1x64xf32>
    %76 = vector.broadcast %75 : vector<1x64xf32> to vector<192x64xf32>
    %77 = arith.mulf %74, %76 : vector<192x64xf32>
    %c0_49 = arith.constant 0 : index
    %c0_50 = arith.constant 0 : index
    %78 = vector.load %arg17[%c0_49, %c0_50] : memref<1x64xf32, #tpu.memory_space<vmem>>, vector<1x64xf32>
    %79 = vector.broadcast %78 : vector<1x64xf32> to vector<192x64xf32>
    %80 = arith.addf %77, %79 : vector<192x64xf32>
    %81 = arith.negf %43 : vector<192x64xf32>
    %82 = math.exp %81 : vector<192x64xf32>
    %cst_51 = arith.constant 1.000000e+00 : f32
    %83 = vector.broadcast %cst_51 : f32 to vector<192x64xf32>
    %84 = arith.addf %83, %82 : vector<192x64xf32>
    %85 = arith.divf %83, %84 : vector<192x64xf32>
    %cst_52 = arith.constant 0.000000e+00 : f32
    %86 = vector.broadcast %cst_52 : f32 to vector<192x64xf32>
    %87 = arith.maximumf %80, %86 : vector<192x64xf32>
    %88 = arith.mulf %85, %87 : vector<192x64xf32>
    %c0_53 = arith.constant 0 : index
    %c0_54 = arith.constant 0 : index
    %89 = vector.load %arg4[%c0_53, %c0_54] : memref<48x192xf32, #tpu.memory_space<vmem>>, vector<48x192xf32>
    %cst_55 = arith.constant dense<0.000000e+00> : vector<48x64xf32>
    %90 = tpu.matmul %89, %88, %cst_55 {dimension_numbers = #tpu.dot_dimension_numbers<[1], [0], [0], [1], [0, 0, 1, 1], [], []>} : vector<48x192xf32>, vector<192x64xf32>, vector<48x64xf32> -> vector<48x64xf32>
    %cst_56 = arith.constant dense<0.000000e+00> : vector<64xf32>
    %91 = vector.multi_reduction <add>, %90, %cst_56 [0] : vector<48x64xf32> to vector<64xf32>
    %92 = vector.shape_cast %91 : vector<64xf32> to vector<1x64xf32>
    %cst_57 = arith.constant 4.800000e+01 : f32
    %93 = vector.broadcast %cst_57 : f32 to vector<1x64xf32>
    %94 = arith.divf %92, %93 : vector<1x64xf32>
    %95 = vector.broadcast %94 : vector<1x64xf32> to vector<48x64xf32>
    %96 = arith.subf %90, %95 : vector<48x64xf32>
    %97 = arith.mulf %96, %96 : vector<48x64xf32>
    %cst_58 = arith.constant dense<0.000000e+00> : vector<64xf32>
    %98 = vector.multi_reduction <add>, %97, %cst_58 [0] : vector<48x64xf32> to vector<64xf32>
    %99 = vector.shape_cast %98 : vector<64xf32> to vector<1x64xf32>
    %cst_59 = arith.constant 4.800000e+01 : f32
    %100 = vector.broadcast %cst_59 : f32 to vector<1x64xf32>
    %101 = arith.divf %99, %100 : vector<1x64xf32>
    %102 = vector.broadcast %94 : vector<1x64xf32> to vector<48x64xf32>
    %103 = arith.subf %90, %102 : vector<48x64xf32>
    %cst_60 = arith.constant 9.99999974E-6 : f32
    %104 = vector.broadcast %cst_60 : f32 to vector<1x64xf32>
    %105 = arith.addf %101, %104 : vector<1x64xf32>
    %106 = math.rsqrt %105 : vector<1x64xf32>
    %107 = vector.broadcast %106 : vector<1x64xf32> to vector<48x64xf32>
    %108 = arith.mulf %103, %107 : vector<48x64xf32>
    %c0_61 = arith.constant 0 : index
    %c0_62 = arith.constant 0 : index
    %109 = vector.load %arg18[%c0_61, %c0_62] : memref<1x64xf32, #tpu.memory_space<vmem>>, vector<1x64xf32>
    %110 = vector.broadcast %109 : vector<1x64xf32> to vector<48x64xf32>
    %111 = arith.mulf %108, %110 : vector<48x64xf32>
    %c0_63 = arith.constant 0 : index
    %c0_64 = arith.constant 0 : index
    %112 = vector.load %arg19[%c0_63, %c0_64] : memref<1x64xf32, #tpu.memory_space<vmem>>, vector<1x64xf32>
    %113 = vector.broadcast %112 : vector<1x64xf32> to vector<48x64xf32>
    %114 = arith.addf %111, %113 : vector<48x64xf32>
    %115 = arith.addf %0, %114 : vector<48x64xf32>
    %cst_65 = arith.constant 0.000000e+00 : f32
    %116 = vector.broadcast %cst_65 : f32 to vector<48x64xf32>
    %117 = arith.maximumf %115, %116 : vector<48x64xf32>
    %c0_66 = arith.constant 0 : index
    %c0_67 = arith.constant 0 : index
    %118 = vector.load %arg20[%c0_66, %c0_67] : memref<48x64xf32, #tpu.memory_space<vmem>>, vector<48x64xf32>
    tpu.vector_store %arg20[%c0_66, %c0_67], %117 {strides = array<i32>} : memref<48x64xf32, #tpu.memory_space<vmem>>, vector<48x64xf32>,
    return
  }
  func.func @transform_0(%arg0: i32) -> (i32, i32) {
    %c0_i32 = arith.constant 0 : i32
    %c0_i32_0 = arith.constant 0 : i32
    %c0_i32_1 = arith.constant 0 : i32
    return %c0_i32, %c0_i32_0 : i32, i32
  }
  func.func @transform_1(%arg0: i32) -> (i32, i32) {
    %c0_i32 = arith.constant 0 : i32
    %c0_i32_0 = arith.constant 0 : i32
    %c0_i32_1 = arith.constant 0 : i32
    return %c0_i32, %c0_i32_0 : i32, i32
  }
  func.func @transform_2(%arg0: i32) -> (i32, i32) {
    %c0_i32 = arith.constant 0 : i32
    %c0_i32_0 = arith.constant 0 : i32
    %c0_i32_1 = arith.constant 0 : i32
    return %c0_i32, %c0_i32_0 : i32, i32
  }
  func.func @transform_3(%arg0: i32) -> (i32, i32) {
    %c0_i32 = arith.constant 0 : i32
    %c0_i32_0 = arith.constant 0 : i32
    %c0_i32_1 = arith.constant 0 : i32
    return %c0_i32, %c0_i32_0 : i32, i32
  }
  func.func @transform_4(%arg0: i32) -> (i32, i32) {
    %c0_i32 = arith.constant 0 : i32
    %c0_i32_0 = arith.constant 0 : i32
    %c0_i32_1 = arith.constant 0 : i32
    return %c0_i32, %c0_i32_0 : i32, i32
  }
  func.func @transform_5(%arg0: i32) -> (i32, i32) {
    %c0_i32 = arith.constant 0 : i32
    %c0_i32_0 = arith.constant 0 : i32
    %c0_i32_1 = arith.constant 0 : i32
    return %c0_i32, %c0_i32_0 : i32, i32
  }
  func.func @transform_6(%arg0: i32) -> (i32, i32) {
    %c0_i32 = arith.constant 0 : i32
    %c0_i32_0 = arith.constant 0 : i32
    %c0_i32_1 = arith.constant 0 : i32
    return %c0_i32, %c0_i32_0 : i32, i32
  }
  func.func @transform_7(%arg0: i32) -> (i32, i32) {
    %c0_i32 = arith.constant 0 : i32
    %c0_i32_0 = arith.constant 0 : i32
    %c0_i32_1 = arith.constant 0 : i32
    return %c0_i32, %c0_i32_0 : i32, i32
  }
  func.func @transform_8(%arg0: i32) -> (i32, i32) {
    %c0_i32 = arith.constant 0 : i32
    %c0_i32_0 = arith.constant 0 : i32
    %c0_i32_1 = arith.constant 0 : i32
    return %c0_i32, %c0_i32_0 : i32, i32
  }
  func.func @transform_9(%arg0: i32) -> (i32, i32) {
    %c0_i32 = arith.constant 0 : i32
    %c0_i32_0 = arith.constant 0 : i32
    %c0_i32_1 = arith.constant 0 : i32
    return %c0_i32, %c0_i32_0 : i32, i32
  }
  func.func @transform_10(%arg0: i32) -> (i32, i32) {
    %c0_i32 = arith.constant 0 : i32
    %c0_i32_0 = arith.constant 0 : i32
    %c0_i32_1 = arith.constant 0 : i32
    return %c0_i32, %c0_i32_0 : i32, i32
  }
  func.func @transform_11(%arg0: i32) -> (i32, i32) {
    %c0_i32 = arith.constant 0 : i32
    %c0_i32_0 = arith.constant 0 : i32
    %c0_i32_1 = arith.constant 0 : i32
    return %c0_i32, %c0_i32_0 : i32, i32
  }
  func.func @transform_12(%arg0: i32) -> (i32, i32) {
    %c0_i32 = arith.constant 0 : i32
    %c0_i32_0 = arith.constant 0 : i32
    %c0_i32_1 = arith.constant 0 : i32
    return %c0_i32, %c0_i32_0 : i32, i32
  }
  func.func @transform_13(%arg0: i32) -> (i32, i32) {
    %c0_i32 = arith.constant 0 : i32
    %c0_i32_0 = arith.constant 0 : i32
    %c0_i32_1 = arith.constant 0 : i32
    return %c0_i32, %c0_i32_0 : i32, i32
  }
  func.func @transform_14(%arg0: i32) -> (i32, i32) {
    %c0_i32 = arith.constant 0 : i32
    %c0_i32_0 = arith.constant 0 : i32
    %c0_i32_1 = arith.constant 0 : i32
    return %c0_i32, %c0_i32_0 : i32, i32
  }
  func.func @transform_15(%arg0: i32) -> (i32, i32) {
    %c0_i32 = arith.constant 0 : i32
    %c0_i32_0 = arith.constant 0 : i32
    %c0_i32_1 = arith.constant 0 : i32
    return %c0_i32, %c0_i32_0 : i32, i32
  }
  func.func @transform_16(%arg0: i32) -> (i32, i32) {
    %c0_i32 = arith.constant 0 : i32
    %c0_i32_0 = arith.constant 0 : i32
    %c0_i32_1 = arith.constant 0 : i32
    return %c0_i32, %c0_i32_0 : i32, i32
  }
  func.func @transform_17(%arg0: i32) -> (i32, i32) {
    %c0_i32 = arith.constant 0 : i32
    %c0_i32_0 = arith.constant 0 : i32
    %c0_i32_1 = arith.constant 0 : i32
    return %c0_i32, %c0_i32_0 : i32, i32
  }
  func.func @transform_18(%arg0: i32) -> (i32, i32) {
    %c0_i32 = arith.constant 0 : i32
    %c0_i32_0 = arith.constant 0 : i32
    %c0_i32_1 = arith.constant 0 : i32
    return %c0_i32, %c0_i32_0 : i32, i32
  }
  func.func @transform_19(%arg0: i32) -> (i32, i32) {
    %c0_i32 = arith.constant 0 : i32
    %c0_i32_0 = arith.constant 0 : i32
    %c0_i32_1 = arith.constant 0 : i32
    return %c0_i32, %c0_i32_0 : i32, i32
  }
}

module attributes {stable_mosaic.version = 11 : i64} {
  func.func @_conv_kernel(%arg0: i32, %arg1: memref<48x64xf32, #tpu.memory_space<vmem>>, %arg2: memref<192x48xf32, #tpu.memory_space<vmem>>, %arg3: memref<192x48xf32, #tpu.memory_space<vmem>>, %arg4: memref<48x192xf32, #tpu.memory_space<vmem>>, %arg5: memref<192x8xf32, #tpu.memory_space<vmem>>, %arg6: memref<64x64xbf16, #tpu.memory_space<vmem>>, %arg7: memref<64x64xbf16, #tpu.memory_space<vmem>>, %arg8: memref<8x64xbf16, #tpu.memory_space<vmem>>, %arg9: memref<1x64xf32, #tpu.memory_space<vmem>>, %arg10: memref<64x64xbf16, #tpu.memory_space<vmem>>, %arg11: memref<64x64xbf16, #tpu.memory_space<vmem>>, %arg12: memref<8x64xbf16, #tpu.memory_space<vmem>>, %arg13: memref<1x64xf32, #tpu.memory_space<vmem>>, %arg14: memref<1x64xf32, #tpu.memory_space<vmem>>, %arg15: memref<1x64xf32, #tpu.memory_space<vmem>>, %arg16: memref<1x64xf32, #tpu.memory_space<vmem>>, %arg17: memref<1x64xf32, #tpu.memory_space<vmem>>, %arg18: memref<1x64xf32, #tpu.memory_space<vmem>>, %arg19: memref<1x64xf32, #tpu.memory_space<vmem>>, %arg20: memref<48x64xf32, #tpu.memory_space<vmem>>) attributes {dimension_semantics = [#tpu.dimension_semantics<arbitrary>], iteration_bounds = array<i64: 1>, scalar_prefetch = 0 : i64, scratch_operands = 0 : i64, tpu.core_type = #tpu.core_type<tc>, window_params = [{pipeline_mode = #tpu.pipeline_mode<synchronous>, transform_indices = @transform_0, window_bounds = array<i64: 48, 64>}, {pipeline_mode = #tpu.pipeline_mode<synchronous>, transform_indices = @transform_1, window_bounds = array<i64: 192, 48>}, {pipeline_mode = #tpu.pipeline_mode<synchronous>, transform_indices = @transform_2, window_bounds = array<i64: 192, 48>}, {pipeline_mode = #tpu.pipeline_mode<synchronous>, transform_indices = @transform_3, window_bounds = array<i64: 48, 192>}, {pipeline_mode = #tpu.pipeline_mode<synchronous>, transform_indices = @transform_4, window_bounds = array<i64: 192, 8>}, {pipeline_mode = #tpu.pipeline_mode<synchronous>, transform_indices = @transform_5, window_bounds = array<i64: 64, 64>}, {pipeline_mode = #tpu.pipeline_mode<synchronous>, transform_indices = @transform_6, window_bounds = array<i64: 64, 64>}, {pipeline_mode = #tpu.pipeline_mode<synchronous>, transform_indices = @transform_7, window_bounds = array<i64: 8, 64>}, {pipeline_mode = #tpu.pipeline_mode<synchronous>, transform_indices = @transform_8, window_bounds = array<i64: 1, 64>}, {pipeline_mode = #tpu.pipeline_mode<synchronous>, transform_indices = @transform_9, window_bounds = array<i64: 64, 64>}, {pipeline_mode = #tpu.pipeline_mode<synchronous>, transform_indices = @transform_10, window_bounds = array<i64: 64, 64>}, {pipeline_mode = #tpu.pipeline_mode<synchronous>, transform_indices = @transform_11, window_bounds = array<i64: 8, 64>}, {pipeline_mode = #tpu.pipeline_mode<synchronous>, transform_indices = @transform_12, window_bounds = array<i64: 1, 64>}, {pipeline_mode = #tpu.pipeline_mode<synchronous>, transform_indices = @transform_13, window_bounds = array<i64: 1, 64>}, {pipeline_mode = #tpu.pipeline_mode<synchronous>, transform_indices = @transform_14, window_bounds = array<i64: 1, 64>}, {pipeline_mode = #tpu.pipeline_mode<synchronous>, transform_indices = @transform_15, window_bounds = array<i64: 1, 64>}, {pipeline_mode = #tpu.pipeline_mode<synchronous>, transform_indices = @transform_16, window_bounds = array<i64: 1, 64>}, {pipeline_mode = #tpu.pipeline_mode<synchronous>, transform_indices = @transform_17, window_bounds = array<i64: 1, 64>}, {pipeline_mode = #tpu.pipeline_mode<synchronous>, transform_indices = @transform_18, window_bounds = array<i64: 1, 64>}, {pipeline_mode = #tpu.pipeline_mode<synchronous>, transform_indices = @transform_19, window_bounds = array<i64: 48, 64>}]} {
    %c0 = arith.constant 0 : index
    %c0_0 = arith.constant 0 : index
    %0 = vector.load %arg1[%c0, %c0_0] : memref<48x64xf32, #tpu.memory_space<vmem>>, vector<48x64xf32>
    %1 = arith.truncf %0 : vector<48x64xf32> to vector<48x64xbf16>
    %c0_1 = arith.constant 0 : index
    %c0_2 = arith.constant 0 : index
    %2 = vector.load %arg2[%c0_1, %c0_2] : memref<192x48xf32, #tpu.memory_space<vmem>>, vector<192x48xf32>
    %cst = arith.constant dense<0.000000e+00> : vector<192x64xf32>
    %3 = tpu.matmul %2, %0, %cst {dimension_numbers = #tpu.dot_dimension_numbers<[1], [0], [0], [1], [0, 0, 1, 1], [], []>} : vector<192x48xf32>, vector<48x64xf32>, vector<192x64xf32> -> vector<192x64xf32>
    %4 = arith.truncf %3 : vector<192x64xf32> to vector<192x64xbf16>
    %c0_3 = arith.constant 0 : index
    %c0_4 = arith.constant 0 : index
    %5 = vector.load %arg5[%c0_3, %c0_4] : memref<192x8xf32, #tpu.memory_space<vmem>>, vector<192x8xf32>
    %6 = arith.truncf %5 : vector<192x8xf32> to vector<192x8xbf16>
    %c0_5 = arith.constant 0 : index
    %c0_6 = arith.constant 0 : index
    %7 = vector.load %arg6[%c0_5, %c0_6] : memref<64x64xbf16, #tpu.memory_space<vmem>>, vector<64x64xbf16>
    %cst_7 = arith.constant dense<0.000000e+00> : vector<48x64xf32>
    %8 = tpu.matmul %1, %7, %cst_7 {dimension_numbers = #tpu.dot_dimension_numbers<[1], [0], [0], [1], [0, 0, 1, 1], [], []>} : vector<48x64xbf16>, vector<64x64xbf16>, vector<48x64xf32> -> vector<48x64xf32>
    %c0_8 = arith.constant 0 : index
    %c0_9 = arith.constant 0 : index
    %9 = vector.load %arg3[%c0_8, %c0_9] : memref<192x48xf32, #tpu.memory_space<vmem>>, vector<192x48xf32>
    %cst_10 = arith.constant dense<0.000000e+00> : vector<192x64xf32>
    %10 = tpu.matmul %9, %8, %cst_10 {dimension_numbers = #tpu.dot_dimension_numbers<[1], [0], [0], [1], [0, 0, 1, 1], [], []>} : vector<192x48xf32>, vector<48x64xf32>, vector<192x64xf32> -> vector<192x64xf32>
    %c0_11 = arith.constant 0 : index
    %c0_12 = arith.constant 0 : index
    %11 = vector.load %arg7[%c0_11, %c0_12] : memref<64x64xbf16, #tpu.memory_space<vmem>>, vector<64x64xbf16>
    %cst_13 = arith.constant dense<0.000000e+00> : vector<192x64xf32>
    %12 = tpu.matmul %4, %11, %cst_13 {dimension_numbers = #tpu.dot_dimension_numbers<[1], [0], [0], [1], [0, 0, 1, 1], [], []>} : vector<192x64xbf16>, vector<64x64xbf16>, vector<192x64xf32> -> vector<192x64xf32>
    %13 = arith.addf %10, %12 : vector<192x64xf32>
    %c0_14 = arith.constant 0 : index
    %c0_15 = arith.constant 0 : index
    %14 = vector.load %arg8[%c0_14, %c0_15] : memref<8x64xbf16, #tpu.memory_space<vmem>>, vector<8x64xbf16>
    %cst_16 = arith.constant dense<0.000000e+00> : vector<192x64xf32>
    %15 = tpu.matmul %6, %14, %cst_16 {dimension_numbers = #tpu.dot_dimension_numbers<[1], [0], [0], [1], [0, 0, 1, 1], [], []>} : vector<192x8xbf16>, vector<8x64xbf16>, vector<192x64xf32> -> vector<192x64xf32>
    %16 = arith.addf %13, %15 : vector<192x64xf32>
    %c0_17 = arith.constant 0 : index
    %c0_18 = arith.constant 0 : index
    %17 = vector.load %arg9[%c0_17, %c0_18] : memref<1x64xf32, #tpu.memory_space<vmem>>, vector<1x64xf32>
    %18 = vector.broadcast %17 : vector<1x64xf32> to vector<192x64xf32>
    %19 = arith.addf %16, %18 : vector<192x64xf32>
    %cst_19 = arith.constant dense<0.000000e+00> : vector<64xf32>
    %20 = vector.multi_reduction <add>, %19, %cst_19 [0] : vector<192x64xf32> to vector<64xf32>
    %21 = vector.shape_cast %20 : vector<64xf32> to vector<1x64xf32>
    %cst_20 = arith.constant 1.920000e+02 : f32
    %22 = vector.broadcast %cst_20 : f32 to vector<1x64xf32>
    %23 = arith.divf %21, %22 : vector<1x64xf32>
    %24 = vector.broadcast %23 : vector<1x64xf32> to vector<192x64xf32>
    %25 = arith.subf %19, %24 : vector<192x64xf32>
    %26 = arith.mulf %25, %25 : vector<192x64xf32>
    %cst_21 = arith.constant dense<0.000000e+00> : vector<64xf32>
    %27 = vector.multi_reduction <add>, %26, %cst_21 [0] : vector<192x64xf32> to vector<64xf32>
    %28 = vector.shape_cast %27 : vector<64xf32> to vector<1x64xf32>
    %cst_22 = arith.constant 1.920000e+02 : f32
    %29 = vector.broadcast %cst_22 : f32 to vector<1x64xf32>
    %30 = arith.divf %28, %29 : vector<1x64xf32>
    %31 = vector.broadcast %23 : vector<1x64xf32> to vector<192x64xf32>
    %32 = arith.subf %19, %31 : vector<192x64xf32>
    %cst_23 = arith.constant 9.99999974E-6 : f32
    %33 = vector.broadcast %cst_23 : f32 to vector<1x64xf32>
    %34 = arith.addf %30, %33 : vector<1x64xf32>
    %35 = math.rsqrt %34 : vector<1x64xf32>
    %36 = vector.broadcast %35 : vector<1x64xf32> to vector<192x64xf32>
    %37 = arith.mulf %32, %36 : vector<192x64xf32>
    %c0_24 = arith.constant 0 : index
    %c0_25 = arith.constant 0 : index
    %38 = vector.load %arg14[%c0_24, %c0_25] : memref<1x64xf32, #tpu.memory_space<vmem>>, vector<1x64xf32>
    %39 = vector.broadcast %38 : vector<1x64xf32> to vector<192x64xf32>
    %40 = arith.mulf %37, %39 : vector<192x64xf32>
    %c0_26 = arith.constant 0 : index
    %c0_27 = arith.constant 0 : index
    %41 = vector.load %arg15[%c0_26, %c0_27] : memref<1x64xf32, #tpu.memory_space<vmem>>, vector<1x64xf32>
    %42 = vector.broadcast %41 : vector<1x64xf32> to vector<192x64xf32>
    %43 = arith.addf %40, %42 : vector<192x64xf32>
    %c0_28 = arith.constant 0 : index
    %c0_29 = arith.constant 0 : index
    %44 = vector.load %arg10[%c0_28, %c0_29] : memref<64x64xbf16, #tpu.memory_space<vmem>>, vector<64x64xbf16>
    %cst_30 = arith.constant dense<0.000000e+00> : vector<48x64xf32>
    %45 = tpu.matmul %1, %44, %cst_30 {dimension_numbers = #tpu.dot_dimension_numbers<[1], [0], [0], [1], [0, 0, 1, 1], [], []>} : vector<48x64xbf16>, vector<64x64xbf16>, vector<48x64xf32> -> vector<48x64xf32>
    %c0_31 = arith.constant 0 : index
    %c0_32 = arith.constant 0 : index
    %46 = vector.load %arg3[%c0_31, %c0_32] : memref<192x48xf32, #tpu.memory_space<vmem>>, vector<192x48xf32>
    %cst_33 = arith.constant dense<0.000000e+00> : vector<192x64xf32>
    %47 = tpu.matmul %46, %45, %cst_33 {dimension_numbers = #tpu.dot_dimension_numbers<[1], [0], [0], [1], [0, 0, 1, 1], [], []>} : vector<192x48xf32>, vector<48x64xf32>, vector<192x64xf32> -> vector<192x64xf32>
    %c0_34 = arith.constant 0 : index
    %c0_35 = arith.constant 0 : index
    %48 = vector.load %arg11[%c0_34, %c0_35] : memref<64x64xbf16, #tpu.memory_space<vmem>>, vector<64x64xbf16>
    %cst_36 = arith.constant dense<0.000000e+00> : vector<192x64xf32>
    %49 = tpu.matmul %4, %48, %cst_36 {dimension_numbers = #tpu.dot_dimension_numbers<[1], [0], [0], [1], [0, 0, 1, 1], [], []>} : vector<192x64xbf16>, vector<64x64xbf16>, vector<192x64xf32> -> vector<192x64xf32>
    %50 = arith.addf %47, %49 : vector<192x64xf32>
    %c0_37 = arith.constant 0 : index
    %c0_38 = arith.constant 0 : index
    %51 = vector.load %arg12[%c0_37, %c0_38] : memref<8x64xbf16, #tpu.memory_space<vmem>>, vector<8x64xbf16>
    %cst_39 = arith.constant dense<0.000000e+00> : vector<192x64xf32>
    %52 = tpu.matmul %6, %51, %cst_39 {dimension_numbers = #tpu.dot_dimension_numbers<[1], [0], [0], [1], [0, 0, 1, 1], [], []>} : vector<192x8xbf16>, vector<8x64xbf16>, vector<192x64xf32> -> vector<192x64xf32>
    %53 = arith.addf %50, %52 : vector<192x64xf32>
    %c0_40 = arith.constant 0 : index
    %c0_41 = arith.constant 0 : index
    %54 = vector.load %arg13[%c0_40, %c0_41] : memref<1x64xf32, #tpu.memory_space<vmem>>, vector<1x64xf32>
    %55 = vector.broadcast %54 : vector<1x64xf32> to vector<192x64xf32>
    %56 = arith.addf %53, %55 : vector<192x64xf32>
    %cst_42 = arith.constant dense<0.000000e+00> : vector<64xf32>
    %57 = vector.multi_reduction <add>, %56, %cst_42 [0] : vector<192x64xf32> to vector<64xf32>
    %58 = vector.shape_cast %57 : vector<64xf32> to vector<1x64xf32>
    %cst_43 = arith.constant 1.920000e+02 : f32
    %59 = vector.broadcast %cst_43 : f32 to vector<1x64xf32>
    %60 = arith.divf %58, %59 : vector<1x64xf32>
    %61 = vector.broadcast %60 : vector<1x64xf32> to vector<192x64xf32>
    %62 = arith.subf %56, %61 : vector<192x64xf32>
    %63 = arith.mulf %62, %62 : vector<192x64xf32>
    %cst_44 = arith.constant dense<0.000000e+00> : vector<64xf32>
    %64 = vector.multi_reduction <add>, %63, %cst_44 [0] : vector<192x64xf32> to vector<64xf32>
    %65 = vector.shape_cast %64 : vector<64xf32> to vector<1x64xf32>
    %cst_45 = arith.constant 1.920000e+02 : f32
    %66 = vector.broadcast %cst_45 : f32 to vector<1x64xf32>
    %67 = arith.divf %65, %66 : vector<1x64xf32>
    %68 = vector.broadcast %60 : vector<1x64xf32> to vector<192x64xf32>
    %69 = arith.subf %56, %68 : vector<192x64xf32>
    %cst_46 = arith.constant 9.99999974E-6 : f32
    %70 = vector.broadcast %cst_46 : f32 to vector<1x64xf32>
    %71 = arith.addf %67, %70 : vector<1x64xf32>
    %72 = math.rsqrt %71 : vector<1x64xf32>
    %73 = vector.broadcast %72 : vector<1x64xf32> to vector<192x64xf32>
    %74 = arith.mulf %69, %73 : vector<192x64xf32>
    %c0_47 = arith.constant 0 : index
    %c0_48 = arith.constant 0 : index
    %75 = vector.load %arg16[%c0_47, %c0_48] : memref<1x64xf32, #tpu.memory_space<vmem>>, vector<1x64xf32>
    %76 = vector.broadcast %75 : vector<1x64xf32> to vector<192x64xf32>
    %77 = arith.mulf %74, %76 : vector<192x64xf32>
    %c0_49 = arith.constant 0 : index
    %c0_50 = arith.constant 0 : index
    %78 = vector.load %arg17[%c0_49, %c0_50] : memref<1x64xf32, #tpu.memory_space<vmem>>, vector<1x64xf32>
    %79 = vector.broadcast %78 : vector<1x64xf32> to vector<192x64xf32>
    %80 = arith.addf %77, %79 : vector<192x64xf32>
    %81 = arith.negf %43 : vector<192x64xf32>
    %82 = math.exp %81 : vector<192x64xf32>
    %cst_51 = arith.constant 1.000000e+00 : f32
    %83 = vector.broadcast %cst_51 : f32 to vector<192x64xf32>
    %84 = arith.addf %83, %82 : vector<192x64xf32>
    %85 = arith.divf %83, %84 : vector<192x64xf32>
    %cst_52 = arith.constant 0.000000e+00 : f32
    %86 = vector.broadcast %cst_52 : f32 to vector<192x64xf32>
    %87 = arith.maximumf %80, %86 : vector<192x64xf32>
    %88 = arith.mulf %85, %87 : vector<192x64xf32>
    %c0_53 = arith.constant 0 : index
    %c0_54 = arith.constant 0 : index
    %89 = vector.load %arg4[%c0_53, %c0_54] : memref<48x192xf32, #tpu.memory_space<vmem>>, vector<48x192xf32>
    %cst_55 = arith.constant dense<0.000000e+00> : vector<48x64xf32>
    %90 = tpu.matmul %89, %88, %cst_55 {dimension_numbers = #tpu.dot_dimension_numbers<[1], [0], [0], [1], [0, 0, 1, 1], [], []>} : vector<48x192xf32>, vector<192x64xf32>, vector<48x64xf32> -> vector<48x64xf32>
    %cst_56 = arith.constant dense<0.000000e+00> : vector<64xf32>
    %91 = vector.multi_reduction <add>, %90, %cst_56 [0] : vector<48x64xf32> to vector<64xf32>
    %92 = vector.shape_cast %91 : vector<64xf32> to vector<1x64xf32>
    %cst_57 = arith.constant 4.800000e+01 : f32
    %93 = vector.broadcast %cst_57 : f32 to vector<1x64xf32>
    %94 = arith.divf %92, %93 : vector<1x64xf32>
    %95 = vector.broadcast %94 : vector<1x64xf32> to vector<48x64xf32>
    %96 = arith.subf %90, %95 : vector<48x64xf32>
    %97 = arith.mulf %96, %96 : vector<48x64xf32>
    %cst_58 = arith.constant dense<0.000000e+00> : vector<64xf32>
    %98 = vector.multi_reduction <add>, %97, %cst_58 [0] : vector<48x64xf32> to vector<64xf32>
    %99 = vector.shape_cast %98 : vector<64xf32> to vector<1x64xf32>
    %cst_59 = arith.constant 4.800000e+01 : f32
    %100 = vector.broadcast %cst_59 : f32 to vector<1x64xf32>
    %101 = arith.divf %99, %100 : vector<1x64xf32>
    %102 = vector.broadcast %94 : vector<1x64xf32> to vector<48x64xf32>
    %103 = arith.subf %90, %102 : vector<48x64xf32>
    %cst_60 = arith.constant 9.99999974E-6 : f32
    %104 = vector.broadcast %cst_60 : f32 to vector<1x64xf32>
    %105 = arith.addf %101, %104 : vector<1x64xf32>
    %106 = math.rsqrt %105 : vector<1x64xf32>
    %107 = vector.broadcast %106 : vector<1x64xf32> to vector<48x64xf32>
    %108 = arith.mulf %103, %107 : vector<48x64xf32>
    %c0_61 = arith.constant 0 : index
    %c0_62 = arith.constant 0 : index
    %109 = vector.load %arg18[%c0_61, %c0_62] : memref<1x64xf32, #tpu.memory_space<vmem>>, vector<1x64xf32>
    %110 = vector.broadcast %109 : vector<1x64xf32> to vector<48x64xf32>
    %111 = arith.mulf %108, %110 : vector<48x64xf32>
    %c0_63 = arith.constant 0 : index
    %c0_64 = arith.constant 0 : index
    %112 = vector.load %arg19[%c0_63, %c0_64] : memref<1x64xf32, #tpu.memory_space<vmem>>, vector<1x64xf32>
    %113 = vector.broadcast %112 : vector<1x64xf32> to vector<48x64xf32>
    %114 = arith.addf %111, %113 : vector<48x64xf32>
    %115 = arith.addf %0, %114 : vector<48x64xf32>
    %cst_65 = arith.constant 0.000000e+00 : f32
    %116 = vector.broadcast %cst_65 : f32 to vector<48x64xf32>
    %117 = arith.maximumf %115, %116 : vector<48x64xf32>
    %c0_66 = arith.constant 0 : index
    %c0_67 = arith.constant 0 : index
    %118 = vector.load %arg20[%c0_66, %c0_67] : memref<48x64xf32, #tpu.memory_space<vmem>>, vector<48x64xf32>
    tpu.vector_store %arg20[%c0_66, %c0_67], %117 {strides = array<i32>} : memref<48x64xf32, #tpu.memory_space<vmem>>, vector<48x64xf32>,
    return
  }
  func.func @transform_0(%arg0: i32) -> (i32, i32) {
    %c0_i32 = arith.constant 0 : i32
    %c0_i32_0 = arith.constant 0 : i32
    %c0_i32_1 = arith.constant 0 : i32
    return %c0_i32, %c0_i32_0 : i32, i32
  }
  func.func @transform_1(%arg0: i32) -> (i32, i32) {
    %c0_i32 = arith.constant 0 : i32
    %c0_i32_0 = arith.constant 0 : i32
    %c0_i32_1 = arith.constant 0 : i32
    return %c0_i32, %c0_i32_0 : i32, i32
  }
  func.func @transform_2(%arg0: i32) -> (i32, i32) {
    %c0_i32 = arith.constant 0 : i32
    %c0_i32_0 = arith.constant 0 : i32
    %c0_i32_1 = arith.constant 0 : i32
    return %c0_i32, %c0_i32_0 : i32, i32
  }
  func.func @transform_3(%arg0: i32) -> (i32, i32) {
    %c0_i32 = arith.constant 0 : i32
    %c0_i32_0 = arith.constant 0 : i32
    %c0_i32_1 = arith.constant 0 : i32
    return %c0_i32, %c0_i32_0 : i32, i32
  }
  func.func @transform_4(%arg0: i32) -> (i32, i32) {
    %c0_i32 = arith.constant 0 : i32
    %c0_i32_0 = arith.constant 0 : i32
    %c0_i32_1 = arith.constant 0 : i32
    return %c0_i32, %c0_i32_0 : i32, i32
  }
  func.func @transform_5(%arg0: i32) -> (i32, i32) {
    %c0_i32 = arith.constant 0 : i32
    %c0_i32_0 = arith.constant 0 : i32
    %c0_i32_1 = arith.constant 0 : i32
    return %c0_i32, %c0_i32_0 : i32, i32
  }
  func.func @transform_6(%arg0: i32) -> (i32, i32) {
    %c0_i32 = arith.constant 0 : i32
    %c0_i32_0 = arith.constant 0 : i32
    %c0_i32_1 = arith.constant 0 : i32
    return %c0_i32, %c0_i32_0 : i32, i32
  }
  func.func @transform_7(%arg0: i32) -> (i32, i32) {
    %c0_i32 = arith.constant 0 : i32
    %c0_i32_0 = arith.constant 0 : i32
    %c0_i32_1 = arith.constant 0 : i32
    return %c0_i32, %c0_i32_0 : i32, i32
  }
  func.func @transform_8(%arg0: i32) -> (i32, i32) {
    %c0_i32 = arith.constant 0 : i32
    %c0_i32_0 = arith.constant 0 : i32
    %c0_i32_1 = arith.constant 0 : i32
    return %c0_i32, %c0_i32_0 : i32, i32
  }
  func.func @transform_9(%arg0: i32) -> (i32, i32) {
    %c0_i32 = arith.constant 0 : i32
    %c0_i32_0 = arith.constant 0 : i32
    %c0_i32_1 = arith.constant 0 : i32
    return %c0_i32, %c0_i32_0 : i32, i32
  }
  func.func @transform_10(%arg0: i32) -> (i32, i32) {
    %c0_i32 = arith.constant 0 : i32
    %c0_i32_0 = arith.constant 0 : i32
    %c0_i32_1 = arith.constant 0 : i32
    return %c0_i32, %c0_i32_0 : i32, i32
  }
  func.func @transform_11(%arg0: i32) -> (i32, i32) {
    %c0_i32 = arith.constant 0 : i32
    %c0_i32_0 = arith.constant 0 : i32
    %c0_i32_1 = arith.constant 0 : i32
    return %c0_i32, %c0_i32_0 : i32, i32
  }
  func.func @transform_12(%arg0: i32) -> (i32, i32) {
    %c0_i32 = arith.constant 0 : i32
    %c0_i32_0 = arith.constant 0 : i32
    %c0_i32_1 = arith.constant 0 : i32
    return %c0_i32, %c0_i32_0 : i32, i32
  }
  func.func @transform_13(%arg0: i32) -> (i32, i32) {
    %c0_i32 = arith.constant 0 : i32
    %c0_i32_0 = arith.constant 0 : i32
    %c0_i32_1 = arith.constant 0 : i32
    return %c0_i32, %c0_i32_0 : i32, i32
  }
  func.func @transform_14(%arg0: i32) -> (i32, i32) {
    %c0_i32 = arith.constant 0 : i32
    %c0_i32_0 = arith.constant 0 : i32
    %c0_i32_1 = arith.constant 0 : i32
    return %c0_i32, %c0_i32_0 : i32, i32
  }
  func.func @transform_15(%arg0: i32) -> (i32, i32) {
    %c0_i32 = arith.constant 0 : i32
    %c0_i32_0 = arith.constant 0 : i32
    %c0_i32_1 = arith.constant 0 : i32
    return %c0_i32, %c0_i32_0 : i32, i32
  }
  func.func @transform_16(%arg0: i32) -> (i32, i32) {
    %c0_i32 = arith.constant 0 : i32
    %c0_i32_0 = arith.constant 0 : i32
    %c0_i32_1 = arith.constant 0 : i32
    return %c0_i32, %c0_i32_0 : i32, i32
  }
  func.func @transform_17(%arg0: i32) -> (i32, i32) {
    %c0_i32 = arith.constant 0 : i32
    %c0_i32_0 = arith.constant 0 : i32
    %c0_i32_1 = arith.constant 0 : i32
    return %c0_i32, %c0_i32_0 : i32, i32
  }
  func.func @transform_18(%arg0: i32) -> (i32, i32) {
    %c0_i32 = arith.constant 0 : i32
    %c0_i32_0 = arith.constant 0 : i32
    %c0_i32_1 = arith.constant 0 : i32
    return %c0_i32, %c0_i32_0 : i32, i32
  }
  func.func @transform_19(%arg0: i32) -> (i32, i32) {
    %c0_i32 = arith.constant 0 : i32
    %c0_i32_0 = arith.constant 0 : i32
    %c0_i32_1 = arith.constant 0 : i32
    return %c0_i32, %c0_i32_0 : i32, i32
  }
}

module attributes {stable_mosaic.version = 11 : i64} {
  func.func @_vae_head_kernel(%arg0: i32, %arg1: memref<16x192xf32, #tpu.memory_space<vmem>>, %arg2: memref<16x32xf32, #tpu.memory_space<vmem>>, %arg3: memref<192x32xbf16, #tpu.memory_space<vmem>>, %arg4: memref<1x32xf32, #tpu.memory_space<vmem>>, %arg5: memref<192x32xbf16, #tpu.memory_space<vmem>>, %arg6: memref<1x32xf32, #tpu.memory_space<vmem>>, %arg7: memref<32x32xbf16, #tpu.memory_space<vmem>>, %arg8: memref<1x32xf32, #tpu.memory_space<vmem>>, %arg9: memref<16x32xf32, #tpu.memory_space<vmem>>, %arg10: memref<16x32xf32, #tpu.memory_space<vmem>>, %arg11: memref<16x32xf32, #tpu.memory_space<vmem>>) attributes {dimension_semantics = [#tpu.dimension_semantics<parallel>], iteration_bounds = array<i64: 1>, scalar_prefetch = 0 : i64, scratch_operands = 0 : i64, tpu.core_type = #tpu.core_type<tc>, window_params = [{transform_indices = @transform_0, window_bounds = array<i64: 16, 192>}, {transform_indices = @transform_1, window_bounds = array<i64: 16, 32>}, {pipeline_mode = #tpu.pipeline_mode<synchronous>, transform_indices = @transform_2, window_bounds = array<i64: 192, 32>}, {pipeline_mode = #tpu.pipeline_mode<synchronous>, transform_indices = @transform_3, window_bounds = array<i64: 1, 32>}, {pipeline_mode = #tpu.pipeline_mode<synchronous>, transform_indices = @transform_4, window_bounds = array<i64: 192, 32>}, {pipeline_mode = #tpu.pipeline_mode<synchronous>, transform_indices = @transform_5, window_bounds = array<i64: 1, 32>}, {pipeline_mode = #tpu.pipeline_mode<synchronous>, transform_indices = @transform_6, window_bounds = array<i64: 32, 32>}, {pipeline_mode = #tpu.pipeline_mode<synchronous>, transform_indices = @transform_7, window_bounds = array<i64: 1, 32>}, {transform_indices = @transform_8, window_bounds = array<i64: 16, 32>}, {transform_indices = @transform_9, window_bounds = array<i64: 16, 32>}, {transform_indices = @transform_10, window_bounds = array<i64: 16, 32>}]} {
    %c0 = arith.constant 0 : index
    %c0_0 = arith.constant 0 : index
    %0 = vector.load %arg1[%c0, %c0_0] : memref<16x192xf32, #tpu.memory_space<vmem>>, vector<16x192xf32>
    %cst = arith.constant 0.000000e+00 : f32
    %1 = vector.broadcast %cst : f32 to vector<16x192xf32>
    %2 = arith.maximumf %0, %1 : vector<16x192xf32>
    %3 = arith.truncf %2 : vector<16x192xf32> to vector<16x192xbf16>
    %c0_1 = arith.constant 0 : index
    %c0_2 = arith.constant 0 : index
    %4 = vector.load %arg3[%c0_1, %c0_2] : memref<192x32xbf16, #tpu.memory_space<vmem>>, vector<192x32xbf16>
    %cst_3 = arith.constant dense<0.000000e+00> : vector<16x32xf32>
    %5 = tpu.matmul %3, %4, %cst_3 {dimension_numbers = #tpu.dot_dimension_numbers<[1], [0], [0], [1], [0, 0, 1, 1], [], []>} : vector<16x192xbf16>, vector<192x32xbf16>, vector<16x32xf32> -> vector<16x32xf32>
    %c0_4 = arith.constant 0 : index
    %c0_5 = arith.constant 0 : index
    %6 = vector.load %arg4[%c0_4, %c0_5] : memref<1x32xf32, #tpu.memory_space<vmem>>, vector<1x32xf32>
    %7 = vector.broadcast %6 : vector<1x32xf32> to vector<16x32xf32>
    %8 = arith.addf %5, %7 : vector<16x32xf32>
    %c0_6 = arith.constant 0 : index
    %c0_7 = arith.constant 0 : index
    %9 = vector.load %arg5[%c0_6, %c0_7] : memref<192x32xbf16, #tpu.memory_space<vmem>>, vector<192x32xbf16>
    %cst_8 = arith.constant dense<0.000000e+00> : vector<16x32xf32>
    %10 = tpu.matmul %3, %9, %cst_8 {dimension_numbers = #tpu.dot_dimension_numbers<[1], [0], [0], [1], [0, 0, 1, 1], [], []>} : vector<16x192xbf16>, vector<192x32xbf16>, vector<16x32xf32> -> vector<16x32xf32>
    %c0_9 = arith.constant 0 : index
    %c0_10 = arith.constant 0 : index
    %11 = vector.load %arg6[%c0_9, %c0_10] : memref<1x32xf32, #tpu.memory_space<vmem>>, vector<1x32xf32>
    %12 = vector.broadcast %11 : vector<1x32xf32> to vector<16x32xf32>
    %13 = arith.addf %10, %12 : vector<16x32xf32>
    %c0_11 = arith.constant 0 : index
    %c0_12 = arith.constant 0 : index
    %14 = vector.load %arg2[%c0_11, %c0_12] : memref<16x32xf32, #tpu.memory_space<vmem>>, vector<16x32xf32>
    %cst_13 = arith.constant 5.000000e-01 : f32
    %15 = vector.broadcast %cst_13 : f32 to vector<16x32xf32>
    %16 = arith.mulf %15, %13 : vector<16x32xf32>
    %17 = math.exp %16 : vector<16x32xf32>
    %18 = arith.mulf %14, %17 : vector<16x32xf32>
    %19 = arith.addf %8, %18 : vector<16x32xf32>
    %20 = arith.truncf %19 : vector<16x32xf32> to vector<16x32xbf16>
    %c0_14 = arith.constant 0 : index
    %c0_15 = arith.constant 0 : index
    %21 = vector.load %arg7[%c0_14, %c0_15] : memref<32x32xbf16, #tpu.memory_space<vmem>>, vector<32x32xbf16>
    %cst_16 = arith.constant dense<0.000000e+00> : vector<16x32xf32>
    %22 = tpu.matmul %20, %21, %cst_16 {dimension_numbers = #tpu.dot_dimension_numbers<[1], [0], [0], [1], [0, 0, 1, 1], [], []>} : vector<16x32xbf16>, vector<32x32xbf16>, vector<16x32xf32> -> vector<16x32xf32>
    %c0_17 = arith.constant 0 : index
    %c0_18 = arith.constant 0 : index
    %23 = vector.load %arg8[%c0_17, %c0_18] : memref<1x32xf32, #tpu.memory_space<vmem>>, vector<1x32xf32>
    %24 = vector.broadcast %23 : vector<1x32xf32> to vector<16x32xf32>
    %25 = arith.addf %22, %24 : vector<16x32xf32>
    %c0_19 = arith.constant 0 : index
    %c0_20 = arith.constant 0 : index
    %26 = vector.load %arg9[%c0_19, %c0_20] : memref<16x32xf32, #tpu.memory_space<vmem>>, vector<16x32xf32>
    tpu.vector_store %arg9[%c0_19, %c0_20], %8 {strides = array<i32>} : memref<16x32xf32, #tpu.memory_space<vmem>>, vector<16x32xf32>,
    %c0_21 = arith.constant 0 : index
    %c0_22 = arith.constant 0 : index
    %27 = vector.load %arg10[%c0_21, %c0_22] : memref<16x32xf32, #tpu.memory_space<vmem>>, vector<16x32xf32>
    tpu.vector_store %arg10[%c0_21, %c0_22], %13 {strides = array<i32>} : memref<16x32xf32, #tpu.memory_space<vmem>>, vector<16x32xf32>,
    %c0_23 = arith.constant 0 : index
    %c0_24 = arith.constant 0 : index
    %28 = vector.load %arg11[%c0_23, %c0_24] : memref<16x32xf32, #tpu.memory_space<vmem>>, vector<16x32xf32>
    tpu.vector_store %arg11[%c0_23, %c0_24], %25 {strides = array<i32>} : memref<16x32xf32, #tpu.memory_space<vmem>>, vector<16x32xf32>,
    return
  }
  func.func @transform_0(%arg0: i32) -> (i32, i32) {
    %c0_i32 = arith.constant 0 : i32
    %c0_i32_0 = arith.constant 0 : i32
    return %arg0, %c0_i32 : i32, i32
  }
  func.func @transform_1(%arg0: i32) -> (i32, i32) {
    %c0_i32 = arith.constant 0 : i32
    %c0_i32_0 = arith.constant 0 : i32
    return %arg0, %c0_i32 : i32, i32
  }
  func.func @transform_2(%arg0: i32) -> (i32, i32) {
    %c0_i32 = arith.constant 0 : i32
    %c0_i32_0 = arith.constant 0 : i32
    %c0_i32_1 = arith.constant 0 : i32
    return %c0_i32, %c0_i32_0 : i32, i32
  }
  func.func @transform_3(%arg0: i32) -> (i32, i32) {
    %c0_i32 = arith.constant 0 : i32
    %c0_i32_0 = arith.constant 0 : i32
    %c0_i32_1 = arith.constant 0 : i32
    return %c0_i32, %c0_i32_0 : i32, i32
  }
  func.func @transform_4(%arg0: i32) -> (i32, i32) {
    %c0_i32 = arith.constant 0 : i32
    %c0_i32_0 = arith.constant 0 : i32
    %c0_i32_1 = arith.constant 0 : i32
    return %c0_i32, %c0_i32_0 : i32, i32
  }
  func.func @transform_5(%arg0: i32) -> (i32, i32) {
    %c0_i32 = arith.constant 0 : i32
    %c0_i32_0 = arith.constant 0 : i32
    %c0_i32_1 = arith.constant 0 : i32
    return %c0_i32, %c0_i32_0 : i32, i32
  }
  func.func @transform_6(%arg0: i32) -> (i32, i32) {
    %c0_i32 = arith.constant 0 : i32
    %c0_i32_0 = arith.constant 0 : i32
    %c0_i32_1 = arith.constant 0 : i32
    return %c0_i32, %c0_i32_0 : i32, i32
  }
  func.func @transform_7(%arg0: i32) -> (i32, i32) {
    %c0_i32 = arith.constant 0 : i32
    %c0_i32_0 = arith.constant 0 : i32
    %c0_i32_1 = arith.constant 0 : i32
    return %c0_i32, %c0_i32_0 : i32, i32
  }
  func.func @transform_8(%arg0: i32) -> (i32, i32) {
    %c0_i32 = arith.constant 0 : i32
    %c0_i32_0 = arith.constant 0 : i32
    return %arg0, %c0_i32 : i32, i32
  }
  func.func @transform_9(%arg0: i32) -> (i32, i32) {
    %c0_i32 = arith.constant 0 : i32
    %c0_i32_0 = arith.constant 0 : i32
    return %arg0, %c0_i32 : i32, i32
  }
  func.func @transform_10(%arg0: i32) -> (i32, i32) {
    %c0_i32 = arith.constant 0 : i32
    %c0_i32_0 = arith.constant 0 : i32
    return %arg0, %c0_i32 : i32, i32
  }
}

module attributes {stable_mosaic.version = 11 : i64} {
  func.func @_idpgan_block_kernel(%arg0: i32, %arg1: memref<1x8x32xf32, #tpu.memory_space<vmem>>, %arg2: memref<8x32x16xbf16, #tpu.memory_space<vmem>>, %arg3: memref<8x1x16xf32, #tpu.memory_space<vmem>>, %arg4: memref<8x32x16xbf16, #tpu.memory_space<vmem>>, %arg5: memref<8x1x16xf32, #tpu.memory_space<vmem>>, %arg6: memref<8x32x16xbf16, #tpu.memory_space<vmem>>, %arg7: memref<8x1x16xf32, #tpu.memory_space<vmem>>, %arg8: memref<8x16x32xbf16, #tpu.memory_space<vmem>>, %arg9: memref<1x32xf32, #tpu.memory_space<vmem>>, %arg10: memref<32x128xbf16, #tpu.memory_space<vmem>>, %arg11: memref<1x128xf32, #tpu.memory_space<vmem>>, %arg12: memref<128x32xbf16, #tpu.memory_space<vmem>>, %arg13: memref<1x32xf32, #tpu.memory_space<vmem>>, %arg14: memref<1x32xf32, #tpu.memory_space<vmem>>, %arg15: memref<1x32xf32, #tpu.memory_space<vmem>>, %arg16: memref<1x32xf32, #tpu.memory_space<vmem>>, %arg17: memref<1x32xf32, #tpu.memory_space<vmem>>, %arg18: memref<1x8x32xf32, #tpu.memory_space<vmem>>) attributes {dimension_semantics = [#tpu.dimension_semantics<parallel>], iteration_bounds = array<i64: 2>, scalar_prefetch = 0 : i64, scratch_operands = 0 : i64, tpu.core_type = #tpu.core_type<tc>, window_params = [{transform_indices = @transform_0, window_bounds = array<i64: 1, 8, 32>}, {pipeline_mode = #tpu.pipeline_mode<synchronous>, transform_indices = @transform_1, window_bounds = array<i64: 8, 32, 16>}, {pipeline_mode = #tpu.pipeline_mode<synchronous>, transform_indices = @transform_2, window_bounds = array<i64: 8, 1, 16>}, {pipeline_mode = #tpu.pipeline_mode<synchronous>, transform_indices = @transform_3, window_bounds = array<i64: 8, 32, 16>}, {pipeline_mode = #tpu.pipeline_mode<synchronous>, transform_indices = @transform_4, window_bounds = array<i64: 8, 1, 16>}, {pipeline_mode = #tpu.pipeline_mode<synchronous>, transform_indices = @transform_5, window_bounds = array<i64: 8, 32, 16>}, {pipeline_mode = #tpu.pipeline_mode<synchronous>, transform_indices = @transform_6, window_bounds = array<i64: 8, 1, 16>}, {pipeline_mode = #tpu.pipeline_mode<synchronous>, transform_indices = @transform_7, window_bounds = array<i64: 8, 16, 32>}, {pipeline_mode = #tpu.pipeline_mode<synchronous>, transform_indices = @transform_8, window_bounds = array<i64: 1, 32>}, {pipeline_mode = #tpu.pipeline_mode<synchronous>, transform_indices = @transform_9, window_bounds = array<i64: 32, 128>}, {pipeline_mode = #tpu.pipeline_mode<synchronous>, transform_indices = @transform_10, window_bounds = array<i64: 1, 128>}, {pipeline_mode = #tpu.pipeline_mode<synchronous>, transform_indices = @transform_11, window_bounds = array<i64: 128, 32>}, {pipeline_mode = #tpu.pipeline_mode<synchronous>, transform_indices = @transform_12, window_bounds = array<i64: 1, 32>}, {pipeline_mode = #tpu.pipeline_mode<synchronous>, transform_indices = @transform_13, window_bounds = array<i64: 1, 32>}, {pipeline_mode = #tpu.pipeline_mode<synchronous>, transform_indices = @transform_14, window_bounds = array<i64: 1, 32>}, {pipeline_mode = #tpu.pipeline_mode<synchronous>, transform_indices = @transform_15, window_bounds = array<i64: 1, 32>}, {pipeline_mode = #tpu.pipeline_mode<synchronous>, transform_indices = @transform_16, window_bounds = array<i64: 1, 32>}, {transform_indices = @transform_17, window_bounds = array<i64: 1, 8, 32>}]} {
    %c0 = arith.constant 0 : index
    %c0_0 = arith.constant 0 : index
    %c0_1 = arith.constant 0 : index
    %0 = vector.load %arg1[%c0, %c0_0, %c0_1] : memref<1x8x32xf32, #tpu.memory_space<vmem>>, vector<1x8x32xf32>
    %1 = vector.shape_cast %0 : vector<1x8x32xf32> to vector<8x32xf32>
    %2 = arith.truncf %1 : vector<8x32xf32> to vector<8x32xbf16>
    %cst = arith.constant 0.000000e+00 : f32
    %3 = vector.broadcast %cst : f32 to vector<8x32xf32>
    %c0_2 = arith.constant 0 : index
    %c0_3 = arith.constant 0 : index
    %c0_4 = arith.constant 0 : index
    %4 = vector.load %arg2[%c0_2, %c0_3, %c0_4] : memref<8x32x16xbf16, #tpu.memory_space<vmem>>, vector<1x32x16xbf16>
    %5 = vector.shape_cast %4 : vector<1x32x16xbf16> to vector<32x16xbf16>
    %cst_5 = arith.constant dense<0.000000e+00> : vector<8x16xf32>
    %6 = tpu.matmul %2, %5, %cst_5 {dimension_numbers = #tpu.dot_dimension_numbers<[1], [0], [0], [1], [0, 0, 1, 1], [], []>} : vector<8x32xbf16>, vector<32x16xbf16>, vector<8x16xf32> -> vector<8x16xf32>
    %c0_6 = arith.constant 0 : index
    %c0_7 = arith.constant 0 : index
    %c0_8 = arith.constant 0 : index
    %7 = vector.load %arg3[%c0_6, %c0_7, %c0_8] : memref<8x1x16xf32, #tpu.memory_space<vmem>>, vector<1x1x16xf32>
    %8 = vector.shape_cast %7 : vector<1x1x16xf32> to vector<1x16xf32>
    %9 = vector.broadcast %8 : vector<1x16xf32> to vector<8x16xf32>
    %10 = arith.addf %6, %9 : vector<8x16xf32>
    %c0_9 = arith.constant 0 : index
    %c0_10 = arith.constant 0 : index
    %c0_11 = arith.constant 0 : index
    %11 = vector.load %arg4[%c0_9, %c0_10, %c0_11] : memref<8x32x16xbf16, #tpu.memory_space<vmem>>, vector<1x32x16xbf16>
    %12 = vector.shape_cast %11 : vector<1x32x16xbf16> to vector<32x16xbf16>
    %cst_12 = arith.constant dense<0.000000e+00> : vector<8x16xf32>
    %13 = tpu.matmul %2, %12, %cst_12 {dimension_numbers = #tpu.dot_dimension_numbers<[1], [0], [0], [1], [0, 0, 1, 1], [], []>} : vector<8x32xbf16>, vector<32x16xbf16>, vector<8x16xf32> -> vector<8x16xf32>
    %c0_13 = arith.constant 0 : index
    %c0_14 = arith.constant 0 : index
    %c0_15 = arith.constant 0 : index
    %14 = vector.load %arg5[%c0_13, %c0_14, %c0_15] : memref<8x1x16xf32, #tpu.memory_space<vmem>>, vector<1x1x16xf32>
    %15 = vector.shape_cast %14 : vector<1x1x16xf32> to vector<1x16xf32>
    %16 = vector.broadcast %15 : vector<1x16xf32> to vector<8x16xf32>
    %17 = arith.addf %13, %16 : vector<8x16xf32>
    %c0_16 = arith.constant 0 : index
    %c0_17 = arith.constant 0 : index
    %c0_18 = arith.constant 0 : index
    %18 = vector.load %arg6[%c0_16, %c0_17, %c0_18] : memref<8x32x16xbf16, #tpu.memory_space<vmem>>, vector<1x32x16xbf16>
    %19 = vector.shape_cast %18 : vector<1x32x16xbf16> to vector<32x16xbf16>
    %cst_19 = arith.constant dense<0.000000e+00> : vector<8x16xf32>
    %20 = tpu.matmul %2, %19, %cst_19 {dimension_numbers = #tpu.dot_dimension_numbers<[1], [0], [0], [1], [0, 0, 1, 1], [], []>} : vector<8x32xbf16>, vector<32x16xbf16>, vector<8x16xf32> -> vector<8x16xf32>
    %c0_20 = arith.constant 0 : index
    %c0_21 = arith.constant 0 : index
    %c0_22 = arith.constant 0 : index
    %21 = vector.load %arg7[%c0_20, %c0_21, %c0_22] : memref<8x1x16xf32, #tpu.memory_space<vmem>>, vector<1x1x16xf32>
    %22 = vector.shape_cast %21 : vector<1x1x16xf32> to vector<1x16xf32>
    %23 = vector.broadcast %22 : vector<1x16xf32> to vector<8x16xf32>
    %24 = arith.addf %20, %23 : vector<8x16xf32>
    %cst_23 = arith.constant dense<0.000000e+00> : vector<8x8xf32>
    %25 = tpu.matmul %10, %17, %cst_23 {dimension_numbers = #tpu.dot_dimension_numbers<[1], [1], [0], [0], [0, 0, 1, 0], [], []>} : vector<8x16xf32>, vector<8x16xf32>, vector<8x8xf32> -> vector<8x8xf32>
    %cst_24 = arith.constant 0.0883883461 : f32
    %26 = vector.broadcast %cst_24 : f32 to vector<8x8xf32>
    %27 = arith.mulf %25, %26 : vector<8x8xf32>
    %cst_25 = arith.constant dense<0xFF800000> : vector<8xf32>
    %28 = vector.multi_reduction <maximumf>, %27, %cst_25 [1] : vector<8x8xf32> to vector<8xf32>
    %29 = vector.shape_cast %28 : vector<8xf32> to vector<8x1xf32>
    %30 = vector.broadcast %29 : vector<8x1xf32> to vector<8x8xf32>
    %31 = arith.subf %27, %30 : vector<8x8xf32>
    %32 = math.exp %31 : vector<8x8xf32>
    %cst_26 = arith.constant dense<0.000000e+00> : vector<8xf32>
    %33 = vector.multi_reduction <add>, %32, %cst_26 [1] : vector<8x8xf32> to vector<8xf32>
    %34 = vector.shape_cast %33 : vector<8xf32> to vector<8x1xf32>
    %35 = tpu.reciprocal %34 {approx = true} : vector<8x1xf32> -> vector<8x1xf32>
    %36 = vector.broadcast %35 : vector<8x1xf32> to vector<8x8xf32>
    %37 = arith.mulf %32, %36 : vector<8x8xf32>
    %cst_27 = arith.constant dense<0.000000e+00> : vector<8x16xf32>
    %38 = tpu.matmul %37, %24, %cst_27 {dimension_numbers = #tpu.dot_dimension_numbers<[1], [0], [0], [1], [0, 0, 1, 1], [], []>} : vector<8x8xf32>, vector<8x16xf32>, vector<8x16xf32> -> vector<8x16xf32>
    %39 = arith.truncf %38 : vector<8x16xf32> to vector<8x16xbf16>
    %c0_28 = arith.constant 0 : index
    %c0_29 = arith.constant 0 : index
    %c0_30 = arith.constant 0 : index
    %40 = vector.load %arg8[%c0_28, %c0_29, %c0_30] : memref<8x16x32xbf16, #tpu.memory_space<vmem>>, vector<1x16x32xbf16>
    %41 = vector.shape_cast %40 : vector<1x16x32xbf16> to vector<16x32xbf16>
    %cst_31 = arith.constant dense<0.000000e+00> : vector<8x32xf32>
    %42 = tpu.matmul %39, %41, %cst_31 {dimension_numbers = #tpu.dot_dimension_numbers<[1], [0], [0], [1], [0, 0, 1, 1], [], []>} : vector<8x16xbf16>, vector<16x32xbf16>, vector<8x32xf32> -> vector<8x32xf32>
    %43 = arith.addf %3, %42 : vector<8x32xf32>
    %c1 = arith.constant 1 : index
    %c0_32 = arith.constant 0 : index
    %c0_33 = arith.constant 0 : index
    %44 = vector.load %arg2[%c1, %c0_32, %c0_33] : memref<8x32x16xbf16, #tpu.memory_space<vmem>>, vector<1x32x16xbf16>
    %45 = vector.shape_cast %44 : vector<1x32x16xbf16> to vector<32x16xbf16>
    %cst_34 = arith.constant dense<0.000000e+00> : vector<8x16xf32>
    %46 = tpu.matmul %2, %45, %cst_34 {dimension_numbers = #tpu.dot_dimension_numbers<[1], [0], [0], [1], [0, 0, 1, 1], [], []>} : vector<8x32xbf16>, vector<32x16xbf16>, vector<8x16xf32> -> vector<8x16xf32>
    %c1_35 = arith.constant 1 : index
    %c0_36 = arith.constant 0 : index
    %c0_37 = arith.constant 0 : index
    %47 = vector.load %arg3[%c1_35, %c0_36, %c0_37] : memref<8x1x16xf32, #tpu.memory_space<vmem>>, vector<1x1x16xf32>
    %48 = vector.shape_cast %47 : vector<1x1x16xf32> to vector<1x16xf32>
    %49 = vector.broadcast %48 : vector<1x16xf32> to vector<8x16xf32>
    %50 = arith.addf %46, %49 : vector<8x16xf32>
    %c1_38 = arith.constant 1 : index
    %c0_39 = arith.constant 0 : index
    %c0_40 = arith.constant 0 : index
    %51 = vector.load %arg4[%c1_38, %c0_39, %c0_40] : memref<8x32x16xbf16, #tpu.memory_space<vmem>>, vector<1x32x16xbf16>
    %52 = vector.shape_cast %51 : vector<1x32x16xbf16> to vector<32x16xbf16>
    %cst_41 = arith.constant dense<0.000000e+00> : vector<8x16xf32>
    %53 = tpu.matmul %2, %52, %cst_41 {dimension_numbers = #tpu.dot_dimension_numbers<[1], [0], [0], [1], [0, 0, 1, 1], [], []>} : vector<8x32xbf16>, vector<32x16xbf16>, vector<8x16xf32> -> vector<8x16xf32>
    %c1_42 = arith.constant 1 : index
    %c0_43 = arith.constant 0 : index
    %c0_44 = arith.constant 0 : index
    %54 = vector.load %arg5[%c1_42, %c0_43, %c0_44] : memref<8x1x16xf32, #tpu.memory_space<vmem>>, vector<1x1x16xf32>
    %55 = vector.shape_cast %54 : vector<1x1x16xf32> to vector<1x16xf32>
    %56 = vector.broadcast %55 : vector<1x16xf32> to vector<8x16xf32>
    %57 = arith.addf %53, %56 : vector<8x16xf32>
    %c1_45 = arith.constant 1 : index
    %c0_46 = arith.constant 0 : index
    %c0_47 = arith.constant 0 : index
    %58 = vector.load %arg6[%c1_45, %c0_46, %c0_47] : memref<8x32x16xbf16, #tpu.memory_space<vmem>>, vector<1x32x16xbf16>
    %59 = vector.shape_cast %58 : vector<1x32x16xbf16> to vector<32x16xbf16>
    %cst_48 = arith.constant dense<0.000000e+00> : vector<8x16xf32>
    %60 = tpu.matmul %2, %59, %cst_48 {dimension_numbers = #tpu.dot_dimension_numbers<[1], [0], [0], [1], [0, 0, 1, 1], [], []>} : vector<8x32xbf16>, vector<32x16xbf16>, vector<8x16xf32> -> vector<8x16xf32>
    %c1_49 = arith.constant 1 : index
    %c0_50 = arith.constant 0 : index
    %c0_51 = arith.constant 0 : index
    %61 = vector.load %arg7[%c1_49, %c0_50, %c0_51] : memref<8x1x16xf32, #tpu.memory_space<vmem>>, vector<1x1x16xf32>
    %62 = vector.shape_cast %61 : vector<1x1x16xf32> to vector<1x16xf32>
    %63 = vector.broadcast %62 : vector<1x16xf32> to vector<8x16xf32>
    %64 = arith.addf %60, %63 : vector<8x16xf32>
    %cst_52 = arith.constant dense<0.000000e+00> : vector<8x8xf32>
    %65 = tpu.matmul %50, %57, %cst_52 {dimension_numbers = #tpu.dot_dimension_numbers<[1], [1], [0], [0], [0, 0, 1, 0], [], []>} : vector<8x16xf32>, vector<8x16xf32>, vector<8x8xf32> -> vector<8x8xf32>
    %cst_53 = arith.constant 0.0883883461 : f32
    %66 = vector.broadcast %cst_53 : f32 to vector<8x8xf32>
    %67 = arith.mulf %65, %66 : vector<8x8xf32>
    %cst_54 = arith.constant dense<0xFF800000> : vector<8xf32>
    %68 = vector.multi_reduction <maximumf>, %67, %cst_54 [1] : vector<8x8xf32> to vector<8xf32>
    %69 = vector.shape_cast %68 : vector<8xf32> to vector<8x1xf32>
    %70 = vector.broadcast %69 : vector<8x1xf32> to vector<8x8xf32>
    %71 = arith.subf %67, %70 : vector<8x8xf32>
    %72 = math.exp %71 : vector<8x8xf32>
    %cst_55 = arith.constant dense<0.000000e+00> : vector<8xf32>
    %73 = vector.multi_reduction <add>, %72, %cst_55 [1] : vector<8x8xf32> to vector<8xf32>
    %74 = vector.shape_cast %73 : vector<8xf32> to vector<8x1xf32>
    %75 = tpu.reciprocal %74 {approx = true} : vector<8x1xf32> -> vector<8x1xf32>
    %76 = vector.broadcast %75 : vector<8x1xf32> to vector<8x8xf32>
    %77 = arith.mulf %72, %76 : vector<8x8xf32>
    %cst_56 = arith.constant dense<0.000000e+00> : vector<8x16xf32>
    %78 = tpu.matmul %77, %64, %cst_56 {dimension_numbers = #tpu.dot_dimension_numbers<[1], [0], [0], [1], [0, 0, 1, 1], [], []>} : vector<8x8xf32>, vector<8x16xf32>, vector<8x16xf32> -> vector<8x16xf32>
    %79 = arith.truncf %78 : vector<8x16xf32> to vector<8x16xbf16>
    %c1_57 = arith.constant 1 : index
    %c0_58 = arith.constant 0 : index
    %c0_59 = arith.constant 0 : index
    %80 = vector.load %arg8[%c1_57, %c0_58, %c0_59] : memref<8x16x32xbf16, #tpu.memory_space<vmem>>, vector<1x16x32xbf16>
    %81 = vector.shape_cast %80 : vector<1x16x32xbf16> to vector<16x32xbf16>
    %cst_60 = arith.constant dense<0.000000e+00> : vector<8x32xf32>
    %82 = tpu.matmul %79, %81, %cst_60 {dimension_numbers = #tpu.dot_dimension_numbers<[1], [0], [0], [1], [0, 0, 1, 1], [], []>} : vector<8x16xbf16>, vector<16x32xbf16>, vector<8x32xf32> -> vector<8x32xf32>
    %83 = arith.addf %43, %82 : vector<8x32xf32>
    %c2 = arith.constant 2 : index
    %c0_61 = arith.constant 0 : index
    %c0_62 = arith.constant 0 : index
    %84 = vector.load %arg2[%c2, %c0_61, %c0_62] : memref<8x32x16xbf16, #tpu.memory_space<vmem>>, vector<1x32x16xbf16>
    %85 = vector.shape_cast %84 : vector<1x32x16xbf16> to vector<32x16xbf16>
    %cst_63 = arith.constant dense<0.000000e+00> : vector<8x16xf32>
    %86 = tpu.matmul %2, %85, %cst_63 {dimension_numbers = #tpu.dot_dimension_numbers<[1], [0], [0], [1], [0, 0, 1, 1], [], []>} : vector<8x32xbf16>, vector<32x16xbf16>, vector<8x16xf32> -> vector<8x16xf32>
    %c2_64 = arith.constant 2 : index
    %c0_65 = arith.constant 0 : index
    %c0_66 = arith.constant 0 : index
    %87 = vector.load %arg3[%c2_64, %c0_65, %c0_66] : memref<8x1x16xf32, #tpu.memory_space<vmem>>, vector<1x1x16xf32>
    %88 = vector.shape_cast %87 : vector<1x1x16xf32> to vector<1x16xf32>
    %89 = vector.broadcast %88 : vector<1x16xf32> to vector<8x16xf32>
    %90 = arith.addf %86, %89 : vector<8x16xf32>
    %c2_67 = arith.constant 2 : index
    %c0_68 = arith.constant 0 : index
    %c0_69 = arith.constant 0 : index
    %91 = vector.load %arg4[%c2_67, %c0_68, %c0_69] : memref<8x32x16xbf16, #tpu.memory_space<vmem>>, vector<1x32x16xbf16>
    %92 = vector.shape_cast %91 : vector<1x32x16xbf16> to vector<32x16xbf16>
    %cst_70 = arith.constant dense<0.000000e+00> : vector<8x16xf32>
    %93 = tpu.matmul %2, %92, %cst_70 {dimension_numbers = #tpu.dot_dimension_numbers<[1], [0], [0], [1], [0, 0, 1, 1], [], []>} : vector<8x32xbf16>, vector<32x16xbf16>, vector<8x16xf32> -> vector<8x16xf32>
    %c2_71 = arith.constant 2 : index
    %c0_72 = arith.constant 0 : index
    %c0_73 = arith.constant 0 : index
    %94 = vector.load %arg5[%c2_71, %c0_72, %c0_73] : memref<8x1x16xf32, #tpu.memory_space<vmem>>, vector<1x1x16xf32>
    %95 = vector.shape_cast %94 : vector<1x1x16xf32> to vector<1x16xf32>
    %96 = vector.broadcast %95 : vector<1x16xf32> to vector<8x16xf32>
    %97 = arith.addf %93, %96 : vector<8x16xf32>
    %c2_74 = arith.constant 2 : index
    %c0_75 = arith.constant 0 : index
    %c0_76 = arith.constant 0 : index
    %98 = vector.load %arg6[%c2_74, %c0_75, %c0_76] : memref<8x32x16xbf16, #tpu.memory_space<vmem>>, vector<1x32x16xbf16>
    %99 = vector.shape_cast %98 : vector<1x32x16xbf16> to vector<32x16xbf16>
    %cst_77 = arith.constant dense<0.000000e+00> : vector<8x16xf32>
    %100 = tpu.matmul %2, %99, %cst_77 {dimension_numbers = #tpu.dot_dimension_numbers<[1], [0], [0], [1], [0, 0, 1, 1], [], []>} : vector<8x32xbf16>, vector<32x16xbf16>, vector<8x16xf32> -> vector<8x16xf32>
    %c2_78 = arith.constant 2 : index
    %c0_79 = arith.constant 0 : index
    %c0_80 = arith.constant 0 : index
    %101 = vector.load %arg7[%c2_78, %c0_79, %c0_80] : memref<8x1x16xf32, #tpu.memory_space<vmem>>, vector<1x1x16xf32>
    %102 = vector.shape_cast %101 : vector<1x1x16xf32> to vector<1x16xf32>
    %103 = vector.broadcast %102 : vector<1x16xf32> to vector<8x16xf32>
    %104 = arith.addf %100, %103 : vector<8x16xf32>
    %cst_81 = arith.constant dense<0.000000e+00> : vector<8x8xf32>
    %105 = tpu.matmul %90, %97, %cst_81 {dimension_numbers = #tpu.dot_dimension_numbers<[1], [1], [0], [0], [0, 0, 1, 0], [], []>} : vector<8x16xf32>, vector<8x16xf32>, vector<8x8xf32> -> vector<8x8xf32>
    %cst_82 = arith.constant 0.0883883461 : f32
    %106 = vector.broadcast %cst_82 : f32 to vector<8x8xf32>
    %107 = arith.mulf %105, %106 : vector<8x8xf32>
    %cst_83 = arith.constant dense<0xFF800000> : vector<8xf32>
    %108 = vector.multi_reduction <maximumf>, %107, %cst_83 [1] : vector<8x8xf32> to vector<8xf32>
    %109 = vector.shape_cast %108 : vector<8xf32> to vector<8x1xf32>
    %110 = vector.broadcast %109 : vector<8x1xf32> to vector<8x8xf32>
    %111 = arith.subf %107, %110 : vector<8x8xf32>
    %112 = math.exp %111 : vector<8x8xf32>
    %cst_84 = arith.constant dense<0.000000e+00> : vector<8xf32>
    %113 = vector.multi_reduction <add>, %112, %cst_84 [1] : vector<8x8xf32> to vector<8xf32>
    %114 = vector.shape_cast %113 : vector<8xf32> to vector<8x1xf32>
    %115 = tpu.reciprocal %114 {approx = true} : vector<8x1xf32> -> vector<8x1xf32>
    %116 = vector.broadcast %115 : vector<8x1xf32> to vector<8x8xf32>
    %117 = arith.mulf %112, %116 : vector<8x8xf32>
    %cst_85 = arith.constant dense<0.000000e+00> : vector<8x16xf32>
    %118 = tpu.matmul %117, %104, %cst_85 {dimension_numbers = #tpu.dot_dimension_numbers<[1], [0], [0], [1], [0, 0, 1, 1], [], []>} : vector<8x8xf32>, vector<8x16xf32>, vector<8x16xf32> -> vector<8x16xf32>
    %119 = arith.truncf %118 : vector<8x16xf32> to vector<8x16xbf16>
    %c2_86 = arith.constant 2 : index
    %c0_87 = arith.constant 0 : index
    %c0_88 = arith.constant 0 : index
    %120 = vector.load %arg8[%c2_86, %c0_87, %c0_88] : memref<8x16x32xbf16, #tpu.memory_space<vmem>>, vector<1x16x32xbf16>
    %121 = vector.shape_cast %120 : vector<1x16x32xbf16> to vector<16x32xbf16>
    %cst_89 = arith.constant dense<0.000000e+00> : vector<8x32xf32>
    %122 = tpu.matmul %119, %121, %cst_89 {dimension_numbers = #tpu.dot_dimension_numbers<[1], [0], [0], [1], [0, 0, 1, 1], [], []>} : vector<8x16xbf16>, vector<16x32xbf16>, vector<8x32xf32> -> vector<8x32xf32>
    %123 = arith.addf %83, %122 : vector<8x32xf32>
    %c3 = arith.constant 3 : index
    %c0_90 = arith.constant 0 : index
    %c0_91 = arith.constant 0 : index
    %124 = vector.load %arg2[%c3, %c0_90, %c0_91] : memref<8x32x16xbf16, #tpu.memory_space<vmem>>, vector<1x32x16xbf16>
    %125 = vector.shape_cast %124 : vector<1x32x16xbf16> to vector<32x16xbf16>
    %cst_92 = arith.constant dense<0.000000e+00> : vector<8x16xf32>
    %126 = tpu.matmul %2, %125, %cst_92 {dimension_numbers = #tpu.dot_dimension_numbers<[1], [0], [0], [1], [0, 0, 1, 1], [], []>} : vector<8x32xbf16>, vector<32x16xbf16>, vector<8x16xf32> -> vector<8x16xf32>
    %c3_93 = arith.constant 3 : index
    %c0_94 = arith.constant 0 : index
    %c0_95 = arith.constant 0 : index
    %127 = vector.load %arg3[%c3_93, %c0_94, %c0_95] : memref<8x1x16xf32, #tpu.memory_space<vmem>>, vector<1x1x16xf32>
    %128 = vector.shape_cast %127 : vector<1x1x16xf32> to vector<1x16xf32>
    %129 = vector.broadcast %128 : vector<1x16xf32> to vector<8x16xf32>
    %130 = arith.addf %126, %129 : vector<8x16xf32>
    %c3_96 = arith.constant 3 : index
    %c0_97 = arith.constant 0 : index
    %c0_98 = arith.constant 0 : index
    %131 = vector.load %arg4[%c3_96, %c0_97, %c0_98] : memref<8x32x16xbf16, #tpu.memory_space<vmem>>, vector<1x32x16xbf16>
    %132 = vector.shape_cast %131 : vector<1x32x16xbf16> to vector<32x16xbf16>
    %cst_99 = arith.constant dense<0.000000e+00> : vector<8x16xf32>
    %133 = tpu.matmul %2, %132, %cst_99 {dimension_numbers = #tpu.dot_dimension_numbers<[1], [0], [0], [1], [0, 0, 1, 1], [], []>} : vector<8x32xbf16>, vector<32x16xbf16>, vector<8x16xf32> -> vector<8x16xf32>
    %c3_100 = arith.constant 3 : index
    %c0_101 = arith.constant 0 : index
    %c0_102 = arith.constant 0 : index
    %134 = vector.load %arg5[%c3_100, %c0_101, %c0_102] : memref<8x1x16xf32, #tpu.memory_space<vmem>>, vector<1x1x16xf32>
    %135 = vector.shape_cast %134 : vector<1x1x16xf32> to vector<1x16xf32>
    %136 = vector.broadcast %135 : vector<1x16xf32> to vector<8x16xf32>
    %137 = arith.addf %133, %136 : vector<8x16xf32>
    %c3_103 = arith.constant 3 : index
    %c0_104 = arith.constant 0 : index
    %c0_105 = arith.constant 0 : index
    %138 = vector.load %arg6[%c3_103, %c0_104, %c0_105] : memref<8x32x16xbf16, #tpu.memory_space<vmem>>, vector<1x32x16xbf16>
    %139 = vector.shape_cast %138 : vector<1x32x16xbf16> to vector<32x16xbf16>
    %cst_106 = arith.constant dense<0.000000e+00> : vector<8x16xf32>
    %140 = tpu.matmul %2, %139, %cst_106 {dimension_numbers = #tpu.dot_dimension_numbers<[1], [0], [0], [1], [0, 0, 1, 1], [], []>} : vector<8x32xbf16>, vector<32x16xbf16>, vector<8x16xf32> -> vector<8x16xf32>
    %c3_107 = arith.constant 3 : index
    %c0_108 = arith.constant 0 : index
    %c0_109 = arith.constant 0 : index
    %141 = vector.load %arg7[%c3_107, %c0_108, %c0_109] : memref<8x1x16xf32, #tpu.memory_space<vmem>>, vector<1x1x16xf32>
    %142 = vector.shape_cast %141 : vector<1x1x16xf32> to vector<1x16xf32>
    %143 = vector.broadcast %142 : vector<1x16xf32> to vector<8x16xf32>
    %144 = arith.addf %140, %143 : vector<8x16xf32>
    %cst_110 = arith.constant dense<0.000000e+00> : vector<8x8xf32>
    %145 = tpu.matmul %130, %137, %cst_110 {dimension_numbers = #tpu.dot_dimension_numbers<[1], [1], [0], [0], [0, 0, 1, 0], [], []>} : vector<8x16xf32>, vector<8x16xf32>, vector<8x8xf32> -> vector<8x8xf32>
    %cst_111 = arith.constant 0.0883883461 : f32
    %146 = vector.broadcast %cst_111 : f32 to vector<8x8xf32>
    %147 = arith.mulf %145, %146 : vector<8x8xf32>
    %cst_112 = arith.constant dense<0xFF800000> : vector<8xf32>
    %148 = vector.multi_reduction <maximumf>, %147, %cst_112 [1] : vector<8x8xf32> to vector<8xf32>
    %149 = vector.shape_cast %148 : vector<8xf32> to vector<8x1xf32>
    %150 = vector.broadcast %149 : vector<8x1xf32> to vector<8x8xf32>
    %151 = arith.subf %147, %150 : vector<8x8xf32>
    %152 = math.exp %151 : vector<8x8xf32>
    %cst_113 = arith.constant dense<0.000000e+00> : vector<8xf32>
    %153 = vector.multi_reduction <add>, %152, %cst_113 [1] : vector<8x8xf32> to vector<8xf32>
    %154 = vector.shape_cast %153 : vector<8xf32> to vector<8x1xf32>
    %155 = tpu.reciprocal %154 {approx = true} : vector<8x1xf32> -> vector<8x1xf32>
    %156 = vector.broadcast %155 : vector<8x1xf32> to vector<8x8xf32>
    %157 = arith.mulf %152, %156 : vector<8x8xf32>
    %cst_114 = arith.constant dense<0.000000e+00> : vector<8x16xf32>
    %158 = tpu.matmul %157, %144, %cst_114 {dimension_numbers = #tpu.dot_dimension_numbers<[1], [0], [0], [1], [0, 0, 1, 1], [], []>} : vector<8x8xf32>, vector<8x16xf32>, vector<8x16xf32> -> vector<8x16xf32>
    %159 = arith.truncf %158 : vector<8x16xf32> to vector<8x16xbf16>
    %c3_115 = arith.constant 3 : index
    %c0_116 = arith.constant 0 : index
    %c0_117 = arith.constant 0 : index
    %160 = vector.load %arg8[%c3_115, %c0_116, %c0_117] : memref<8x16x32xbf16, #tpu.memory_space<vmem>>, vector<1x16x32xbf16>
    %161 = vector.shape_cast %160 : vector<1x16x32xbf16> to vector<16x32xbf16>
    %cst_118 = arith.constant dense<0.000000e+00> : vector<8x32xf32>
    %162 = tpu.matmul %159, %161, %cst_118 {dimension_numbers = #tpu.dot_dimension_numbers<[1], [0], [0], [1], [0, 0, 1, 1], [], []>} : vector<8x16xbf16>, vector<16x32xbf16>, vector<8x32xf32> -> vector<8x32xf32>
    %163 = arith.addf %123, %162 : vector<8x32xf32>
    %c4 = arith.constant 4 : index
    %c0_119 = arith.constant 0 : index
    %c0_120 = arith.constant 0 : index
    %164 = vector.load %arg2[%c4, %c0_119, %c0_120] : memref<8x32x16xbf16, #tpu.memory_space<vmem>>, vector<1x32x16xbf16>
    %165 = vector.shape_cast %164 : vector<1x32x16xbf16> to vector<32x16xbf16>
    %cst_121 = arith.constant dense<0.000000e+00> : vector<8x16xf32>
    %166 = tpu.matmul %2, %165, %cst_121 {dimension_numbers = #tpu.dot_dimension_numbers<[1], [0], [0], [1], [0, 0, 1, 1], [], []>} : vector<8x32xbf16>, vector<32x16xbf16>, vector<8x16xf32> -> vector<8x16xf32>
    %c4_122 = arith.constant 4 : index
    %c0_123 = arith.constant 0 : index
    %c0_124 = arith.constant 0 : index
    %167 = vector.load %arg3[%c4_122, %c0_123, %c0_124] : memref<8x1x16xf32, #tpu.memory_space<vmem>>, vector<1x1x16xf32>
    %168 = vector.shape_cast %167 : vector<1x1x16xf32> to vector<1x16xf32>
    %169 = vector.broadcast %168 : vector<1x16xf32> to vector<8x16xf32>
    %170 = arith.addf %166, %169 : vector<8x16xf32>
    %c4_125 = arith.constant 4 : index
    %c0_126 = arith.constant 0 : index
    %c0_127 = arith.constant 0 : index
    %171 = vector.load %arg4[%c4_125, %c0_126, %c0_127] : memref<8x32x16xbf16, #tpu.memory_space<vmem>>, vector<1x32x16xbf16>
    %172 = vector.shape_cast %171 : vector<1x32x16xbf16> to vector<32x16xbf16>
    %cst_128 = arith.constant dense<0.000000e+00> : vector<8x16xf32>
    %173 = tpu.matmul %2, %172, %cst_128 {dimension_numbers = #tpu.dot_dimension_numbers<[1], [0], [0], [1], [0, 0, 1, 1], [], []>} : vector<8x32xbf16>, vector<32x16xbf16>, vector<8x16xf32> -> vector<8x16xf32>
    %c4_129 = arith.constant 4 : index
    %c0_130 = arith.constant 0 : index
    %c0_131 = arith.constant 0 : index
    %174 = vector.load %arg5[%c4_129, %c0_130, %c0_131] : memref<8x1x16xf32, #tpu.memory_space<vmem>>, vector<1x1x16xf32>
    %175 = vector.shape_cast %174 : vector<1x1x16xf32> to vector<1x16xf32>
    %176 = vector.broadcast %175 : vector<1x16xf32> to vector<8x16xf32>
    %177 = arith.addf %173, %176 : vector<8x16xf32>
    %c4_132 = arith.constant 4 : index
    %c0_133 = arith.constant 0 : index
    %c0_134 = arith.constant 0 : index
    %178 = vector.load %arg6[%c4_132, %c0_133, %c0_134] : memref<8x32x16xbf16, #tpu.memory_space<vmem>>, vector<1x32x16xbf16>
    %179 = vector.shape_cast %178 : vector<1x32x16xbf16> to vector<32x16xbf16>
    %cst_135 = arith.constant dense<0.000000e+00> : vector<8x16xf32>
    %180 = tpu.matmul %2, %179, %cst_135 {dimension_numbers = #tpu.dot_dimension_numbers<[1], [0], [0], [1], [0, 0, 1, 1], [], []>} : vector<8x32xbf16>, vector<32x16xbf16>, vector<8x16xf32> -> vector<8x16xf32>
    %c4_136 = arith.constant 4 : index
    %c0_137 = arith.constant 0 : index
    %c0_138 = arith.constant 0 : index
    %181 = vector.load %arg7[%c4_136, %c0_137, %c0_138] : memref<8x1x16xf32, #tpu.memory_space<vmem>>, vector<1x1x16xf32>
    %182 = vector.shape_cast %181 : vector<1x1x16xf32> to vector<1x16xf32>
    %183 = vector.broadcast %182 : vector<1x16xf32> to vector<8x16xf32>
    %184 = arith.addf %180, %183 : vector<8x16xf32>
    %cst_139 = arith.constant dense<0.000000e+00> : vector<8x8xf32>
    %185 = tpu.matmul %170, %177, %cst_139 {dimension_numbers = #tpu.dot_dimension_numbers<[1], [1], [0], [0], [0, 0, 1, 0], [], []>} : vector<8x16xf32>, vector<8x16xf32>, vector<8x8xf32> -> vector<8x8xf32>
    %cst_140 = arith.constant 0.0883883461 : f32
    %186 = vector.broadcast %cst_140 : f32 to vector<8x8xf32>
    %187 = arith.mulf %185, %186 : vector<8x8xf32>
    %cst_141 = arith.constant dense<0xFF800000> : vector<8xf32>
    %188 = vector.multi_reduction <maximumf>, %187, %cst_141 [1] : vector<8x8xf32> to vector<8xf32>
    %189 = vector.shape_cast %188 : vector<8xf32> to vector<8x1xf32>
    %190 = vector.broadcast %189 : vector<8x1xf32> to vector<8x8xf32>
    %191 = arith.subf %187, %190 : vector<8x8xf32>
    %192 = math.exp %191 : vector<8x8xf32>
    %cst_142 = arith.constant dense<0.000000e+00> : vector<8xf32>
    %193 = vector.multi_reduction <add>, %192, %cst_142 [1] : vector<8x8xf32> to vector<8xf32>
    %194 = vector.shape_cast %193 : vector<8xf32> to vector<8x1xf32>
    %195 = tpu.reciprocal %194 {approx = true} : vector<8x1xf32> -> vector<8x1xf32>
    %196 = vector.broadcast %195 : vector<8x1xf32> to vector<8x8xf32>
    %197 = arith.mulf %192, %196 : vector<8x8xf32>
    %cst_143 = arith.constant dense<0.000000e+00> : vector<8x16xf32>
    %198 = tpu.matmul %197, %184, %cst_143 {dimension_numbers = #tpu.dot_dimension_numbers<[1], [0], [0], [1], [0, 0, 1, 1], [], []>} : vector<8x8xf32>, vector<8x16xf32>, vector<8x16xf32> -> vector<8x16xf32>
    %199 = arith.truncf %198 : vector<8x16xf32> to vector<8x16xbf16>
    %c4_144 = arith.constant 4 : index
    %c0_145 = arith.constant 0 : index
    %c0_146 = arith.constant 0 : index
    %200 = vector.load %arg8[%c4_144, %c0_145, %c0_146] : memref<8x16x32xbf16, #tpu.memory_space<vmem>>, vector<1x16x32xbf16>
    %201 = vector.shape_cast %200 : vector<1x16x32xbf16> to vector<16x32xbf16>
    %cst_147 = arith.constant dense<0.000000e+00> : vector<8x32xf32>
    %202 = tpu.matmul %199, %201, %cst_147 {dimension_numbers = #tpu.dot_dimension_numbers<[1], [0], [0], [1], [0, 0, 1, 1], [], []>} : vector<8x16xbf16>, vector<16x32xbf16>, vector<8x32xf32> -> vector<8x32xf32>
    %203 = arith.addf %163, %202 : vector<8x32xf32>
    %c5 = arith.constant 5 : index
    %c0_148 = arith.constant 0 : index
    %c0_149 = arith.constant 0 : index
    %204 = vector.load %arg2[%c5, %c0_148, %c0_149] : memref<8x32x16xbf16, #tpu.memory_space<vmem>>, vector<1x32x16xbf16>
    %205 = vector.shape_cast %204 : vector<1x32x16xbf16> to vector<32x16xbf16>
    %cst_150 = arith.constant dense<0.000000e+00> : vector<8x16xf32>
    %206 = tpu.matmul %2, %205, %cst_150 {dimension_numbers = #tpu.dot_dimension_numbers<[1], [0], [0], [1], [0, 0, 1, 1], [], []>} : vector<8x32xbf16>, vector<32x16xbf16>, vector<8x16xf32> -> vector<8x16xf32>
    %c5_151 = arith.constant 5 : index
    %c0_152 = arith.constant 0 : index
    %c0_153 = arith.constant 0 : index
    %207 = vector.load %arg3[%c5_151, %c0_152, %c0_153] : memref<8x1x16xf32, #tpu.memory_space<vmem>>, vector<1x1x16xf32>
    %208 = vector.shape_cast %207 : vector<1x1x16xf32> to vector<1x16xf32>
    %209 = vector.broadcast %208 : vector<1x16xf32> to vector<8x16xf32>
    %210 = arith.addf %206, %209 : vector<8x16xf32>
    %c5_154 = arith.constant 5 : index
    %c0_155 = arith.constant 0 : index
    %c0_156 = arith.constant 0 : index
    %211 = vector.load %arg4[%c5_154, %c0_155, %c0_156] : memref<8x32x16xbf16, #tpu.memory_space<vmem>>, vector<1x32x16xbf16>
    %212 = vector.shape_cast %211 : vector<1x32x16xbf16> to vector<32x16xbf16>
    %cst_157 = arith.constant dense<0.000000e+00> : vector<8x16xf32>
    %213 = tpu.matmul %2, %212, %cst_157 {dimension_numbers = #tpu.dot_dimension_numbers<[1], [0], [0], [1], [0, 0, 1, 1], [], []>} : vector<8x32xbf16>, vector<32x16xbf16>, vector<8x16xf32> -> vector<8x16xf32>
    %c5_158 = arith.constant 5 : index
    %c0_159 = arith.constant 0 : index
    %c0_160 = arith.constant 0 : index
    %214 = vector.load %arg5[%c5_158, %c0_159, %c0_160] : memref<8x1x16xf32, #tpu.memory_space<vmem>>, vector<1x1x16xf32>
    %215 = vector.shape_cast %214 : vector<1x1x16xf32> to vector<1x16xf32>
    %216 = vector.broadcast %215 : vector<1x16xf32> to vector<8x16xf32>
    %217 = arith.addf %213, %216 : vector<8x16xf32>
    %c5_161 = arith.constant 5 : index
    %c0_162 = arith.constant 0 : index
    %c0_163 = arith.constant 0 : index
    %218 = vector.load %arg6[%c5_161, %c0_162, %c0_163] : memref<8x32x16xbf16, #tpu.memory_space<vmem>>, vector<1x32x16xbf16>
    %219 = vector.shape_cast %218 : vector<1x32x16xbf16> to vector<32x16xbf16>
    %cst_164 = arith.constant dense<0.000000e+00> : vector<8x16xf32>
    %220 = tpu.matmul %2, %219, %cst_164 {dimension_numbers = #tpu.dot_dimension_numbers<[1], [0], [0], [1], [0, 0, 1, 1], [], []>} : vector<8x32xbf16>, vector<32x16xbf16>, vector<8x16xf32> -> vector<8x16xf32>
    %c5_165 = arith.constant 5 : index
    %c0_166 = arith.constant 0 : index
    %c0_167 = arith.constant 0 : index
    %221 = vector.load %arg7[%c5_165, %c0_166, %c0_167] : memref<8x1x16xf32, #tpu.memory_space<vmem>>, vector<1x1x16xf32>
    %222 = vector.shape_cast %221 : vector<1x1x16xf32> to vector<1x16xf32>
    %223 = vector.broadcast %222 : vector<1x16xf32> to vector<8x16xf32>
    %224 = arith.addf %220, %223 : vector<8x16xf32>
    %cst_168 = arith.constant dense<0.000000e+00> : vector<8x8xf32>
    %225 = tpu.matmul %210, %217, %cst_168 {dimension_numbers = #tpu.dot_dimension_numbers<[1], [1], [0], [0], [0, 0, 1, 0], [], []>} : vector<8x16xf32>, vector<8x16xf32>, vector<8x8xf32> -> vector<8x8xf32>
    %cst_169 = arith.constant 0.0883883461 : f32
    %226 = vector.broadcast %cst_169 : f32 to vector<8x8xf32>
    %227 = arith.mulf %225, %226 : vector<8x8xf32>
    %cst_170 = arith.constant dense<0xFF800000> : vector<8xf32>
    %228 = vector.multi_reduction <maximumf>, %227, %cst_170 [1] : vector<8x8xf32> to vector<8xf32>
    %229 = vector.shape_cast %228 : vector<8xf32> to vector<8x1xf32>
    %230 = vector.broadcast %229 : vector<8x1xf32> to vector<8x8xf32>
    %231 = arith.subf %227, %230 : vector<8x8xf32>
    %232 = math.exp %231 : vector<8x8xf32>
    %cst_171 = arith.constant dense<0.000000e+00> : vector<8xf32>
    %233 = vector.multi_reduction <add>, %232, %cst_171 [1] : vector<8x8xf32> to vector<8xf32>
    %234 = vector.shape_cast %233 : vector<8xf32> to vector<8x1xf32>
    %235 = tpu.reciprocal %234 {approx = true} : vector<8x1xf32> -> vector<8x1xf32>
    %236 = vector.broadcast %235 : vector<8x1xf32> to vector<8x8xf32>
    %237 = arith.mulf %232, %236 : vector<8x8xf32>
    %cst_172 = arith.constant dense<0.000000e+00> : vector<8x16xf32>
    %238 = tpu.matmul %237, %224, %cst_172 {dimension_numbers = #tpu.dot_dimension_numbers<[1], [0], [0], [1], [0, 0, 1, 1], [], []>} : vector<8x8xf32>, vector<8x16xf32>, vector<8x16xf32> -> vector<8x16xf32>
    %239 = arith.truncf %238 : vector<8x16xf32> to vector<8x16xbf16>
    %c5_173 = arith.constant 5 : index
    %c0_174 = arith.constant 0 : index
    %c0_175 = arith.constant 0 : index
    %240 = vector.load %arg8[%c5_173, %c0_174, %c0_175] : memref<8x16x32xbf16, #tpu.memory_space<vmem>>, vector<1x16x32xbf16>
    %241 = vector.shape_cast %240 : vector<1x16x32xbf16> to vector<16x32xbf16>
    %cst_176 = arith.constant dense<0.000000e+00> : vector<8x32xf32>
    %242 = tpu.matmul %239, %241, %cst_176 {dimension_numbers = #tpu.dot_dimension_numbers<[1], [0], [0], [1], [0, 0, 1, 1], [], []>} : vector<8x16xbf16>, vector<16x32xbf16>, vector<8x32xf32> -> vector<8x32xf32>
    %243 = arith.addf %203, %242 : vector<8x32xf32>
    %c6 = arith.constant 6 : index
    %c0_177 = arith.constant 0 : index
    %c0_178 = arith.constant 0 : index
    %244 = vector.load %arg2[%c6, %c0_177, %c0_178] : memref<8x32x16xbf16, #tpu.memory_space<vmem>>, vector<1x32x16xbf16>
    %245 = vector.shape_cast %244 : vector<1x32x16xbf16> to vector<32x16xbf16>
    %cst_179 = arith.constant dense<0.000000e+00> : vector<8x16xf32>
    %246 = tpu.matmul %2, %245, %cst_179 {dimension_numbers = #tpu.dot_dimension_numbers<[1], [0], [0], [1], [0, 0, 1, 1], [], []>} : vector<8x32xbf16>, vector<32x16xbf16>, vector<8x16xf32> -> vector<8x16xf32>
    %c6_180 = arith.constant 6 : index
    %c0_181 = arith.constant 0 : index
    %c0_182 = arith.constant 0 : index
    %247 = vector.load %arg3[%c6_180, %c0_181, %c0_182] : memref<8x1x16xf32, #tpu.memory_space<vmem>>, vector<1x1x16xf32>
    %248 = vector.shape_cast %247 : vector<1x1x16xf32> to vector<1x16xf32>
    %249 = vector.broadcast %248 : vector<1x16xf32> to vector<8x16xf32>
    %250 = arith.addf %246, %249 : vector<8x16xf32>
    %c6_183 = arith.constant 6 : index
    %c0_184 = arith.constant 0 : index
    %c0_185 = arith.constant 0 : index
    %251 = vector.load %arg4[%c6_183, %c0_184, %c0_185] : memref<8x32x16xbf16, #tpu.memory_space<vmem>>, vector<1x32x16xbf16>
    %252 = vector.shape_cast %251 : vector<1x32x16xbf16> to vector<32x16xbf16>
    %cst_186 = arith.constant dense<0.000000e+00> : vector<8x16xf32>
    %253 = tpu.matmul %2, %252, %cst_186 {dimension_numbers = #tpu.dot_dimension_numbers<[1], [0], [0], [1], [0, 0, 1, 1], [], []>} : vector<8x32xbf16>, vector<32x16xbf16>, vector<8x16xf32> -> vector<8x16xf32>
    %c6_187 = arith.constant 6 : index
    %c0_188 = arith.constant 0 : index
    %c0_189 = arith.constant 0 : index
    %254 = vector.load %arg5[%c6_187, %c0_188, %c0_189] : memref<8x1x16xf32, #tpu.memory_space<vmem>>, vector<1x1x16xf32>
    %255 = vector.shape_cast %254 : vector<1x1x16xf32> to vector<1x16xf32>
    %256 = vector.broadcast %255 : vector<1x16xf32> to vector<8x16xf32>
    %257 = arith.addf %253, %256 : vector<8x16xf32>
    %c6_190 = arith.constant 6 : index
    %c0_191 = arith.constant 0 : index
    %c0_192 = arith.constant 0 : index
    %258 = vector.load %arg6[%c6_190, %c0_191, %c0_192] : memref<8x32x16xbf16, #tpu.memory_space<vmem>>, vector<1x32x16xbf16>
    %259 = vector.shape_cast %258 : vector<1x32x16xbf16> to vector<32x16xbf16>
    %cst_193 = arith.constant dense<0.000000e+00> : vector<8x16xf32>
    %260 = tpu.matmul %2, %259, %cst_193 {dimension_numbers = #tpu.dot_dimension_numbers<[1], [0], [0], [1], [0, 0, 1, 1], [], []>} : vector<8x32xbf16>, vector<32x16xbf16>, vector<8x16xf32> -> vector<8x16xf32>
    %c6_194 = arith.constant 6 : index
    %c0_195 = arith.constant 0 : index
    %c0_196 = arith.constant 0 : index
    %261 = vector.load %arg7[%c6_194, %c0_195, %c0_196] : memref<8x1x16xf32, #tpu.memory_space<vmem>>, vector<1x1x16xf32>
    %262 = vector.shape_cast %261 : vector<1x1x16xf32> to vector<1x16xf32>
    %263 = vector.broadcast %262 : vector<1x16xf32> to vector<8x16xf32>
    %264 = arith.addf %260, %263 : vector<8x16xf32>
    %cst_197 = arith.constant dense<0.000000e+00> : vector<8x8xf32>
    %265 = tpu.matmul %250, %257, %cst_197 {dimension_numbers = #tpu.dot_dimension_numbers<[1], [1], [0], [0], [0, 0, 1, 0], [], []>} : vector<8x16xf32>, vector<8x16xf32>, vector<8x8xf32> -> vector<8x8xf32>
    %cst_198 = arith.constant 0.0883883461 : f32
    %266 = vector.broadcast %cst_198 : f32 to vector<8x8xf32>
    %267 = arith.mulf %265, %266 : vector<8x8xf32>
    %cst_199 = arith.constant dense<0xFF800000> : vector<8xf32>
    %268 = vector.multi_reduction <maximumf>, %267, %cst_199 [1] : vector<8x8xf32> to vector<8xf32>
    %269 = vector.shape_cast %268 : vector<8xf32> to vector<8x1xf32>
    %270 = vector.broadcast %269 : vector<8x1xf32> to vector<8x8xf32>
    %271 = arith.subf %267, %270 : vector<8x8xf32>
    %272 = math.exp %271 : vector<8x8xf32>
    %cst_200 = arith.constant dense<0.000000e+00> : vector<8xf32>
    %273 = vector.multi_reduction <add>, %272, %cst_200 [1] : vector<8x8xf32> to vector<8xf32>
    %274 = vector.shape_cast %273 : vector<8xf32> to vector<8x1xf32>
    %275 = tpu.reciprocal %274 {approx = true} : vector<8x1xf32> -> vector<8x1xf32>
    %276 = vector.broadcast %275 : vector<8x1xf32> to vector<8x8xf32>
    %277 = arith.mulf %272, %276 : vector<8x8xf32>
    %cst_201 = arith.constant dense<0.000000e+00> : vector<8x16xf32>
    %278 = tpu.matmul %277, %264, %cst_201 {dimension_numbers = #tpu.dot_dimension_numbers<[1], [0], [0], [1], [0, 0, 1, 1], [], []>} : vector<8x8xf32>, vector<8x16xf32>, vector<8x16xf32> -> vector<8x16xf32>
    %279 = arith.truncf %278 : vector<8x16xf32> to vector<8x16xbf16>
    %c6_202 = arith.constant 6 : index
    %c0_203 = arith.constant 0 : index
    %c0_204 = arith.constant 0 : index
    %280 = vector.load %arg8[%c6_202, %c0_203, %c0_204] : memref<8x16x32xbf16, #tpu.memory_space<vmem>>, vector<1x16x32xbf16>
    %281 = vector.shape_cast %280 : vector<1x16x32xbf16> to vector<16x32xbf16>
    %cst_205 = arith.constant dense<0.000000e+00> : vector<8x32xf32>
    %282 = tpu.matmul %279, %281, %cst_205 {dimension_numbers = #tpu.dot_dimension_numbers<[1], [0], [0], [1], [0, 0, 1, 1], [], []>} : vector<8x16xbf16>, vector<16x32xbf16>, vector<8x32xf32> -> vector<8x32xf32>
    %283 = arith.addf %243, %282 : vector<8x32xf32>
    %c7 = arith.constant 7 : index
    %c0_206 = arith.constant 0 : index
    %c0_207 = arith.constant 0 : index
    %284 = vector.load %arg2[%c7, %c0_206, %c0_207] : memref<8x32x16xbf16, #tpu.memory_space<vmem>>, vector<1x32x16xbf16>
    %285 = vector.shape_cast %284 : vector<1x32x16xbf16> to vector<32x16xbf16>
    %cst_208 = arith.constant dense<0.000000e+00> : vector<8x16xf32>
    %286 = tpu.matmul %2, %285, %cst_208 {dimension_numbers = #tpu.dot_dimension_numbers<[1], [0], [0], [1], [0, 0, 1, 1], [], []>} : vector<8x32xbf16>, vector<32x16xbf16>, vector<8x16xf32> -> vector<8x16xf32>
    %c7_209 = arith.constant 7 : index
    %c0_210 = arith.constant 0 : index
    %c0_211 = arith.constant 0 : index
    %287 = vector.load %arg3[%c7_209, %c0_210, %c0_211] : memref<8x1x16xf32, #tpu.memory_space<vmem>>, vector<1x1x16xf32>
    %288 = vector.shape_cast %287 : vector<1x1x16xf32> to vector<1x16xf32>
    %289 = vector.broadcast %288 : vector<1x16xf32> to vector<8x16xf32>
    %290 = arith.addf %286, %289 : vector<8x16xf32>
    %c7_212 = arith.constant 7 : index
    %c0_213 = arith.constant 0 : index
    %c0_214 = arith.constant 0 : index
    %291 = vector.load %arg4[%c7_212, %c0_213, %c0_214] : memref<8x32x16xbf16, #tpu.memory_space<vmem>>, vector<1x32x16xbf16>
    %292 = vector.shape_cast %291 : vector<1x32x16xbf16> to vector<32x16xbf16>
    %cst_215 = arith.constant dense<0.000000e+00> : vector<8x16xf32>
    %293 = tpu.matmul %2, %292, %cst_215 {dimension_numbers = #tpu.dot_dimension_numbers<[1], [0], [0], [1], [0, 0, 1, 1], [], []>} : vector<8x32xbf16>, vector<32x16xbf16>, vector<8x16xf32> -> vector<8x16xf32>
    %c7_216 = arith.constant 7 : index
    %c0_217 = arith.constant 0 : index
    %c0_218 = arith.constant 0 : index
    %294 = vector.load %arg5[%c7_216, %c0_217, %c0_218] : memref<8x1x16xf32, #tpu.memory_space<vmem>>, vector<1x1x16xf32>
    %295 = vector.shape_cast %294 : vector<1x1x16xf32> to vector<1x16xf32>
    %296 = vector.broadcast %295 : vector<1x16xf32> to vector<8x16xf32>
    %297 = arith.addf %293, %296 : vector<8x16xf32>
    %c7_219 = arith.constant 7 : index
    %c0_220 = arith.constant 0 : index
    %c0_221 = arith.constant 0 : index
    %298 = vector.load %arg6[%c7_219, %c0_220, %c0_221] : memref<8x32x16xbf16, #tpu.memory_space<vmem>>, vector<1x32x16xbf16>
    %299 = vector.shape_cast %298 : vector<1x32x16xbf16> to vector<32x16xbf16>
    %cst_222 = arith.constant dense<0.000000e+00> : vector<8x16xf32>
    %300 = tpu.matmul %2, %299, %cst_222 {dimension_numbers = #tpu.dot_dimension_numbers<[1], [0], [0], [1], [0, 0, 1, 1], [], []>} : vector<8x32xbf16>, vector<32x16xbf16>, vector<8x16xf32> -> vector<8x16xf32>
    %c7_223 = arith.constant 7 : index
    %c0_224 = arith.constant 0 : index
    %c0_225 = arith.constant 0 : index
    %301 = vector.load %arg7[%c7_223, %c0_224, %c0_225] : memref<8x1x16xf32, #tpu.memory_space<vmem>>, vector<1x1x16xf32>
    %302 = vector.shape_cast %301 : vector<1x1x16xf32> to vector<1x16xf32>
    %303 = vector.broadcast %302 : vector<1x16xf32> to vector<8x16xf32>
    %304 = arith.addf %300, %303 : vector<8x16xf32>
    %cst_226 = arith.constant dense<0.000000e+00> : vector<8x8xf32>
    %305 = tpu.matmul %290, %297, %cst_226 {dimension_numbers = #tpu.dot_dimension_numbers<[1], [1], [0], [0], [0, 0, 1, 0], [], []>} : vector<8x16xf32>, vector<8x16xf32>, vector<8x8xf32> -> vector<8x8xf32>
    %cst_227 = arith.constant 0.0883883461 : f32
    %306 = vector.broadcast %cst_227 : f32 to vector<8x8xf32>
    %307 = arith.mulf %305, %306 : vector<8x8xf32>
    %cst_228 = arith.constant dense<0xFF800000> : vector<8xf32>
    %308 = vector.multi_reduction <maximumf>, %307, %cst_228 [1] : vector<8x8xf32> to vector<8xf32>
    %309 = vector.shape_cast %308 : vector<8xf32> to vector<8x1xf32>
    %310 = vector.broadcast %309 : vector<8x1xf32> to vector<8x8xf32>
    %311 = arith.subf %307, %310 : vector<8x8xf32>
    %312 = math.exp %311 : vector<8x8xf32>
    %cst_229 = arith.constant dense<0.000000e+00> : vector<8xf32>
    %313 = vector.multi_reduction <add>, %312, %cst_229 [1] : vector<8x8xf32> to vector<8xf32>
    %314 = vector.shape_cast %313 : vector<8xf32> to vector<8x1xf32>
    %315 = tpu.reciprocal %314 {approx = true} : vector<8x1xf32> -> vector<8x1xf32>
    %316 = vector.broadcast %315 : vector<8x1xf32> to vector<8x8xf32>
    %317 = arith.mulf %312, %316 : vector<8x8xf32>
    %cst_230 = arith.constant dense<0.000000e+00> : vector<8x16xf32>
    %318 = tpu.matmul %317, %304, %cst_230 {dimension_numbers = #tpu.dot_dimension_numbers<[1], [0], [0], [1], [0, 0, 1, 1], [], []>} : vector<8x8xf32>, vector<8x16xf32>, vector<8x16xf32> -> vector<8x16xf32>
    %319 = arith.truncf %318 : vector<8x16xf32> to vector<8x16xbf16>
    %c7_231 = arith.constant 7 : index
    %c0_232 = arith.constant 0 : index
    %c0_233 = arith.constant 0 : index
    %320 = vector.load %arg8[%c7_231, %c0_232, %c0_233] : memref<8x16x32xbf16, #tpu.memory_space<vmem>>, vector<1x16x32xbf16>
    %321 = vector.shape_cast %320 : vector<1x16x32xbf16> to vector<16x32xbf16>
    %cst_234 = arith.constant dense<0.000000e+00> : vector<8x32xf32>
    %322 = tpu.matmul %319, %321, %cst_234 {dimension_numbers = #tpu.dot_dimension_numbers<[1], [0], [0], [1], [0, 0, 1, 1], [], []>} : vector<8x16xbf16>, vector<16x32xbf16>, vector<8x32xf32> -> vector<8x32xf32>
    %323 = arith.addf %283, %322 : vector<8x32xf32>
    %c0_235 = arith.constant 0 : index
    %c0_236 = arith.constant 0 : index
    %324 = vector.load %arg9[%c0_235, %c0_236] : memref<1x32xf32, #tpu.memory_space<vmem>>, vector<1x32xf32>
    %325 = vector.broadcast %324 : vector<1x32xf32> to vector<8x32xf32>
    %326 = arith.addf %323, %325 : vector<8x32xf32>
    %327 = arith.addf %1, %326 : vector<8x32xf32>
    %cst_237 = arith.constant dense<0.000000e+00> : vector<8xf32>
    %328 = vector.multi_reduction <add>, %327, %cst_237 [1] : vector<8x32xf32> to vector<8xf32>
    %329 = vector.shape_cast %328 : vector<8xf32> to vector<8x1xf32>
    %cst_238 = arith.constant 3.200000e+01 : f32
    %330 = vector.broadcast %cst_238 : f32 to vector<8x1xf32>
    %331 = arith.divf %329, %330 : vector<8x1xf32>
    %332 = vector.broadcast %331 : vector<8x1xf32> to vector<8x32xf32>
    %333 = arith.subf %327, %332 : vector<8x32xf32>
    %334 = arith.mulf %333, %333 : vector<8x32xf32>
    %cst_239 = arith.constant dense<0.000000e+00> : vector<8xf32>
    %335 = vector.multi_reduction <add>, %334, %cst_239 [1] : vector<8x32xf32> to vector<8xf32>
    %336 = vector.shape_cast %335 : vector<8xf32> to vector<8x1xf32>
    %cst_240 = arith.constant 3.200000e+01 : f32
    %337 = vector.broadcast %cst_240 : f32 to vector<8x1xf32>
    %338 = arith.divf %336, %337 : vector<8x1xf32>
    %339 = vector.broadcast %331 : vector<8x1xf32> to vector<8x32xf32>
    %340 = arith.subf %327, %339 : vector<8x32xf32>
    %cst_241 = arith.constant 9.99999974E-6 : f32
    %341 = vector.broadcast %cst_241 : f32 to vector<8x1xf32>
    %342 = arith.addf %338, %341 : vector<8x1xf32>
    %343 = math.rsqrt %342 : vector<8x1xf32>
    %344 = vector.broadcast %343 : vector<8x1xf32> to vector<8x32xf32>
    %345 = arith.mulf %340, %344 : vector<8x32xf32>
    %c0_242 = arith.constant 0 : index
    %c0_243 = arith.constant 0 : index
    %346 = vector.load %arg14[%c0_242, %c0_243] : memref<1x32xf32, #tpu.memory_space<vmem>>, vector<1x32xf32>
    %347 = vector.broadcast %346 : vector<1x32xf32> to vector<8x32xf32>
    %348 = arith.mulf %345, %347 : vector<8x32xf32>
    %c0_244 = arith.constant 0 : index
    %c0_245 = arith.constant 0 : index
    %349 = vector.load %arg15[%c0_244, %c0_245] : memref<1x32xf32, #tpu.memory_space<vmem>>, vector<1x32xf32>
    %350 = vector.broadcast %349 : vector<1x32xf32> to vector<8x32xf32>
    %351 = arith.addf %348, %350 : vector<8x32xf32>
    %352 = arith.truncf %351 : vector<8x32xf32> to vector<8x32xbf16>
    %c0_246 = arith.constant 0 : index
    %c0_247 = arith.constant 0 : index
    %353 = vector.load %arg10[%c0_246, %c0_247] : memref<32x128xbf16, #tpu.memory_space<vmem>>, vector<32x128xbf16>
    %cst_248 = arith.constant dense<0.000000e+00> : vector<8x128xf32>
    %354 = tpu.matmul %352, %353, %cst_248 {dimension_numbers = #tpu.dot_dimension_numbers<[1], [0], [0], [1], [0, 0, 1, 1], [], []>} : vector<8x32xbf16>, vector<32x128xbf16>, vector<8x128xf32> -> vector<8x128xf32>
    %c0_249 = arith.constant 0 : index
    %c0_250 = arith.constant 0 : index
    %355 = vector.load %arg11[%c0_249, %c0_250] : memref<1x128xf32, #tpu.memory_space<vmem>>, vector<1x128xf32>
    %356 = vector.broadcast %355 : vector<1x128xf32> to vector<8x128xf32>
    %357 = arith.addf %354, %356 : vector<8x128xf32>
    %cst_251 = arith.constant 0.000000e+00 : f32
    %358 = vector.broadcast %cst_251 : f32 to vector<8x128xf32>
    %359 = arith.maximumf %357, %358 : vector<8x128xf32>
    %360 = arith.truncf %359 : vector<8x128xf32> to vector<8x128xbf16>
    %c0_252 = arith.constant 0 : index
    %c0_253 = arith.constant 0 : index
    %361 = vector.load %arg12[%c0_252, %c0_253] : memref<128x32xbf16, #tpu.memory_space<vmem>>, vector<128x32xbf16>
    %cst_254 = arith.constant dense<0.000000e+00> : vector<8x32xf32>
    %362 = tpu.matmul %360, %361, %cst_254 {dimension_numbers = #tpu.dot_dimension_numbers<[1], [0], [0], [1], [0, 0, 1, 1], [], []>} : vector<8x128xbf16>, vector<128x32xbf16>, vector<8x32xf32> -> vector<8x32xf32>
    %c0_255 = arith.constant 0 : index
    %c0_256 = arith.constant 0 : index
    %363 = vector.load %arg13[%c0_255, %c0_256] : memref<1x32xf32, #tpu.memory_space<vmem>>, vector<1x32xf32>
    %364 = vector.broadcast %363 : vector<1x32xf32> to vector<8x32xf32>
    %365 = arith.addf %362, %364 : vector<8x32xf32>
    %366 = arith.addf %351, %365 : vector<8x32xf32>
    %cst_257 = arith.constant dense<0.000000e+00> : vector<8xf32>
    %367 = vector.multi_reduction <add>, %366, %cst_257 [1] : vector<8x32xf32> to vector<8xf32>
    %368 = vector.shape_cast %367 : vector<8xf32> to vector<8x1xf32>
    %cst_258 = arith.constant 3.200000e+01 : f32
    %369 = vector.broadcast %cst_258 : f32 to vector<8x1xf32>
    %370 = arith.divf %368, %369 : vector<8x1xf32>
    %371 = vector.broadcast %370 : vector<8x1xf32> to vector<8x32xf32>
    %372 = arith.subf %366, %371 : vector<8x32xf32>
    %373 = arith.mulf %372, %372 : vector<8x32xf32>
    %cst_259 = arith.constant dense<0.000000e+00> : vector<8xf32>
    %374 = vector.multi_reduction <add>, %373, %cst_259 [1] : vector<8x32xf32> to vector<8xf32>
    %375 = vector.shape_cast %374 : vector<8xf32> to vector<8x1xf32>
    %cst_260 = arith.constant 3.200000e+01 : f32
    %376 = vector.broadcast %cst_260 : f32 to vector<8x1xf32>
    %377 = arith.divf %375, %376 : vector<8x1xf32>
    %378 = vector.broadcast %370 : vector<8x1xf32> to vector<8x32xf32>
    %379 = arith.subf %366, %378 : vector<8x32xf32>
    %cst_261 = arith.constant 9.99999974E-6 : f32
    %380 = vector.broadcast %cst_261 : f32 to vector<8x1xf32>
    %381 = arith.addf %377, %380 : vector<8x1xf32>
    %382 = math.rsqrt %381 : vector<8x1xf32>
    %383 = vector.broadcast %382 : vector<8x1xf32> to vector<8x32xf32>
    %384 = arith.mulf %379, %383 : vector<8x32xf32>
    %c0_262 = arith.constant 0 : index
    %c0_263 = arith.constant 0 : index
    %385 = vector.load %arg16[%c0_262, %c0_263] : memref<1x32xf32, #tpu.memory_space<vmem>>, vector<1x32xf32>
    %386 = vector.broadcast %385 : vector<1x32xf32> to vector<8x32xf32>
    %387 = arith.mulf %384, %386 : vector<8x32xf32>
    %c0_264 = arith.constant 0 : index
    %c0_265 = arith.constant 0 : index
    %388 = vector.load %arg17[%c0_264, %c0_265] : memref<1x32xf32, #tpu.memory_space<vmem>>, vector<1x32xf32>
    %389 = vector.broadcast %388 : vector<1x32xf32> to vector<8x32xf32>
    %390 = arith.addf %387, %389 : vector<8x32xf32>
    %c0_266 = arith.constant 0 : index
    %c0_267 = arith.constant 0 : index
    %c0_268 = arith.constant 0 : index
    %391 = vector.load %arg18[%c0_266, %c0_267, %c0_268] : memref<1x8x32xf32, #tpu.memory_space<vmem>>, vector<1x8x32xf32>
    %392 = vector.shape_cast %391 : vector<1x8x32xf32> to vector<8x32xf32>
    %393 = vector.shape_cast %390 : vector<8x32xf32> to vector<1x8x32xf32>
    tpu.vector_store %arg18[%c0_266, %c0_267, %c0_268], %393 {strides = array<i32>} : memref<1x8x32xf32, #tpu.memory_space<vmem>>, vector<1x8x32xf32>,
    return
  }
  func.func @transform_0(%arg0: i32) -> (i32, i32, i32) {
    %c0_i32 = arith.constant 0 : i32
    %c0_i32_0 = arith.constant 0 : i32
    %c0_i32_1 = arith.constant 0 : i32
    return %arg0, %c0_i32, %c0_i32_0 : i32, i32, i32
  }
  func.func @transform_1(%arg0: i32) -> (i32, i32, i32) {
    %c0_i32 = arith.constant 0 : i32
    %c0_i32_0 = arith.constant 0 : i32
    %c0_i32_1 = arith.constant 0 : i32
    %c0_i32_2 = arith.constant 0 : i32
    return %c0_i32, %c0_i32_0, %c0_i32_1 : i32, i32, i32
  }
  func.func @transform_2(%arg0: i32) -> (i32, i32, i32) {
    %c0_i32 = arith.constant 0 : i32
    %c0_i32_0 = arith.constant 0 : i32
    %c0_i32_1 = arith.constant 0 : i32
    %c0_i32_2 = arith.constant 0 : i32
    return %c0_i32, %c0_i32_0, %c0_i32_1 : i32, i32, i32
  }
  func.func @transform_3(%arg0: i32) -> (i32, i32, i32) {
    %c0_i32 = arith.constant 0 : i32
    %c0_i32_0 = arith.constant 0 : i32
    %c0_i32_1 = arith.constant 0 : i32
    %c0_i32_2 = arith.constant 0 : i32
    return %c0_i32, %c0_i32_0, %c0_i32_1 : i32, i32, i32
  }
  func.func @transform_4(%arg0: i32) -> (i32, i32, i32) {
    %c0_i32 = arith.constant 0 : i32
    %c0_i32_0 = arith.constant 0 : i32
    %c0_i32_1 = arith.constant 0 : i32
    %c0_i32_2 = arith.constant 0 : i32
    return %c0_i32, %c0_i32_0, %c0_i32_1 : i32, i32, i32
  }
  func.func @transform_5(%arg0: i32) -> (i32, i32, i32) {
    %c0_i32 = arith.constant 0 : i32
    %c0_i32_0 = arith.constant 0 : i32
    %c0_i32_1 = arith.constant 0 : i32
    %c0_i32_2 = arith.constant 0 : i32
    return %c0_i32, %c0_i32_0, %c0_i32_1 : i32, i32, i32
  }
  func.func @transform_6(%arg0: i32) -> (i32, i32, i32) {
    %c0_i32 = arith.constant 0 : i32
    %c0_i32_0 = arith.constant 0 : i32
    %c0_i32_1 = arith.constant 0 : i32
    %c0_i32_2 = arith.constant 0 : i32
    return %c0_i32, %c0_i32_0, %c0_i32_1 : i32, i32, i32
  }
  func.func @transform_7(%arg0: i32) -> (i32, i32, i32) {
    %c0_i32 = arith.constant 0 : i32
    %c0_i32_0 = arith.constant 0 : i32
    %c0_i32_1 = arith.constant 0 : i32
    %c0_i32_2 = arith.constant 0 : i32
    return %c0_i32, %c0_i32_0, %c0_i32_1 : i32, i32, i32
  }
  func.func @transform_8(%arg0: i32) -> (i32, i32) {
    %c0_i32 = arith.constant 0 : i32
    %c0_i32_0 = arith.constant 0 : i32
    %c0_i32_1 = arith.constant 0 : i32
    return %c0_i32, %c0_i32_0 : i32, i32
  }
  func.func @transform_9(%arg0: i32) -> (i32, i32) {
    %c0_i32 = arith.constant 0 : i32
    %c0_i32_0 = arith.constant 0 : i32
    %c0_i32_1 = arith.constant 0 : i32
    return %c0_i32, %c0_i32_0 : i32, i32
  }
  func.func @transform_10(%arg0: i32) -> (i32, i32) {
    %c0_i32 = arith.constant 0 : i32
    %c0_i32_0 = arith.constant 0 : i32
    %c0_i32_1 = arith.constant 0 : i32
    return %c0_i32, %c0_i32_0 : i32, i32
  }
  func.func @transform_11(%arg0: i32) -> (i32, i32) {
    %c0_i32 = arith.constant 0 : i32
    %c0_i32_0 = arith.constant 0 : i32
    %c0_i32_1 = arith.constant 0 : i32
    return %c0_i32, %c0_i32_0 : i32, i32
  }
  func.func @transform_12(%arg0: i32) -> (i32, i32) {
    %c0_i32 = arith.constant 0 : i32
    %c0_i32_0 = arith.constant 0 : i32
    %c0_i32_1 = arith.constant 0 : i32
    return %c0_i32, %c0_i32_0 : i32, i32
  }
  func.func @transform_13(%arg0: i32) -> (i32, i32) {
    %c0_i32 = arith.constant 0 : i32
    %c0_i32_0 = arith.constant 0 : i32
    %c0_i32_1 = arith.constant 0 : i32
    return %c0_i32, %c0_i32_0 : i32, i32
  }
  func.func @transform_14(%arg0: i32) -> (i32, i32) {
    %c0_i32 = arith.constant 0 : i32
    %c0_i32_0 = arith.constant 0 : i32
    %c0_i32_1 = arith.constant 0 : i32
    return %c0_i32, %c0_i32_0 : i32, i32
  }
  func.func @transform_15(%arg0: i32) -> (i32, i32) {
    %c0_i32 = arith.constant 0 : i32
    %c0_i32_0 = arith.constant 0 : i32
    %c0_i32_1 = arith.constant 0 : i32
    return %c0_i32, %c0_i32_0 : i32, i32
  }
  func.func @transform_16(%arg0: i32) -> (i32, i32) {
    %c0_i32 = arith.constant 0 : i32
    %c0_i32_0 = arith.constant 0 : i32
    %c0_i32_1 = arith.constant 0 : i32
    return %c0_i32, %c0_i32_0 : i32, i32
  }
  func.func @transform_17(%arg0: i32) -> (i32, i32, i32) {
    %c0_i32 = arith.constant 0 : i32
    %c0_i32_0 = arith.constant 0 : i32
    %c0_i32_1 = arith.constant 0 : i32
    return %arg0, %c0_i32, %c0_i32_0 : i32, i32, i32
  }
}

module attributes {stable_mosaic.version = 11 : i64} {
  func.func @_linear_kernel(%arg0: i32, %arg1: memref<16x32xf32, #tpu.memory_space<vmem>>, %arg2: memref<32x128xbf16, #tpu.memory_space<vmem>>, %arg3: memref<1x128xf32, #tpu.memory_space<vmem>>, %arg4: memref<16x128xf32, #tpu.memory_space<vmem>>) attributes {dimension_semantics = [#tpu.dimension_semantics<parallel>], iteration_bounds = array<i64: 1>, scalar_prefetch = 0 : i64, scratch_operands = 0 : i64, tpu.core_type = #tpu.core_type<tc>, window_params = [{transform_indices = @transform_0, window_bounds = array<i64: 16, 32>}, {pipeline_mode = #tpu.pipeline_mode<synchronous>, transform_indices = @transform_1, window_bounds = array<i64: 32, 128>}, {pipeline_mode = #tpu.pipeline_mode<synchronous>, transform_indices = @transform_2, window_bounds = array<i64: 1, 128>}, {transform_indices = @transform_3, window_bounds = array<i64: 16, 128>}]} {
    %c0 = arith.constant 0 : index
    %c0_0 = arith.constant 0 : index
    %0 = vector.load %arg1[%c0, %c0_0] : memref<16x32xf32, #tpu.memory_space<vmem>>, vector<16x32xf32>
    %1 = arith.truncf %0 : vector<16x32xf32> to vector<16x32xbf16>
    %c0_1 = arith.constant 0 : index
    %c0_2 = arith.constant 0 : index
    %2 = vector.load %arg2[%c0_1, %c0_2] : memref<32x128xbf16, #tpu.memory_space<vmem>>, vector<32x128xbf16>
    %cst = arith.constant dense<0.000000e+00> : vector<16x128xf32>
    %3 = tpu.matmul %1, %2, %cst {dimension_numbers = #tpu.dot_dimension_numbers<[1], [0], [0], [1], [0, 0, 1, 1], [], []>} : vector<16x32xbf16>, vector<32x128xbf16>, vector<16x128xf32> -> vector<16x128xf32>
    %c0_3 = arith.constant 0 : index
    %c0_4 = arith.constant 0 : index
    %4 = vector.load %arg3[%c0_3, %c0_4] : memref<1x128xf32, #tpu.memory_space<vmem>>, vector<1x128xf32>
    %5 = vector.broadcast %4 : vector<1x128xf32> to vector<16x128xf32>
    %6 = arith.addf %3, %5 : vector<16x128xf32>
    %c0_5 = arith.constant 0 : index
    %c0_6 = arith.constant 0 : index
    %7 = vector.load %arg4[%c0_5, %c0_6] : memref<16x128xf32, #tpu.memory_space<vmem>>, vector<16x128xf32>
    tpu.vector_store %arg4[%c0_5, %c0_6], %6 {strides = array<i32>} : memref<16x128xf32, #tpu.memory_space<vmem>>, vector<16x128xf32>,
    return
  }
  func.func @transform_0(%arg0: i32) -> (i32, i32) {
    %c0_i32 = arith.constant 0 : i32
    %c0_i32_0 = arith.constant 0 : i32
    return %arg0, %c0_i32 : i32, i32
  }
  func.func @transform_1(%arg0: i32) -> (i32, i32) {
    %c0_i32 = arith.constant 0 : i32
    %c0_i32_0 = arith.constant 0 : i32
    %c0_i32_1 = arith.constant 0 : i32
    return %c0_i32, %c0_i32_0 : i32, i32
  }
  func.func @transform_2(%arg0: i32) -> (i32, i32) {
    %c0_i32 = arith.constant 0 : i32
    %c0_i32_0 = arith.constant 0 : i32
    %c0_i32_1 = arith.constant 0 : i32
    return %c0_i32, %c0_i32_0 : i32, i32
  }
  func.func @transform_3(%arg0: i32) -> (i32, i32) {
    %c0_i32 = arith.constant 0 : i32
    %c0_i32_0 = arith.constant 0 : i32
    return %arg0, %c0_i32 : i32, i32
  }
}

</mosaic_0001>

<bundles_post_ra>
// kernel: tile.5
= control target key start
LH: loop header
LB: loop body
LE: loop exit
PB: predicated region body
PF: predicated region fallthrough
CT: control target
= control target key end

     0   :  { %s197_s10 = smov 92   ;;  %s198_s11 = smov 84   ;;  %vm3_vm0 = vcmask 31744   ;;  %vm9_vm1 = vcmask 786144   ;;  %vm15_vm2 = vcmask 753344   ;;  %vm21_vm3 = vcmask 720544   ;;  %s305_s0 = inlined_call_operand.vmem [shape: s32[24,4], index: 0, kind: input, shape index: {}]   ;;  %s306_s1 = inlined_call_operand.vmem [shape: s32[96], index: 1, kind: output, shape index: {}]  }
   0x1   :  { %v151_v0 = vld [vmem:[%s305_s0 + $0x17] sm:$0x1]   ;;  %v153_v1 = vld [vmem:[%s305_s0 + $0x15] sm:$0x1]   ;;  %v152_v2 = vld [vmem:[%s305_s0 + $0x16] sm:$0x1]  }
   0x2   :  { %7 = vrot.lane.b32.xlu0 %v151_v0, %s197_s10  ;;  %19 = vrot.lane.b32.xlu1 %v153_v1, %s198_s11  ;;  %v154_v3 = vld [vmem:[%s305_s0 + $0x14] sm:$0x1]   ;;  %s199_s16 = smov 88   ;;  %s200_s17 = smov 80   ;;  %v155_v4 = vld [vmem:[%s305_s0 + $0x13] sm:$0x1]  }
   0x3   :  { %v156_v5 = vld [vmem:[%s305_s0 + $0x12] sm:$0x1]   ;;  %s201_s22 = smov 76   ;;  %s202_s23 = smov 72   ;;  %v157_v6 = vld [vmem:[%s305_s0 + $0x11] sm:$0x1]  }
   0x4   :  { %v158_v7 = vld [vmem:[%s305_s0 + $0x10] sm:$0x1]   ;;  %v2_v8 = vld [vmem:[%s305_s0] sm:$0x1]   ;;  %s203_s30 = smov 68   ;;  %s204_s2 = smov 64  }
   0x5   :  { %4 = vst.msk [vmem:[#allocation0] sm:$0x1] %vm3_vm0, %v2_v8   ;;  %v159_v9 = vld [vmem:[%s305_s0 + $0xf] sm:$0x1]   ;;  %v160_v10 = vld [vmem:[%s305_s0 + $0xe] sm:$0x1]  }
   0x6   :  { %13 = vrot.lane.b32.xlu0 %v152_v2, %s199_s16  ;;  %25 = vrot.lane.b32.xlu1 %v154_v3, %s200_s17  ;;  %s205_s7 = smov 60   ;;  %s206_s8 = smov 56   ;;  %v161_v11 = vld [vmem:[%s305_s0 + $0xd] sm:$0x1]   ;;  %v162_v12 = vld [vmem:[%s305_s0 + $0xc] sm:$0x1]  }
   0x7   :  { %s207_s13 = smov 52   ;;  %s208_s14 = smov 48   ;;  %v163_v13 = vld [vmem:[%s305_s0 + $0xb] sm:$0x1]   ;;  %v164_v14 = vld [vmem:[%s305_s0 + $0xa] sm:$0x1]  }
   0x8   :  { %s209_s19 = smov 44   ;;  %s210_s20 = smov 40   ;;  %v165_v15 = vld [vmem:[%s305_s0 + $0x9] sm:$0x1]   ;;  %v166_v16 = vld [vmem:[%s305_s0 + $0x8] sm:$0x1]  }
   0x9   :  { %s211_s25 = smov 36   ;;  %s212_s26 = smov 32   ;;  %v167_v17 = vld [vmem:[%s305_s0 + $0x7] sm:$0x1]   ;;  %v168_v18 = vld [vmem:[%s305_s0 + $0x6] sm:$0x1]  }
   0xa   :  { %31 = vrot.lane.b32.xlu0 %v155_v4, %s201_s22  ;;  %37 = vrot.lane.b32.xlu1 %v156_v5, %s202_s23  ;;  %s214_s3 = smov 24   ;;  %v169_v19 = vld [vmem:[%s305_s0 + $0x5] sm:$0x1]   ;;  %v170_v20 = vld [vmem:[%s305_s0 + $0x4] sm:$0x1]   ;;  %s216_s9 = smov 16  }
   0xb   :  { %v171_v21 = vld [vmem:[%s305_s0 + $0x3] sm:$0x1]   ;;  %v172_v22 = vld [vmem:[%s305_s0 + $0x2] sm:$0x1]   ;;  %s218_s15 = smov 8   ;;  %vm27_vm4 = vcmask 687744  }
   0xc   :  { %v173_v23 = vld [vmem:[%s305_s0 + $0x1] sm:$0x1]   ;;  %s219_s0 = smov 4   ;;  %vm33_vm5 = vcmask 654944   ;;  %vm39_vm6 = vcmask 622144   ;;  %vm45_vm7 = vcmask 589344  }
   0xd   :  { %vm51_vm8 = vcmask 556544   ;;  %vm57_vm9 = vcmask 523744   ;;  %vm63_vm10 = vcmask 490944   ;;  %vm69_vm11 = vcmask 458144  }
   0xe   :  { %43 = vrot.lane.b32.xlu0 %v157_v6, %s203_s30  ;;  %49 = vrot.lane.b32.xlu1 %v158_v7, %s204_s2  ;;  %s213_s2 = smov 28   ;;  %vm75_vm12 = vcmask 425344   ;;  %vm81_vm13 = vcmask 392544   ;;  %vm87_vm14 = vcmask 359744   ;;  %vm93_vm15 = vcmask 326944  }
   0xf   :  { %vm99_vm0 = vcmask 294144  }
  0x12   :  { %55 = vrot.lane.b32.xlu0 %v159_v9, %s205_s7  ;;  %61 = vrot.lane.b32.xlu1 %v160_v10, %s206_s8  ;;  %s215_s8 = smov 20  }
  0x16   :  { %67 = vrot.lane.b32.xlu0 %v161_v11, %s207_s13  ;;  %73 = vrot.lane.b32.xlu1 %v162_v12, %s208_s14  ;;  %s217_s14 = smov 12  }
  0x1a   :  { %79 = vrot.lane.b32.xlu0 %v163_v13, %s209_s19  ;;  %85 = vrot.lane.b32.xlu1 %v164_v14, %s210_s20 }
  0x1e   :  { %91 = vrot.lane.b32.xlu0 %v165_v15, %s211_s25  ;;  %97 = vrot.lane.b32.xlu1 %v166_v16, %s212_s26 }
  0x22   :  { %103 = vrot.lane.b32.xlu0 %v167_v17, %s213_s2  ;;  %109 = vrot.lane.b32.xlu1 %v168_v18, %s214_s3 }
  0x26   :  { %115 = vrot.lane.b32.xlu0 %v169_v19, %s215_s8  ;;  %121 = vrot.lane.b32.xlu1 %v170_v20, %s216_s9 }
  0x2a   :  { %127 = vrot.lane.b32.xlu0 %v171_v21, %s217_s14  ;;  %133 = vrot.lane.b32.xlu1 %v172_v22, %s218_s15 }
  0x2e   :  { %139 = vrot.lane.b32.xlu0 %v173_v23, %s219_s0 }
  0x74   :  { %v8_v24 = vpop.permute.xlu0 %7   ;;  %v20_v25 = vpop.permute.xlu1 %19  }
  0x75   :  { %10 = vst.msk [vmem:[#allocation0] sm:$0x1] %vm9_vm1, %v8_v24   ;;  %vm105_vm1 = vcmask 261344  }
  0x78   :  { %v14_v26 = vpop.permute.xlu0 %13   ;;  %v26_v27 = vpop.permute.xlu1 %25  }
  0x79   :  { %16 = vst.msk [vmem:[#allocation0] sm:$0x1] %vm15_vm2, %v14_v26   ;;  %vm111_vm2 = vcmask 228544  }
  0x7a   :  { %22 = vst.msk [vmem:[#allocation0] sm:$0x1] %vm21_vm3, %v20_v25   ;;  %vm117_vm3 = vcmask 195744  }
  0x7b   :  { %28 = vst.msk [vmem:[#allocation0] sm:$0x1] %vm27_vm4, %v26_v27   ;;  %vm123_vm4 = vcmask 162944  }
  0x7c   :  { %v32_v28 = vpop.permute.xlu0 %31   ;;  %v38_v29 = vpop.permute.xlu1 %37  }
  0x7d   :  { %34 = vst.msk [vmem:[#allocation0] sm:$0x1] %vm33_vm5, %v32_v28   ;;  %vm129_vm5 = vcmask 130144  }
  0x7e   :  { %40 = vst.msk [vmem:[#allocation0] sm:$0x1] %vm39_vm6, %v38_v29   ;;  %vm135_vm6 = vcmask 97344  }
  0x80   :  { %v44_v30 = vpop.permute.xlu0 %43   ;;  %v50_v31 = vpop.permute.xlu1 %49  }
  0x81   :  { %46 = vst.msk [vmem:[#allocation0] sm:$0x1] %vm45_vm7, %v44_v30   ;;  %vm141_vm7 = vcmask 64544  }
  0x82   :  { %52 = vst.msk [vmem:[#allocation0] sm:$0x1] %vm51_vm8, %v50_v31  }
  0x84   :  { %v56_v32 = vpop.permute.xlu0 %55   ;;  %v62_v33 = vpop.permute.xlu1 %61  }
  0x85   :  { %58 = vst.msk [vmem:[#allocation0] sm:$0x1] %vm57_vm9, %v56_v32  }
  0x86   :  { %64 = vst.msk [vmem:[#allocation0] sm:$0x1] %vm63_vm10, %v62_v33  }
  0x88   :  { %v68_v34 = vpop.permute.xlu0 %67   ;;  %v74_v35 = vpop.permute.xlu1 %73  }
  0x89   :  { %70 = vst.msk [vmem:[#allocation0] sm:$0x1] %vm69_vm11, %v68_v34  }
  0x8a   :  { %76 = vst.msk [vmem:[#allocation0] sm:$0x1] %vm75_vm12, %v74_v35  }
  0x8c   :  { %v80_v36 = vpop.permute.xlu0 %79   ;;  %v86_v37 = vpop.permute.xlu1 %85  }
  0x8d   :  { %82 = vst.msk [vmem:[#allocation0] sm:$0x1] %vm81_vm13, %v80_v36  }
  0x8e   :  { %88 = vst.msk [vmem:[#allocation0] sm:$0x1] %vm87_vm14, %v86_v37  }
  0x90   :  { %v92_v38 = vpop.permute.xlu0 %91   ;;  %v98_v39 = vpop.permute.xlu1 %97  }
  0x91   :  { %94 = vst.msk [vmem:[#allocation0] sm:$0x1] %vm93_vm15, %v92_v38  }
  0x92   :  { %100 = vst.msk [vmem:[#allocation0] sm:$0x1] %vm99_vm0, %v98_v39  }
  0x94   :  { %v104_v40 = vpop.permute.xlu0 %103   ;;  %v110_v41 = vpop.permute.xlu1 %109  }
  0x95   :  { %106 = vst.msk [vmem:[#allocation0] sm:$0x1] %vm105_vm1, %v104_v40  }
  0x96   :  { %112 = vst.msk [vmem:[#allocation0] sm:$0x1] %vm111_vm2, %v110_v41  }
  0x98   :  { %v116_v42 = vpop.permute.xlu0 %115   ;;  %v122_v43 = vpop.permute.xlu1 %121  }
  0x99   :  { %118 = vst.msk [vmem:[#allocation0] sm:$0x1] %vm117_vm3, %v116_v42  }
  0x9a   :  { %124 = vst.msk [vmem:[#allocation0] sm:$0x1] %vm123_vm4, %v122_v43  }
  0x9c   :  { %v128_v44 = vpop.permute.xlu0 %127   ;;  %v134_v45 = vpop.permute.xlu1 %133  }
  0x9d   :  { %130 = vst.msk [vmem:[#allocation0] sm:$0x1] %vm129_vm5, %v128_v44  }
  0x9e   :  { %136 = vst.msk [vmem:[#allocation0] sm:$0x1] %vm135_vm6, %v134_v45  }
  0xa0   :  { %v140_v46 = vpop.permute.xlu0 %139  }
  0xa1   :  { %142 = vst.msk [vmem:[#allocation0] sm:$0x1] %vm141_vm7, %v140_v46  }
  0xa8   :  { %v147_v47 = vld [vmem:[#allocation0] sm:$0x1] }
  0xa9   :  { %150 = vst [vmem:[%s306_s1] sm:$0x1] %v147_v47 }

// kernel: tile.6
= control target key start
LH: loop header
LB: loop body
LE: loop exit
PB: predicated region body
PF: predicated region fallthrough
CT: control target
= control target key end

     0   :  { %s22_s0 = inlined_call_operand.vmem [shape: s32[96], index: 0, kind: input, shape index: {}]   ;;  %s23_s1 = inlined_call_operand.vmem [shape: s32[2,96], index: 1, kind: output, shape index: {}]  }
   0x1   :  { %v4_v0 = vld [vmem:[%s22_s0] ss:$0 sm:$0xff] }
   0x2   :  { %5 = vst [vmem:[%s23_s1] sm:$0x3] %v4_v0 }

// kernel: phanto_idp_forward.11
= control target key start
LH: loop header
LB: loop body
LE: loop exit
PB: predicated region body
PF: predicated region fallthrough
CT: control target
= control target key end

     0   :  { %v145_v0 = vmov 0.0   ;;  %vm146_vm0 = vmmov 0   ;;  %vm39_vm1 = vcmask 130048   ;;  %vm106_vm2 = vcmask 523264   ;;  %s215_s1 = inlined_call_operand.vmem [shape: bf16[16,64], index: 1, kind: input, shape index: {}]   ;;  %s216_s0 = inlined_call_operand.vmem [shape: f32[48,16], index: 0, kind: input, shape index: {}]   ;;  %s217_s2 = inlined_call_operand.vmem [shape: f32[1,64], index: 2, kind: input, shape index: {}]   ;;  %s218_s3 = inlined_call_operand.vmem [shape: f32[48,64], index: 3, kind: output, shape index: {}]  }
   0x1   :  { %140 = vmatprep.subr.bf16.mxu1 %v145_v0  ;;  %v144_v1 = vld [vmem:[%s215_s1] sm:$0xff]   ;;  %126 = vmatprep.subr.bf16.mxu0 %v145_v0  ;;  %v17_v2 = vld [vmem:[%s216_s0 + $0x10] sm:$0xff]  ;;  %v18_v3 = vld [vmem:[%s216_s0 + $0x18] sm:$0xff] }
   0x2   :  { %132 = vmatprep.mubr.msk.bf16.mxu1 %vm146_vm0, %v145_v0  ;;  %128 = vmatprep.mubr.msk.bf16.mxu0 %vm146_vm0, %v145_v0  ;;  %v15_v4 = vld [vmem:[%s216_s0] sm:$0xff]  ;;  %v22_v5 = vpack.c.bf16 %v18_v3, %v17_v2  ;;  %v16_v6 = vld [vmem:[%s216_s0 + $0x8] sm:$0xff] }
   0x3   :  { %141 = vmatpush3.bf16.msra.mxu1 %v144_v1  ;;  %127 = vmatpush3.bf16.msra.mxu0 %v144_v1  ;;  %v21_v7 = vpack.c.bf16 %v16_v6, %v15_v4  ;;  %v19_v8 = vld [vmem:[%s216_s0 + $0x20] sm:$0xff]  ;;  %v20_v9 = vld [vmem:[%s216_s0 + $0x28] sm:$0xff] }
   0x4   :  { %v23_v10 = vpack.c.bf16 %v20_v9, %v19_v8  ;;  %v117_v11 = vld [vmem:[%s217_s2] ss:$0 sm:$0xff] }
   0x6   :  { %133 = vmatmul.mubr.msk.bf16.vlgmr.msra.gmra.mxu1 %vm39_vm1, %v22_v5  ;;  %129 = vmatmul.mubr.msk.bf16.vlgmr.msra.gmra.mxu0 %vm39_vm1, %v21_v7 }
   0x7   :  { %136 = vmatprep.mubr.msk.bf16.mxu1 %vm146_vm0, %v145_v0 }
   0xe   :  { %137 = vmatmul.mubr.msk.bf16.gmra.mxu1 %vm39_vm1, %v23_v10 }
  0xc6   :  { %v91_v12 = vpop.f32.mrf.mxu1  ;;  %v83_v13 = vpop.f32.mrf.mxu0 }
  0xc7   :  { %v92_v14 = vadd.f32 %v117_v11, %v91_v12  ;;  %v84_v15 = vadd.f32 %v117_v11, %v83_v13 }
  0xc8   :  { %v134_v16 = vpop.f32.mrf.mxu1  ;;  %v130_v17 = vpop.f32.mrf.mxu0 }
  0xc9   :  { %109 = vst.msk [vmem:[%s218_s3 + $0x10] sm:$0xff] %vm106_vm2, %v92_v14  ;;  %107 = vst.msk [vmem:[%s218_s3] sm:$0xff] %vm106_vm2, %v84_v15 }
  0xca   :  { %v94_v18 = vpop.f32.mrf.mxu1  ;;  %v86_v19 = vpop.f32.mrf.mxu0 }
  0xcb   :  { %v95_v20 = vadd.f32 %v117_v11, %v94_v18  ;;  %v87_v21 = vadd.f32 %v117_v11, %v86_v19 }
  0xcc   :  { %v135_v22 = vpop.f32.mrf.mxu1  ;;  %v131_v23 = vpop.f32.mrf.mxu0 }
  0xcd   :  { %110 = vst.msk [vmem:[%s218_s3 + $0x18] sm:$0xff] %vm106_vm2, %v95_v20  ;;  %108 = vst.msk [vmem:[%s218_s3 + $0x8] sm:$0xff] %vm106_vm2, %v87_v21 }
  0xce   :  { %v99_v24 = vpop.f32.mrf.mxu1 }
  0xcf   :  { %v100_v25 = vadd.f32 %v117_v11, %v99_v24 }
  0xd0   :  { %v138_v26 = vpop.f32.mrf.mxu1 }
  0xd1   :  { %111 = vst.msk [vmem:[%s218_s3 + $0x20] sm:$0xff] %vm106_vm2, %v100_v25 }
  0xd2   :  { %v102_v27 = vpop.f32.mrf.mxu1 }
  0xd3   :  { %v103_v28 = vadd.f32 %v117_v11, %v102_v27 }
  0xd4   :  { %v139_v29 = vpop.f32.mrf.mxu1 }
  0xd5   :  { %112 = vst.msk [vmem:[%s218_s3 + $0x28] sm:$0xff] %vm106_vm2, %v103_v28 }

// kernel: phanto_idp_forward.16
= control target key start
LH: loop header
LB: loop body
LE: loop exit
PB: predicated region body
PF: predicated region fallthrough
CT: control target
= control target key end

     0   :  { %16 = vsyncpa [#allocation3], 0  ;;  %v584_v1 = vmov 0   ;;  %vm148_vm0 = vcmask 523264   ;;  %s794_s0 = inlined_call_operand.vmem [shape: f32[16,192], index: 0, kind: input, shape index: {}]   ;;  %s795_s1 = inlined_call_operand.vmem [shape: f32[16,32], index: 1, kind: input, shape index: {}]   ;;  %s796_s2 = inlined_call_operand.vmem [shape: bf16[192,32], index: 2, kind: input, shape index: {}]   ;;  %s797_s3 = inlined_call_operand.vmem [shape: f32[1,32], index: 3, kind: input, shape index: {}]   ;;  %s798_s4 = inlined_call_operand.vmem [shape: bf16[192,32], index: 4, kind: input, shape index: {}]   ;;  %s799_s5 = inlined_call_operand.vmem [shape: f32[1,32], index: 5, kind: input, shape index: {}]   ;;  %s800_s6 = inlined_call_operand.vmem [shape: bf16[32,32], index: 6, kind: input, shape index: {}]   ;;  %s801_s7 = inlined_call_operand.vmem [shape: f32[1,32], index: 7, kind: input, shape index: {}]   ;;  %s802_s8 = inlined_call_operand.hbm [shape: f32[16,32], index: 8, kind: output, shape index: {0}]   ;;  %s803_s9 = inlined_call_operand.hbm [shape: f32[16,32], index: 9, kind: output, shape index: {1}]   ;;  %s804_s10 = inlined_call_operand.vmem [shape: f32[16,32], index: 10, kind: output, shape index: {2}]  }
   0x1   :  { %v510_v0 = vld [vmem:[%s798_s4 + $0x38] sm:$0xff]   ;;  %296 = vmatprep.subr.bf16.mxu1 %v584_v1  ;;  %152 = vmatprep.subr.bf16.mxu0 %v584_v1  ;;  %v511_v2 = vld [vmem:[%s798_s4 + $0x30] sm:$0xff]   ;;  %v512_v4 = vld [vmem:[%s798_s4 + $0x28] sm:$0xff]  }
   0x2   :  { %297 = vmatpush1.bf16.msra.mxu1 %v510_v0  ;;  %v514_v3 = vld [vmem:[%s796_s2 + $0x38] sm:$0xff]   ;;  %v516_v5 = vld [vmem:[%s796_s2 + $0x30] sm:$0xff]   ;;  %v513_v6 = vld [vmem:[%s798_s4 + $0x20] sm:$0xff]  }
   0x3   :  { %298 = vmatprep.subr.bf16.mxu1 %v584_v1  ;;  %153 = vmatpush1.bf16.msra.mxu0 %v514_v3  ;;  %v518_v7 = vld [vmem:[%s796_s2 + $0x28] sm:$0xff]   ;;  %v515_v8 = vld [vmem:[%s798_s4 + $0x18] sm:$0xff]   ;;  %v520_v9 = vld [vmem:[%s796_s2 + $0x20] sm:$0xff]  }
   0x4   :  { %154 = vmatprep.subr.bf16.mxu0 %v584_v1  ;;  %v517_v10 = vld [vmem:[%s798_s4 + $0x10] sm:$0xff]   ;;  %v522_v11 = vld [vmem:[%s796_s2 + $0x18] sm:$0xff]   ;;  %v36_v12 = vld [vmem:[%s794_s0 + $0x8] sm:$0xff] }
   0x5   :  { %v38_v13 = vld [vmem:[%s794_s0 + $0x18] sm:$0xff]  ;;  %v519_v14 = vld [vmem:[%s798_s4 + $0x8] sm:$0xff]   ;;  %v524_v15 = vld [vmem:[%s796_s2 + $0x10] sm:$0xff]   ;;  %v40_v16 = vmax.f32 %v36_v12, 0.0 }
   0x6   :  { %299 = vmatpush1.bf16.msra.mxu1 %v511_v2  ;;  %v42_v17 = vmax.f32 %v38_v13, 0.0  ;;  %v521_v19 = vld [vmem:[%s798_s4] sm:$0xff]   ;;  %v526_v20 = vld [vmem:[%s796_s2 + $0x8] sm:$0xff]  }
   0x7   :  { %300 = vmatprep.subr.bf16.mxu1 %v584_v1  ;;  %155 = vmatpush1.bf16.msra.mxu0 %v516_v5 }
   0x8   :  { %156 = vmatprep.subr.bf16.mxu0 %v584_v1  ;;  %v44_v18 = vpack.c.bf16 %v42_v17, %v40_v16 }
   0xa   :  { %301 = vmatpush1.bf16.msra.mxu1 %v512_v4 }
   0xb   :  { %302 = vmatprep.subr.bf16.mxu1 %v584_v1  ;;  %157 = vmatpush1.bf16.msra.mxu0 %v518_v7 }
   0xc   :  { %158 = vmatprep.subr.bf16.mxu0 %v584_v1 }
   0xe   :  { %303 = vmatpush1.bf16.msra.mxu1 %v513_v6 }
   0xf   :  { %304 = vmatprep.subr.bf16.mxu1 %v584_v1  ;;  %159 = vmatpush1.bf16.msra.mxu0 %v520_v9 }
  0x10   :  { %160 = vmatprep.subr.bf16.mxu0 %v584_v1 }
  0x12   :  { %305 = vmatpush1.bf16.msra.mxu1 %v515_v8 }
  0x13   :  { %306 = vmatprep.subr.bf16.mxu1 %v584_v1  ;;  %161 = vmatpush1.bf16.msra.mxu0 %v522_v11 }
  0x14   :  { %162 = vmatprep.subr.bf16.mxu0 %v584_v1 }
  0x16   :  { %307 = vmatpush1.bf16.msra.mxu1 %v517_v10 }
  0x17   :  { %308 = vmatprep.subr.bf16.mxu1 %v584_v1  ;;  %163 = vmatpush1.bf16.msra.mxu0 %v524_v15 }
  0x18   :  { %164 = vmatprep.subr.bf16.mxu0 %v584_v1 }
  0x1a   :  { %309 = vmatpush1.bf16.msra.mxu1 %v519_v14 }
  0x1b   :  { %310 = vmatprep.subr.bf16.mxu1 %v584_v1 }
  0x1c   :  { %17 = vsyncpa [#allocation5], 0  ;;  %487 = vmatprep.mubr.msk.bf16.mxu1 %vm148_vm0, %v44_v18  ;;  %473 = vmatprep.mubr.msk.bf16.mxu0 %vm148_vm0, %v44_v18  ;;  %v523_v21 = vld [vmem:[%s798_s4 + $0x58] sm:$0xff]   ;;  %v528_v22 = vld [vmem:[%s796_s2] sm:$0xff]   ;;  %v585_v36 = vmov 0.0   ;;  %vm586_vm1 = vmmov 0  }
  0x1d   :  { %165 = vmatpush1.bf16.msra.mxu0 %v526_v20  ;;  %v525_v23 = vld [vmem:[%s798_s4 + $0x50] sm:$0xff]   ;;  %v530_v24 = vld [vmem:[%s796_s2 + $0x58] sm:$0xff]   ;;  %v527_v25 = vld [vmem:[%s798_s4 + $0x48] sm:$0xff]   ;;  %vm373_vm2 = vcmask 261120   ;;  %s587_s15 = smov [#allocation2]   ;;  %s588_s17 = smov [#allocation4]  }
  0x1e   :  { %311 = vmatpush1.bf16.msra.mxu1 %v521_v19  ;;  %166 = vmatprep.subr.bf16.mxu0 %v584_v1  ;;  %v35_v26 = vld [vmem:[%s794_s0] sm:$0xff]  ;;  %v37_v27 = vld [vmem:[%s794_s0 + $0x10] sm:$0xff]  ;;  %v532_v32 = vld [vmem:[%s796_s2 + $0x48] sm:$0xff]   ;;  %s429_s16 = sshll.u32 %s587_s15, 4  ;;  %s441_s18 = sshll.u32 %s588_s17, 4  ;;  %s430_s16 = int_to_ptr.vmem [resolvable:$true] %s429_s16  ;;  %s442_s18 = int_to_ptr.vmem [resolvable:$true] %s441_s18 }
  0x1f   :  { %320 = vmatprep.subr.bf16.mxu1 %v584_v1  ;;  %v531_v28 = vld [vmem:[%s796_s2 + $0x50] sm:$0xff]   ;;  %v39_v29 = vmax.f32 %v35_v26, 0.0  ;;  %v41_v30 = vmax.f32 %v37_v27, 0.0  ;;  %v529_v31 = vld [vmem:[%s798_s4 + $0x40] sm:$0xff]   ;;  %v534_v35 = vld [vmem:[%s800_s6 + $0x8] sm:$0xff]   ;;  %s540_s19 = scalar_lea.vmem %s430_s16, 256  ;;  %p545_p1 = scmp.lt.s32.totalorder %s430_s16, %s430_s16 }
  0x20   :  { %v533_v34 = vld [vmem:[%s796_s2 + $0x40] sm:$0xff]   ;;  %v338_v58 = vld [vmem:[%s795_s1 + $0x8] sm:$0xff]  ;;  %p541_p0 = scmp.ne.s32.totalorder %s430_s16, %s540_s19  ;;  %p546_p2 = scmp.lt.s32.totalorder %s540_s19, %s540_s19 }
  0x21   :  { %167 = vmatpush1.bf16.msra.mxu0 %v528_v22  ;;  %v43_v33 = vpack.c.bf16 %v41_v30, %v39_v29  ;;  %v535_v37 = vld [vmem:[%s800_s6] sm:$0xff]  }
  0x22   :  { %321 = vmatpush2.bf16.msra.mxu1 %v523_v21  ;;  %176 = vmatprep.subr.bf16.mxu0 %v584_v1  ;;  %v474_v38 = vld [vmem:[%s799_s5] ss:$0 sm:$0xff]  ;;  %p547_p3 = por %p546_p2, %p545_p1 }
  0x23   :  { %322 = vmatprep.subr.bf16.mxu1 %v584_v1  ;;  %v460_v42 = vld [vmem:[%s797_s3] ss:$0 sm:$0xff] }
  0x24   :  { %v337_v57 = vld [vmem:[%s795_s1] sm:$0xff]  ;;  %p548_p4 = pnand %p547_p3, %p541_p0 }
  0x25   :  { %177 = vmatpush2.bf16.msra.mxu0 %v530_v24 }
  0x26   :  { %323 = vmatpush2.bf16.msra.mxu1 %v525_v23  ;;  %178 = vmatprep.subr.bf16.mxu0 %v584_v1 }
  0x27   :  { %324 = vmatprep.subr.bf16.mxu1 %v584_v1 }
  0x29   :  { %179 = vmatpush2.bf16.msra.mxu0 %v531_v28 }
  0x2a   :  { %325 = vmatpush2.bf16.msra.mxu1 %v527_v25  ;;  %180 = vmatprep.subr.bf16.mxu0 %v584_v1 }
  0x2b   :  { %326 = vmatprep.subr.bf16.mxu1 %v584_v1 }
  0x2d   :  { %181 = vmatpush2.bf16.msra.mxu0 %v532_v32 }
  0x2e   :  { %327 = vmatpush2.bf16.msra.mxu1 %v529_v31  ;;  %182 = vmatprep.subr.bf16.mxu0 %v584_v1 }
  0x31   :  { %329 = vmatmul.mubr.bf16.vlgmr.msra.gmra.mxu1 %v43_v33  ;;  %183 = vmatpush2.bf16.msra.mxu0 %v533_v34 }
  0x32   :  { %495 = vmatprep.subr.bf16.mxu0 %v585_v36 }
  0x34   :  { %185 = vmatmul.mubr.bf16.vlgmr.msra.gmra.mxu0 %v43_v33 }
  0x35   :  { %496 = vmatpush3.bf16.msra.mxu0 %v534_v35  ;;  %499 = vmatprep.mubr.msk.bf16.mxu0 %vm586_vm1, %v585_v36 }
  0x36   :  { %497 = vmatprep.subr.bf16.mxu0 %v585_v36 }
  0x39   :  { %498 = vmatpush3.bf16.msra.mxu0 %v535_v37 }
  0xf1   :  { %v330_v39 = vpop.f32.mrf.mxu1 }
  0xf2   :  { %v331_v40 = vadd.f32 %v474_v38, %v330_v39 }
  0xf3   :  { %v332_v41 = vpop.f32.mrf.mxu1 }
  0xf4   :  { %v339_v43 = vmul.f32 0.5, %v331_v40  ;;  %420 = vst.msk [vmem:[#allocation4] sm:$0xff] %vm373_vm2, %v331_v40  ;;  %v186_v45 = vpop.f32.mrf.mxu0 }
  0xf5   :  { %v333_v44 = vpop.f32.mrf.mxu1  ;;  %v187_v48 = vadd.f32 %v460_v42, %v186_v45 }
  0xf6   :  { %v341_v46 = vmul.f32 1.442695, %v339_v43  ;;  %v334_v47 = vadd.f32 %v474_v38, %v333_v44  ;;  %v188_v50 = vpop.f32.mrf.mxu0 }
  0xf7   :  { %v335_v49 = vpop.f32.mrf.mxu1  ;;  %418 = vst.msk [vmem:[#allocation2] sm:$0xff] %vm373_vm2, %v187_v48 }
  0xf8   :  { %536 = vpow2.f32 %v341_v46  ;;  %v340_v51 = vmul.f32 0.5, %v334_v47  ;;  %421 = vst.msk [vmem:[#allocation4 + $0x8] sm:$0xff] %vm373_vm2, %v334_v47  ;;  %v189_v52 = vpop.f32.mrf.mxu0 }
  0xf9   :  { %v190_v54 = vadd.f32 %v460_v42, %v189_v52 }
  0xfa   :  { %v343_v53 = vmul.f32 1.442695, %v340_v51  ;;  %v191_v55 = vpop.f32.mrf.mxu0 }
  0xfb   :  { %419 = vst.msk [vmem:[#allocation2 + $0x8] sm:$0xff] %vm373_vm2, %v190_v54 }
  0xfc   :  { %538 = vpow2.f32 %v343_v53 }
 0x105   :  { %v537_v56 = vpop.eup %536 }
 0x106   :  { %v345_v59 = vmul.f32 %v537_v56, %v337_v57 }
 0x108   :  { %v347_v62 = vadd.f32 %v345_v59, %v187_v48 }
 0x109   :  { %v539_v60 = vpop.eup %538 }
 0x10a   :  { %v346_v61 = vmul.f32 %v539_v60, %v338_v58 }
 0x10c   :  { %v348_v63 = vadd.f32 %v346_v61, %v190_v54 }
 0x10e   :  { %v349_v0 = vpack.c.bf16 %v348_v63, %v347_v62 }
 0x110   :  { %500 = vmatmul.mubr.msk.bf16.vlgmr.msra.gmra.mxu0 %vm373_vm2, %v349_v0 }
 0x111   :  { %551 = shalt.err (!%p548_p4)
}
 0x112   :  { %s589_s1 = smov 128   ;;  %s590_s20 = smov 8  }
 0x113   :  { %435 = dma.vmem_to_hbm [thread:$0]  %s430_s16, 256, %s802_s8, [#allocation3], %s589_s1, %s589_s1, %s590_s20  }
 0x114   :  { %s560_s23 = scalar_lea.vmem %s442_s18, 256  ;;  %p565_p6 = scmp.lt.s32.totalorder %s442_s18, %s442_s18 }
 0x115   :  { %p561_p5 = scmp.ne.s32.totalorder %s442_s18, %s560_s23  ;;  %p566_p7 = scmp.lt.s32.totalorder %s560_s23, %s560_s23 }
 0x117   :  { %p567_p8 = por %p566_p7, %p565_p6 }
 0x119   :  { %p568_p9 = pnand %p567_p8, %p561_p5 }
 0x11b   :  { %571 = shalt.err (!%p568_p9)
}
 0x11c   :  { %447 = dma.vmem_to_hbm [thread:$0]  %s442_s18, 256, %s803_s9, [#allocation5], %s589_s1, %s589_s1, %s590_s20  }
 0x11d   :  { %v488_v1 = vld [vmem:[%s801_s7] ss:$0 sm:$0xff] }
 0x1d0   :  { %v411_v2 = vpop.f32.mrf.mxu0 }
 0x1d1   :  { %v412_v3 = vadd.f32 %v488_v1, %v411_v2 }
 0x1d2   :  { %v501_v4 = vpop.f32.mrf.mxu0 }
 0x1d3   :  { %422 = vst.msk [vmem:[%s804_s10] sm:$0xff] %vm373_vm2, %v412_v3 }
 0x1d4   :  { %v414_v5 = vpop.f32.mrf.mxu0 }
 0x1d5   :  { %v415_v6 = vadd.f32 %v488_v1, %v414_v5 }
 0x1d6   :  { %v502_v7 = vpop.f32.mrf.mxu0 }
 0x1d7   :  { %423 = vst.msk [vmem:[%s804_s10 + $0x8] sm:$0xff] %vm373_vm2, %v415_v6 }
 0x1d8   :  { %580 = dma.done.wait [#allocation3], 256  }
 0x1d9   :  { %581 = vsyncadd [#allocation3], 4294967040 }
 0x1da   :  { %582 = dma.done.wait [#allocation5], 256  }
 0x1db   :  { %583 = vsyncadd [#allocation5], 4294967040 }
 0x1dc   :  { %458 = vsyncpa [#allocation3], 1 }
 0x1dd   :  { %459 = vsyncpa [#allocation5], 1 }

// kernel: phanto_idp_forward.21
= control target key start
LH: loop header
LB: loop body
LE: loop exit
PB: predicated region body
PF: predicated region fallthrough
CT: control target
= control target key end

     0   :  { %v111_v0 = vmov 0.0   ;;  %vm112_vm0 = vmmov 0   ;;  %vm41_vm1 = vcmask 261120   ;;  %s154_s1 = inlined_call_operand.vmem [shape: bf16[32,128], index: 1, kind: input, shape index: {}]   ;;  %s155_s0 = inlined_call_operand.vmem [shape: f32[16,32], index: 0, kind: input, shape index: {}]   ;;  %s156_s2 = inlined_call_operand.vmem [shape: f32[1,128], index: 2, kind: input, shape index: {}]   ;;  %s157_s3 = inlined_call_operand.vmem [shape: f32[16,128], index: 3, kind: output, shape index: {}]  }
   0x1   :  { %99 = vmatprep.subr.bf16.mxu0 %v111_v0  ;;  %v109_v1 = vld [vmem:[%s154_s1 + $0x8] sm:$0xff]   ;;  %103 = vmatprep.mubr.msk.bf16.mxu0 %vm112_vm0, %v111_v0  ;;  %v110_v2 = vld [vmem:[%s154_s1] sm:$0xff]  }
   0x2   :  { %100 = vmatpush3.bf16.msra.mxu0 %v109_v1  ;;  %v15_v3 = vld [vmem:[%s155_s0] sm:$0xff]  ;;  %v16_v4 = vld [vmem:[%s155_s0 + $0x8] sm:$0xff] }
   0x3   :  { %101 = vmatprep.subr.bf16.mxu0 %v111_v0  ;;  %v17_v5 = vpack.c.bf16 %v16_v4, %v15_v3  ;;  %v92_v6 = vld [vmem:[%s156_s2] ss:$0 sm:$0xff] }
   0x6   :  { %102 = vmatpush3.bf16.msra.mxu0 %v110_v2 }
   0x9   :  { %104 = vmatmul.mubr.msk.bf16.vlgmr.msra.gmra.mxu0 %vm41_vm1, %v17_v5 }
  0xc9   :  { %v79_v7 = vpop.f32.mrf.mxu0 }
  0xca   :  { %v80_v8 = vadd.f32 %v92_v6, %v79_v7 }
  0xcb   :  { %v105_v9 = vpop.f32.mrf.mxu0 }
  0xcc   :  { %86 = vst [vmem:[%s157_s3] sm:$0xff] %v80_v8 }
  0xcd   :  { %v82_v10 = vpop.f32.mrf.mxu0 }
  0xce   :  { %v83_v11 = vadd.f32 %v92_v6, %v82_v10 }
  0xcf   :  { %v106_v12 = vpop.f32.mrf.mxu0 }
  0xd0   :  { %87 = vst [vmem:[%s157_s3 + $0x8] sm:$0xff] %v83_v11 }

// kernel: phanto_idp_forward.14
= control target key start
LH: loop header
LB: loop body
LE: loop exit
PB: predicated region body
PF: predicated region fallthrough
CT: control target
= control target key end

     0   :  { %s5627_s0 = inlined_call_operand.vmem [shape: f32[48,64], index: 0, kind: input, shape index: {}]   ;;  %s5628_s1 = inlined_call_operand.vmem [shape: f32[192,48], index: 1, kind: input, shape index: {}]   ;;  %s5629_s2 = inlined_call_operand.vmem [shape: f32[192,48], index: 2, kind: input, shape index: {}]   ;;  %s5630_s3 = inlined_call_operand.vmem [shape: f32[48,192], index: 3, kind: input, shape index: {}]   ;;  %s5631_s4 = inlined_call_operand.vmem [shape: f32[192,8], index: 4, kind: input, shape index: {}]   ;;  %s5632_s5 = inlined_call_operand.vmem [shape: bf16[64,64], index: 5, kind: input, shape index: {}]   ;;  %s5633_s6 = inlined_call_operand.vmem [shape: bf16[64,64], index: 6, kind: input, shape index: {}]   ;;  %s5634_s7 = inlined_call_operand.vmem [shape: bf16[8,64], index: 7, kind: input, shape index: {}]   ;;  %s5635_s8 = inlined_call_operand.hbm [shape: f32[1,64], index: 8, kind: input, shape index: {}]   ;;  %s5636_s9 = inlined_call_operand.vmem [shape: bf16[64,64], index: 9, kind: input, shape index: {}]   ;;  %s5637_s10 = inlined_call_operand.vmem [shape: bf16[64,64], index: 10, kind: input, shape index: {}]   ;;  %s5638_s11 = inlined_call_operand.vmem [shape: bf16[8,64], index: 11, kind: input, shape index: {}]   ;;  %s5639_s12 = inlined_call_operand.hbm [shape: f32[1,64], index: 12, kind: input, shape index: {}]   ;;  %s5640_s13 = inlined_call_operand.hbm [shape: f32[1,64], index: 13, kind: input, shape index: {}]   ;;  %s5641_s14 = inlined_call_operand.hbm [shape: f32[1,64], index: 14, kind: input, shape index: {}]   ;;  %s5642_s15 = inlined_call_operand.hbm [shape: f32[1,64], index: 15, kind: input, shape index: {}]   ;;  %s5643_s16 = inlined_call_operand.hbm [shape: f32[1,64], index: 16, kind: input, shape index: {}]   ;;  %s5644_s17 = inlined_call_operand.hbm [shape: f32[1,64], index: 17, kind: input, shape index: {}]   ;;  %s5645_s18 = inlined_call_operand.hbm [shape: f32[1,64], index: 18, kind: input, shape index: {}]   ;;  %s5646_s19 = inlined_call_operand.vmem [shape: f32[48,64], index: 19, kind: output, shape index: {}]  }
   0x1   :  { %5671 = sst [smem:[#allocation38_spill]] %s5627_s0 }
   0x2   :  { %5672 = sst [smem:[#allocation39_spill]] %s5628_s1 }
   0x3   :  { %5673 = sst [smem:[#allocation40_spill]] %s5629_s2 }
   0x4   :  { %5674 = sst [smem:[#allocation41_spill]] %s5630_s3 }
   0x5   :  { %24 = vsyncpa [#allocation3], 0 }
   0x6   :  { %25 = vsyncpa [#allocation5], 0 }
   0x7   :  { %26 = vsyncpa [#allocation8], 0 }
   0x8   :  { %27 = vsyncpa [#allocation11], 0 }
   0x9   :  { %28 = vsyncpa [#allocation14], 0  ;;  %s3797_s0 = smov [#allocation4]   ;;  %s3798_s20 = smov [#allocation7]  }
   0xa   :  { %s67_s30 = sshll.u32 %s3797_s0, 4  ;;  %s87_s21 = sshll.u32 %s3798_s20, 4  ;;  %s68_s30 = int_to_ptr.vmem [resolvable:$true] %s67_s30  ;;  %s88_s21 = int_to_ptr.vmem [resolvable:$true] %s87_s21 }
   0xb   :  { %s3635_s1 = scalar_lea.vmem %s68_s30, 16  ;;  %s3639_s22 = scalar_lea.vmem %s68_s30, 32 }
   0xc   :  { %p3636_p0 = scmp.ne.s32.totalorder %s68_s30, %s3635_s1  ;;  %p3640_p1 = scmp.lt.s32.totalorder %s68_s30, %s68_s30 }
   0xd   :  { %p3641_p2 = scmp.lt.s32.totalorder %s3639_s22, %s3635_s1 }
   0xf   :  { %p3642_p3 = por %p3641_p2, %p3640_p1 }
  0x11   :  { %p3643_p4 = pnand %p3642_p3, %p3636_p0 }
  0x13   :  { %3646 = shalt.err (!%p3643_p4)
}
  0x14   :  { %70 = dma.hbm_to_vmem [thread:$0]  %s5639_s12, 16, %s68_s30, [#allocation5]  }
  0x15   :  { %s3655_s24 = scalar_lea.vmem %s88_s21, 16  ;;  %s3659_s25 = scalar_lea.vmem %s88_s21, 32 }
  0x16   :  { %p3656_p5 = scmp.ne.s32.totalorder %s88_s21, %s3655_s24  ;;  %p3660_p6 = scmp.lt.s32.totalorder %s88_s21, %s88_s21 }
  0x17   :  { %p3661_p7 = scmp.lt.s32.totalorder %s3659_s25, %s3655_s24 }
  0x19   :  { %p3662_p8 = por %p3661_p7, %p3660_p6 }
  0x1b   :  { %p3663_p9 = pnand %p3662_p8, %p3656_p5 }
  0x1d   :  { %3666 = shalt.err (!%p3663_p9)
}
  0x1e   :  { %90 = dma.hbm_to_vmem [thread:$0]  %s5641_s14, 16, %s88_s21, [#allocation8]  }
  0x1f   :  { %s3799_s27 = smov [#allocation10]   ;;  %s3800_s29 = smov [#allocation2]  }
  0x20   :  { %s107_s28 = sshll.u32 %s3799_s27, 4  ;;  %s51_s0 = sshll.u32 %s3800_s29, 4  ;;  %s108_s28 = int_to_ptr.vmem [resolvable:$true] %s107_s28  ;;  %s52_s0 = int_to_ptr.vmem [resolvable:$true] %s51_s0 }
  0x21   :  { %s3675_s20 = scalar_lea.vmem %s108_s28, 16  ;;  %s3679_s12 = scalar_lea.vmem %s108_s28, 32 }
  0x22   :  { %p3676_p10 = scmp.ne.s32.totalorder %s108_s28, %s3675_s20  ;;  %p3680_p11 = scmp.lt.s32.totalorder %s108_s28, %s108_s28 }
  0x23   :  { %p3681_p12 = scmp.lt.s32.totalorder %s3679_s12, %s3675_s20 }
  0x25   :  { %p3682_p13 = por %p3681_p12, %p3680_p11 }
  0x27   :  { %p3683_p0 = pnand %p3682_p13, %p3676_p10 }
  0x29   :  { %3686 = shalt.err (!%p3683_p0)
}
  0x2a   :  { %110 = dma.hbm_to_vmem [thread:$0]  %s5643_s16, 16, %s108_s28, [#allocation11]  }
  0x2b   :  { %s3695_s22 = scalar_lea.vmem %s52_s0, 16  ;;  %s3699_s14 = scalar_lea.vmem %s52_s0, 32 }
  0x2c   :  { %p3696_p1 = scmp.ne.s32.totalorder %s52_s0, %s3695_s22  ;;  %p3700_p2 = scmp.lt.s32.totalorder %s52_s0, %s52_s0 }
  0x2d   :  { %p3701_p3 = scmp.lt.s32.totalorder %s3699_s14, %s3695_s22 }
  0x2f   :  { %p3702_p4 = por %p3701_p3, %p3700_p2 }
  0x31   :  { %p3703_p5 = pnand %p3702_p4, %p3696_p1 }
  0x33   :  { %3706 = shalt.err (!%p3703_p5)
}
  0x34   :  { %54 = dma.hbm_to_vmem [thread:$0]  %s5635_s8, 16, %s52_s0, [#allocation3]  }
  0x35   :  { %s3801_s23 = smov [#allocation6]   ;;  %s3802_s25 = smov [#allocation9]  }
  0x36   :  { %s77_s24 = sshll.u32 %s3801_s23, 4  ;;  %s97_s3 = sshll.u32 %s3802_s25, 4  ;;  %s78_s24 = int_to_ptr.vmem [resolvable:$true] %s77_s24  ;;  %s98_s3 = int_to_ptr.vmem [resolvable:$true] %s97_s3 }
  0x37   :  { %s3715_s26 = scalar_lea.vmem %s78_s24, 16  ;;  %s3719_s16 = scalar_lea.vmem %s78_s24, 32 }
  0x38   :  { %p3716_p6 = scmp.ne.s32.totalorder %s78_s24, %s3715_s26  ;;  %p3720_p7 = scmp.lt.s32.totalorder %s78_s24, %s78_s24 }
  0x39   :  { %p3721_p8 = scmp.lt.s32.totalorder %s3719_s16, %s3715_s26 }
  0x3b   :  { %p3722_p9 = por %p3721_p8, %p3720_p7 }
  0x3d   :  { %p3723_p10 = pnand %p3722_p9, %p3716_p6 }
  0x3f   :  { %3726 = shalt.err (!%p3723_p10)
}
  0x40   :  { %80 = dma.hbm_to_vmem [thread:$0]  %s5640_s13, 16, %s78_s24, [#allocation5]  }
  0x41   :  { %s3735_s29 = scalar_lea.vmem %s98_s3, 16  ;;  %s3739_s8 = scalar_lea.vmem %s98_s3, 32 }
  0x42   :  { %p3736_p11 = scmp.ne.s32.totalorder %s98_s3, %s3735_s29  ;;  %p3740_p12 = scmp.lt.s32.totalorder %s98_s3, %s98_s3 }
  0x43   :  { %p3741_p13 = scmp.lt.s32.totalorder %s3739_s8, %s3735_s29 }
  0x45   :  { %p3742_p0 = por %p3741_p13, %p3740_p12 }
  0x47   :  { %p3743_p1 = pnand %p3742_p0, %p3736_p11 }
  0x49   :  { %3746 = shalt.err (!%p3743_p1)
}
  0x4a   :  { %100 = dma.hbm_to_vmem [thread:$0]  %s5642_s15, 16, %s98_s3, [#allocation8]  }
  0x4b   :  { %s3803_s12 = smov [#allocation12]   ;;  %s3804_s1 = smov [#allocation13]  }
  0x4c   :  { %s117_s30 = sshll.u32 %s3803_s12, 4  ;;  %s127_s22 = sshll.u32 %s3804_s1, 4  ;;  %s118_s30 = int_to_ptr.vmem [resolvable:$true] %s117_s30  ;;  %s128_s22 = int_to_ptr.vmem [resolvable:$true] %s127_s22 }
  0x4d   :  { %s3755_s14 = scalar_lea.vmem %s118_s30, 16  ;;  %s3759_s13 = scalar_lea.vmem %s118_s30, 32 }
  0x4e   :  { %p3756_p2 = scmp.ne.s32.totalorder %s118_s30, %s3755_s14  ;;  %p3760_p3 = scmp.lt.s32.totalorder %s118_s30, %s118_s30 }
  0x4f   :  { %p3761_p4 = scmp.lt.s32.totalorder %s3759_s13, %s3755_s14 }
  0x51   :  { %p3762_p5 = por %p3761_p4, %p3760_p3 }
  0x53   :  { %p3763_p6 = pnand %p3762_p5, %p3756_p2 }
  0x55   :  { %3766 = shalt.err (!%p3763_p6)
}
  0x56   :  { %120 = dma.hbm_to_vmem [thread:$0]  %s5644_s17, 16, %s118_s30, [#allocation11]  }
  0x57   :  { %s3775_s23 = scalar_lea.vmem %s128_s22, 16  ;;  %s3779_s15 = scalar_lea.vmem %s128_s22, 32 }
  0x58   :  { %p3776_p7 = scmp.ne.s32.totalorder %s128_s22, %s3775_s23  ;;  %p3780_p8 = scmp.lt.s32.totalorder %s128_s22, %s128_s22 }
  0x59   :  { %p3781_p9 = scmp.lt.s32.totalorder %s3779_s15, %s3775_s23 }
  0x5b   :  { %p3782_p10 = por %p3781_p9, %p3780_p8 }
  0x5d   :  { %p3783_p11 = pnand %p3782_p10, %p3776_p7 }
  0x5f   :  { %3786 = shalt.err (!%p3783_p11)
}
  0x60   :  { %130 = dma.hbm_to_vmem [thread:$0]  %s5645_s18, 16, %s128_s22, [#allocation14]  }
  0x61   :  { %3787 = dma.done.wait [#allocation3], 16  }
  0x62   :  { %3788 = vsyncadd [#allocation3], 4294967280 }
  0x63   :  { %3789 = dma.done.wait [#allocation5], 32  }
  0x64   :  { %3790 = vsyncadd [#allocation5], 4294967264 }
  0x65   :  { %3791 = dma.done.wait [#allocation8], 32  }
  0x66   :  { %3792 = vsyncadd [#allocation8], 4294967264 }
  0x67   :  { %3793 = dma.done.wait [#allocation11], 32  }
  0x68   :  { %3794 = vsyncadd [#allocation11], 4294967264 }
  0x69   :  { %3795 = dma.done.wait [#allocation14], 16  }
  0x6a   :  { %3796 = vsyncadd [#allocation14], 4294967280  ;;  %v5651_v0 = vmov 0.0   ;;  %vm3806_vm0 = vmmov 0   ;;  %s5675_s18 = sld [smem:[#allocation38_spill]]  ;;  %v3503_v3 = vld [vmem:[%s5632_s5 + $0x18] sm:$0xff]  }
  0x6b   :  { %3227 = vmatprep.subr.bf16.mxu1 %v5651_v0  ;;  %3235 = vmatprep.mubr.msk.bf16.mxu1 %vm3806_vm0, %v5651_v0  ;;  %v3504_v5 = vld [vmem:[%s5632_s5 + $0x10] sm:$0xff]   ;;  %vm189_vm1 = vcmask 392192   ;;  %s5676_s14 = sld [smem:[#allocation39_spill]]  ;;  %v3505_v9 = vld [vmem:[%s5632_s5 + $0x8] sm:$0xff]   ;;  %v3506_v12 = vld [vmem:[%s5632_s5] sm:$0xff]   ;;  %vm527_vm2 = vcmask 523264  }
  0x6c   :  { %3228 = vmatpush3.bf16.msra.mxu1 %v3503_v3  ;;  %v3507_v17 = vld [vmem:[%s5633_s6 + $0x18] sm:$0xff]   ;;  %v3508_v18 = vld [vmem:[%s5633_s6 + $0x10] sm:$0xff]   ;;  %v3509_v40 = vld [vmem:[%s5633_s6 + $0x8] sm:$0xff]   ;;  %s5677_s1 = sld [smem:[#allocation40_spill]]  ;;  %vm1110_vm3 = vcmask 1043456   ;;  %vm1073_vm4 = vcmask 64512  }
  0x6d   :  { %3229 = vmatprep.subr.bf16.mxu1 %v5651_v0  ;;  %v3510_v41 = vld [vmem:[%s5633_s6] sm:$0xff]   ;;  %s5702_s17 = sld [smem:[#allocation41_spill]] }
  0x70   :  { %v3937_v1 = vld [vmem:[%s5675_s18 + $0x28] sm:$0xff]  ;;  %v3942_v2 = vld [vmem:[%s5675_s18 + $0x20] sm:$0xff]  ;;  %v159_v4 = vld [vmem:[%s5675_s18 + $0x18] sm:$0xff]  ;;  %3230 = vmatpush3.bf16.msra.mxu1 %v3504_v5 }
  0x71   :  { %3179 = vmatprep.subr.mxu0 %v3937_v1  ;;  %v158_v6 = vld [vmem:[%s5675_s18 + $0x10] sm:$0xff]  ;;  %v165_v7 = vld [vmem:[%s5676_s14] sm:$0xff]  ;;  %v157_v8 = vld [vmem:[%s5675_s18 + $0x8] sm:$0xff]  ;;  %3231 = vmatprep.subr.bf16.mxu1 %v5651_v0  ;;  %v4042_v27 = vpack.c.bf16 %v3937_v1, %v3942_v2 }
  0x72   :  { %3180 = vmatpush3.msra.mxu0 %v3937_v1  ;;  %3191 = vmatprep.mubr.msk.f32.mxu0 %vm189_vm1, %v165_v7  ;;  %v156_v10 = vld [vmem:[%s5675_s18] sm:$0xff]  ;;  %v166_v11 = vld [vmem:[%s5676_s14 + $0x8] sm:$0xff]  ;;  %v167_v13 = vld [vmem:[%s5676_s14 + $0x10] sm:$0xff]  ;;  %v4018_v22 = vpack.c.bf16 %v159_v4, %v158_v6 }
  0x73   :  { %3181 = vmatprep.subr.mxu0 %v3942_v2  ;;  %v168_v14 = vld [vmem:[%s5676_s14 + $0x18] sm:$0xff]  ;;  %v169_v15 = vld [vmem:[%s5676_s14 + $0x20] sm:$0xff]  ;;  %v3993_v16 = vpack.c.bf16 %v157_v8, %v156_v10  ;;  %v170_v19 = vld [vmem:[%s5676_s14 + $0x28] sm:$0xff] }
  0x74   :  { %3182 = vmatpush3.msra.mxu0 %v3942_v2  ;;  %3232 = vmatpush3.bf16.msra.mxu1 %v3505_v9  ;;  %v171_v20 = vld [vmem:[%s5676_s14 + $0x30] sm:$0xff]  ;;  %v172_v21 = vld [vmem:[%s5676_s14 + $0x38] sm:$0xff]  ;;  %v173_v23 = vld [vmem:[%s5676_s14 + $0x40] sm:$0xff] }
  0x75   :  { %3183 = vmatprep.subr.mxu0 %v159_v4  ;;  %3233 = vmatprep.subr.bf16.mxu1 %v5651_v0  ;;  %v174_v24 = vld [vmem:[%s5676_s14 + $0x48] sm:$0xff]  ;;  %v175_v25 = vld [vmem:[%s5676_s14 + $0x50] sm:$0xff]  ;;  %v176_v26 = vld [vmem:[%s5676_s14 + $0x58] sm:$0xff] }
  0x76   :  { %3184 = vmatpush3.msra.mxu0 %v159_v4  ;;  %v177_v28 = vld [vmem:[%s5676_s14 + $0x60] sm:$0xff]  ;;  %v178_v29 = vld [vmem:[%s5676_s14 + $0x68] sm:$0xff]  ;;  %v179_v30 = vld [vmem:[%s5676_s14 + $0x70] sm:$0xff] }
  0x77   :  { %3185 = vmatprep.subr.mxu0 %v158_v6  ;;  %v180_v31 = vld [vmem:[%s5676_s14 + $0x78] sm:$0xff]  ;;  %v181_v32 = vld [vmem:[%s5676_s14 + $0x80] sm:$0xff]  ;;  %v182_v33 = vld [vmem:[%s5676_s14 + $0x88] sm:$0xff] }
  0x78   :  { %3186 = vmatpush3.msra.mxu0 %v158_v6  ;;  %3234 = vmatpush3.bf16.msra.mxu1 %v3506_v12  ;;  %v183_v34 = vld [vmem:[%s5676_s14 + $0x90] sm:$0xff]  ;;  %v184_v35 = vld [vmem:[%s5676_s14 + $0x98] sm:$0xff]  ;;  %v185_v36 = vld [vmem:[%s5676_s14 + $0xa0] sm:$0xff] }
  0x79   :  { %3187 = vmatprep.subr.mxu0 %v157_v8  ;;  %3247 = vmatprep.subr.bf16.mxu1 %v3507_v17  ;;  %v186_v37 = vld [vmem:[%s5676_s14 + $0xa8] sm:$0xff]  ;;  %v187_v38 = vld [vmem:[%s5676_s14 + $0xb0] sm:$0xff]  ;;  %v188_v39 = vld [vmem:[%s5676_s14 + $0xb8] sm:$0xff] }
  0x7a   :  { %3188 = vmatpush3.msra.mxu0 %v157_v8  ;;  %v4104_v42 = vld [vmem:[%s5677_s1] sm:$0xff] }
  0x7b   :  { %3189 = vmatprep.subr.mxu0 %v156_v10  ;;  %3236 = vmatmul.mubr.msk.bf16.vlgmr.msra.gmra.mxu1 %vm527_vm2, %v3993_v16 }
  0x7c   :  { %3190 = vmatpush3.msra.mxu0 %v156_v10  ;;  %3239 = vmatprep.mubr.msk.bf16.mxu1 %vm3806_vm0, %v5651_v0 }
  0x7d   :  { %3192 = vmatmul.mubr.msk.f32.vlgmr.msra.gmra.mxu0 %vm189_vm1, %v166_v11  ;;  %3248 = vmatpush3.bf16.msra.mxu1 %v3507_v17 }
  0x7e   :  { %3194 = vmatprep.mubr.msk.f32.mxu0 %vm189_vm1, %v167_v13  ;;  %3249 = vmatprep.subr.bf16.mxu1 %v3508_v18 }
  0x81   :  { %3195 = vmatmul.mubr.msk.f32.gmra.mxu0 %vm189_vm1, %v168_v14  ;;  %3250 = vmatpush3.bf16.msra.mxu1 %v3508_v18 }
  0x82   :  { %3197 = vmatprep.mubr.msk.f32.mxu0 %vm189_vm1, %v169_v15  ;;  %3251 = vmatprep.subr.bf16.mxu1 %v3509_v40 }
  0x83   :  { %3240 = vmatmul.mubr.msk.bf16.gmra.mxu1 %vm527_vm2, %v4018_v22 }
  0x84   :  { %3243 = vmatprep.mubr.msk.bf16.mxu1 %vm3806_vm0, %v5651_v0 }
  0x85   :  { %3198 = vmatmul.mubr.msk.f32.gmra.mxu0 %vm189_vm1, %v170_v19  ;;  %3252 = vmatpush3.bf16.msra.mxu1 %v3509_v40 }
  0x86   :  { %3200 = vmatprep.mubr.msk.f32.mxu0 %vm189_vm1, %v171_v20  ;;  %3253 = vmatprep.subr.bf16.mxu1 %v3510_v41 }
  0x89   :  { %3201 = vmatmul.mubr.msk.f32.gmra.mxu0 %vm189_vm1, %v172_v21  ;;  %3254 = vmatpush3.bf16.msra.mxu1 %v3510_v41  ;;  %v4147_v21 = vld [vmem:[%s5677_s1 + $0x8] sm:$0xff]  ;;  %v4218_v41 = vld [vmem:[%s5677_s1 + $0xa0] sm:$0xff] }
  0x8a   :  { %3203 = vmatprep.mubr.msk.f32.mxu0 %vm189_vm1, %v173_v23  ;;  %v4154_v23 = vld [vmem:[%s5677_s1 + $0x10] sm:$0xff]  ;;  %5678 = vst [vmem:[#allocation20_spill] sm:$0xff] %v4218_v41 }
  0x8b   :  { %3244 = vmatmul.mubr.msk.bf16.gmra.mxu1 %vm527_vm2, %v4042_v27 }
  0x8d   :  { %3204 = vmatmul.mubr.msk.f32.gmra.mxu0 %vm189_vm1, %v174_v24  ;;  %v1072_v24 = vld [vmem:[%s5634_s7] sm:$0xf] }
  0x8e   :  { %3206 = vmatprep.mubr.msk.f32.mxu0 %vm189_vm1, %v175_v25 }
  0x91   :  { %3207 = vmatmul.mubr.msk.f32.gmra.mxu0 %vm189_vm1, %v176_v26  ;;  %v3511_v26 = vld [vmem:[%s5636_s9 + $0x18] sm:$0xff]  }
  0x92   :  { %3209 = vmatprep.mubr.msk.f32.mxu0 %vm189_vm1, %v177_v28 }
  0x95   :  { %3210 = vmatmul.mubr.msk.f32.gmra.mxu0 %vm189_vm1, %v178_v29 }
  0x96   :  { %3212 = vmatprep.mubr.msk.f32.mxu0 %vm189_vm1, %v179_v30  ;;  %v4175_v30 = vld [vmem:[%s5677_s1 + $0x18] sm:$0xff] }
  0x99   :  { %3213 = vmatmul.mubr.msk.f32.gmra.mxu0 %vm189_vm1, %v180_v31  ;;  %v4183_v31 = vld [vmem:[%s5677_s1 + $0x20] sm:$0xff] }
  0x9a   :  { %3215 = vmatprep.mubr.msk.f32.mxu0 %vm189_vm1, %v181_v32 }
  0x9d   :  { %3216 = vmatmul.mubr.msk.f32.gmra.mxu0 %vm189_vm1, %v182_v33  ;;  %v3512_v33 = vld [vmem:[%s5636_s9 + $0x10] sm:$0xff]  }
  0x9e   :  { %3218 = vmatprep.mubr.msk.f32.mxu0 %vm189_vm1, %v183_v34 }
  0xa1   :  { %3219 = vmatmul.mubr.msk.f32.gmra.mxu0 %vm189_vm1, %v184_v35 }
  0xa2   :  { %3221 = vmatprep.mubr.msk.f32.mxu0 %vm189_vm1, %v185_v36  ;;  %v4199_v36 = vld [vmem:[%s5677_s1 + $0x28] sm:$0xff] }
  0xa5   :  { %3222 = vmatmul.mubr.msk.f32.gmra.mxu0 %vm189_vm1, %v186_v37  ;;  %v4206_v37 = vld [vmem:[%s5677_s1 + $0x30] sm:$0xff] }
  0xa6   :  { %3224 = vmatprep.mubr.msk.f32.mxu0 %vm189_vm1, %v187_v38 }
  0xa9   :  { %3225 = vmatmul.mubr.msk.f32.gmra.mxu0 %vm189_vm1, %v188_v39  ;;  %v3513_v39 = vld [vmem:[%s5636_s9 + $0x8] sm:$0xff]  }
  0xaa   :  { %3291 = vmatprep.mubr.msk.f32.mxu0 %vm189_vm1, %v4104_v42 }
 0x13b   :  { %v4110_v47 = vpop.f32.mrf.mxu1 }
 0x13d   :  { %v3193_v43 = vpop.f32.mrf.mxu0  ;;  %v3237_v50 = vpop.f32.mrf.mxu1 }
 0x13e   :  { %v4258_v50 = vld [vmem:[%s5677_s1 + $0x50] sm:$0xff] }
 0x13f   :  { %v328_v44 = vpop.f32.mrf.mxu0  ;;  %v574_v52 = vpop.f32.mrf.mxu1 }
 0x140   :  { %v4108_v45 = vpack.c.bf16 %v3193_v43, %v328_v44  ;;  %v4226_v43 = vld [vmem:[%s5677_s1 + $0x38] sm:$0xff]  ;;  %v4233_v44 = vld [vmem:[%s5677_s1 + $0x40] sm:$0xff] }
 0x141   :  { %v3196_v46 = vpop.f32.mrf.mxu0  ;;  %v3238_v55 = vpop.f32.mrf.mxu1 }
 0x142   :  { %3255 = vmatprep.mubr.msk.bf16.mxu1 %vm527_vm2, %v4108_v45  ;;  %v459_v55 = vld [vmem:[%s5631_s4] sm:$0xff] }
 0x143   :  { %v338_v48 = vpop.f32.mrf.mxu0  ;;  %v579_v57 = vpop.f32.mrf.mxu1 }
 0x144   :  { %v4114_v49 = vpack.c.bf16 %v3196_v46, %v338_v48  ;;  %v3514_v46 = vld [vmem:[%s5636_s9] sm:$0xff]   ;;  %v4253_v48 = vld [vmem:[%s5677_s1 + $0x48] sm:$0xff] }
 0x145   :  { %v3199_v51 = vpop.f32.mrf.mxu0  ;;  %v3241_v60 = vpop.f32.mrf.mxu1 }
 0x146   :  { %3256 = vmatmul.mubr.msk.bf16.vlgmr.msra.gmra.mxu1 %vm527_vm2, %v4114_v49  ;;  %v4299_v60 = vld [vmem:[%s5677_s1 + $0xb8] sm:$0xff] }
 0x147   :  { %v348_v53 = vpop.f32.mrf.mxu0  ;;  %v582_v62 = vpop.f32.mrf.mxu1  ;;  %5681 = vst [vmem:[#allocation23_spill] sm:$0xff] %v4299_v60 }
 0x148   :  { %v4118_v54 = vpack.c.bf16 %v3199_v51, %v348_v53  ;;  %v4263_v51 = vld [vmem:[%s5677_s1 + $0xa8] sm:$0xff]  ;;  %v1112_v53 = vsel %vm1110_vm3, %v1072_v24, 0 }
 0x149   :  { %v3202_v56 = vpop.f32.mrf.mxu0  ;;  %v3242_v2 = vpop.f32.mrf.mxu1  ;;  %5679 = vst [vmem:[#allocation21_spill] sm:$0xff] %v4263_v51 }
 0x14a   :  { %3259 = vmatprep.mubr.msk.bf16.mxu1 %vm527_vm2, %v4118_v54  ;;  %v463_v2 = vld [vmem:[%s5631_s4 + $0x20] sm:$0xff] }
 0x14b   :  { %v358_v58 = vpop.f32.mrf.mxu0  ;;  %v587_v4 = vpop.f32.mrf.mxu1 }
 0x14c   :  { %v4122_v59 = vpack.c.bf16 %v3202_v56, %v358_v58  ;;  %v460_v56 = vld [vmem:[%s5631_s4 + $0x8] sm:$0xff]  ;;  %v4292_v58 = vld [vmem:[%s5677_s1 + $0x60] sm:$0xff] }
 0x14d   :  { %v3205_v61 = vpop.f32.mrf.mxu0  ;;  %v3245_v7 = vpop.f32.mrf.mxu1 }
 0x14e   :  { %3260 = vmatmul.mubr.msk.bf16.gmra.mxu1 %vm527_vm2, %v4122_v59 }
 0x14f   :  { %v368_v63 = vpop.f32.mrf.mxu0  ;;  %v590_v9 = vpop.f32.mrf.mxu1 }
 0x150   :  { %v4126_v1 = vpack.c.bf16 %v3205_v61, %v368_v63  ;;  %3279 = vmatprep.subr.mxu0 %v590_v9  ;;  %3479 = vmatprep.subr.mxu1 %v590_v9  ;;  %v4301_v61 = vpack.c.bf16 %v460_v56, %v459_v55  ;;  %v462_v63 = vld [vmem:[%s5631_s4 + $0x18] sm:$0xff]  ;;  %v473_v55 = vld [vmem:[%s5631_s4 + $0x70] sm:$0xff]  ;;  %v476_v56 = vld [vmem:[%s5631_s4 + $0x88] sm:$0xff] }
 0x151   :  { %v3208_v3 = vpop.f32.mrf.mxu0  ;;  %v3246_v11 = vpop.f32.mrf.mxu1  ;;  %3280 = vmatpush3.msra.mxu0 %v590_v9  ;;  %3485 = vmatpush3.msra.mxu1 %v590_v9  ;;  %v4344_v9 = vld [vmem:[%s5677_s1 + $0x78] sm:$0xff] }
 0x152   :  { %3263 = vmatprep.mubr.msk.bf16.mxu1 %vm527_vm2, %v4126_v1  ;;  %3281 = vmatprep.subr.mxu0 %v587_v4  ;;  %v465_v11 = vld [vmem:[%s5631_s4 + $0x30] sm:$0xff] }
 0x153   :  { %v378_v5 = vpop.f32.mrf.mxu0  ;;  %3480 = vmatprep.subr.mxu1 %v587_v4  ;;  %3282 = vmatpush3.msra.mxu0 %v587_v4 }
 0x154   :  { %v4130_v6 = vpack.c.bf16 %v3208_v3, %v378_v5  ;;  %3486 = vmatpush3.msra.mxu1 %v587_v4  ;;  %3283 = vmatprep.subr.mxu0 %v582_v62  ;;  %v464_v3 = vld [vmem:[%s5631_s4 + $0x28] sm:$0xff]  ;;  %v4329_v5 = vld [vmem:[%s5677_s1 + $0x70] sm:$0xff] }
 0x155   :  { %v3211_v8 = vpop.f32.mrf.mxu0  ;;  %3481 = vmatprep.subr.mxu1 %v582_v62  ;;  %3284 = vmatpush3.msra.mxu0 %v582_v62  ;;  %v4322_v4 = vld [vmem:[%s5677_s1 + $0x68] sm:$0xff] }
 0x156   :  { %3264 = vmatmul.mubr.msk.bf16.gmra.mxu1 %vm527_vm2, %v4130_v6  ;;  %3285 = vmatprep.subr.mxu0 %v579_v57 }
 0x157   :  { %v388_v10 = vpop.f32.mrf.mxu0  ;;  %3487 = vmatpush3.msra.mxu1 %v582_v62  ;;  %3286 = vmatpush3.msra.mxu0 %v579_v57  ;;  %v461_v62 = vld [vmem:[%s5631_s4 + $0x10] sm:$0xff] }
 0x158   :  { %v4134_v12 = vpack.c.bf16 %v3211_v8, %v388_v10  ;;  %3482 = vmatprep.subr.mxu1 %v579_v57  ;;  %3287 = vmatprep.subr.mxu0 %v574_v52  ;;  %v4331_v7 = vpack.c.bf16 %v462_v63, %v461_v62  ;;  %v4335_v8 = vpack.c.bf16 %v464_v3, %v463_v2  ;;  %v4351_v10 = vld [vmem:[%s5677_s1 + $0x80] sm:$0xff]  ;;  %v477_v3 = vld [vmem:[%s5631_s4 + $0x90] sm:$0xff] }
 0x159   :  { %v3214_v13 = vpop.f32.mrf.mxu0  ;;  %3488 = vmatpush3.msra.mxu1 %v579_v57  ;;  %3288 = vmatpush3.msra.mxu0 %v574_v52  ;;  %v4285_v57 = vld [vmem:[%s5677_s1 + $0x58] sm:$0xff]  ;;  %v3518_v63 = vld [vmem:[%s5637_s10] sm:$0xff]  }
 0x15a   :  { %3267 = vmatprep.mubr.msk.bf16.mxu1 %vm527_vm2, %v4134_v12  ;;  %3483 = vmatprep.subr.mxu1 %v574_v52 }
 0x15b   :  { %v398_v14 = vpop.f32.mrf.mxu0  ;;  %3489 = vmatpush3.msra.mxu1 %v574_v52  ;;  %3289 = vmatprep.subr.mxu0 %v4110_v47  ;;  %v4270_v52 = vld [vmem:[%s5677_s1 + $0xb0] sm:$0xff] }
 0x15c   :  { %v4136_v15 = vpack.c.bf16 %v3214_v13, %v398_v14  ;;  %3484 = vmatprep.subr.mxu1 %v4110_v47  ;;  %3290 = vmatpush3.msra.mxu0 %v4110_v47  ;;  %5680 = vst [vmem:[#allocation22_spill] sm:$0xff] %v4270_v52  ;;  %v466_v13 = vld [vmem:[%s5631_s4 + $0x38] sm:$0xff]  ;;  %v467_v14 = vld [vmem:[%s5631_s4 + $0x40] sm:$0xff] }
 0x15d   :  { %v3217_v17 = vpop.f32.mrf.mxu0  ;;  %3490 = vmatpush3.msra.mxu1 %v4110_v47  ;;  %3292 = vmatmul.mubr.msk.f32.vlgmr.msra.gmra.mxu0 %vm189_vm1, %v4147_v21  ;;  %v4246_v47 = vld [vmem:[%s5637_s10 + $0x18] sm:$0xff]  }
 0x15e   :  { %3268 = vmatmul.mubr.msk.bf16.gmra.mxu1 %vm527_vm2, %v4136_v15  ;;  %3294 = vmatprep.mubr.msk.f32.mxu0 %vm189_vm1, %v4154_v23 }
 0x15f   :  { %v408_v18 = vpop.f32.mrf.mxu0  ;;  %3491 = vmatprep.subr.msk.bf16.mxu1 %vm1110_vm3, %v1072_v24  ;;  %3353 = vmatprep.subr.bf16.mxu0 %v5651_v0  ;;  %v4381_v24 = vpack.c.bf16 %v466_v13, %v465_v11  ;;  %v478_v11 = vld [vmem:[%s5631_s4 + $0x98] sm:$0xff]  ;;  %v480_v13 = vld [vmem:[%s5631_s4 + $0xa8] sm:$0xff] }
 0x160   :  { %v4142_v19 = vpack.c.bf16 %v3217_v17, %v408_v18  ;;  %3354 = vmatpush3.bf16.msra.mxu0 %v3511_v26  ;;  %v468_v17 = vld [vmem:[%s5631_s4 + $0x48] sm:$0xff]  ;;  %v4392_v26 = vld [vmem:[%s5677_s1 + $0x98] sm:$0xff] }
 0x161   :  { %v3220_v20 = vpop.f32.mrf.mxu0  ;;  %3295 = vmatmul.mubr.msk.f32.gmra.mxu0 %vm189_vm1, %v4175_v30  ;;  %3355 = vmatprep.subr.bf16.mxu0 %v5651_v0  ;;  %v4374_v18 = vld [vmem:[%s5677_s1 + $0x88] sm:$0xff]  ;;  %5682 = vst [vmem:[#allocation24_spill] sm:$0xff] %v4392_v26 }
 0x162   :  { %3271 = vmatprep.mubr.msk.bf16.mxu1 %vm527_vm2, %v4142_v19  ;;  %3297 = vmatprep.mubr.msk.f32.mxu0 %vm189_vm1, %v4183_v31 }
 0x163   :  { %v418_v25 = vpop.f32.mrf.mxu0 }
 0x164   :  { %v4164_v28 = vpack.c.bf16 %v3220_v20, %v418_v25  ;;  %3356 = vmatpush3.bf16.msra.mxu0 %v3512_v33  ;;  %v4379_v20 = vld [vmem:[%s5677_s1 + $0x90] sm:$0xff]  ;;  %v4383_v25 = vpack.c.bf16 %v468_v17, %v467_v14  ;;  %v471_v33 = vld [vmem:[%s5631_s4 + $0x60] sm:$0xff]  ;;  %v492_v14 = vpack.c.bf16 %v478_v11, %v477_v3 }
 0x165   :  { %v3223_v29 = vpop.f32.mrf.mxu0  ;;  %3298 = vmatmul.mubr.msk.f32.gmra.mxu0 %vm189_vm1, %v4199_v36  ;;  %3357 = vmatprep.subr.bf16.mxu0 %v5651_v0 }
 0x166   :  { %3272 = vmatmul.mubr.msk.bf16.gmra.mxu1 %vm527_vm2, %v4164_v28  ;;  %3300 = vmatprep.mubr.msk.f32.mxu0 %vm189_vm1, %v4206_v37 }
 0x167   :  { %v428_v32 = vpop.f32.mrf.mxu0 }
 0x168   :  { %v4189_v34 = vpack.c.bf16 %v3223_v29, %v428_v32  ;;  %3358 = vmatpush3.bf16.msra.mxu0 %v3513_v39  ;;  %v469_v29 = vld [vmem:[%s5631_s4 + $0x50] sm:$0xff]  ;;  %v470_v32 = vld [vmem:[%s5631_s4 + $0x58] sm:$0xff] }
 0x169   :  { %v3226_v35 = vpop.f32.mrf.mxu0  ;;  %3301 = vmatmul.mubr.msk.f32.gmra.mxu0 %vm189_vm1, %v4226_v43  ;;  %3359 = vmatprep.subr.bf16.mxu0 %v5651_v0  ;;  %v3516_v39 = vld [vmem:[%s5637_s10 + $0x10] sm:$0xff]  }
 0x16a   :  { %3275 = vmatprep.mubr.msk.bf16.mxu1 %vm527_vm2, %v4189_v34  ;;  %3303 = vmatprep.mubr.msk.f32.mxu0 %vm189_vm1, %v4233_v44 }
 0x16b   :  { %v438_v38 = vpop.f32.mrf.mxu0 }
 0x16c   :  { %v4211_v40 = vpack.c.bf16 %v3226_v35, %v438_v38  ;;  %3360 = vmatpush3.bf16.msra.mxu0 %v3514_v46  ;;  %v472_v35 = vld [vmem:[%s5631_s4 + $0x68] sm:$0xff]  ;;  %v488_v38 = vpack.c.bf16 %v470_v32, %v469_v29  ;;  %v481_v29 = vld [vmem:[%s5631_s4 + $0xb0] sm:$0xff]  ;;  %v482_v32 = vld [vmem:[%s5631_s4 + $0xb8] sm:$0xff] }
 0x16d   :  { %3304 = vmatmul.mubr.msk.f32.gmra.mxu0 %vm189_vm1, %v4253_v48  ;;  %3373 = vmatprep.subr.bf16.mxu0 %v4246_v47  ;;  %v489_v46 = vpack.c.bf16 %v472_v35, %v471_v33  ;;  %v494_v33 = vpack.c.bf16 %v482_v32, %v481_v29 }
 0x16e   :  { %3276 = vmatmul.mubr.msk.bf16.gmra.mxu1 %vm527_vm2, %v4211_v40  ;;  %3306 = vmatprep.mubr.msk.f32.mxu0 %vm189_vm1, %v4258_v50 }
 0x16f   :  { %3321 = vmatprep.mubr.msk.f32.mxu1 %vm189_vm1, %v4218_v41 }
 0x171   :  { %3307 = vmatmul.mubr.msk.f32.gmra.mxu0 %vm189_vm1, %v4285_v57 }
 0x172   :  { %3309 = vmatprep.mubr.msk.f32.mxu0 %vm189_vm1, %v4292_v58 }
 0x175   :  { %3310 = vmatmul.mubr.msk.f32.gmra.mxu0 %vm189_vm1, %v4322_v4 }
 0x176   :  { %3322 = vmatmul.mubr.msk.f32.vlgmr.msra.gmra.mxu1 %vm189_vm1, %v4263_v51  ;;  %3312 = vmatprep.mubr.msk.f32.mxu0 %vm189_vm1, %v4329_v5 }
 0x177   :  { %3324 = vmatprep.mubr.msk.f32.mxu1 %vm189_vm1, %v4270_v52  ;;  %3328 = vmatpush3.bf16.msra.mxu1 %v1112_v53  ;;  %v3517_v53 = vld [vmem:[%s5637_s10 + $0x8] sm:$0xff]  }
 0x179   :  { %3313 = vmatmul.mubr.msk.f32.gmra.mxu0 %vm189_vm1, %v4344_v9 }
 0x17a   :  { %3325 = vmatmul.mubr.msk.f32.gmra.mxu1 %vm189_vm1, %v4299_v60  ;;  %3315 = vmatprep.mubr.msk.f32.mxu0 %vm189_vm1, %v4351_v10 }
 0x17b   :  { %3329 = vmatprep.mubr.msk.bf16.mxu1 %vm1073_vm4, %v4301_v61 }
 0x17d   :  { %3316 = vmatmul.mubr.msk.f32.gmra.mxu0 %vm189_vm1, %v4374_v18 }
 0x17e   :  { %3330 = vmatmul.mubr.msk.bf16.vlgmr.msra.gmra.mxu1 %vm1073_vm4, %v4331_v7  ;;  %3318 = vmatprep.mubr.msk.f32.mxu0 %vm189_vm1, %v4379_v20 }
 0x17f   :  { %3333 = vmatprep.mubr.msk.bf16.mxu1 %vm1073_vm4, %v4335_v8 }
 0x181   :  { %3319 = vmatmul.mubr.msk.f32.gmra.mxu0 %vm189_vm1, %v4392_v26 }
 0x182   :  { %3361 = vmatprep.mubr.msk.bf16.mxu0 %vm3806_vm0, %v5651_v0 }
 0x185   :  { %3362 = vmatmul.mubr.msk.bf16.vlgmr.msra.gmra.mxu0 %vm527_vm2, %v3993_v16  ;;  %v474_v16 = vld [vmem:[%s5631_s4 + $0x78] sm:$0xff] }
 0x186   :  { %3334 = vmatmul.mubr.msk.bf16.gmra.mxu1 %vm1073_vm4, %v4381_v24  ;;  %3365 = vmatprep.mubr.msk.bf16.mxu0 %vm3806_vm0, %v5651_v0  ;;  %v490_v62 = vpack.c.bf16 %v474_v16, %v473_v55 }
 0x187   :  { %3337 = vmatprep.mubr.msk.bf16.mxu1 %vm1073_vm4, %v4383_v25  ;;  %3374 = vmatpush3.bf16.msra.mxu0 %v4246_v47  ;;  %v475_v47 = vld [vmem:[%s5631_s4 + $0x80] sm:$0xff] }
 0x188   :  { %3375 = vmatprep.subr.bf16.mxu0 %v3516_v39  ;;  %v491_v2 = vpack.c.bf16 %v476_v56, %v475_v47 }
 0x18b   :  { %3376 = vmatpush3.bf16.msra.mxu0 %v3516_v39 }
 0x18c   :  { %3377 = vmatprep.subr.bf16.mxu0 %v3517_v53 }
 0x18d   :  { %3366 = vmatmul.mubr.msk.bf16.gmra.mxu0 %vm527_vm2, %v4018_v22  ;;  %v479_v22 = vld [vmem:[%s5631_s4 + $0xa0] sm:$0xff] }
 0x18e   :  { %3338 = vmatmul.mubr.msk.bf16.gmra.mxu1 %vm1073_vm4, %v488_v38  ;;  %3369 = vmatprep.mubr.msk.bf16.mxu0 %vm3806_vm0, %v5651_v0  ;;  %v493_v17 = vpack.c.bf16 %v480_v13, %v479_v22 }
 0x18f   :  { %3341 = vmatprep.mubr.msk.bf16.mxu1 %vm1073_vm4, %v489_v46  ;;  %3378 = vmatpush3.bf16.msra.mxu0 %v3517_v53 }
 0x190   :  { %3379 = vmatprep.subr.bf16.mxu0 %v3518_v63 }
 0x193   :  { %3380 = vmatpush3.bf16.msra.mxu0 %v3518_v63 }
 0x195   :  { %3370 = vmatmul.mubr.msk.bf16.gmra.mxu0 %vm527_vm2, %v4042_v27  ;;  %v1978_v27 = vld [vmem:[%s5638_s11] sm:$0xf] }
 0x196   :  { %3342 = vmatmul.mubr.msk.bf16.gmra.mxu1 %vm1073_vm4, %v490_v62  ;;  %3381 = vmatprep.mubr.msk.bf16.mxu0 %vm527_vm2, %v4108_v45 }
 0x197   :  { %3345 = vmatprep.mubr.msk.bf16.mxu1 %vm1073_vm4, %v491_v2  ;;  %3492 = vmatprep.subr.msk.bf16.mxu0 %vm1110_vm3, %v1978_v27 }
 0x19d   :  { %3382 = vmatmul.mubr.msk.bf16.vlgmr.msra.gmra.mxu0 %vm527_vm2, %v4114_v49 }
 0x19e   :  { %3346 = vmatmul.mubr.msk.bf16.gmra.mxu1 %vm1073_vm4, %v492_v14  ;;  %3385 = vmatprep.mubr.msk.bf16.mxu0 %vm527_vm2, %v4118_v54 }
 0x19f   :  { %3349 = vmatprep.mubr.msk.bf16.mxu1 %vm1073_vm4, %v493_v17 }
 0x1a5   :  { %3386 = vmatmul.mubr.msk.bf16.gmra.mxu0 %vm527_vm2, %v4122_v59 }
 0x1a6   :  { %3350 = vmatmul.mubr.msk.bf16.gmra.mxu1 %vm1073_vm4, %v494_v33  ;;  %3389 = vmatprep.mubr.msk.bf16.mxu0 %vm527_vm2, %v4126_v1 }
 0x1a7   :  { %3417 = vmatprep.mubr.msk.f32.mxu1 %vm189_vm1, %v4104_v42  ;;  %v1980_v42 = vsel %vm1110_vm3, %v1978_v27, 0 }
 0x1a8   :  { %3454 = vmatpush3.bf16.msra.mxu0 %v1980_v42 }
 0x1ad   :  { %3390 = vmatmul.mubr.msk.bf16.gmra.mxu0 %vm527_vm2, %v4130_v6 }
 0x1ae   :  { %3393 = vmatprep.mubr.msk.bf16.mxu0 %vm527_vm2, %v4134_v12 }
 0x1b5   :  { %3394 = vmatmul.mubr.msk.bf16.gmra.mxu0 %vm527_vm2, %v4136_v15 }
 0x1b6   :  { %3397 = vmatprep.mubr.msk.bf16.mxu0 %vm527_vm2, %v4142_v19 }
 0x1bd   :  { %3398 = vmatmul.mubr.msk.bf16.gmra.mxu0 %vm527_vm2, %v4164_v28 }
 0x1be   :  { %3401 = vmatprep.mubr.msk.bf16.mxu0 %vm527_vm2, %v4189_v34 }
 0x1c5   :  { %3402 = vmatmul.mubr.msk.bf16.gmra.mxu0 %vm527_vm2, %v4211_v40 }
 0x1c6   :  { %3455 = vmatprep.mubr.msk.bf16.mxu0 %vm1073_vm4, %v4301_v61 }
 0x1cd   :  { %3456 = vmatmul.mubr.msk.bf16.vlgmr.msra.gmra.mxu0 %vm1073_vm4, %v4331_v7 }
 0x1ce   :  { %3459 = vmatprep.mubr.msk.bf16.mxu0 %vm1073_vm4, %v4335_v8 }
 0x1d5   :  { %3460 = vmatmul.mubr.msk.bf16.gmra.mxu0 %vm1073_vm4, %v4381_v24 }
 0x1d6   :  { %3463 = vmatprep.mubr.msk.bf16.mxu0 %vm1073_vm4, %v4383_v25 }
 0x1dd   :  { %3464 = vmatmul.mubr.msk.bf16.gmra.mxu0 %vm1073_vm4, %v488_v38 }
 0x1de   :  { %3467 = vmatprep.mubr.msk.bf16.mxu0 %vm1073_vm4, %v489_v46 }
 0x1e5   :  { %3468 = vmatmul.mubr.msk.bf16.gmra.mxu0 %vm1073_vm4, %v490_v62 }
 0x1e6   :  { %3471 = vmatprep.mubr.msk.bf16.mxu0 %vm1073_vm4, %v491_v2 }
 0x1ed   :  { %3472 = vmatmul.mubr.msk.bf16.gmra.mxu0 %vm1073_vm4, %v492_v14 }
 0x1ee   :  { %3475 = vmatprep.mubr.msk.bf16.mxu0 %vm1073_vm4, %v493_v17 }
 0x1f5   :  { %3476 = vmatmul.mubr.msk.bf16.gmra.mxu0 %vm1073_vm4, %v494_v33 }
 0x206   :  { %v3257_v45 = vpop.f32.mrf.mxu1 }
 0x208   :  { %v720_v49 = vpop.f32.mrf.mxu1 }
 0x20a   :  { %v3258_v54 = vpop.f32.mrf.mxu1 }
 0x20c   :  { %v723_v59 = vpop.f32.mrf.mxu1 }
 0x20e   :  { %v3261_v1 = vpop.f32.mrf.mxu1 }
 0x210   :  { %v736_v6 = vpop.f32.mrf.mxu1 }
 0x212   :  { %v3262_v12 = vpop.f32.mrf.mxu1 }
 0x214   :  { %v739_v15 = vpop.f32.mrf.mxu1 }
 0x216   :  { %v3265_v19 = vpop.f32.mrf.mxu1 }
 0x218   :  { %v752_v28 = vpop.f32.mrf.mxu1 }
 0x21a   :  { %v3266_v34 = vpop.f32.mrf.mxu1 }
 0x21c   :  { %v755_v40 = vpop.f32.mrf.mxu1 }
 0x21d   :  { %v3293_v24 = vpop.f32.mrf.mxu0 }
 0x21e   :  { %v3269_v61 = vpop.f32.mrf.mxu1  ;;  %v959_v35 = vadd.f32 %v3293_v24, %v723_v59 }
 0x21f   :  { %v953_v38 = vpop.f32.mrf.mxu0 }
 0x220   :  { %v768_v7 = vpop.f32.mrf.mxu1  ;;  %v954_v46 = vadd.f32 %v953_v38, %v720_v49 }
 0x221   :  { %v3296_v53 = vpop.f32.mrf.mxu0 }
 0x222   :  { %v3270_v8 = vpop.f32.mrf.mxu1  ;;  %v969_v16 = vadd.f32 %v3296_v53, %v3258_v54 }
 0x223   :  { %v963_v47 = vpop.f32.mrf.mxu0 }
 0x224   :  { %v771_v25 = vpop.f32.mrf.mxu1  ;;  %v964_v62 = vadd.f32 %v3257_v45, %v963_v47 }
 0x225   :  { %v3299_v63 = vpop.f32.mrf.mxu0 }
 0x226   :  { %v4519_v39 = vpop.f32.mrf.mxu1  ;;  %v4521_v3 = vadd.f32 %v3299_v63, %v739_v15 }
 0x227   :  { %v973_v11 = vpop.f32.mrf.mxu0 }
 0x228   :  { %v784_v55 = vpop.f32.mrf.mxu1  ;;  %v974_v13 = vadd.f32 %v973_v11, %v736_v6 }
 0x229   :  { %v3302_v14 = vpop.f32.mrf.mxu0 }
 0x22a   :  { %v3274_v56 = vpop.f32.mrf.mxu1  ;;  %v4523_v29 = vadd.f32 %v3302_v14, %v3262_v12 }
 0x22b   :  { %v983_v32 = vpop.f32.mrf.mxu0 }
 0x22c   :  { %v787_v2 = vpop.f32.mrf.mxu1  ;;  %v984_v27 = vadd.f32 %v3261_v1, %v983_v32 }
 0x22d   :  { %v3305_v42 = vpop.f32.mrf.mxu0 }
 0x22e   :  { %v3277_v22 = vpop.f32.mrf.mxu1  ;;  %v4525_v54 = vadd.f32 %v3305_v42, %v755_v40 }
 0x22f   :  { %v993_v59 = vpop.f32.mrf.mxu0 }
 0x230   :  { %v800_v17 = vpop.f32.mrf.mxu1  ;;  %v4527_v24 = vadd.f32 %v993_v59, %v752_v28 }
 0x231   :  { %v3308_v38 = vpop.f32.mrf.mxu0 }
 0x232   :  { %v3278_v33 = vpop.f32.mrf.mxu1  ;;  %v4531_v6 = vadd.f32 %v3308_v38, %v3266_v34 }
 0x233   :  { %v1003_v12 = vpop.f32.mrf.mxu0 }
 0x234   :  { %v803_v49 = vpop.f32.mrf.mxu1  ;;  %v4535_v11 = vadd.f32 %v3265_v19, %v1003_v12 }
 0x235   :  { %v3311_v40 = vpop.f32.mrf.mxu0 }
 0x236   :  { %v3323_v45 = vpop.f32.mrf.mxu1  ;;  %v4539_v32 = vadd.f32 %v3311_v40, %v771_v25 }
 0x237   :  { %v4529_v15 = vadd.f32 %v3323_v45, %v803_v49  ;;  %v1013_v42 = vpop.f32.mrf.mxu0 }
 0x238   :  { %v1053_v53 = vpop.f32.mrf.mxu1  ;;  %v4543_v59 = vadd.f32 %v1013_v42, %v768_v7 }
 0x239   :  { %v4533_v47 = vadd.f32 %v1053_v53, %v800_v17  ;;  %v3314_v34 = vpop.f32.mrf.mxu0 }
 0x23a   :  { %v3326_v63 = vpop.f32.mrf.mxu1  ;;  %v4545_v17 = vadd.f32 %v3314_v34, %v3270_v8 }
 0x23b   :  { %v4537_v1 = vadd.f32 %v3326_v63, %v3278_v33  ;;  %v1023_v53 = vpop.f32.mrf.mxu0  ;;  %v4547_v33 = vld [vmem:[#allocation2] ss:$0 sm:$0xff] }
 0x23c   :  { %v1063_v14 = vpop.f32.mrf.mxu1  ;;  %v4549_v63 = vadd.f32 %v3269_v61, %v1023_v53 }
 0x23d   :  { %v4541_v28 = vadd.f32 %v3277_v22, %v1063_v14  ;;  %v3317_v22 = vpop.f32.mrf.mxu0 }
 0x23e   :  { %v3331_v49 = vpop.f32.mrf.mxu1  ;;  %v4554_v7 = vadd.f32 %v3317_v22, %v787_v2 }
 0x23f   :  { %v1245_v12 = vadd.f32 %v3331_v49, %v964_v62  ;;  %v1033_v0 = vpop.f32.mrf.mxu0 }
 0x240   :  { %v1148_v45 = vpop.f32.mrf.mxu1  ;;  %v4562_v49 = vadd.f32 %v1033_v0, %v784_v55 }
 0x241   :  { %v1243_v38 = vadd.f32 %v1148_v45, %v954_v46  ;;  %v4557_v46 = vadd.f32 %v4547_v33, %v1245_v12  ;;  %v3320_v34 = vpop.f32.mrf.mxu0 }
 0x242   :  { %v3332_v19 = vpop.f32.mrf.mxu1  ;;  %v4571_v2 = vadd.f32 %v3320_v34, %v3274_v56 }
 0x243   :  { %v4552_v25 = vadd.f32 %v4547_v33, %v1243_v38  ;;  %v1246_v14 = vadd.f32 %v3332_v19, %v969_v16  ;;  %v1043_v19 = vpop.f32.mrf.mxu0  ;;  %v1301_v0 = vsel %vm527_vm2, %v4557_v46, 0.0 }
 0x244   :  { %v1151_v40 = vpop.f32.mrf.mxu1 }
 0x245   :  { %v1244_v42 = vadd.f32 %v1151_v40, %v959_v35  ;;  %v1298_v61 = vsel %vm527_vm2, %v4552_v25, 0.0  ;;  %v4567_v16 = vadd.f32 %v4547_v33, %v1246_v14  ;;  %v4579_v40 = vadd.f32 %v4519_v39, %v1043_v19 }
 0x246   :  { %v3335_v8 = vpop.f32.mrf.mxu1 }
 0x247   :  { %v4560_v62 = vadd.f32 %v4547_v33, %v1244_v42  ;;  %v1249_v55 = vadd.f32 %v3335_v8, %v984_v27  ;;  %v4581_v42 = vpop.f32.mrf.mxu0  ;;  %v1303_v56 = vsel %vm527_vm2, %v4567_v16, 0.0 }
 0x248   :  { %v1164_v45 = vpop.f32.mrf.mxu1 }
 0x249   :  { %v1299_v35 = vsel %vm527_vm2, %v4560_v62, 0.0  ;;  %v1247_v38 = vadd.f32 %v1164_v45, %v974_v13  ;;  %v3363_v45 = vpop.f32.mrf.mxu0  ;;  %v4588_v8 = vadd.f32 %v4547_v33, %v1249_v55 }
 0x24a   :  { %v1300_v53 = vadd.f32 %v1299_v35, %v1298_v61  ;;  %v3336_v12 = vpop.f32.mrf.mxu1 }
 0x24b   :  { %v4576_v22 = vadd.f32 %v4547_v33, %v1247_v38  ;;  %v1250_v13 = vadd.f32 %v3336_v12, %v4523_v29 }
 0x24c   :  { %v1302_v14 = vadd.f32 %v1301_v0, %v1300_v53  ;;  %v1167_v60 = vpop.f32.mrf.mxu1  ;;  %v4595_v53 = vpop.f32.mrf.mxu0 }
 0x24d   :  { %v1248_v61 = vadd.f32 %v1167_v60, %v4521_v3  ;;  %v1305_v39 = vsel %vm527_vm2, %v4576_v22, 0.0  ;;  %v4598_v29 = vadd.f32 %v4547_v33, %v1250_v13 }
 0x24e   :  { %v1304_v34 = vadd.f32 %v1303_v56, %v1302_v14  ;;  %v3339_v27 = vpop.f32.mrf.mxu1  ;;  %v3364_v0 = vpop.f32.mrf.mxu0  ;;  %v1309_v14 = vsel %vm527_vm2, %v4588_v8, 0.0 }
 0x24f   :  { %v4593_v35 = vadd.f32 %v4547_v33, %v1248_v61  ;;  %v1253_v56 = vadd.f32 %v3339_v27, %v4535_v11 }
 0x250   :  { %v1306_v38 = vadd.f32 %v1305_v39, %v1304_v34  ;;  %v1180_v19 = vpop.f32.mrf.mxu1  ;;  %v4609_v45 = vpop.f32.mrf.mxu0  ;;  %v1311_v39 = vsel %vm527_vm2, %v4598_v29, 0.0 }
 0x251   :  { %v1307_v60 = vsel %vm527_vm2, %v4593_v35, 0.0  ;;  %v1251_v3 = vadd.f32 %v1180_v19, %v4527_v24  ;;  %v4616_v52 = vadd.f32 %v4547_v33, %v1253_v56 }
 0x252   :  { %v1308_v12 = vadd.f32 %v1307_v60, %v1306_v38  ;;  %v3340_v55 = vpop.f32.mrf.mxu1  ;;  %v3367_v60 = vpop.f32.mrf.mxu0 }
 0x253   :  { %v4607_v61 = vadd.f32 %v4547_v33, %v1251_v3  ;;  %v1254_v24 = vadd.f32 %v3340_v55, %v4531_v6 }
 0x254   :  { %v1310_v34 = vadd.f32 %v1309_v14, %v1308_v12  ;;  %v1183_v13 = vpop.f32.mrf.mxu1  ;;  %v1620_v12 = vpop.f32.mrf.mxu0 }
 0x255   :  { %v1252_v38 = vadd.f32 %v1183_v13, %v4525_v54  ;;  %v1313_v11 = vsel %vm527_vm2, %v4607_v61, 0.0  ;;  %v4624_v51 = vadd.f32 %v4547_v33, %v1254_v24  ;;  %v1317_v13 = vsel %vm527_vm2, %v4616_v52, 0.0 }
 0x256   :  { %v1312_v19 = vadd.f32 %v1311_v39, %v1310_v34  ;;  %v3343_v0 = vpop.f32.mrf.mxu1  ;;  %v3368_v56 = vpop.f32.mrf.mxu0 }
 0x257   :  { %v4621_v27 = vadd.f32 %v4547_v33, %v1252_v38  ;;  %v1257_v39 = vadd.f32 %v3343_v0, %v4549_v63 }
 0x258   :  { %v1314_v3 = vadd.f32 %v1313_v11, %v1312_v19  ;;  %v1196_v14 = vpop.f32.mrf.mxu1  ;;  %v1625_v60 = vpop.f32.mrf.mxu0  ;;  %v1319_v11 = vsel %vm527_vm2, %v4624_v51, 0.0 }
 0x259   :  { %v1315_v54 = vsel %vm527_vm2, %v4621_v27, 0.0  ;;  %v1255_v6 = vadd.f32 %v1196_v14, %v4543_v59  ;;  %v4640_v56 = vadd.f32 %v4547_v33, %v1257_v39 }
 0x25a   :  { %v1316_v55 = vadd.f32 %v1315_v54, %v1314_v3  ;;  %v3344_v34 = vpop.f32.mrf.mxu1  ;;  %v3371_v14 = vpop.f32.mrf.mxu0 }
 0x25b   :  { %v4633_v38 = vadd.f32 %v4547_v33, %v1255_v6  ;;  %v1258_v41 = vadd.f32 %v3344_v34, %v4545_v17 }
 0x25c   :  { %v1318_v19 = vadd.f32 %v1317_v13, %v1316_v55  ;;  %v1199_v24 = vpop.f32.mrf.mxu1  ;;  %v1628_v55 = vpop.f32.mrf.mxu0 }
 0x25d   :  { %v1256_v59 = vadd.f32 %v1199_v24, %v4539_v32  ;;  %v1321_v63 = vsel %vm527_vm2, %v4633_v38, 0.0  ;;  %v4648_v26 = vadd.f32 %v4547_v33, %v1258_v41  ;;  %3405 = vmatprep.subr.mxu1 %v1628_v55  ;;  %v1325_v24 = vsel %vm527_vm2, %v4640_v56, 0.0 }
 0x25e   :  { %v1320_v3 = vadd.f32 %v1319_v11, %v1318_v19  ;;  %v3347_v54 = vpop.f32.mrf.mxu1  ;;  %v3372_v39 = vpop.f32.mrf.mxu0  ;;  %3406 = vmatpush3.msra.mxu1 %v1628_v55 }
 0x25f   :  { %v4645_v0 = vadd.f32 %v4547_v33, %v1256_v59  ;;  %v1261_v11 = vadd.f32 %v3347_v54, %v4579_v40  ;;  %3407 = vmatprep.subr.mxu1 %v1625_v60 }
 0x260   :  { %v1322_v6 = vadd.f32 %v1321_v63, %v1320_v3  ;;  %v1212_v13 = vpop.f32.mrf.mxu1  ;;  %3408 = vmatpush3.msra.mxu1 %v1625_v60 }
 0x261   :  { %v1323_v32 = vsel %vm527_vm2, %v4645_v0, 0.0  ;;  %v1259_v17 = vadd.f32 %v1212_v13, %v4562_v49  ;;  %v1327_v49 = vsel %vm527_vm2, %v4648_v26, 0.0  ;;  %3409 = vmatprep.subr.mxu1 %v1620_v12  ;;  %v4664_v40 = vadd.f32 %v4547_v33, %v1261_v11 }
 0x262   :  { %v1324_v34 = vadd.f32 %v1323_v32, %v1322_v6  ;;  %v3348_v19 = vpop.f32.mrf.mxu1  ;;  %3410 = vmatpush3.msra.mxu1 %v1620_v12 }
 0x263   :  { %v4657_v59 = vadd.f32 %v4547_v33, %v1259_v17  ;;  %v1262_v14 = vadd.f32 %v3348_v19, %v4571_v2  ;;  %3411 = vmatprep.subr.mxu1 %v4609_v45 }
 0x264   :  { %v1326_v41 = vadd.f32 %v1325_v24, %v1324_v34  ;;  %v1215_v3 = vpop.f32.mrf.mxu1  ;;  %3412 = vmatpush3.msra.mxu1 %v4609_v45  ;;  %v1333_v45 = vsel %vm527_vm2, %v4664_v40, 0.0 }
 0x265   :  { %v1260_v63 = vadd.f32 %v1215_v3, %v4554_v7  ;;  %v1329_v54 = vsel %vm527_vm2, %v4657_v59, 0.0  ;;  %v4674_v7 = vadd.f32 %v4547_v33, %v1262_v14  ;;  %3413 = vmatprep.subr.mxu1 %v4595_v53 }
 0x266   :  { %v1328_v6 = vadd.f32 %v1327_v49, %v1326_v41  ;;  %v3351_v55 = vpop.f32.mrf.mxu1  ;;  %3414 = vmatpush3.msra.mxu1 %v4595_v53 }
 0x267   :  { %v4669_v60 = vadd.f32 %v4547_v33, %v1260_v63  ;;  %v1265_v32 = vadd.f32 %v3351_v55, %v4541_v28  ;;  %3415 = vmatprep.subr.mxu1 %v4581_v42  ;;  %v1335_v28 = vsel %vm527_vm2, %v4674_v7, 0.0 }
 0x268   :  { %v1330_v13 = vadd.f32 %v1329_v54, %v1328_v6  ;;  %v1228_v2 = vpop.f32.mrf.mxu1  ;;  %3416 = vmatpush3.msra.mxu1 %v4581_v42 }
 0x269   :  { %v1331_v12 = vsel %vm527_vm2, %v4669_v60, 0.0  ;;  %v1263_v17 = vadd.f32 %v1228_v2, %v4533_v47  ;;  %v1296_v53 = vadd.f32 %v4547_v33, %v1265_v32  ;;  %3418 = vmatmul.mubr.msk.f32.vlgmr.msra.gmra.mxu1 %vm189_vm1, %v4147_v21 }
 0x26a   :  { %v1332_v34 = vadd.f32 %v1331_v12, %v1330_v13  ;;  %v3352_v39 = vpop.f32.mrf.mxu1  ;;  %3420 = vmatprep.mubr.msk.f32.mxu1 %vm189_vm1, %v4154_v23  ;;  %v5698_v12 = vld [vmem:[#allocation20_spill] sm:$0xff] }
 0x26b   :  { %v4685_v19 = vadd.f32 %v4547_v33, %v1263_v17  ;;  %v1266_v24 = vadd.f32 %v3352_v39, %v4537_v1  ;;  %v5683_v1 = vmov 0.0   ;;  %v1341_v6 = vsel %vm527_vm2, %v1296_v53, 0.0  ;;  %v5699_v39 = vld [vmem:[#allocation21_spill] sm:$0xff] }
 0x26c   :  { %v1334_v11 = vadd.f32 %v1333_v45, %v1332_v34  ;;  %v1231_v47 = vpop.f32.mrf.mxu1  ;;  %2632 = vmatprep.subr.mxu1 %v5683_v1 }
 0x26d   :  { %v1337_v41 = vsel %vm527_vm2, %v4685_v19, 0.0  ;;  %v1264_v3 = vadd.f32 %v1231_v47, %v4529_v15  ;;  %v1297_v42 = vadd.f32 %v4547_v33, %v1266_v24  ;;  %3421 = vmatmul.mubr.msk.f32.gmra.mxu1 %vm189_vm1, %v4175_v30  ;;  %v5700_v24 = vld [vmem:[#allocation22_spill] sm:$0xff] }
 0x26e   :  { %v1336_v49 = vadd.f32 %v1335_v28, %v1334_v11  ;;  %3423 = vmatprep.mubr.msk.f32.mxu1 %vm189_vm1, %v4183_v31 }
 0x26f   :  { %v1295_v14 = vadd.f32 %v4547_v33, %v1264_v3  ;;  %v1343_v21 = vsel %vm527_vm2, %v1297_v42, 0.0 }
 0x270   :  { %v1338_v63 = vadd.f32 %v1337_v41, %v1336_v49  ;;  %v5701_v41 = vld [vmem:[#allocation23_spill] sm:$0xff] }
 0x271   :  { %v1339_v55 = vsel %vm527_vm2, %v1295_v14, 0.0  ;;  %3424 = vmatmul.mubr.msk.f32.gmra.mxu1 %vm189_vm1, %v4199_v36 }
 0x272   :  { %v1340_v15 = vadd.f32 %v1339_v55, %v1338_v63  ;;  %3426 = vmatprep.mubr.msk.f32.mxu1 %vm189_vm1, %v4206_v37  ;;  %v4842_v55 = vpop.f32.mrf.mxu0 }
 0x274   :  { %v1342_v54 = vadd.f32 %v1341_v6, %v1340_v15 }
 0x275   :  { %3427 = vmatmul.mubr.msk.f32.gmra.mxu1 %vm189_vm1, %v4226_v43 }
 0x276   :  { %v1344_v23 = vadd.f32 %v1343_v21, %v1342_v54  ;;  %3429 = vmatprep.mubr.msk.f32.mxu1 %vm189_vm1, %v4233_v44 }
 0x278   :  { %v1345_v33 = vrot.slane %v1344_v23, 4 }
 0x279   :  { %3430 = vmatmul.mubr.msk.f32.gmra.mxu1 %vm189_vm1, %v4253_v48 }
 0x27a   :  { %v1346_v13 = vadd.f32 %v1345_v33, %v1344_v23  ;;  %3432 = vmatprep.mubr.msk.f32.mxu1 %vm189_vm1, %v4258_v50 }
 0x27c   :  { %v1347_v30 = vrot.slane %v1346_v13, 2 }
 0x27d   :  { %3433 = vmatmul.mubr.msk.f32.gmra.mxu1 %vm189_vm1, %v4285_v57 }
 0x27e   :  { %v1348_v31 = vadd.f32 %v1347_v30, %v1346_v13  ;;  %3435 = vmatprep.mubr.msk.f32.mxu1 %vm189_vm1, %v4292_v58  ;;  %v4850_v30 = vpop.f32.mrf.mxu0 }
 0x280   :  { %v1349_v36 = vrot.slane %v1348_v31, 1 }
 0x281   :  { %3436 = vmatmul.mubr.msk.f32.gmra.mxu1 %vm189_vm1, %v4322_v4 }
 0x282   :  { %v1350_v37 = vadd.f32 %v1349_v36, %v1348_v31  ;;  %3438 = vmatprep.mubr.msk.f32.mxu1 %vm189_vm1, %v4329_v5 }
 0x284   :  { %v1352_v43 = vmul.f32 0.0052083335, %v1350_v37 }
 0x285   :  { %3439 = vmatmul.mubr.msk.f32.gmra.mxu1 %vm189_vm1, %v4344_v9 }
 0x286   :  { %v4729_v44 = vsub.f32 %v4552_v25, %v1352_v43  ;;  %v4732_v48 = vsub.f32 %v4560_v62, %v1352_v43  ;;  %v4735_v50 = vsub.f32 %v4557_v46, %v1352_v43  ;;  %v4738_v2 = vsub.f32 %v4567_v16, %v1352_v43  ;;  %3441 = vmatprep.mubr.msk.f32.mxu1 %vm189_vm1, %v4351_v10 }
 0x287   :  { %v4743_v57 = vsub.f32 %v4576_v22, %v1352_v43  ;;  %v4746_v58 = vsub.f32 %v4593_v35, %v1352_v43  ;;  %v4749_v4 = vsub.f32 %v4588_v8, %v1352_v43  ;;  %v4752_v25 = vsub.f32 %v4598_v29, %v1352_v43 }
 0x288   :  { %5684 = vst [vmem:[#allocation25_spill] sm:$0xff] %v4729_v44  ;;  %5685 = vst [vmem:[#allocation26_spill] sm:$0xff] %v4732_v48  ;;  %v4755_v46 = vsub.f32 %v4607_v61, %v1352_v43  ;;  %v4758_v62 = vsub.f32 %v4621_v27, %v1352_v43  ;;  %v4761_v5 = vsub.f32 %v4616_v52, %v1352_v43 }
 0x289   :  { %5686 = vst [vmem:[#allocation27_spill] sm:$0xff] %v4735_v50  ;;  %5687 = vst [vmem:[#allocation28_spill] sm:$0xff] %v4738_v2  ;;  %v4764_v16 = vsub.f32 %v4624_v51, %v1352_v43  ;;  %v4767_v22 = vsub.f32 %v4633_v38, %v1352_v43  ;;  %v4770_v8 = vsub.f32 %v4645_v0, %v1352_v43  ;;  %3442 = vmatmul.mubr.msk.f32.gmra.mxu1 %vm189_vm1, %v4374_v18 }
 0x28a   :  { %5688 = vst [vmem:[#allocation29_spill] sm:$0xff] %v4743_v57  ;;  %5689 = vst [vmem:[#allocation30_spill] sm:$0xff] %v4746_v58  ;;  %v4773_v35 = vsub.f32 %v4640_v56, %v1352_v43  ;;  %v4776_v29 = vsub.f32 %v4648_v26, %v1352_v43  ;;  %v4781_v52 = vsub.f32 %v4657_v59, %v1352_v43  ;;  %3444 = vmatprep.mubr.msk.f32.mxu1 %vm189_vm1, %v4379_v20 }
 0x28b   :  { %5690 = vst [vmem:[#allocation31_spill] sm:$0xff] %v4749_v4  ;;  %v4784_v51 = vsub.f32 %v4669_v60, %v1352_v43  ;;  %v4787_v61 = vsub.f32 %v4664_v40, %v1352_v43  ;;  %v4790_v27 = vsub.f32 %v4674_v7, %v1352_v43  ;;  %v4795_v26 = vsub.f32 %v4685_v19, %v1352_v43  ;;  %v5697_v40 = vld [vmem:[#allocation24_spill] sm:$0xff] }
 0x28c   :  { %5691 = vst [vmem:[#allocation32_spill] sm:$0xff] %v4781_v52  ;;  %v4797_v38 = vsub.f32 %v1295_v14, %v1352_v43  ;;  %v4799_v9 = vsub.f32 %v1296_v53, %v1352_v43  ;;  %v4801_v56 = vsub.f32 %v1297_v42, %v1352_v43  ;;  %v1377_v0 = vmul.f32 %v4729_v44, %v4729_v44 }
 0x28d   :  { %5692 = vst [vmem:[#allocation33_spill] sm:$0xff] %v4784_v51  ;;  %5693 = vst [vmem:[#allocation34_spill] sm:$0xff] %v4787_v61  ;;  %v1378_v59 = vmul.f32 %v4732_v48, %v4732_v48  ;;  %v1379_v10 = vmul.f32 %v4735_v50, %v4735_v50  ;;  %3445 = vmatmul.mubr.msk.f32.gmra.mxu1 %vm189_vm1, %v5697_v40  ;;  %v1380_v60 = vmul.f32 %v4738_v2, %v4738_v2 }
 0x28e   :  { %5694 = vst [vmem:[#allocation35_spill] sm:$0xff] %v4790_v27  ;;  %5695 = vst [vmem:[#allocation36_spill] sm:$0xff] %v4799_v9  ;;  %v1401_v18 = vsel %vm527_vm2, %v1377_v0, 0.0  ;;  %3447 = vmatprep.mubr.msk.f32.mxu1 %vm189_vm1, %v5698_v12  ;;  %v1381_v20 = vmul.f32 %v4743_v57, %v4743_v57  ;;  %v1382_v45 = vmul.f32 %v4746_v58, %v4746_v58 }
 0x28f   :  { %5696 = vst [vmem:[#allocation37_spill] sm:$0xff] %v4801_v56  ;;  %v1402_v7 = vsel %vm527_vm2, %v1378_v59, 0.0  ;;  %v1404_v17 = vsel %vm527_vm2, %v1379_v10, 0.0  ;;  %v1406_v19 = vsel %vm527_vm2, %v1380_v60, 0.0  ;;  %v1383_v47 = vmul.f32 %v4749_v4, %v4749_v4  ;;  %v4858_v10 = vpop.f32.mrf.mxu0 }
 0x290   :  { %v1403_v32 = vadd.f32 %v1402_v7, %v1401_v18  ;;  %v1408_v28 = vsel %vm527_vm2, %v1381_v20, 0.0  ;;  %v1384_v3 = vmul.f32 %v4752_v25, %v4752_v25  ;;  %v1410_v49 = vsel %vm527_vm2, %v1382_v45, 0.0 }
 0x291   :  { %3448 = vmatmul.mubr.msk.f32.gmra.mxu1 %vm189_vm1, %v5699_v39  ;;  %v1385_v14 = vmul.f32 %v4755_v46, %v4755_v46  ;;  %v1412_v63 = vsel %vm527_vm2, %v1383_v47, 0.0  ;;  %v1386_v15 = vmul.f32 %v4758_v62, %v4758_v62  ;;  %v1387_v23 = vmul.f32 %v4761_v5, %v4761_v5  ;;  %v4866_v20 = vpop.f32.mrf.mxu0 }
 0x292   :  { %v1405_v34 = vadd.f32 %v1404_v17, %v1403_v32  ;;  %3450 = vmatprep.mubr.msk.f32.mxu1 %vm189_vm1, %v5700_v24  ;;  %v1414_v21 = vsel %vm527_vm2, %v1384_v3, 0.0  ;;  %v1388_v31 = vmul.f32 %v4764_v16, %v4764_v16  ;;  %v1389_v43 = vmul.f32 %v4767_v22, %v4767_v22 }
 0x293   :  { %v1416_v33 = vsel %vm527_vm2, %v1385_v14, 0.0  ;;  %v1418_v36 = vsel %vm527_vm2, %v1386_v15, 0.0  ;;  %v1420_v0 = vsel %vm527_vm2, %v1387_v23, 0.0  ;;  %v1390_v40 = vmul.f32 %v4770_v8, %v4770_v8 }
 0x294   :  { %v1407_v11 = vadd.f32 %v1406_v19, %v1405_v34  ;;  %v1422_v60 = vsel %vm527_vm2, %v1388_v31, 0.0  ;;  %v1391_v7 = vmul.f32 %v4773_v35, %v4773_v35  ;;  %v1424_v12 = vsel %vm527_vm2, %v1389_v43, 0.0 }
 0x295   :  { %3451 = vmatmul.mubr.msk.f32.gmra.mxu1 %vm189_vm1, %v5701_v41  ;;  %v1392_v17 = vmul.f32 %v4776_v29, %v4776_v29  ;;  %v1426_v34 = vsel %vm527_vm2, %v1390_v40, 0.0  ;;  %v1393_v45 = vmul.f32 %v4781_v52, %v4781_v52  ;;  %v1394_v47 = vmul.f32 %v4784_v51, %v4784_v51 }
 0x296   :  { %v1409_v53 = vadd.f32 %v1408_v28, %v1407_v11  ;;  %v1428_v19 = vsel %vm527_vm2, %v1391_v7, 0.0  ;;  %v4874_v11 = vpop.f32.mrf.mxu0  ;;  %v1395_v41 = vmul.f32 %v4787_v61, %v4787_v61  ;;  %v1396_v14 = vmul.f32 %v4790_v27, %v4790_v27 }
 0x297   :  { %v1430_v28 = vsel %vm527_vm2, %v1392_v17, 0.0  ;;  %v1432_v3 = vsel %vm527_vm2, %v1393_v45, 0.0  ;;  %v1397_v15 = vmul.f32 %v4795_v26, %v4795_v26 }
 0x298   :  { %v1411_v42 = vadd.f32 %v1410_v49, %v1409_v53 }
 0x29a   :  { %v1413_v6 = vadd.f32 %v1412_v63, %v1411_v42  ;;  %v4882_v42 = vpop.f32.mrf.mxu0  ;;  %v1434_v63 = vsel %vm527_vm2, %v1394_v47, 0.0 }
 0x29c   :  { %v1415_v54 = vadd.f32 %v1414_v21, %v1413_v6  ;;  %v1436_v21 = vsel %vm527_vm2, %v1395_v41, 0.0  ;;  %v4890_v23 = vpop.f32.mrf.mxu0 }
 0x29e   :  { %v1417_v13 = vadd.f32 %v1416_v33, %v1415_v54  ;;  %v1398_v33 = vmul.f32 %v4797_v38, %v4797_v38 }
 0x2a0   :  { %v1419_v37 = vadd.f32 %v1418_v36, %v1417_v13  ;;  %v1438_v13 = vsel %vm527_vm2, %v1396_v14, 0.0  ;;  %v1399_v36 = vmul.f32 %v4799_v9, %v4799_v9  ;;  %v1442_v40 = vsel %vm527_vm2, %v1398_v33, 0.0 }
 0x2a2   :  { %v1421_v59 = vadd.f32 %v1420_v0, %v1419_v37  ;;  %v1440_v37 = vsel %vm527_vm2, %v1397_v15, 0.0  ;;  %v4898_v0 = vpop.f32.mrf.mxu0 }
 0x2a4   :  { %v1423_v18 = vadd.f32 %v1422_v60, %v1421_v59  ;;  %v1400_v59 = vmul.f32 %v4801_v56, %v4801_v56  ;;  %v4965_v56 = vld [vmem:[#allocation4] ss:$0 sm:$0xff] }
 0x2a6   :  { %v1425_v32 = vadd.f32 %v1424_v12, %v1423_v18  ;;  %v1444_v18 = vsel %vm527_vm2, %v1399_v36, 0.0  ;;  %v4904_v12 = vpop.f32.mrf.mxu0 }
 0x2a8   :  { %v1427_v39 = vadd.f32 %v1426_v34, %v1425_v32  ;;  %v1446_v32 = vsel %vm527_vm2, %v1400_v59, 0.0 }
 0x2aa   :  { %v1429_v24 = vadd.f32 %v1428_v19, %v1427_v39  ;;  %v4907_v39 = vpop.f32.mrf.mxu0 }
 0x2ac   :  { %v1431_v53 = vadd.f32 %v1430_v28, %v1429_v24  ;;  %v4909_v24 = vpop.f32.mrf.mxu0 }
 0x2ae   :  { %v1433_v49 = vadd.f32 %v1432_v3, %v1431_v53  ;;  %v4911_v53 = vpop.f32.mrf.mxu0 }
 0x2b0   :  { %v1435_v6 = vadd.f32 %v1434_v63, %v1433_v49  ;;  %v4913_v49 = vpop.f32.mrf.mxu0 }
 0x2b2   :  { %v1437_v54 = vadd.f32 %v1436_v21, %v1435_v6  ;;  %v4915_v63 = vpop.f32.mrf.mxu0 }
 0x2b4   :  { %v1439_v31 = vadd.f32 %v1438_v13, %v1437_v54  ;;  %v4917_v6 = vpop.f32.mrf.mxu0 }
 0x2b6   :  { %v1441_v43 = vadd.f32 %v1440_v37, %v1439_v31  ;;  %v4919_v15 = vpop.f32.mrf.mxu0 }
 0x2b8   :  { %v1443_v60 = vadd.f32 %v1442_v40, %v1441_v43  ;;  %v4921_v21 = vpop.f32.mrf.mxu0 }
 0x2ba   :  { %v1445_v7 = vadd.f32 %v1444_v18, %v1443_v60  ;;  %v4929_v13 = vpop.f32.mrf.mxu0 }
 0x2bc   :  { %v1447_v17 = vadd.f32 %v1446_v32, %v1445_v7  ;;  %v4939_v37 = vpop.f32.mrf.mxu0 }
 0x2be   :  { %v1448_v34 = vrot.slane %v1447_v17, 4  ;;  %v4945_v59 = vpop.f32.mrf.mxu0 }
 0x2c0   :  { %v1449_v45 = vadd.f32 %v1448_v34, %v1447_v17 }
 0x2c2   :  { %v1450_v19 = vrot.slane %v1449_v45, 2 }
 0x2c4   :  { %v1451_v47 = vadd.f32 %v1450_v19, %v1449_v45 }
 0x2c6   :  { %v1452_v28 = vrot.slane %v1451_v47, 1 }
 0x2c8   :  { %v1453_v41 = vadd.f32 %v1452_v28, %v1451_v47 }
 0x2ca   :  { %v1454_v3 = vmul.f32 0.0052083335, %v1453_v41 }
 0x2cc   :  { %v1455_v14 = vadd.f32 1e-05, %v1454_v3 }
 0x2ce   :  { %3519 = vrsqrt.f32 %v1455_v14 }
 0x2db   :  { %v4923_v54 = vpop.eup %3519 }
 0x2dc   :  { %v4927_v33 = vmul.f32 %v4923_v54, %v4776_v29  ;;  %v4933_v31 = vmul.f32 %v4923_v54, %v4773_v35  ;;  %v4937_v36 = vmul.f32 %v4923_v54, %v4770_v8  ;;  %v4943_v43 = vmul.f32 %v4923_v54, %v4767_v22  ;;  %v4947_v29 = vpop.f32.mrf.mxu0 }
 0x2de   :  { %v4949_v40 = vpop.f32.mrf.mxu0 }
 0x2e0   :  { %v4951_v60 = vpop.f32.mrf.mxu0 }
 0x2e2   :  { %v4953_v35 = vpop.f32.mrf.mxu0 }
 0x2e4   :  { %v3457_v18 = vpop.f32.mrf.mxu0 }
 0x2e6   :  { %v2016_v7 = vpop.f32.mrf.mxu0 }
 0x2e8   :  { %v3458_v8 = vpop.f32.mrf.mxu0 }
 0x2ea   :  { %v2019_v32 = vpop.f32.mrf.mxu0 }
 0x2ec   :  { %v3461_v17 = vpop.f32.mrf.mxu0 }
 0x2ee   :  { %v2032_v34 = vpop.f32.mrf.mxu0 }
 0x2f0   :  { %v3462_v45 = vpop.f32.mrf.mxu0 }
 0x2f2   :  { %v2035_v19 = vpop.f32.mrf.mxu0 }
 0x2f4   :  { %v4955_v22 = vpop.f32.mrf.mxu0 }
 0x2f6   :  { %v2048_v47 = vpop.f32.mrf.mxu0 }
 0x2f8   :  { %v4957_v28 = vpop.f32.mrf.mxu0 }
 0x2fa   :  { %v2051_v41 = vpop.f32.mrf.mxu0 }
 0x2fc   :  { %v4959_v3 = vpop.f32.mrf.mxu0 }
 0x2fe   :  { %v4962_v51 = vpop.f32.mrf.mxu0 }
 0x300   :  { %v4968_v57 = vpop.f32.mrf.mxu0 }
 0x329   :  { %v3419_v14 = vpop.f32.mrf.mxu1 }
 0x32a   :  { %v1865_v1 = vadd.f32 %v3419_v14, %v4866_v20 }
 0x32b   :  { %v1859_v52 = vpop.f32.mrf.mxu1 }
 0x32c   :  { %v1860_v61 = vadd.f32 %v1859_v52, %v4850_v30  ;;  %v2112_v44 = vadd.f32 %v2019_v32, %v1865_v1 }
 0x32d   :  { %v3422_v27 = vpop.f32.mrf.mxu1 }
 0x32e   :  { %v2111_v48 = vadd.f32 %v2016_v7, %v1860_v61  ;;  %v1875_v50 = vadd.f32 %v3422_v27, %v4858_v10  ;;  %v4974_v20 = vadd.f32 %v4965_v56, %v2112_v44  ;;  %v2067_v7 = vpop.f32.mrf.mxu0 }
 0x32f   :  { %v1869_v2 = vpop.f32.mrf.mxu1 }
 0x330   :  { %v4971_v58 = vadd.f32 %v4965_v56, %v2111_v48  ;;  %v2114_v14 = vadd.f32 %v3458_v8, %v1875_v50  ;;  %v1870_v9 = vadd.f32 %v4842_v55, %v1869_v2  ;;  %v2167_v48 = vsel %vm527_vm2, %v4974_v20, 0.0  ;;  %v4994_v4 = vpop.f32.mrf.mxu0 }
 0x331   :  { %v3425_v52 = vpop.f32.mrf.mxu1 }
 0x332   :  { %v2166_v1 = vsel %vm527_vm2, %v4971_v58, 0.0  ;;  %v2113_v30 = vadd.f32 %v3457_v18, %v1870_v9  ;;  %v1885_v61 = vadd.f32 %v3425_v52, %v4898_v0  ;;  %v4981_v27 = vadd.f32 %v4965_v56, %v2114_v14 }
 0x333   :  { %v1879_v10 = vpop.f32.mrf.mxu1  ;;  %v2168_v55 = vadd.f32 %v2167_v48, %v2166_v1 }
 0x334   :  { %v4986_v44 = vadd.f32 %v4965_v56, %v2113_v30  ;;  %v1880_v50 = vadd.f32 %v1879_v10, %v4882_v42  ;;  %v2116_v2 = vadd.f32 %v2035_v19, %v1885_v61  ;;  %v2171_v32 = vsel %vm527_vm2, %v4981_v27, 0.0 }
 0x335   :  { %v3428_v8 = vpop.f32.mrf.mxu1 }
 0x336   :  { %v2169_v9 = vsel %vm527_vm2, %v4986_v44, 0.0  ;;  %v2115_v0 = vadd.f32 %v2032_v34, %v1880_v50  ;;  %v1895_v18 = vadd.f32 %v3428_v8, %v4890_v23  ;;  %v5000_v42 = vadd.f32 %v4965_v56, %v2116_v2 }
 0x337   :  { %v2170_v14 = vadd.f32 %v2169_v9, %v2168_v55  ;;  %v1889_v52 = vpop.f32.mrf.mxu1  ;;  %v2080_v9 = vpop.f32.mrf.mxu0 }
 0x338   :  { %v4997_v30 = vadd.f32 %v4965_v56, %v2115_v0  ;;  %v2118_v19 = vadd.f32 %v3462_v45, %v1895_v18  ;;  %v1890_v1 = vadd.f32 %v4874_v11, %v1889_v52  ;;  %v2175_v2 = vsel %vm527_vm2, %v5000_v42, 0.0 }
 0x339   :  { %v2172_v61 = vadd.f32 %v2171_v32, %v2170_v14  ;;  %v3431_v34 = vpop.f32.mrf.mxu1 }
 0x33a   :  { %v2173_v23 = vsel %vm527_vm2, %v4997_v30, 0.0  ;;  %v2117_v10 = vadd.f32 %v3461_v17, %v1890_v1  ;;  %v1905_v48 = vadd.f32 %v3431_v34, %v4911_v53  ;;  %v5007_v55 = vadd.f32 %v4965_v56, %v2118_v19 }
 0x33b   :  { %v2174_v50 = vadd.f32 %v2173_v23, %v2172_v61  ;;  %v1899_v8 = vpop.f32.mrf.mxu1  ;;  %v3474_v61 = vpop.f32.mrf.mxu0 }
 0x33c   :  { %v5012_v45 = vadd.f32 %v4965_v56, %v2117_v10  ;;  %v1900_v11 = vadd.f32 %v1899_v8, %v4907_v39  ;;  %v2120_v0 = vadd.f32 %v2051_v41, %v1905_v48  ;;  %v2179_v52 = vsel %vm527_vm2, %v5007_v55, 0.0 }
 0x33d   :  { %v2176_v18 = vadd.f32 %v2175_v2, %v2174_v50  ;;  %v3434_v32 = vpop.f32.mrf.mxu1 }
 0x33e   :  { %v2177_v53 = vsel %vm527_vm2, %v5012_v45, 0.0  ;;  %v2119_v17 = vadd.f32 %v2048_v47, %v1900_v11  ;;  %v1915_v14 = vadd.f32 %v3434_v32, %v4909_v24  ;;  %v5024_v39 = vadd.f32 %v4965_v56, %v2120_v0  ;;  %v2083_v0 = vpop.f32.mrf.mxu0 }
 0x33f   :  { %v2178_v19 = vadd.f32 %v2177_v53, %v2176_v18  ;;  %v1909_v1 = vpop.f32.mrf.mxu1 }
 0x340   :  { %v5021_v34 = vadd.f32 %v4965_v56, %v2119_v17  ;;  %v2122_v41 = vadd.f32 %v4957_v28, %v1915_v14  ;;  %v1910_v23 = vadd.f32 %v4904_v12, %v1909_v1  ;;  %v2183_v28 = vsel %vm527_vm2, %v5024_v39, 0.0 }
 0x341   :  { %v2180_v10 = vadd.f32 %v2179_v52, %v2178_v19  ;;  %v3437_v47 = vpop.f32.mrf.mxu1 }
 0x342   :  { %v2181_v24 = vsel %vm527_vm2, %v5021_v34, 0.0  ;;  %v2121_v48 = vadd.f32 %v4955_v22, %v1910_v23  ;;  %v1925_v50 = vadd.f32 %v3437_v47, %v4919_v15  ;;  %v5033_v2 = vadd.f32 %v4965_v56, %v2122_v41  ;;  %v3477_v41 = vpop.f32.mrf.mxu0 }
 0x343   :  { %v2182_v8 = vadd.f32 %v2181_v24, %v2180_v10  ;;  %v1919_v11 = vpop.f32.mrf.mxu1 }
 0x344   :  { %v5038_v12 = vadd.f32 %v4965_v56, %v2121_v48  ;;  %v1920_v18 = vadd.f32 %v1919_v11, %v4915_v63  ;;  %v2124_v32 = vadd.f32 %v2067_v7, %v1925_v50  ;;  %v2187_v52 = vsel %vm527_vm2, %v5033_v2, 0.0 }
 0x345   :  { %v2184_v53 = vadd.f32 %v2183_v28, %v2182_v8  ;;  %v3440_v17 = vpop.f32.mrf.mxu1  ;;  %v2096_v28 = vpop.f32.mrf.mxu0 }
 0x346   :  { %v2185_v15 = vsel %vm527_vm2, %v5038_v12, 0.0  ;;  %v2123_v22 = vadd.f32 %v4962_v51, %v1920_v18  ;;  %v1935_v14 = vadd.f32 %v3440_v17, %v4917_v6  ;;  %v5051_v63 = vadd.f32 %v4965_v56, %v2124_v32 }
 0x347   :  { %v2186_v19 = vadd.f32 %v2185_v15, %v2184_v53  ;;  %v1929_v1 = vpop.f32.mrf.mxu1 }
 0x348   :  { %v5048_v23 = vadd.f32 %v4965_v56, %v2123_v22  ;;  %v2126_v7 = vadd.f32 %v4968_v57, %v1935_v14  ;;  %v1930_v10 = vadd.f32 %v4913_v49, %v1929_v1  ;;  %v2191_v57 = vsel %vm527_vm2, %v5051_v63, 0.0 }
 0x349   :  { %v2188_v47 = vadd.f32 %v2187_v52, %v2186_v19  ;;  %v3443_v51 = vpop.f32.mrf.mxu1  ;;  %v3478_v19 = vpop.f32.mrf.mxu0 }
 0x34a   :  { %v2189_v6 = vsel %vm527_vm2, %v5048_v23, 0.0  ;;  %v2125_v24 = vadd.f32 %v4959_v3, %v1930_v10  ;;  %v1945_v48 = vadd.f32 %v3443_v51, %v4945_v59  ;;  %v5060_v8 = vadd.f32 %v4965_v56, %v2126_v7 }
 0x34b   :  { %v2190_v50 = vadd.f32 %v2189_v6, %v2188_v47  ;;  %v1939_v11 = vpop.f32.mrf.mxu1 }
 0x34c   :  { %v5065_v49 = vadd.f32 %v4965_v56, %v2125_v24  ;;  %v1940_v18 = vadd.f32 %v1939_v11, %v4929_v13  ;;  %v2128_v32 = vadd.f32 %v2083_v0, %v1945_v48  ;;  %v2195_v22 = vsel %vm527_vm2, %v5060_v8, 0.0 }
 0x34d   :  { %v2192_v53 = vadd.f32 %v2191_v57, %v2190_v50  ;;  %v3446_v17 = vpop.f32.mrf.mxu1  ;;  %v2099_v50 = vpop.f32.mrf.mxu0 }
 0x34e   :  { %v2193_v59 = vsel %vm527_vm2, %v5065_v49, 0.0  ;;  %v2127_v3 = vadd.f32 %v2080_v9, %v1940_v18  ;;  %v1955_v15 = vadd.f32 %v3446_v17, %v4939_v37  ;;  %v5077_v13 = vadd.f32 %v4965_v56, %v2128_v32 }
 0x34f   :  { %v2194_v14 = vadd.f32 %v2193_v59, %v2192_v53  ;;  %v1949_v52 = vpop.f32.mrf.mxu1 }
 0x350   :  { %v5074_v1 = vadd.f32 %v4965_v56, %v2127_v3  ;;  %v2130_v0 = vadd.f32 %v3474_v61, %v1955_v15  ;;  %v1950_v7 = vadd.f32 %v4921_v21, %v1949_v52  ;;  %v2199_v61 = vsel %vm527_vm2, %v5077_v13, 0.0 }
 0x351   :  { %v2196_v10 = vadd.f32 %v2195_v22, %v2194_v14  ;;  %v3449_v47 = vpop.f32.mrf.mxu1 }
 0x352   :  { %v2197_v37 = vsel %vm527_vm2, %v5074_v1, 0.0  ;;  %v2129_v9 = vadd.f32 %v4994_v4, %v1950_v7  ;;  %v1965_v51 = vadd.f32 %v3449_v47, %v4953_v35  ;;  %v5085_v24 = vadd.f32 %v4965_v56, %v2130_v0 }
 0x353   :  { %v2198_v6 = vadd.f32 %v2197_v37, %v2196_v10  ;;  %v1959_v48 = vpop.f32.mrf.mxu1 }
 0x354   :  { %v5090_v21 = vadd.f32 %v4965_v56, %v2129_v9  ;;  %v1960_v11 = vadd.f32 %v1959_v48, %v4949_v40  ;;  %v2132_v57 = vadd.f32 %v2099_v50, %v1965_v51  ;;  %v2203_v17 = vsel %vm527_vm2, %v5085_v24, 0.0 }
 0x355   :  { %v2200_v18 = vadd.f32 %v2199_v61, %v2198_v6  ;;  %v3452_v32 = vpop.f32.mrf.mxu1 }
 0x356   :  { %v2201_v4 = vsel %vm527_vm2, %v5090_v21, 0.0  ;;  %v2131_v35 = vadd.f32 %v2096_v28, %v1960_v11  ;;  %v1975_v53 = vadd.f32 %v3452_v32, %v4951_v60  ;;  %v5102_v22 = vadd.f32 %v4965_v56, %v2132_v57 }
 0x357   :  { %v2202_v59 = vadd.f32 %v2201_v4, %v2200_v18  ;;  %v1969_v3 = vpop.f32.mrf.mxu1 }
 0x358   :  { %v5099_v15 = vadd.f32 %v4965_v56, %v2131_v35  ;;  %v2134_v40 = vadd.f32 %v3478_v19, %v1975_v53  ;;  %v1970_v14 = vadd.f32 %v4947_v29, %v1969_v3  ;;  %v2207_v7 = vsel %vm527_vm2, %v5102_v22, 0.0 }
 0x359   :  { %v2204_v52 = vadd.f32 %v2203_v17, %v2202_v59 }
 0x35a   :  { %v2205_v28 = vsel %vm527_vm2, %v5099_v15, 0.0  ;;  %v2133_v0 = vadd.f32 %v3477_v41, %v1970_v14  ;;  %v5110_v10 = vadd.f32 %v4965_v56, %v2134_v40 }
 0x35b   :  { %v2206_v60 = vadd.f32 %v2205_v28, %v2204_v52 }
 0x35c   :  { %v5113_v47 = vadd.f32 %v4965_v56, %v2133_v0  ;;  %v2211_v9 = vsel %vm527_vm2, %v5110_v10, 0.0 }
 0x35d   :  { %v2208_v37 = vadd.f32 %v2207_v7, %v2206_v60 }
 0x35e   :  { %v2209_v19 = vsel %vm527_vm2, %v5113_v47, 0.0 }
 0x35f   :  { %v2210_v29 = vadd.f32 %v2209_v19, %v2208_v37 }
 0x361   :  { %v2212_v51 = vadd.f32 %v2211_v9, %v2210_v29 }
 0x363   :  { %v2213_v41 = vrot.slane %v2212_v51, 4 }
 0x365   :  { %v2214_v6 = vadd.f32 %v2213_v41, %v2212_v51 }
 0x367   :  { %v2215_v48 = vrot.slane %v2214_v6, 2 }
 0x369   :  { %v2216_v50 = vadd.f32 %v2215_v48, %v2214_v6 }
 0x36b   :  { %v2217_v61 = vrot.slane %v2216_v50, 1 }
 0x36d   :  { %v2218_v11 = vadd.f32 %v2217_v61, %v2216_v50 }
 0x36f   :  { %v5119_v57 = vmul.f32 0.0052083335, %v2218_v11 }
 0x371   :  { %v5123_v56 = vsub.f32 %v4971_v58, %v5119_v57  ;;  %v5127_v18 = vsub.f32 %v4974_v20, %v5119_v57  ;;  %v5131_v32 = vsub.f32 %v4986_v44, %v5119_v57  ;;  %v5135_v4 = vsub.f32 %v4981_v27, %v5119_v57 }
 0x372   :  { %v5143_v58 = vsub.f32 %v4997_v30, %v5119_v57  ;;  %v5149_v44 = vsub.f32 %v5000_v42, %v5119_v57  ;;  %v5157_v40 = vsub.f32 %v5012_v45, %v5119_v57  ;;  %v5164_v42 = vsub.f32 %v5007_v55, %v5119_v57  ;;  %v2603_v45 = vld [vmem:[%s5702_s17 + $0x8] sm:$0xff] }
 0x373   :  { %v2244_v35 = vmul.f32 %v5123_v56, %v5123_v56  ;;  %v2245_v53 = vmul.f32 %v5127_v18, %v5127_v18  ;;  %v2246_v20 = vmul.f32 %v5131_v32, %v5131_v32  ;;  %v2247_v27 = vmul.f32 %v5135_v4, %v5135_v4  ;;  %3009 = vmatprep.mubr.msk.f32.mxu1 %vm527_vm2, %v2603_v45 }
 0x374   :  { %v2248_v30 = vmul.f32 %v5143_v58, %v5143_v58  ;;  %v2249_v28 = vmul.f32 %v5149_v44, %v5149_v44  ;;  %v5174_v7 = vsub.f32 %v5021_v34, %v5119_v57  ;;  %v2250_v37 = vmul.f32 %v5157_v40, %v5157_v40 }
 0x375   :  { %v2268_v17 = vsel %vm527_vm2, %v2244_v35, 0.0  ;;  %v2269_v59 = vsel %vm527_vm2, %v2245_v53, 0.0  ;;  %v2271_v14 = vsel %vm527_vm2, %v2246_v20, 0.0  ;;  %v2273_v0 = vsel %vm527_vm2, %v2247_v27, 0.0 }
 0x376   :  { %v2270_v3 = vadd.f32 %v2269_v59, %v2268_v17  ;;  %v2275_v55 = vsel %vm527_vm2, %v2248_v30, 0.0  ;;  %v5182_v29 = vsub.f32 %v5024_v39, %v5119_v57  ;;  %v2251_v9 = vmul.f32 %v5164_v42, %v5164_v42 }
 0x377   :  { %v2277_v51 = vsel %vm527_vm2, %v2249_v28, 0.0  ;;  %v5189_v34 = vsub.f32 %v5038_v12, %v5119_v57  ;;  %v2252_v6 = vmul.f32 %v5174_v7, %v5174_v7  ;;  %v2279_v48 = vsel %vm527_vm2, %v2250_v37, 0.0 }
 0x378   :  { %v2272_v52 = vadd.f32 %v2271_v14, %v2270_v3  ;;  %v5196_v39 = vsub.f32 %v5033_v2, %v5119_v57  ;;  %v2253_v61 = vmul.f32 %v5182_v29, %v5182_v29  ;;  %v2281_v11 = vsel %vm527_vm2, %v2251_v9, 0.0 }
 0x379   :  { %v5203_v12 = vsub.f32 %v5048_v23, %v5119_v57  ;;  %v2254_v53 = vmul.f32 %v5189_v34, %v5189_v34  ;;  %v2283_v20 = vsel %vm527_vm2, %v2252_v6, 0.0  ;;  %v5210_v2 = vsub.f32 %v5051_v63, %v5119_v57 }
 0x37a   :  { %v2274_v60 = vadd.f32 %v2273_v0, %v2272_v52  ;;  %v2255_v17 = vmul.f32 %v5196_v39, %v5196_v39  ;;  %v2285_v59 = vsel %vm527_vm2, %v2253_v61, 0.0  ;;  %v5217_v23 = vsub.f32 %v5065_v49, %v5119_v57 }
 0x37b   :  { %v2256_v30 = vmul.f32 %v5203_v12, %v5203_v12  ;;  %v2287_v14 = vsel %vm527_vm2, %v2254_v53, 0.0  ;;  %v5224_v63 = vsub.f32 %v5060_v8, %v5119_v57  ;;  %v2257_v28 = vmul.f32 %v5210_v2, %v5210_v2 }
 0x37c   :  { %v2276_v19 = vadd.f32 %v2275_v55, %v2274_v60  ;;  %v2289_v0 = vsel %vm527_vm2, %v2255_v17, 0.0  ;;  %v5231_v49 = vsub.f32 %v5074_v1, %v5119_v57  ;;  %v2258_v45 = vmul.f32 %v5217_v23, %v5217_v23 }
 0x37d   :  { %v2291_v37 = vsel %vm527_vm2, %v2256_v30, 0.0  ;;  %v5238_v8 = vsub.f32 %v5077_v13, %v5119_v57  ;;  %v2293_v9 = vsel %vm527_vm2, %v2257_v28, 0.0  ;;  %v5245_v1 = vsub.f32 %v5090_v21, %v5119_v57  ;;  %v5282_v28 = vld [vmem:[#allocation7] ss:$0 sm:$0xff] }
 0x37e   :  { %v2278_v41 = vadd.f32 %v2277_v51, %v2276_v19  ;;  %v2259_v19 = vmul.f32 %v5224_v63, %v5224_v63  ;;  %v2295_v6 = vsel %vm527_vm2, %v2258_v45, 0.0  ;;  %v5252_v13 = vsub.f32 %v5085_v24, %v5119_v57 }
 0x37f   :  { %v5259_v21 = vsub.f32 %v5099_v15, %v5119_v57  ;;  %v5268_v24 = vsub.f32 %v5102_v22, %v5119_v57  ;;  %v5275_v15 = vsub.f32 %v5113_v47, %v5119_v57 }
 0x380   :  { %v2280_v50 = vadd.f32 %v2279_v48, %v2278_v41  ;;  %v2260_v41 = vmul.f32 %v5231_v49, %v5231_v49  ;;  %v2297_v61 = vsel %vm527_vm2, %v2259_v19, 0.0  ;;  %v2263_v17 = vmul.f32 %v5252_v13, %v5252_v13 }
 0x381   :  { %v2264_v30 = vmul.f32 %v5259_v21, %v5259_v21 }
 0x382   :  { %v2282_v35 = vadd.f32 %v2281_v11, %v2280_v50  ;;  %v2261_v50 = vmul.f32 %v5238_v8, %v5238_v8  ;;  %v2299_v53 = vsel %vm527_vm2, %v2260_v41, 0.0  ;;  %v2305_v47 = vsel %vm527_vm2, %v2263_v17, 0.0 }
 0x383   :  { %v2307_v19 = vsel %vm527_vm2, %v2264_v30, 0.0 }
 0x384   :  { %v2284_v27 = vadd.f32 %v2283_v20, %v2282_v35  ;;  %v2262_v35 = vmul.f32 %v5245_v1, %v5245_v1 }
 0x386   :  { %v2286_v3 = vadd.f32 %v2285_v59, %v2284_v27  ;;  %v5264_v27 = vld [vmem:[#allocation6] ss:$0 sm:$0xff]  ;;  %v2301_v59 = vsel %vm527_vm2, %v2261_v50, 0.0 }
 0x387   :  { %v1503_v22 = vmul.f32 %v5264_v27, %v4927_v33  ;;  %v2266_v33 = vmul.f32 %v5275_v15, %v5275_v15 }
 0x388   :  { %v2288_v52 = vadd.f32 %v2287_v14, %v2286_v3  ;;  %v2303_v14 = vsel %vm527_vm2, %v2262_v35, 0.0  ;;  %v1465_v35 = vmul.f32 %v4923_v54, %v4755_v46 }
 0x38a   :  { %v2290_v60 = vadd.f32 %v2289_v0, %v2288_v52  ;;  %v5286_v0 = vsub.f32 %v5110_v10, %v5119_v57  ;;  %v1534_v10 = vadd.f32 %v5282_v28, %v1503_v22  ;;  %v1501_v57 = vmul.f32 %v5264_v27, %v4937_v36 }
 0x38b   :  { %v1477_v36 = vmul.f32 %v4923_v54, %v4795_v26  ;;  %v1496_v22 = vmul.f32 %v5264_v27, %v1465_v35 }
 0x38c   :  { %v2292_v55 = vadd.f32 %v2291_v37, %v2290_v60  ;;  %v2265_v60 = vmul.f32 %v5268_v24, %v5268_v24  ;;  %v1502_v37 = vmul.f32 %v5264_v27, %v4933_v31  ;;  %v2267_v31 = vmul.f32 %v5286_v0, %v5286_v0 }
 0x38d   :  { %v1508_v46 = vmul.f32 %v5264_v27, %v1477_v36 }
 0x38e   :  { %v2294_v51 = vadd.f32 %v2293_v9, %v2292_v55  ;;  %v1468_v55 = vmul.f32 %v4923_v54, %v4764_v16  ;;  %v2309_v41 = vsel %vm527_vm2, %v2265_v60, 0.0  ;;  %v1500_v16 = vmul.f32 %v5264_v27, %v4943_v43  ;;  %v5703_v60 = vld [vmem:[#allocation31_spill] sm:$0xff] }
 0x38f   :  { %v1533_v50 = vadd.f32 %v5282_v28, %v1502_v37  ;;  %v2313_v17 = vsel %vm527_vm2, %v2267_v31, 0.0 }
 0x390   :  { %v2296_v48 = vadd.f32 %v2295_v6, %v2294_v51  ;;  %v1467_v51 = vmul.f32 %v4923_v54, %v4761_v5  ;;  %v1466_v6 = vmul.f32 %v4923_v54, %v4758_v62  ;;  %v1478_v5 = vmul.f32 %v4923_v54, %v4797_v38 }
 0x391   :  { %v1532_v62 = vadd.f32 %v5282_v28, %v1501_v57  ;;  %v2999_v30 = vmul.f32 -1.442695, %v1533_v50  ;;  %v5706_v50 = vld [vmem:[#allocation29_spill] sm:$0xff] }
 0x392   :  { %v2298_v11 = vadd.f32 %v2297_v61, %v2296_v48  ;;  %v1499_v61 = vmul.f32 %v5264_v27, %v1468_v55  ;;  %v1497_v26 = vmul.f32 %v5264_v27, %v1466_v6  ;;  %v1527_v6 = vadd.f32 %v5282_v28, %v1496_v22 }
 0x393   :  { %v2998_v37 = vmul.f32 -1.442695, %v1532_v62 }
 0x394   :  { %v2300_v20 = vadd.f32 %v2299_v53, %v2298_v11  ;;  %v2311_v11 = vsel %vm527_vm2, %v2266_v33, 0.0  ;;  %v3000_v53 = vmul.f32 -1.442695, %v1534_v10  ;;  %v1530_v38 = vadd.f32 %v5282_v28, %v1499_v61  ;;  %v5704_v33 = vld [vmem:[#allocation36_spill] sm:$0xff]  ;;  %v5705_v10 = vld [vmem:[#allocation30_spill] sm:$0xff] }
 0x395   :  { %v1462_v57 = vmul.f32 %v4923_v54, %v5705_v10  ;;  %v1461_v61 = vmul.f32 %v4923_v54, %v5706_v50 }
 0x396   :  { %v2302_v3 = vadd.f32 %v2301_v59, %v2300_v20  ;;  %v1498_v20 = vmul.f32 %v5264_v27, %v1467_v51  ;;  %v1531_v59 = vadd.f32 %v5282_v28, %v1500_v16  ;;  %3521 = vpow2.f32 %v3000_v53  ;;  %v5707_v53 = vld [vmem:[#allocation28_spill] sm:$0xff] }
 0x397   :  { %3523 = vpow2.f32 %v2999_v30  ;;  %v2996_v31 = vmul.f32 -1.442695, %v1530_v38  ;;  %v1539_v16 = vadd.f32 %v5282_v28, %v1508_v46  ;;  %v1460_v62 = vmul.f32 %v4923_v54, %v5707_v53  ;;  %v5708_v38 = vld [vmem:[#allocation27_spill] sm:$0xff] }
 0x398   :  { %v2304_v52 = vadd.f32 %v2303_v14, %v2302_v3  ;;  %v1464_v14 = vmul.f32 %v4923_v54, %v4752_v25  ;;  %v1529_v55 = vadd.f32 %v5282_v28, %v1498_v20  ;;  %v1528_v25 = vadd.f32 %v5282_v28, %v1497_v26 }
 0x399   :  { %3525 = vpow2.f32 %v2998_v37  ;;  %v2993_v26 = vmul.f32 -1.442695, %v1527_v6  ;;  %v1492_v30 = vmul.f32 %v5264_v27, %v1461_v61  ;;  %v3005_v46 = vmul.f32 -1.442695, %v1539_v16 }
 0x39a   :  { %v2306_v45 = vadd.f32 %v2305_v47, %v2304_v52  ;;  %v1509_v52 = vmul.f32 %v5264_v27, %v1478_v5  ;;  %v1463_v47 = vmul.f32 %v4923_v54, %v5703_v60  ;;  %v2994_v35 = vmul.f32 -1.442695, %v1528_v25 }
 0x39b   :  { %v1523_v25 = vadd.f32 %v5282_v28, %v1492_v30 }
 0x39c   :  { %v2308_v9 = vadd.f32 %v2307_v19, %v2306_v45  ;;  %v1479_v19 = vmul.f32 %v4923_v54, %v5704_v33  ;;  %v1540_v36 = vadd.f32 %v5282_v28, %v1509_v52  ;;  %v5709_v33 = vld [vmem:[#allocation26_spill] sm:$0xff] }
 0x39d   :  { %v2989_v61 = vmul.f32 -1.442695, %v1523_v25 }
 0x39e   :  { %v2310_v48 = vadd.f32 %v2309_v41, %v2308_v9  ;;  %v2997_v9 = vmul.f32 -1.442695, %v1531_v59  ;;  %v1495_v41 = vmul.f32 %v5264_v27, %v1464_v14  ;;  %v1510_v20 = vmul.f32 %v5264_v27, %v1479_v19 }
 0x39f   :  { %v1459_v14 = vmul.f32 %v4923_v54, %v5708_v38  ;;  %v3006_v22 = vmul.f32 -1.442695, %v1540_v36  ;;  %v1458_v19 = vmul.f32 %v4923_v54, %v5709_v33 }
 0x3a0   :  { %v2312_v43 = vadd.f32 %v2311_v11, %v2310_v48  ;;  %v1494_v48 = vmul.f32 %v5264_v27, %v1463_v47  ;;  %v2995_v11 = vmul.f32 -1.442695, %v1529_v55  ;;  %3527 = vpow2.f32 %v2997_v9 }
 0x3a1   :  { %3529 = vpow2.f32 %v2996_v31  ;;  %v1526_v59 = vadd.f32 %v5282_v28, %v1495_v41  ;;  %v1491_v47 = vmul.f32 %v5264_v27, %v1460_v62  ;;  %v1490_v10 = vmul.f32 %v5264_v27, %v1459_v14  ;;  %v5713_v14 = vld [vmem:[#allocation34_spill] sm:$0xff] }
 0x3a2   :  { %v2314_v3 = vadd.f32 %v2313_v17, %v2312_v43  ;;  %v1493_v43 = vmul.f32 %v5264_v27, %v1462_v57  ;;  %3531 = vpow2.f32 %v2995_v11 }
 0x3a3   :  { %3533 = vpow2.f32 %v2994_v35  ;;  %v2992_v55 = vmul.f32 -1.442695, %v1526_v59  ;;  %v1522_v41 = vadd.f32 %v5282_v28, %v1491_v47  ;;  %v1521_v36 = vadd.f32 %v5282_v28, %v1490_v10  ;;  %v5711_v35 = vld [vmem:[#allocation37_spill] sm:$0xff]  ;;  %v5715_v10 = vld [vmem:[#allocation32_spill] sm:$0xff] }
 0x3a4   :  { %v2315_v45 = vrot.slane %v2314_v3, 4  ;;  %v1524_v60 = vadd.f32 %v5282_v28, %v1493_v43  ;;  %3535 = vpow2.f32 %v2993_v26  ;;  %v1480_v43 = vmul.f32 %v4923_v54, %v5711_v35 }
 0x3a5   :  { %3537 = vpow2.f32 %v3005_v46  ;;  %v1475_v46 = vmul.f32 %v4923_v54, %v5713_v14 }
 0x3a6   :  { %v2316_v51 = vadd.f32 %v2315_v45, %v2314_v3  ;;  %v1525_v3 = vadd.f32 %v5282_v28, %v1494_v48  ;;  %v1541_v45 = vadd.f32 %v5282_v28, %v1510_v20  ;;  %3539 = vpow2.f32 %v3006_v22 }
 0x3a7   :  { %v2990_v31 = vmul.f32 -1.442695, %v1524_v60  ;;  %3541 = vpow2.f32 %v2992_v55  ;;  %v1489_v48 = vmul.f32 %v5264_v27, %v1458_v19  ;;  %v2988_v20 = vmul.f32 -1.442695, %v1522_v41 }
 0x3a8   :  { %v2317_v5 = vrot.slane %v2316_v51, 2  ;;  %v2991_v9 = vmul.f32 -1.442695, %v1525_v3  ;;  %v3007_v16 = vmul.f32 -1.442695, %v1541_v45  ;;  %v1511_v60 = vmul.f32 %v5264_v27, %v1480_v43 }
 0x3a9   :  { %v1520_v30 = vadd.f32 %v5282_v28, %v1489_v48 }
 0x3aa   :  { %v2318_v17 = vadd.f32 %v2317_v5, %v2316_v51  ;;  %v3522_v51 = vpop.eup %3521  ;;  %3543 = vpow2.f32 %v2991_v9  ;;  %v5710_v5 = vld [vmem:[#allocation35_spill] sm:$0xff] }
 0x3ab   :  { %v3524_v50 = vpop.eup %3523  ;;  %v1476_v11 = vmul.f32 %v4923_v54, %v5710_v5  ;;  %v2497_v53 = vadd.f32 1.0, %v3522_v51  ;;  %v2986_v25 = vmul.f32 -1.442695, %v1520_v30  ;;  %v1506_v51 = vmul.f32 %v5264_v27, %v1475_v46 }
 0x3ac   :  { %v2319_v52 = vrot.slane %v2318_v17, 1  ;;  %v3526_v62 = vpop.eup %3525  ;;  %v2496_v3 = vadd.f32 1.0, %v3524_v50 }
 0x3ad   :  { %v3528_v26 = vpop.eup %3527  ;;  %v1507_v22 = vmul.f32 %v5264_v27, %v1476_v11  ;;  %v2495_v47 = vadd.f32 1.0, %v3526_v62 }
 0x3ae   :  { %v2320_v37 = vadd.f32 %v2319_v52, %v2318_v17  ;;  %v5712_v17 = vld [vmem:[#allocation25_spill] sm:$0xff]  ;;  %v3530_v38 = vpop.eup %3529  ;;  %v2987_v52 = vmul.f32 -1.442695, %v1521_v36  ;;  %v2494_v33 = vadd.f32 1.0, %v3528_v26 }
 0x3af   :  { %v1457_v59 = vmul.f32 %v4923_v54, %v5712_v17  ;;  %v3532_v45 = vpop.eup %3531 }
 0x3b0   :  { %v2321_v57 = vmul.f32 0.0052083335, %v2320_v37  ;;  %v5714_v37 = vld [vmem:[#allocation33_spill] sm:$0xff]  ;;  %v3534_v9 = vpop.eup %3533  ;;  %v2492_v48 = vadd.f32 1.0, %v3532_v45 }
 0x3b1   :  { %v1474_v55 = vmul.f32 %v4923_v54, %v5714_v37  ;;  %v1488_v19 = vmul.f32 %v5264_v27, %v1457_v59  ;;  %v3536_v41 = vpop.eup %3535  ;;  %v2491_v36 = vadd.f32 1.0, %v3534_v9  ;;  %v5396_v59 = vld [vmem:[#allocation9] ss:$0 sm:$0xff] }
 0x3b2   :  { %v2322_v6 = vadd.f32 1e-05, %v2321_v57  ;;  %v1473_v57 = vmul.f32 %v4923_v54, %v5715_v10  ;;  %v5383_v50 = vpop.eup %3537  ;;  %v2490_v35 = vadd.f32 1.0, %v3536_v41 }
 0x3b3   :  { %v1519_v5 = vadd.f32 %v5282_v28, %v1488_v19  ;;  %v5387_v54 = vpop.eup %3539 }
 0x3b4   :  { %3545 = vrsqrt.f32 %v2322_v6  ;;  %v1542_v6 = vadd.f32 %v5282_v28, %v1511_v60  ;;  %v3542_v11 = vpop.eup %3541  ;;  %v5402_v30 = vmul.f32 %v5264_v27, %v1473_v57 }
 0x3b5   :  { %3547 = vpow2.f32 %v2990_v31  ;;  %v2493_v31 = vadd.f32 1.0, %v3530_v38  ;;  %v2985_v26 = vmul.f32 -1.442695, %v1519_v5 }
 0x3b6   :  { %3549 = vpow2.f32 %v3007_v16  ;;  %v1538_v16 = vadd.f32 %v5282_v28, %v1507_v22  ;;  %v3008_v62 = vmul.f32 -1.442695, %v1542_v6  ;;  %v2489_v22 = vadd.f32 1.0, %v3542_v11 }
 0x3b7   :  { %3551 = vpow2.f32 %v2989_v61  ;;  %v1505_v61 = vmul.f32 %v5264_v27, %v1474_v55  ;;  %v3544_v43 = vpop.eup %3543 }
 0x3b8   :  { %3553 = vrcp.f32 %v2497_v53  ;;  %v5389_v53 = vmul.f32 -1.442695, %v1538_v16 }
 0x3b9   :  { %3555 = vpow2.f32 %v2988_v20  ;;  %v5392_v20 = vadd.f32 %v5282_v28, %v1506_v51 }
 0x3ba   :  { %3557 = vrcp.f32 %v2496_v3  ;;  %v5399_v3 = vadd.f32 %v5282_v28, %v1505_v61 }
 0x3bb   :  { %3559 = vpow2.f32 %v2987_v52 }
 0x3bc   :  { %3561 = vrcp.f32 %v2495_v47  ;;  %v5412_v47 = vld [vmem:[#allocation10] ss:$0 sm:$0xff] }
 0x3bd   :  { %3563 = vrcp.f32 %v2494_v33  ;;  %v2488_v33 = vadd.f32 1.0, %v3544_v43 }
 0x3be   :  { %3565 = vpow2.f32 %v2986_v25 }
 0x3bf   :  { %3567 = vrcp.f32 %v2493_v31 }
 0x3c0   :  { %3569 = vrcp.f32 %v2492_v48 }
 0x3c1   :  { %v5394_v17 = vpop.eup %3545  ;;  %3571 = vrcp.f32 %v2491_v36 }
 0x3c2   :  { %v3548_v38 = vpop.eup %3547  ;;  %v2339_v14 = vmul.f32 %v5394_v17, %v5224_v63  ;;  %v2338_v46 = vmul.f32 %v5394_v17, %v5217_v23  ;;  %v2337_v52 = vmul.f32 %v5394_v17, %v5210_v2  ;;  %v2336_v45 = vmul.f32 %v5394_v17, %v5203_v12 }
 0x3c3   :  { %v5410_v60 = vpop.eup %3549  ;;  %v2335_v27 = vmul.f32 %v5394_v17, %v5196_v39  ;;  %v2334_v63 = vmul.f32 %v5394_v17, %v5189_v34  ;;  %3573 = vrcp.f32 %v2490_v35  ;;  %v2333_v12 = vmul.f32 %v5394_v17, %v5182_v29 }
 0x3c4   :  { %v3552_v37 = vpop.eup %3551  ;;  %v2370_v23 = vmul.f32 %v5396_v59, %v2339_v14  ;;  %v2369_v2 = vmul.f32 %v5396_v59, %v2338_v46  ;;  %v2368_v55 = vmul.f32 %v5396_v59, %v2337_v52  ;;  %v2367_v9 = vmul.f32 %v5396_v59, %v2336_v45 }
 0x3c5   :  { %v3554_v19 = vpop.eup %3553  ;;  %v2487_v25 = vadd.f32 1.0, %v3548_v38  ;;  %3575 = vpow2.f32 %v2985_v26  ;;  %v2366_v51 = vmul.f32 %v5396_v59, %v2335_v27  ;;  %v2365_v16 = vmul.f32 %v5396_v59, %v2334_v63 }
 0x3c6   :  { %v3556_v39 = vpop.eup %3555  ;;  %v2401_v34 = vadd.f32 %v5412_v47, %v2370_v23  ;;  %v2400_v10 = vadd.f32 %v5412_v47, %v2369_v2  ;;  %v2399_v57 = vadd.f32 %v5412_v47, %v2368_v55  ;;  %v2398_v41 = vadd.f32 %v5412_v47, %v2367_v9 }
 0x3c7   :  { %v3558_v31 = vpop.eup %3557  ;;  %v2486_v6 = vadd.f32 1.0, %v3552_v37  ;;  %3577 = vpow2.f32 %v3008_v62  ;;  %v2332_v36 = vmul.f32 %v5394_v17, %v5174_v7  ;;  %v2364_v35 = vmul.f32 %v5396_v59, %v2333_v12 }
 0x3c8   :  { %v3560_v48 = vpop.eup %3559  ;;  %v2569_v29 = vmax.f32 %v2401_v34, 0.0  ;;  %v2568_v61 = vmax.f32 %v2400_v10, 0.0  ;;  %3579 = vrcp.f32 %v2489_v22  ;;  %v2566_v11 = vmax.f32 %v2398_v41, 0.0 }
 0x3c9   :  { %v3562_v5 = vpop.eup %3561  ;;  %3581 = vrcp.f32 %v2488_v33  ;;  %v2485_v43 = vadd.f32 1.0, %v3556_v39  ;;  %v2567_v14 = vmax.f32 %v2399_v57, 0.0  ;;  %v2397_v46 = vadd.f32 %v5412_v47, %v2366_v51 }
 0x3ca   :  { %v3564_v26 = vpop.eup %3563  ;;  %v2593_v38 = vmul.f32 %v3554_v19, %v2569_v29  ;;  %3583 = vrcp.f32 %v2487_v25  ;;  %v2396_v45 = vadd.f32 %v5412_v47, %v2365_v16  ;;  %v2484_v27 = vadd.f32 1.0, %v3560_v48 }
 0x3cb   :  { %v3566_v62 = vpop.eup %3565  ;;  %v2590_v52 = vmul.f32 %v3564_v26, %v2566_v11  ;;  %3585 = vrcp.f32 %v2486_v6  ;;  %v2592_v22 = vmul.f32 %v3558_v31, %v2568_v61  ;;  %v2363_v63 = vmul.f32 %v5396_v59, %v2332_v36 }
 0x3cc   :  { %v3568_v7 = vpop.eup %3567  ;;  %2633 = vmatpush1.msra.mxu1 %v2593_v38  ;;  %v2331_v37 = vmul.f32 %v5394_v17, %v5164_v42  ;;  %v2330_v23 = vmul.f32 %v5394_v17, %v5157_v40  ;;  %v5716_v55 = vmov 0.0   ;;  %v2395_v33 = vadd.f32 %v5412_v47, %v2364_v35 }
 0x3cd   :  { %v3570_v2 = vpop.eup %3569  ;;  %2634 = vmatprep.subr.mxu1 %v5716_v55  ;;  %3587 = vrcp.f32 %v2485_v43  ;;  %v3003_v19 = vmul.f32 -1.442695, %v5392_v20  ;;  %v1535_v9 = vadd.f32 %v5282_v28, %v5402_v30  ;;  %v2591_v25 = vmul.f32 %v3562_v5, %v2567_v14 }
 0x3ce   :  { %v3572_v12 = vpop.eup %3571  ;;  %2635 = vmatpush1.msra.mxu1 %v2592_v22  ;;  %v2565_v39 = vmax.f32 %v2397_v46, 0.0  ;;  %v2362_v42 = vmul.f32 %v5396_v59, %v2331_v37  ;;  %v2329_v40 = vmul.f32 %v5394_v17, %v5149_v44  ;;  %v2564_v34 = vmax.f32 %v2396_v45, 0.0 }
 0x3cf   :  { %2636 = vmatprep.subr.mxu1 %v5716_v55  ;;  %3589 = vpow2.f32 %v5389_v53  ;;  %v3002_v10 = vmul.f32 -1.442695, %v5399_v3  ;;  %v2394_v28 = vadd.f32 %v5412_v47, %v2363_v63  ;;  %v2361_v30 = vmul.f32 %v5396_v59, %v2330_v23 }
 0x3d0   :  { %v3574_v20 = vpop.eup %3573  ;;  %2637 = vmatpush1.msra.mxu1 %v2591_v25  ;;  %v2328_v57 = vmul.f32 %v5394_v17, %v5143_v58  ;;  %3591 = vrcp.f32 %v2484_v27  ;;  %v2563_v44 = vmax.f32 %v2395_v33, 0.0  ;;  %v3001_v51 = vmul.f32 -1.442695, %v1535_v9 }
 0x3d1   :  { %2638 = vmatprep.subr.mxu1 %v5716_v55  ;;  %3593 = vpow2.f32 %v3003_v19  ;;  %v2589_v53 = vmul.f32 %v3568_v7, %v2565_v39  ;;  %v2393_v3 = vadd.f32 %v5412_v47, %v2362_v42  ;;  %v2360_v41 = vmul.f32 %v5396_v59, %v2329_v40 }
 0x3d2   :  { %v3576_v31 = vpop.eup %3575  ;;  %2639 = vmatpush1.msra.mxu1 %v2590_v52  ;;  %v2327_v16 = vmul.f32 %v5394_v17, %v5135_v4  ;;  %v2588_v6 = vmul.f32 %v3570_v2, %v2564_v34  ;;  %v2483_v58 = vadd.f32 1.0, %v3566_v62  ;;  %3595 = vpow2.f32 %v3002_v10 }
 0x3d3   :  { %2640 = vmatprep.subr.mxu1 %v5716_v55  ;;  %v2562_v29 = vmax.f32 %v2394_v28, 0.0  ;;  %v2392_v61 = vadd.f32 %v5412_v47, %v2361_v30  ;;  %v2359_v36 = vmul.f32 %v5396_v59, %v2328_v57  ;;  %v2326_v5 = vmul.f32 %v5394_v17, %v5131_v32 }
 0x3d4   :  { %v3578_v48 = vpop.eup %3577  ;;  %2641 = vmatpush1.msra.mxu1 %v2589_v53  ;;  %v2325_v4 = vmul.f32 %v5394_v17, %v5127_v18  ;;  %v2482_v35 = vadd.f32 1.0, %v3576_v31  ;;  %3597 = vpow2.f32 %v3001_v51  ;;  %v2587_v26 = vmul.f32 %v3572_v12, %v2563_v44 }
 0x3d5   :  { %v3580_v11 = vpop.eup %3579  ;;  %2642 = vmatprep.subr.mxu1 %v5716_v55  ;;  %v2561_v38 = vmax.f32 %v2393_v3, 0.0  ;;  %v2391_v14 = vadd.f32 %v5412_v47, %v2360_v41  ;;  %v2358_v46 = vmul.f32 %v5396_v59, %v2327_v16  ;;  %3599 = vrcp.f32 %v2483_v58 }
 0x3d6   :  { %v3582_v43 = vpop.eup %3581  ;;  %2643 = vmatpush1.msra.mxu1 %v2588_v6  ;;  %v2324_v32 = vmul.f32 %v5394_v17, %v5123_v56  ;;  %v2505_v52 = vadd.f32 1.0, %v3578_v48  ;;  %v2586_v18 = vmul.f32 %v3574_v20, %v2562_v29  ;;  %v2560_v27 = vmax.f32 %v2392_v61, 0.0 }
 0x3d7   :  { %v3584_v62 = vpop.eup %3583  ;;  %2644 = vmatprep.subr.mxu1 %v5716_v55  ;;  %v2390_v7 = vadd.f32 %v5412_v47, %v2359_v36  ;;  %v2357_v22 = vmul.f32 %v5396_v59, %v2326_v5  ;;  %v2356_v63 = vmul.f32 %v5396_v59, %v2325_v4  ;;  %3601 = vrcp.f32 %v2482_v35 }
 0x3d8   :  { %v3586_v45 = vpop.eup %3585  ;;  %2645 = vmatpush1.msra.mxu1 %v2587_v26  ;;  %v2504_v37 = vadd.f32 1.0, %v5410_v60  ;;  %v2585_v2 = vmul.f32 %v3580_v11, %v2561_v38  ;;  %v2559_v56 = vmax.f32 %v2391_v14, 0.0  ;;  %v2389_v33 = vadd.f32 %v5412_v47, %v2358_v46 }
 0x3d9   :  { %2646 = vmatprep.subr.mxu1 %v5716_v55  ;;  %v2347_v19 = vmul.f32 %v5394_v17, %v5286_v0  ;;  %v2503_v9 = vadd.f32 1.0, %v5387_v54  ;;  %v2355_v12 = vmul.f32 %v5396_v59, %v2324_v32  ;;  %3603 = vrcp.f32 %v2505_v52 }
 0x3da   :  { %v3588_v23 = vpop.eup %3587  ;;  %2647 = vmatpush1.msra.mxu1 %v2586_v18  ;;  %v2346_v60 = vmul.f32 %v5394_v17, %v5275_v15  ;;  %v2584_v39 = vmul.f32 %v3582_v43, %v2560_v27  ;;  %v2558_v42 = vmax.f32 %v2390_v7, 0.0  ;;  %v2388_v40 = vadd.f32 %v5412_v47, %v2357_v22 }
 0x3db   :  { %2648 = vmatprep.subr.mxu1 %v5716_v55  ;;  %v2387_v0 = vadd.f32 %v5412_v47, %v2356_v63  ;;  %3605 = vrcp.f32 %v2504_v37  ;;  %v2502_v54 = vadd.f32 1.0, %v5383_v50  ;;  %v2583_v20 = vmul.f32 %v3584_v62, %v2559_v56 }
 0x3dc   :  { %v3590_v25 = vpop.eup %3589  ;;  %2649 = vmatpush1.msra.mxu1 %v2585_v2  ;;  %v2557_v28 = vmax.f32 %v2389_v33, 0.0  ;;  %v2378_v30 = vmul.f32 %v5396_v59, %v2347_v19  ;;  %v2345_v15 = vmul.f32 %v5394_v17, %v5268_v24  ;;  %3607 = vrcp.f32 %v2503_v9 }
 0x3dd   :  { %v3592_v34 = vpop.eup %3591  ;;  %2650 = vmatprep.subr.mxu1 %v5716_v55  ;;  %v2386_v57 = vadd.f32 %v5412_v47, %v2355_v12  ;;  %v2501_v44 = vadd.f32 1.0, %v3590_v25  ;;  %v2377_v31 = vmul.f32 %v5396_v59, %v2346_v60  ;;  %v2582_v50 = vmul.f32 %v3586_v45, %v2558_v42 }
 0x3de   :  { %v3594_v10 = vpop.eup %3593  ;;  %2651 = vmatpush1.msra.mxu1 %v2584_v39  ;;  %v2556_v53 = vmax.f32 %v2388_v40, 0.0  ;;  %v2344_v3 = vmul.f32 %v5394_v17, %v5259_v21  ;;  %v2555_v41 = vmax.f32 %v2387_v0, 0.0  ;;  %3609 = vrcp.f32 %v2502_v54 }
 0x3df   :  { %2652 = vmatprep.subr.mxu1 %v5716_v55  ;;  %v3596_v51 = vpop.eup %3595  ;;  %v2500_v24 = vadd.f32 1.0, %v3594_v10  ;;  %v2581_v6 = vmul.f32 %v3588_v23, %v2557_v28  ;;  %v2409_v58 = vadd.f32 %v5412_v47, %v2378_v30  ;;  %v2376_v48 = vmul.f32 %v5396_v59, %v2345_v15  ;;  %v2602_v30 = vld [vmem:[%s5702_s17] sm:$0xff]  ;;  %v2605_v15 = vld [vmem:[%s5702_s17 + $0x18] sm:$0xff] }
 0x3e0   :  { %2653 = vmatpush1.msra.mxu1 %v2583_v20  ;;  %v2343_v29 = vmul.f32 %v5394_v17, %v5252_v13  ;;  %v2554_v61 = vmax.f32 %v2386_v57, 0.0  ;;  %3611 = vrcp.f32 %v2501_v44  ;;  %v2499_v21 = vadd.f32 1.0, %v3596_v51  ;;  %v2604_v57 = vld [vmem:[%s5702_s17 + $0x10] sm:$0xff]  ;;  %v2607_v44 = vld [vmem:[%s5702_s17 + $0x28] sm:$0xff]  ;;  %v2609_v51 = vld [vmem:[%s5702_s17 + $0x38] sm:$0xff] }
 0x3e1   :  { %2654 = vmatprep.subr.mxu1 %v5716_v55  ;;  %v3598_v16 = vpop.eup %3597  ;;  %v2580_v5 = vmul.f32 %v3592_v34, %v2556_v53  ;;  %v2408_v11 = vadd.f32 %v5412_v47, %v2377_v31  ;;  %v2375_v4 = vmul.f32 %v5396_v59, %v2344_v3  ;;  %v2342_v35 = vmul.f32 %v5394_v17, %v5245_v1  ;;  %v2608_v31 = vld [vmem:[%s5702_s17 + $0x30] sm:$0xff]  ;;  %v2610_v53 = vld [vmem:[%s5702_s17 + $0x40] sm:$0xff]  ;;  %v2613_v3 = vld [vmem:[%s5702_s17 + $0x58] sm:$0xff] }
 0x3e2   :  { %2655 = vmatpush1.msra.mxu1 %v2582_v50  ;;  %v3600_v36 = vpop.eup %3599  ;;  %3613 = vrcp.f32 %v2500_v24  ;;  %v2498_v13 = vadd.f32 1.0, %v3598_v16  ;;  %v2577_v38 = vmax.f32 %v2409_v58, 0.0  ;;  %v2407_v14 = vadd.f32 %v5412_v47, %v2376_v48  ;;  %v2611_v50 = vld [vmem:[%s5702_s17 + $0x48] sm:$0xff] }
 0x3e3   :  { %2656 = vmatprep.subr.mxu1 %v5716_v55  ;;  %v2579_v43 = vmul.f32 %v3600_v36, %v2555_v41  ;;  %v2374_v46 = vmul.f32 %v5396_v59, %v2343_v29  ;;  %v2341_v62 = vmul.f32 %v5394_v17, %v5238_v8  ;;  %3615 = vrcp.f32 %v2499_v21  ;;  %v2612_v41 = vld [vmem:[%s5702_s17 + $0x50] sm:$0xff] }
 0x3e4   :  { %2657 = vmatpush1.msra.mxu1 %v2581_v6  ;;  %v3602_v26 = vpop.eup %3601  ;;  %v2576_v52 = vmax.f32 %v2408_v11, 0.0  ;;  %v2406_v45 = vadd.f32 %v5412_v47, %v2375_v4  ;;  %v2373_v18 = vmul.f32 %v5396_v59, %v2342_v35  ;;  %v2340_v27 = vmul.f32 %v5394_v17, %v5231_v49 }
 0x3e5   :  { %2658 = vmatprep.subr.mxu1 %v5716_v55  ;;  %v2578_v32 = vmul.f32 %v3602_v26, %v2554_v61  ;;  %3617 = vrcp.f32 %v2498_v13  ;;  %v2575_v22 = vmax.f32 %v2407_v14, 0.0  ;;  %v2405_v63 = vadd.f32 %v5412_v47, %v2374_v46 }
 0x3e6   :  { %2659 = vmatpush1.msra.mxu1 %v2580_v5  ;;  %v3604_v1 = vpop.eup %3603  ;;  %v2372_v37 = vmul.f32 %v5396_v59, %v2341_v62  ;;  %v2574_v56 = vmax.f32 %v2406_v45, 0.0  ;;  %v2404_v33 = vadd.f32 %v5412_v47, %v2373_v18  ;;  %v2371_v49 = vmul.f32 %v5396_v59, %v2340_v27 }
 0x3e7   :  { %2660 = vmatprep.subr.mxu1 %v5716_v55  ;;  %v2601_v8 = vmul.f32 %v3604_v1, %v2577_v38  ;;  %v2573_v9 = vmax.f32 %v2405_v63, 0.0 }
 0x3e8   :  { %2661 = vmatpush1.msra.mxu1 %v2579_v43  ;;  %v3606_v7 = vpop.eup %3605  ;;  %v2403_v12 = vadd.f32 %v5412_v47, %v2372_v37  ;;  %v2572_v39 = vmax.f32 %v2404_v33, 0.0  ;;  %v2402_v42 = vadd.f32 %v5412_v47, %v2371_v49 }
 0x3e9   :  { %2662 = vmatprep.subr.mxu1 %v5716_v55  ;;  %v3608_v23 = vpop.eup %3607  ;;  %v2600_v2 = vmul.f32 %v3606_v7, %v2576_v52 }
 0x3ea   :  { %2663 = vmatpush1.msra.mxu1 %v2578_v32  ;;  %v2599_v19 = vmul.f32 %v3608_v23, %v2575_v22  ;;  %v2571_v34 = vmax.f32 %v2403_v12, 0.0  ;;  %v2570_v10 = vmax.f32 %v2402_v42, 0.0 }
 0x3eb   :  { %2680 = vmatprep.subr.mxu1 %v5716_v55  ;;  %v3610_v17 = vpop.eup %3609 }
 0x3ec   :  { %2681 = vmatpush2.msra.mxu1 %v2601_v8  ;;  %v2598_v60 = vmul.f32 %v3610_v17, %v2574_v56 }
 0x3ed   :  { %2682 = vmatprep.subr.mxu1 %v5716_v55  ;;  %v3612_v25 = vpop.eup %3611 }
 0x3ee   :  { %2683 = vmatpush2.msra.mxu1 %v2600_v2  ;;  %v2597_v59 = vmul.f32 %v3612_v25, %v2573_v9 }
 0x3ef   :  { %2684 = vmatprep.subr.mxu1 %v5716_v55  ;;  %v3614_v40 = vpop.eup %3613 }
 0x3f0   :  { %2685 = vmatpush2.msra.mxu1 %v2599_v19  ;;  %v3616_v0 = vpop.eup %3615  ;;  %v2596_v54 = vmul.f32 %v3614_v40, %v2572_v39 }
 0x3f1   :  { %2686 = vmatprep.subr.mxu1 %v5716_v55  ;;  %v2595_v28 = vmul.f32 %v3616_v0, %v2571_v34 }
 0x3f2   :  { %2687 = vmatpush2.msra.mxu1 %v2598_v60  ;;  %v3618_v20 = vpop.eup %3617 }
 0x3f3   :  { %2688 = vmatprep.subr.mxu1 %v5716_v55  ;;  %v2594_v47 = vmul.f32 %v3618_v20, %v2570_v10 }
 0x3f4   :  { %2689 = vmatpush2.msra.mxu1 %v2597_v59 }
 0x3f5   :  { %2690 = vmatprep.subr.mxu1 %v5716_v55 }
 0x3f6   :  { %2691 = vmatpush2.msra.mxu1 %v2596_v54 }
 0x3f7   :  { %2692 = vmatprep.subr.mxu1 %v5716_v55 }
 0x3f8   :  { %2693 = vmatpush2.msra.mxu1 %v2595_v28 }
 0x3f9   :  { %2694 = vmatprep.subr.mxu1 %v5716_v55  ;;  %v2606_v55 = vld [vmem:[%s5702_s17 + $0x20] sm:$0xff] }
 0x3fa   :  { %2695 = vmatpush2.msra.mxu1 %v2594_v47 }
 0x3fb   :  { %2697 = vmatmul.mubr.f32.vlgmr.msra.gmra.mxu1 %v2602_v30 }
 0x3fc   :  { %3010 = vmatprep.mubr.msk.f32.mxu1 %vm527_vm2, %v2605_v15 }
 0x3ff   :  { %2702 = vmatmul.mubr.f32.gmra.mxu1 %v2604_v57 }
 0x400   :  { %3011 = vmatprep.mubr.msk.f32.mxu1 %vm527_vm2, %v2607_v44 }
 0x403   :  { %2707 = vmatmul.mubr.f32.gmra.mxu1 %v2606_v55 }
 0x404   :  { %3012 = vmatprep.mubr.msk.f32.mxu1 %vm527_vm2, %v2609_v51 }
 0x407   :  { %2712 = vmatmul.mubr.f32.gmra.mxu1 %v2608_v31 }
 0x408   :  { %3013 = vmatprep.mubr.msk.f32.mxu1 %vm527_vm2, %v2611_v50 }
 0x40b   :  { %2717 = vmatmul.mubr.f32.gmra.mxu1 %v2610_v53 }
 0x40c   :  { %3014 = vmatprep.mubr.msk.f32.mxu1 %vm527_vm2, %v2613_v3  ;;  %v3015_v3 = vld [vmem:[#allocation12] ss:$0 sm:$0xff] }
 0x40f   :  { %2722 = vmatmul.mubr.f32.gmra.mxu1 %v2612_v41 }
 0x4bb   :  { %v2698_v24 = vpop.f32.mrf.mxu1 }
 0x4bc   :  { %v2727_v36 = vsel %vm527_vm2, %v2698_v24, 0.0 }
 0x4bd   :  { %v2700_v16 = vpop.f32.mrf.mxu1 }
 0x4bf   :  { %v2703_v6 = vpop.f32.mrf.mxu1 }
 0x4c0   :  { %v2728_v61 = vsel %vm527_vm2, %v2703_v6, 0.0 }
 0x4c1   :  { %v2705_v58 = vpop.f32.mrf.mxu1  ;;  %v2729_v11 = vadd.f32 %v2728_v61, %v2727_v36 }
 0x4c3   :  { %v2708_v48 = vpop.f32.mrf.mxu1 }
 0x4c4   :  { %v2730_v5 = vsel %vm527_vm2, %v2708_v48, 0.0 }
 0x4c5   :  { %v2710_v29 = vpop.f32.mrf.mxu1  ;;  %v2731_v43 = vadd.f32 %v2730_v5, %v2729_v11 }
 0x4c6   :  { %v3016_v29 = vld [vmem:[#allocation13] ss:$0 sm:$0xff] }
 0x4c7   :  { %v2713_v21 = vpop.f32.mrf.mxu1 }
 0x4c8   :  { %v2732_v35 = vsel %vm527_vm2, %v2713_v21, 0.0 }
 0x4c9   :  { %v2715_v4 = vpop.f32.mrf.mxu1  ;;  %v2733_v38 = vadd.f32 %v2732_v35, %v2731_v43 }
 0x4cb   :  { %v2718_v13 = vpop.f32.mrf.mxu1 }
 0x4cc   :  { %v2734_v26 = vsel %vm527_vm2, %v2718_v13, 0.0 }
 0x4cd   :  { %v2720_v14 = vpop.f32.mrf.mxu1  ;;  %v2735_v46 = vadd.f32 %v2734_v26, %v2733_v38 }
 0x4cf   :  { %v2723_v62 = vpop.f32.mrf.mxu1 }
 0x4d0   :  { %v2736_v32 = vsel %vm527_vm2, %v2723_v62, 0.0 }
 0x4d1   :  { %v2737_v1 = vadd.f32 %v2736_v32, %v2735_v46  ;;  %v2725_v52 = vpop.f32.mrf.mxu1  ;;  %v3621_v46 = vld [vmem:[%s5675_s18] sm:$0xff]  ;;  %v3622_v32 = vld [vmem:[%s5675_s18 + $0x8] sm:$0xff] }
 0x4d2   :  { %v3623_v52 = vld [vmem:[%s5675_s18 + $0x10] sm:$0xff] }
 0x4d3   :  { %v2738_v45 = vrot.slane %v2737_v1, 4 }
 0x4d5   :  { %v2739_v18 = vadd.f32 %v2738_v45, %v2737_v1 }
 0x4d7   :  { %v2740_v27 = vrot.slane %v2739_v18, 2 }
 0x4d9   :  { %v2741_v7 = vadd.f32 %v2740_v27, %v2739_v18  ;;  %v3624_v18 = vld [vmem:[%s5675_s18 + $0x18] sm:$0xff] }
 0x4db   :  { %v2742_v8 = vrot.slane %v2741_v7, 1 }
 0x4dd   :  { %v2743_v22 = vadd.f32 %v2742_v8, %v2741_v7  ;;  %v3625_v7 = vld [vmem:[%s5675_s18 + $0x20] sm:$0xff] }
 0x4df   :  { %v2745_v63 = vmul.f32 0.020833334, %v2743_v22  ;;  %v3626_v22 = vld [vmem:[%s5675_s18 + $0x28] sm:$0xff] }
 0x4e1   :  { %v2746_v37 = vsub.f32 %v2698_v24, %v2745_v63  ;;  %v2747_v23 = vsub.f32 %v2703_v6, %v2745_v63  ;;  %v2748_v2 = vsub.f32 %v2708_v48, %v2745_v63  ;;  %v2749_v56 = vsub.f32 %v2713_v21, %v2745_v63 }
 0x4e2   :  { %v2750_v33 = vsub.f32 %v2718_v13, %v2745_v63  ;;  %v2751_v9 = vsub.f32 %v2723_v62, %v2745_v63 }
 0x4e3   :  { %v2752_v49 = vmul.f32 %v2746_v37, %v2746_v37  ;;  %v2753_v17 = vmul.f32 %v2747_v23, %v2747_v23  ;;  %v2754_v19 = vmul.f32 %v2748_v2, %v2748_v2  ;;  %v2755_v12 = vmul.f32 %v2749_v56, %v2749_v56 }
 0x4e4   :  { %v2756_v42 = vmul.f32 %v2750_v33, %v2750_v33  ;;  %v2757_v34 = vmul.f32 %v2751_v9, %v2751_v9 }
 0x4e5   :  { %v2758_v25 = vsel %vm527_vm2, %v2752_v49, 0.0  ;;  %v2759_v60 = vsel %vm527_vm2, %v2753_v17, 0.0  ;;  %v2761_v40 = vsel %vm527_vm2, %v2754_v19, 0.0  ;;  %v2763_v0 = vsel %vm527_vm2, %v2755_v12, 0.0 }
 0x4e6   :  { %v2760_v39 = vadd.f32 %v2759_v60, %v2758_v25  ;;  %v2765_v10 = vsel %vm527_vm2, %v2756_v42, 0.0  ;;  %v2767_v28 = vsel %vm527_vm2, %v2757_v34, 0.0 }
 0x4e8   :  { %v2762_v59 = vadd.f32 %v2761_v40, %v2760_v39 }
 0x4ea   :  { %v2764_v54 = vadd.f32 %v2763_v0, %v2762_v59 }
 0x4ec   :  { %v2766_v20 = vadd.f32 %v2765_v10, %v2764_v54 }
 0x4ee   :  { %v2768_v47 = vadd.f32 %v2767_v28, %v2766_v20 }
 0x4f0   :  { %v2769_v30 = vrot.slane %v2768_v47, 4 }
 0x4f2   :  { %v2770_v15 = vadd.f32 %v2769_v30, %v2768_v47 }
 0x4f4   :  { %v2771_v57 = vrot.slane %v2770_v15, 2 }
 0x4f6   :  { %v2772_v44 = vadd.f32 %v2771_v57, %v2770_v15 }
 0x4f8   :  { %v2773_v55 = vrot.slane %v2772_v44, 1 }
 0x4fa   :  { %v2774_v51 = vadd.f32 %v2773_v55, %v2772_v44 }
 0x4fc   :  { %v2775_v31 = vmul.f32 0.020833334, %v2774_v51 }
 0x4fe   :  { %v2776_v50 = vadd.f32 1e-05, %v2775_v31 }
 0x500   :  { %3619 = vrsqrt.f32 %v2776_v50 }
 0x50d   :  { %v3620_v53 = vpop.eup %3619 }
 0x50e   :  { %v2778_v41 = vmul.f32 %v3620_v53, %v2746_v37  ;;  %v2779_v24 = vmul.f32 %v3620_v53, %v2747_v23  ;;  %v2780_v16 = vmul.f32 %v3620_v53, %v2748_v2  ;;  %v2781_v6 = vmul.f32 %v3620_v53, %v2749_v56 }
 0x50f   :  { %v2782_v58 = vmul.f32 %v3620_v53, %v2750_v33  ;;  %v2783_v48 = vmul.f32 %v3620_v53, %v2751_v9 }
 0x510   :  { %v2791_v61 = vmul.f32 %v3015_v3, %v2778_v41  ;;  %v2792_v21 = vmul.f32 %v3015_v3, %v2779_v24  ;;  %v2793_v36 = vmul.f32 %v3015_v3, %v2780_v16  ;;  %v2794_v5 = vmul.f32 %v3015_v3, %v2781_v6 }
 0x511   :  { %v2795_v11 = vmul.f32 %v3015_v3, %v2782_v58  ;;  %v2796_v4 = vmul.f32 %v3015_v3, %v2783_v48 }
 0x512   :  { %v2804_v35 = vadd.f32 %v3016_v29, %v2791_v61  ;;  %v2805_v43 = vadd.f32 %v3016_v29, %v2792_v21  ;;  %v2806_v13 = vadd.f32 %v3016_v29, %v2793_v36  ;;  %v2807_v26 = vadd.f32 %v3016_v29, %v2794_v5 }
 0x513   :  { %v2808_v38 = vadd.f32 %v3016_v29, %v2795_v11  ;;  %v2809_v14 = vadd.f32 %v3016_v29, %v2796_v4 }
 0x514   :  { %v2810_v62 = vadd.f32 %v3621_v46, %v2804_v35  ;;  %v2811_v1 = vadd.f32 %v3622_v32, %v2805_v43  ;;  %v2812_v45 = vadd.f32 %v3623_v52, %v2806_v13  ;;  %v2813_v27 = vadd.f32 %v3624_v18, %v2807_v26 }
 0x515   :  { %v2814_v8 = vadd.f32 %v3625_v7, %v2808_v38  ;;  %v2815_v63 = vadd.f32 %v3626_v22, %v2809_v14 }
 0x516   :  { %v2816_v37 = vmax.f32 %v2810_v62, 0.0  ;;  %v2817_v23 = vmax.f32 %v2811_v1, 0.0  ;;  %v2818_v2 = vmax.f32 %v2812_v45, 0.0  ;;  %v2819_v56 = vmax.f32 %v2813_v27, 0.0 }
 0x517   :  { %v2820_v33 = vmax.f32 %v2814_v8, 0.0  ;;  %v2821_v49 = vmax.f32 %v2815_v63, 0.0 }
 0x518   :  { %2822 = vst.msk [vmem:[%s5646_s19] sm:$0xff] %vm527_vm2, %v2816_v37  ;;  %2823 = vst.msk [vmem:[%s5646_s19 + $0x8] sm:$0xff] %vm527_vm2, %v2817_v23 }
 0x519   :  { %2824 = vst.msk [vmem:[%s5646_s19 + $0x10] sm:$0xff] %vm527_vm2, %v2818_v2  ;;  %2825 = vst.msk [vmem:[%s5646_s19 + $0x18] sm:$0xff] %vm527_vm2, %v2819_v56 }
 0x51a   :  { %2826 = vst.msk [vmem:[%s5646_s19 + $0x20] sm:$0xff] %vm527_vm2, %v2820_v33  ;;  %2827 = vst.msk [vmem:[%s5646_s19 + $0x28] sm:$0xff] %vm527_vm2, %v2821_v49 }
 0x51b   :  { %2832 = vsyncpa [#allocation3], 1 }
 0x51c   :  { %2833 = vsyncpa [#allocation5], 1 }
 0x51d   :  { %2834 = vsyncpa [#allocation8], 1 }
 0x51e   :  { %2835 = vsyncpa [#allocation11], 1 }
 0x51f   :  { %2836 = vsyncpa [#allocation14], 1 }

// kernel: phanto_idp_forward.12
= control target key start
LH: loop header
LB: loop body
LE: loop exit
PB: predicated region body
PF: predicated region fallthrough
CT: control target
= control target key end

     0   :  { %v5367_v1 = vmov 0.0   ;;  %vm3522_vm0 = vmmov 0   ;;  %vm96_vm1 = vcmask 392192   ;;  %vm434_vm2 = vcmask 523264   ;;  %s5343_s0 = inlined_call_operand.vmem [shape: f32[48,64], index: 0, kind: input, shape index: {}]   ;;  %s5344_s5 = inlined_call_operand.vmem [shape: bf16[64,64], index: 5, kind: input, shape index: {}]   ;;  %s5345_s1 = inlined_call_operand.vmem [shape: f32[192,48], index: 1, kind: input, shape index: {}]   ;;  %s5346_s6 = inlined_call_operand.vmem [shape: bf16[64,64], index: 6, kind: input, shape index: {}]   ;;  %s5347_s2 = inlined_call_operand.vmem [shape: f32[192,48], index: 2, kind: input, shape index: {}]   ;;  %s5348_s9 = inlined_call_operand.vmem [shape: bf16[64,64], index: 9, kind: input, shape index: {}]   ;;  %s5349_s10 = inlined_call_operand.vmem [shape: bf16[64,64], index: 10, kind: input, shape index: {}]   ;;  %s5350_s7 = inlined_call_operand.vmem [shape: bf16[8,64], index: 7, kind: input, shape index: {}]   ;;  %s5351_s4 = inlined_call_operand.vmem [shape: f32[192,8], index: 4, kind: input, shape index: {}]   ;;  %s5352_s11 = inlined_call_operand.vmem [shape: bf16[8,64], index: 11, kind: input, shape index: {}]   ;;  %s5353_s8 = inlined_call_operand.vmem [shape: f32[1,64], index: 8, kind: input, shape index: {}]   ;;  %s5354_s12 = inlined_call_operand.vmem [shape: f32[1,64], index: 12, kind: input, shape index: {}]   ;;  %s5355_s3 = inlined_call_operand.vmem [shape: f32[48,192], index: 3, kind: input, shape index: {}]   ;;  %s5356_s13 = inlined_call_operand.vmem [shape: f32[1,64], index: 13, kind: input, shape index: {}]   ;;  %s5357_s14 = inlined_call_operand.vmem [shape: f32[1,64], index: 14, kind: input, shape index: {}]   ;;  %s5358_s15 = inlined_call_operand.vmem [shape: f32[1,64], index: 15, kind: input, shape index: {}]   ;;  %s5359_s16 = inlined_call_operand.vmem [shape: f32[1,64], index: 16, kind: input, shape index: {}]   ;;  %s5360_s17 = inlined_call_operand.vmem [shape: f32[1,64], index: 17, kind: input, shape index: {}]   ;;  %s5361_s18 = inlined_call_operand.vmem [shape: f32[1,64], index: 18, kind: input, shape index: {}]   ;;  %s5362_s19 = inlined_call_operand.vmem [shape: f32[48,64], index: 19, kind: output, shape index: {}]  }
   0x1   :  { %5387 = sst [smem:[#allocation20_spill]] %s5343_s0  ;;  %3129 = vmatprep.subr.bf16.mxu1 %v5367_v1  ;;  %3137 = vmatprep.mubr.msk.bf16.mxu1 %vm3522_vm0, %v5367_v1  ;;  %v3796_v42 = vld [vmem:[%s5347_s2] sm:$0xff]  ;;  %vm1017_vm3 = vcmask 1043456   ;;  %vm980_vm4 = vcmask 64512  }
   0x2   :  { %5388 = sst [smem:[#allocation21_spill]] %s5344_s5 }
   0x3   :  { %5389 = sst [smem:[#allocation22_spill]] %s5345_s1 }
   0x4   :  { %5390 = sst [smem:[#allocation23_spill]] %s5346_s6 }
   0x5   :  { %s5391_s20 = sld [smem:[#allocation20_spill]] }
   0x6   :  { %s5392_s23 = sld [smem:[#allocation21_spill]] }
   0x7   :  { %s5393_s30 = sld [smem:[#allocation22_spill]] }
   0x8   :  { %s5394_s25 = sld [smem:[#allocation23_spill]] }
   0xb   :  { %v3626_v0 = vld [vmem:[%s5391_s20 + $0x28] sm:$0xff]  ;;  %v3632_v2 = vld [vmem:[%s5391_s20 + $0x20] sm:$0xff]  ;;  %v66_v4 = vld [vmem:[%s5391_s20 + $0x18] sm:$0xff] }
   0xc   :  { %3081 = vmatprep.subr.mxu0 %v3626_v0  ;;  %v3397_v3 = vld [vmem:[%s5392_s23 + $0x18] sm:$0xff]   ;;  %v3398_v5 = vld [vmem:[%s5392_s23 + $0x10] sm:$0xff]   ;;  %v64_v8 = vld [vmem:[%s5391_s20 + $0x8] sm:$0xff]  ;;  %v3734_v27 = vpack.c.bf16 %v3626_v0, %v3632_v2 }
   0xd   :  { %3082 = vmatpush3.msra.mxu0 %v3626_v0  ;;  %3130 = vmatpush3.bf16.msra.mxu1 %v3397_v3  ;;  %v65_v6 = vld [vmem:[%s5391_s20 + $0x10] sm:$0xff]  ;;  %v72_v7 = vld [vmem:[%s5393_s30] sm:$0xff]  ;;  %v3399_v9 = vld [vmem:[%s5392_s23 + $0x8] sm:$0xff]  }
   0xe   :  { %3083 = vmatprep.subr.mxu0 %v3632_v2  ;;  %3131 = vmatprep.subr.bf16.mxu1 %v5367_v1  ;;  %v63_v10 = vld [vmem:[%s5391_s20] sm:$0xff]  ;;  %v73_v11 = vld [vmem:[%s5393_s30 + $0x8] sm:$0xff]  ;;  %v74_v13 = vld [vmem:[%s5393_s30 + $0x10] sm:$0xff]  ;;  %v3710_v22 = vpack.c.bf16 %v66_v4, %v65_v6 }
   0xf   :  { %3084 = vmatpush3.msra.mxu0 %v3632_v2  ;;  %3093 = vmatprep.mubr.msk.f32.mxu0 %vm96_vm1, %v72_v7  ;;  %v3400_v12 = vld [vmem:[%s5392_s23] sm:$0xff]   ;;  %v75_v14 = vld [vmem:[%s5393_s30 + $0x18] sm:$0xff]  ;;  %v3685_v16 = vpack.c.bf16 %v64_v8, %v63_v10  ;;  %v3402_v18 = vld [vmem:[%s5394_s25 + $0x10] sm:$0xff]  }
  0x10   :  { %3085 = vmatprep.subr.mxu0 %v66_v4  ;;  %v76_v15 = vld [vmem:[%s5393_s30 + $0x20] sm:$0xff]  ;;  %v3401_v17 = vld [vmem:[%s5394_s25 + $0x18] sm:$0xff]   ;;  %v77_v19 = vld [vmem:[%s5393_s30 + $0x28] sm:$0xff] }
  0x11   :  { %3086 = vmatpush3.msra.mxu0 %v66_v4  ;;  %3132 = vmatpush3.bf16.msra.mxu1 %v3398_v5  ;;  %v78_v20 = vld [vmem:[%s5393_s30 + $0x30] sm:$0xff]  ;;  %v79_v21 = vld [vmem:[%s5393_s30 + $0x38] sm:$0xff]  ;;  %v80_v23 = vld [vmem:[%s5393_s30 + $0x40] sm:$0xff] }
  0x12   :  { %3087 = vmatprep.subr.mxu0 %v65_v6  ;;  %3133 = vmatprep.subr.bf16.mxu1 %v5367_v1  ;;  %v81_v24 = vld [vmem:[%s5393_s30 + $0x48] sm:$0xff]  ;;  %v82_v25 = vld [vmem:[%s5393_s30 + $0x50] sm:$0xff]  ;;  %v83_v26 = vld [vmem:[%s5393_s30 + $0x58] sm:$0xff] }
  0x13   :  { %3088 = vmatpush3.msra.mxu0 %v65_v6  ;;  %v84_v28 = vld [vmem:[%s5393_s30 + $0x60] sm:$0xff]  ;;  %v85_v29 = vld [vmem:[%s5393_s30 + $0x68] sm:$0xff]  ;;  %v86_v30 = vld [vmem:[%s5393_s30 + $0x70] sm:$0xff] }
  0x14   :  { %3089 = vmatprep.subr.mxu0 %v64_v8  ;;  %v87_v31 = vld [vmem:[%s5393_s30 + $0x78] sm:$0xff]  ;;  %v88_v32 = vld [vmem:[%s5393_s30 + $0x80] sm:$0xff]  ;;  %v89_v33 = vld [vmem:[%s5393_s30 + $0x88] sm:$0xff] }
  0x15   :  { %3090 = vmatpush3.msra.mxu0 %v64_v8  ;;  %3134 = vmatpush3.bf16.msra.mxu1 %v3399_v9  ;;  %v90_v34 = vld [vmem:[%s5393_s30 + $0x90] sm:$0xff]  ;;  %v91_v35 = vld [vmem:[%s5393_s30 + $0x98] sm:$0xff]  ;;  %v92_v36 = vld [vmem:[%s5393_s30 + $0xa0] sm:$0xff] }
  0x16   :  { %3091 = vmatprep.subr.mxu0 %v63_v10  ;;  %3135 = vmatprep.subr.bf16.mxu1 %v5367_v1  ;;  %v93_v37 = vld [vmem:[%s5393_s30 + $0xa8] sm:$0xff]  ;;  %v94_v38 = vld [vmem:[%s5393_s30 + $0xb0] sm:$0xff]  ;;  %v95_v39 = vld [vmem:[%s5393_s30 + $0xb8] sm:$0xff] }
  0x17   :  { %3092 = vmatpush3.msra.mxu0 %v63_v10  ;;  %v3403_v40 = vld [vmem:[%s5394_s25 + $0x8] sm:$0xff]   ;;  %v3404_v41 = vld [vmem:[%s5394_s25] sm:$0xff]  }
  0x18   :  { %3094 = vmatmul.mubr.msk.f32.vlgmr.msra.gmra.mxu0 %vm96_vm1, %v73_v11 }
  0x19   :  { %3096 = vmatprep.mubr.msk.f32.mxu0 %vm96_vm1, %v74_v13  ;;  %3136 = vmatpush3.bf16.msra.mxu1 %v3400_v12 }
  0x1a   :  { %3149 = vmatprep.subr.bf16.mxu1 %v3401_v17 }
  0x1c   :  { %3097 = vmatmul.mubr.msk.f32.gmra.mxu0 %vm96_vm1, %v75_v14  ;;  %3138 = vmatmul.mubr.msk.bf16.vlgmr.msra.gmra.mxu1 %vm434_vm2, %v3685_v16 }
  0x1d   :  { %3099 = vmatprep.mubr.msk.f32.mxu0 %vm96_vm1, %v76_v15  ;;  %3141 = vmatprep.mubr.msk.bf16.mxu1 %vm3522_vm0, %v5367_v1 }
  0x1e   :  { %3150 = vmatpush3.bf16.msra.mxu1 %v3401_v17 }
  0x1f   :  { %3151 = vmatprep.subr.bf16.mxu1 %v3402_v18 }
  0x20   :  { %3100 = vmatmul.mubr.msk.f32.gmra.mxu0 %vm96_vm1, %v77_v19 }
  0x21   :  { %3102 = vmatprep.mubr.msk.f32.mxu0 %vm96_vm1, %v78_v20 }
  0x22   :  { %3152 = vmatpush3.bf16.msra.mxu1 %v3402_v18 }
  0x23   :  { %3153 = vmatprep.subr.bf16.mxu1 %v3403_v40 }
  0x24   :  { %3103 = vmatmul.mubr.msk.f32.gmra.mxu0 %vm96_vm1, %v79_v21  ;;  %3142 = vmatmul.mubr.msk.bf16.gmra.mxu1 %vm434_vm2, %v3710_v22  ;;  %v3839_v21 = vld [vmem:[%s5347_s2 + $0x8] sm:$0xff] }
  0x25   :  { %3105 = vmatprep.mubr.msk.f32.mxu0 %vm96_vm1, %v80_v23  ;;  %3145 = vmatprep.mubr.msk.bf16.mxu1 %vm3522_vm0, %v5367_v1  ;;  %v3846_v23 = vld [vmem:[%s5347_s2 + $0x10] sm:$0xff] }
  0x26   :  { %3154 = vmatpush3.bf16.msra.mxu1 %v3403_v40 }
  0x27   :  { %3155 = vmatprep.subr.bf16.mxu1 %v3404_v41 }
  0x28   :  { %3106 = vmatmul.mubr.msk.f32.gmra.mxu0 %vm96_vm1, %v81_v24  ;;  %v979_v24 = vld [vmem:[%s5350_s7] sm:$0xf] }
  0x29   :  { %3108 = vmatprep.mubr.msk.f32.mxu0 %vm96_vm1, %v82_v25 }
  0x2a   :  { %3156 = vmatpush3.bf16.msra.mxu1 %v3404_v41  ;;  %v3910_v41 = vld [vmem:[%s5347_s2 + $0xa0] sm:$0xff] }
  0x2b   :  { %5395 = vst [vmem:[#allocation2_spill] sm:$0xff] %v3910_v41 }
  0x2c   :  { %3109 = vmatmul.mubr.msk.f32.gmra.mxu0 %vm96_vm1, %v83_v26  ;;  %3146 = vmatmul.mubr.msk.bf16.gmra.mxu1 %vm434_vm2, %v3734_v27  ;;  %v3405_v26 = vld [vmem:[%s5348_s9 + $0x18] sm:$0xff]  }
  0x2d   :  { %3111 = vmatprep.mubr.msk.f32.mxu0 %vm96_vm1, %v84_v28 }
  0x30   :  { %3112 = vmatmul.mubr.msk.f32.gmra.mxu0 %vm96_vm1, %v85_v29 }
  0x31   :  { %3114 = vmatprep.mubr.msk.f32.mxu0 %vm96_vm1, %v86_v30  ;;  %v3867_v30 = vld [vmem:[%s5347_s2 + $0x18] sm:$0xff] }
  0x34   :  { %3115 = vmatmul.mubr.msk.f32.gmra.mxu0 %vm96_vm1, %v87_v31  ;;  %v3875_v31 = vld [vmem:[%s5347_s2 + $0x20] sm:$0xff] }
  0x35   :  { %3117 = vmatprep.mubr.msk.f32.mxu0 %vm96_vm1, %v88_v32 }
  0x38   :  { %3118 = vmatmul.mubr.msk.f32.gmra.mxu0 %vm96_vm1, %v89_v33  ;;  %v3406_v33 = vld [vmem:[%s5348_s9 + $0x10] sm:$0xff]  }
  0x39   :  { %3120 = vmatprep.mubr.msk.f32.mxu0 %vm96_vm1, %v90_v34 }
  0x3c   :  { %3121 = vmatmul.mubr.msk.f32.gmra.mxu0 %vm96_vm1, %v91_v35 }
  0x3d   :  { %3123 = vmatprep.mubr.msk.f32.mxu0 %vm96_vm1, %v92_v36  ;;  %v3891_v36 = vld [vmem:[%s5347_s2 + $0x28] sm:$0xff] }
  0x40   :  { %3124 = vmatmul.mubr.msk.f32.gmra.mxu0 %vm96_vm1, %v93_v37  ;;  %v3898_v37 = vld [vmem:[%s5347_s2 + $0x30] sm:$0xff] }
  0x41   :  { %3126 = vmatprep.mubr.msk.f32.mxu0 %vm96_vm1, %v94_v38 }
  0x44   :  { %3127 = vmatmul.mubr.msk.f32.gmra.mxu0 %vm96_vm1, %v95_v39  ;;  %v3407_v39 = vld [vmem:[%s5348_s9 + $0x8] sm:$0xff]  }
  0x45   :  { %3193 = vmatprep.mubr.msk.f32.mxu0 %vm96_vm1, %v3796_v42 }
  0xd8   :  { %v3095_v43 = vpop.f32.mrf.mxu0 }
  0xda   :  { %v235_v44 = vpop.f32.mrf.mxu0 }
  0xdb   :  { %v3800_v45 = vpack.c.bf16 %v3095_v43, %v235_v44  ;;  %v3918_v43 = vld [vmem:[%s5347_s2 + $0x38] sm:$0xff]  ;;  %v3925_v44 = vld [vmem:[%s5347_s2 + $0x40] sm:$0xff] }
  0xdc   :  { %v3098_v46 = vpop.f32.mrf.mxu0  ;;  %v3802_v47 = vpop.f32.mrf.mxu1 }
  0xdd   :  { %3157 = vmatprep.mubr.msk.bf16.mxu1 %vm434_vm2, %v3800_v45 }
  0xde   :  { %v245_v48 = vpop.f32.mrf.mxu0  ;;  %v3139_v50 = vpop.f32.mrf.mxu1 }
  0xdf   :  { %v3806_v49 = vpack.c.bf16 %v3098_v46, %v245_v48  ;;  %v3408_v46 = vld [vmem:[%s5348_s9] sm:$0xff]   ;;  %v3945_v48 = vld [vmem:[%s5347_s2 + $0x48] sm:$0xff]  ;;  %v3950_v50 = vld [vmem:[%s5347_s2 + $0x50] sm:$0xff] }
  0xe0   :  { %v3101_v51 = vpop.f32.mrf.mxu0  ;;  %v481_v52 = vpop.f32.mrf.mxu1 }
  0xe1   :  { %3158 = vmatmul.mubr.msk.bf16.vlgmr.msra.gmra.mxu1 %vm434_vm2, %v3806_v49 }
  0xe2   :  { %v255_v53 = vpop.f32.mrf.mxu0  ;;  %v3140_v55 = vpop.f32.mrf.mxu1 }
  0xe3   :  { %v3810_v54 = vpack.c.bf16 %v3101_v51, %v255_v53  ;;  %v3955_v51 = vld [vmem:[%s5347_s2 + $0xa8] sm:$0xff]  ;;  %v1019_v53 = vsel %vm1017_vm3, %v979_v24, 0  ;;  %v366_v55 = vld [vmem:[%s5351_s4] sm:$0xff] }
  0xe4   :  { %v3104_v56 = vpop.f32.mrf.mxu0  ;;  %v486_v57 = vpop.f32.mrf.mxu1  ;;  %5396 = vst [vmem:[#allocation3_spill] sm:$0xff] %v3955_v51 }
  0xe5   :  { %3161 = vmatprep.mubr.msk.bf16.mxu1 %vm434_vm2, %v3810_v54 }
  0xe6   :  { %v265_v58 = vpop.f32.mrf.mxu0  ;;  %v3143_v60 = vpop.f32.mrf.mxu1 }
  0xe7   :  { %v3814_v59 = vpack.c.bf16 %v3104_v56, %v265_v58  ;;  %v367_v56 = vld [vmem:[%s5351_s4 + $0x8] sm:$0xff]  ;;  %v3984_v58 = vld [vmem:[%s5347_s2 + $0x60] sm:$0xff]  ;;  %v3991_v60 = vld [vmem:[%s5347_s2 + $0xb8] sm:$0xff] }
  0xe8   :  { %v3107_v61 = vpop.f32.mrf.mxu0  ;;  %v489_v62 = vpop.f32.mrf.mxu1  ;;  %5398 = vst [vmem:[#allocation5_spill] sm:$0xff] %v3991_v60 }
  0xe9   :  { %3162 = vmatmul.mubr.msk.bf16.gmra.mxu1 %vm434_vm2, %v3814_v59 }
  0xea   :  { %v275_v63 = vpop.f32.mrf.mxu0  ;;  %v3144_v2 = vpop.f32.mrf.mxu1 }
  0xeb   :  { %v3818_v0 = vpack.c.bf16 %v3107_v61, %v275_v63  ;;  %v3993_v61 = vpack.c.bf16 %v367_v56, %v366_v55  ;;  %v369_v63 = vld [vmem:[%s5351_s4 + $0x18] sm:$0xff]  ;;  %v370_v2 = vld [vmem:[%s5351_s4 + $0x20] sm:$0xff]  ;;  %v380_v55 = vld [vmem:[%s5351_s4 + $0x70] sm:$0xff] }
  0xec   :  { %v3110_v3 = vpop.f32.mrf.mxu0  ;;  %v494_v4 = vpop.f32.mrf.mxu1  ;;  %v383_v56 = vld [vmem:[%s5351_s4 + $0x88] sm:$0xff] }
  0xed   :  { %3165 = vmatprep.mubr.msk.bf16.mxu1 %vm434_vm2, %v3818_v0 }
  0xee   :  { %v285_v5 = vpop.f32.mrf.mxu0  ;;  %v3147_v7 = vpop.f32.mrf.mxu1 }
  0xef   :  { %v3822_v6 = vpack.c.bf16 %v3110_v3, %v285_v5  ;;  %v371_v3 = vld [vmem:[%s5351_s4 + $0x28] sm:$0xff]  ;;  %v4021_v5 = vld [vmem:[%s5347_s2 + $0x70] sm:$0xff] }
  0xf0   :  { %v3113_v8 = vpop.f32.mrf.mxu0  ;;  %v497_v9 = vpop.f32.mrf.mxu1 }
  0xf1   :  { %3166 = vmatmul.mubr.msk.bf16.gmra.mxu1 %vm434_vm2, %v3822_v6  ;;  %3181 = vmatprep.subr.mxu0 %v497_v9 }
  0xf2   :  { %v295_v10 = vpop.f32.mrf.mxu0  ;;  %3381 = vmatprep.subr.mxu1 %v497_v9  ;;  %v3148_v11 = vpop.f32.mrf.mxu1  ;;  %3182 = vmatpush3.msra.mxu0 %v497_v9 }
  0xf3   :  { %3387 = vmatpush3.msra.mxu1 %v497_v9  ;;  %v3826_v12 = vpack.c.bf16 %v3113_v8, %v295_v10  ;;  %3183 = vmatprep.subr.mxu0 %v494_v4  ;;  %v4027_v8 = vpack.c.bf16 %v371_v3, %v370_v2  ;;  %v4036_v9 = vld [vmem:[%s5347_s2 + $0x78] sm:$0xff]  ;;  %v4043_v10 = vld [vmem:[%s5347_s2 + $0x80] sm:$0xff]  ;;  %v372_v11 = vld [vmem:[%s5351_s4 + $0x30] sm:$0xff] }
  0xf4   :  { %v3116_v13 = vpop.f32.mrf.mxu0  ;;  %3382 = vmatprep.subr.mxu1 %v494_v4  ;;  %3184 = vmatpush3.msra.mxu0 %v494_v4  ;;  %v384_v3 = vld [vmem:[%s5351_s4 + $0x90] sm:$0xff] }
  0xf5   :  { %3388 = vmatpush3.msra.mxu1 %v494_v4  ;;  %3185 = vmatprep.subr.mxu0 %v489_v62  ;;  %v4014_v4 = vld [vmem:[%s5347_s2 + $0x68] sm:$0xff] }
  0xf6   :  { %v305_v14 = vpop.f32.mrf.mxu0  ;;  %3383 = vmatprep.subr.mxu1 %v489_v62  ;;  %3186 = vmatpush3.msra.mxu0 %v489_v62 }
  0xf7   :  { %v3828_v15 = vpack.c.bf16 %v3116_v13, %v305_v14  ;;  %3389 = vmatpush3.msra.mxu1 %v489_v62  ;;  %3169 = vmatprep.mubr.msk.bf16.mxu1 %vm434_vm2, %v3826_v12  ;;  %v368_v62 = vld [vmem:[%s5351_s4 + $0x10] sm:$0xff]  ;;  %v373_v13 = vld [vmem:[%s5351_s4 + $0x38] sm:$0xff]  ;;  %v374_v14 = vld [vmem:[%s5351_s4 + $0x40] sm:$0xff] }
  0xf8   :  { %v3119_v17 = vpop.f32.mrf.mxu0  ;;  %3187 = vmatprep.subr.mxu0 %v486_v57  ;;  %3384 = vmatprep.subr.mxu1 %v486_v57  ;;  %v4023_v7 = vpack.c.bf16 %v369_v63, %v368_v62  ;;  %v3412_v63 = vld [vmem:[%s5349_s10] sm:$0xff]  }
  0xf9   :  { %3170 = vmatmul.mubr.msk.bf16.gmra.mxu1 %vm434_vm2, %v3828_v15  ;;  %3188 = vmatpush3.msra.mxu0 %v486_v57 }
  0xfa   :  { %3390 = vmatpush3.msra.mxu1 %v486_v57  ;;  %v315_v18 = vpop.f32.mrf.mxu0  ;;  %3189 = vmatprep.subr.mxu0 %v481_v52  ;;  %v3977_v57 = vld [vmem:[%s5347_s2 + $0x58] sm:$0xff] }
  0xfb   :  { %v3834_v19 = vpack.c.bf16 %v3119_v17, %v315_v18  ;;  %3385 = vmatprep.subr.mxu1 %v481_v52  ;;  %3190 = vmatpush3.msra.mxu0 %v481_v52  ;;  %v375_v17 = vld [vmem:[%s5351_s4 + $0x48] sm:$0xff] }
  0xfc   :  { %3391 = vmatpush3.msra.mxu1 %v481_v52  ;;  %v3122_v20 = vpop.f32.mrf.mxu0  ;;  %3191 = vmatprep.subr.mxu0 %v3802_v47  ;;  %v3962_v52 = vld [vmem:[%s5347_s2 + $0xb0] sm:$0xff]  ;;  %v4066_v18 = vld [vmem:[%s5347_s2 + $0x88] sm:$0xff] }
  0xfd   :  { %3386 = vmatprep.subr.mxu1 %v3802_v47  ;;  %3192 = vmatpush3.msra.mxu0 %v3802_v47  ;;  %5397 = vst [vmem:[#allocation4_spill] sm:$0xff] %v3962_v52 }
  0xfe   :  { %3392 = vmatpush3.msra.mxu1 %v3802_v47  ;;  %v325_v25 = vpop.f32.mrf.mxu0  ;;  %3194 = vmatmul.mubr.msk.f32.vlgmr.msra.gmra.mxu0 %vm96_vm1, %v3839_v21  ;;  %v3938_v47 = vld [vmem:[%s5349_s10 + $0x18] sm:$0xff]  }
  0xff   :  { %v3856_v28 = vpack.c.bf16 %v3122_v20, %v325_v25  ;;  %3173 = vmatprep.mubr.msk.bf16.mxu1 %vm434_vm2, %v3834_v19  ;;  %3196 = vmatprep.mubr.msk.f32.mxu0 %vm96_vm1, %v3846_v23  ;;  %v4071_v20 = vld [vmem:[%s5347_s2 + $0x90] sm:$0xff]  ;;  %v4075_v25 = vpack.c.bf16 %v375_v17, %v374_v14 }
 0x100   :  { %v3125_v29 = vpop.f32.mrf.mxu0  ;;  %3393 = vmatprep.subr.msk.bf16.mxu1 %vm1017_vm3, %v979_v24  ;;  %3255 = vmatprep.subr.bf16.mxu0 %v5367_v1  ;;  %v4073_v24 = vpack.c.bf16 %v373_v13, %v372_v11  ;;  %v385_v11 = vld [vmem:[%s5351_s4 + $0x98] sm:$0xff]  ;;  %v387_v13 = vld [vmem:[%s5351_s4 + $0xa8] sm:$0xff] }
 0x101   :  { %3174 = vmatmul.mubr.msk.bf16.gmra.mxu1 %vm434_vm2, %v3856_v28  ;;  %3256 = vmatpush3.bf16.msra.mxu0 %v3405_v26  ;;  %v4084_v26 = vld [vmem:[%s5347_s2 + $0x98] sm:$0xff]  ;;  %v399_v14 = vpack.c.bf16 %v385_v11, %v384_v3 }
 0x102   :  { %v335_v32 = vpop.f32.mrf.mxu0  ;;  %3197 = vmatmul.mubr.msk.f32.gmra.mxu0 %vm96_vm1, %v3867_v30  ;;  %3257 = vmatprep.subr.bf16.mxu0 %v5367_v1  ;;  %5399 = vst [vmem:[#allocation6_spill] sm:$0xff] %v4084_v26 }
 0x103   :  { %v3881_v34 = vpack.c.bf16 %v3125_v29, %v335_v32  ;;  %3199 = vmatprep.mubr.msk.f32.mxu0 %vm96_vm1, %v3875_v31  ;;  %v376_v29 = vld [vmem:[%s5351_s4 + $0x50] sm:$0xff]  ;;  %v377_v32 = vld [vmem:[%s5351_s4 + $0x58] sm:$0xff] }
 0x104   :  { %v3128_v35 = vpop.f32.mrf.mxu0 }
 0x105   :  { %3177 = vmatprep.mubr.msk.bf16.mxu1 %vm434_vm2, %v3881_v34  ;;  %3258 = vmatpush3.bf16.msra.mxu0 %v3406_v33  ;;  %v378_v33 = vld [vmem:[%s5351_s4 + $0x60] sm:$0xff] }
 0x106   :  { %v345_v38 = vpop.f32.mrf.mxu0  ;;  %3200 = vmatmul.mubr.msk.f32.gmra.mxu0 %vm96_vm1, %v3891_v36  ;;  %3259 = vmatprep.subr.bf16.mxu0 %v5367_v1 }
 0x107   :  { %v3903_v40 = vpack.c.bf16 %v3128_v35, %v345_v38  ;;  %3202 = vmatprep.mubr.msk.f32.mxu0 %vm96_vm1, %v3898_v37  ;;  %v379_v35 = vld [vmem:[%s5351_s4 + $0x68] sm:$0xff]  ;;  %v395_v38 = vpack.c.bf16 %v377_v32, %v376_v29  ;;  %v388_v29 = vld [vmem:[%s5351_s4 + $0xb0] sm:$0xff]  ;;  %v389_v32 = vld [vmem:[%s5351_s4 + $0xb8] sm:$0xff] }
 0x109   :  { %3178 = vmatmul.mubr.msk.bf16.gmra.mxu1 %vm434_vm2, %v3903_v40  ;;  %3260 = vmatpush3.bf16.msra.mxu0 %v3407_v39  ;;  %v3410_v39 = vld [vmem:[%s5349_s10 + $0x10] sm:$0xff]  }
 0x10a   :  { %3223 = vmatprep.mubr.msk.f32.mxu1 %vm96_vm1, %v3910_v41  ;;  %3203 = vmatmul.mubr.msk.f32.gmra.mxu0 %vm96_vm1, %v3918_v43 }
 0x10b   :  { %3261 = vmatprep.subr.bf16.mxu0 %v5367_v1  ;;  %3205 = vmatprep.mubr.msk.f32.mxu0 %vm96_vm1, %v3925_v44 }
 0x10d   :  { %3262 = vmatpush3.bf16.msra.mxu0 %v3408_v46  ;;  %v396_v46 = vpack.c.bf16 %v379_v35, %v378_v33  ;;  %v401_v33 = vpack.c.bf16 %v389_v32, %v388_v29 }
 0x10e   :  { %3206 = vmatmul.mubr.msk.f32.gmra.mxu0 %vm96_vm1, %v3945_v48  ;;  %3275 = vmatprep.subr.bf16.mxu0 %v3938_v47 }
 0x10f   :  { %3208 = vmatprep.mubr.msk.f32.mxu0 %vm96_vm1, %v3950_v50 }
 0x111   :  { %3224 = vmatmul.mubr.msk.f32.vlgmr.msra.gmra.mxu1 %vm96_vm1, %v3955_v51 }
 0x112   :  { %3226 = vmatprep.mubr.msk.f32.mxu1 %vm96_vm1, %v3962_v52  ;;  %3230 = vmatpush3.bf16.msra.mxu1 %v1019_v53  ;;  %v3411_v53 = vld [vmem:[%s5349_s10 + $0x8] sm:$0xff]  }
 0x113   :  { %3209 = vmatmul.mubr.msk.f32.gmra.mxu0 %vm96_vm1, %v3977_v57 }
 0x114   :  { %3211 = vmatprep.mubr.msk.f32.mxu0 %vm96_vm1, %v3984_v58 }
 0x115   :  { %3227 = vmatmul.mubr.msk.f32.gmra.mxu1 %vm96_vm1, %v3991_v60 }
 0x116   :  { %3231 = vmatprep.mubr.msk.bf16.mxu1 %vm980_vm4, %v3993_v61 }
 0x117   :  { %3212 = vmatmul.mubr.msk.f32.gmra.mxu0 %vm96_vm1, %v4014_v4 }
 0x118   :  { %3214 = vmatprep.mubr.msk.f32.mxu0 %vm96_vm1, %v4021_v5 }
 0x119   :  { %3232 = vmatmul.mubr.msk.bf16.vlgmr.msra.gmra.mxu1 %vm980_vm4, %v4023_v7 }
 0x11a   :  { %3235 = vmatprep.mubr.msk.bf16.mxu1 %vm980_vm4, %v4027_v8 }
 0x11b   :  { %3215 = vmatmul.mubr.msk.f32.gmra.mxu0 %vm96_vm1, %v4036_v9 }
 0x11c   :  { %3217 = vmatprep.mubr.msk.f32.mxu0 %vm96_vm1, %v4043_v10 }
 0x11f   :  { %3218 = vmatmul.mubr.msk.f32.gmra.mxu0 %vm96_vm1, %v4066_v18 }
 0x120   :  { %3220 = vmatprep.mubr.msk.f32.mxu0 %vm96_vm1, %v4071_v20 }
 0x121   :  { %3236 = vmatmul.mubr.msk.bf16.gmra.mxu1 %vm980_vm4, %v4073_v24 }
 0x122   :  { %3239 = vmatprep.mubr.msk.bf16.mxu1 %vm980_vm4, %v4075_v25 }
 0x123   :  { %3221 = vmatmul.mubr.msk.f32.gmra.mxu0 %vm96_vm1, %v4084_v26 }
 0x124   :  { %3263 = vmatprep.mubr.msk.bf16.mxu0 %vm3522_vm0, %v5367_v1 }
 0x127   :  { %3264 = vmatmul.mubr.msk.bf16.vlgmr.msra.gmra.mxu0 %vm434_vm2, %v3685_v16  ;;  %v381_v16 = vld [vmem:[%s5351_s4 + $0x78] sm:$0xff] }
 0x128   :  { %3267 = vmatprep.mubr.msk.bf16.mxu0 %vm3522_vm0, %v5367_v1  ;;  %3276 = vmatpush3.bf16.msra.mxu0 %v3938_v47  ;;  %v382_v47 = vld [vmem:[%s5351_s4 + $0x80] sm:$0xff]  ;;  %v397_v62 = vpack.c.bf16 %v381_v16, %v380_v55 }
 0x129   :  { %3240 = vmatmul.mubr.msk.bf16.gmra.mxu1 %vm980_vm4, %v395_v38  ;;  %3277 = vmatprep.subr.bf16.mxu0 %v3410_v39  ;;  %v398_v2 = vpack.c.bf16 %v383_v56, %v382_v47 }
 0x12a   :  { %3243 = vmatprep.mubr.msk.bf16.mxu1 %vm980_vm4, %v396_v46 }
 0x12c   :  { %3278 = vmatpush3.bf16.msra.mxu0 %v3410_v39 }
 0x12d   :  { %3279 = vmatprep.subr.bf16.mxu0 %v3411_v53 }
 0x12f   :  { %3268 = vmatmul.mubr.msk.bf16.gmra.mxu0 %vm434_vm2, %v3710_v22  ;;  %v386_v22 = vld [vmem:[%s5351_s4 + $0xa0] sm:$0xff] }
 0x130   :  { %3271 = vmatprep.mubr.msk.bf16.mxu0 %vm3522_vm0, %v5367_v1  ;;  %3280 = vmatpush3.bf16.msra.mxu0 %v3411_v53  ;;  %v400_v17 = vpack.c.bf16 %v387_v13, %v386_v22 }
 0x131   :  { %3244 = vmatmul.mubr.msk.bf16.gmra.mxu1 %vm980_vm4, %v397_v62  ;;  %3281 = vmatprep.subr.bf16.mxu0 %v3412_v63 }
 0x132   :  { %3247 = vmatprep.mubr.msk.bf16.mxu1 %vm980_vm4, %v398_v2 }
 0x134   :  { %3282 = vmatpush3.bf16.msra.mxu0 %v3412_v63 }
 0x137   :  { %3272 = vmatmul.mubr.msk.bf16.gmra.mxu0 %vm434_vm2, %v3734_v27  ;;  %v1885_v27 = vld [vmem:[%s5352_s11] sm:$0xf] }
 0x138   :  { %3283 = vmatprep.mubr.msk.bf16.mxu0 %vm434_vm2, %v3800_v45  ;;  %3394 = vmatprep.subr.msk.bf16.mxu0 %vm1017_vm3, %v1885_v27 }
 0x139   :  { %3248 = vmatmul.mubr.msk.bf16.gmra.mxu1 %vm980_vm4, %v399_v14 }
 0x13a   :  { %3251 = vmatprep.mubr.msk.bf16.mxu1 %vm980_vm4, %v400_v17 }
 0x13f   :  { %3284 = vmatmul.mubr.msk.bf16.vlgmr.msra.gmra.mxu0 %vm434_vm2, %v3806_v49 }
 0x140   :  { %3287 = vmatprep.mubr.msk.bf16.mxu0 %vm434_vm2, %v3810_v54 }
 0x141   :  { %3252 = vmatmul.mubr.msk.bf16.gmra.mxu1 %vm980_vm4, %v401_v33 }
 0x142   :  { %3319 = vmatprep.mubr.msk.f32.mxu1 %vm96_vm1, %v3796_v42  ;;  %v1887_v42 = vsel %vm1017_vm3, %v1885_v27, 0 }
 0x143   :  { %3356 = vmatpush3.bf16.msra.mxu0 %v1887_v42 }
 0x147   :  { %3288 = vmatmul.mubr.msk.bf16.gmra.mxu0 %vm434_vm2, %v3814_v59 }
 0x148   :  { %3291 = vmatprep.mubr.msk.bf16.mxu0 %vm434_vm2, %v3818_v0 }
 0x14f   :  { %3292 = vmatmul.mubr.msk.bf16.gmra.mxu0 %vm434_vm2, %v3822_v6 }
 0x150   :  { %3295 = vmatprep.mubr.msk.bf16.mxu0 %vm434_vm2, %v3826_v12 }
 0x157   :  { %3296 = vmatmul.mubr.msk.bf16.gmra.mxu0 %vm434_vm2, %v3828_v15 }
 0x158   :  { %3299 = vmatprep.mubr.msk.bf16.mxu0 %vm434_vm2, %v3834_v19 }
 0x15f   :  { %3300 = vmatmul.mubr.msk.bf16.gmra.mxu0 %vm434_vm2, %v3856_v28 }
 0x160   :  { %3303 = vmatprep.mubr.msk.bf16.mxu0 %vm434_vm2, %v3881_v34 }
 0x167   :  { %3304 = vmatmul.mubr.msk.bf16.gmra.mxu0 %vm434_vm2, %v3903_v40 }
 0x168   :  { %3357 = vmatprep.mubr.msk.bf16.mxu0 %vm980_vm4, %v3993_v61 }
 0x16f   :  { %3358 = vmatmul.mubr.msk.bf16.vlgmr.msra.gmra.mxu0 %vm980_vm4, %v4023_v7 }
 0x170   :  { %3361 = vmatprep.mubr.msk.bf16.mxu0 %vm980_vm4, %v4027_v8 }
 0x177   :  { %3362 = vmatmul.mubr.msk.bf16.gmra.mxu0 %vm980_vm4, %v4073_v24 }
 0x178   :  { %3365 = vmatprep.mubr.msk.bf16.mxu0 %vm980_vm4, %v4075_v25 }
 0x17f   :  { %3366 = vmatmul.mubr.msk.bf16.gmra.mxu0 %vm980_vm4, %v395_v38 }
 0x180   :  { %3369 = vmatprep.mubr.msk.bf16.mxu0 %vm980_vm4, %v396_v46 }
 0x187   :  { %3370 = vmatmul.mubr.msk.bf16.gmra.mxu0 %vm980_vm4, %v397_v62 }
 0x188   :  { %3373 = vmatprep.mubr.msk.bf16.mxu0 %vm980_vm4, %v398_v2 }
 0x18f   :  { %3374 = vmatmul.mubr.msk.bf16.gmra.mxu0 %vm980_vm4, %v399_v14 }
 0x190   :  { %3377 = vmatprep.mubr.msk.bf16.mxu0 %vm980_vm4, %v400_v17 }
 0x197   :  { %3378 = vmatmul.mubr.msk.bf16.gmra.mxu0 %vm980_vm4, %v401_v33 }
 0x1a1   :  { %v3159_v45 = vpop.f32.mrf.mxu1 }
 0x1a3   :  { %v627_v49 = vpop.f32.mrf.mxu1 }
 0x1a5   :  { %v3160_v54 = vpop.f32.mrf.mxu1 }
 0x1a7   :  { %v630_v59 = vpop.f32.mrf.mxu1 }
 0x1a9   :  { %v3163_v0 = vpop.f32.mrf.mxu1 }
 0x1ab   :  { %v643_v6 = vpop.f32.mrf.mxu1 }
 0x1ad   :  { %v3164_v12 = vpop.f32.mrf.mxu1 }
 0x1af   :  { %v646_v15 = vpop.f32.mrf.mxu1 }
 0x1b1   :  { %v3167_v19 = vpop.f32.mrf.mxu1 }
 0x1b3   :  { %v659_v28 = vpop.f32.mrf.mxu1 }
 0x1b5   :  { %v3168_v34 = vpop.f32.mrf.mxu1 }
 0x1b7   :  { %v662_v40 = vpop.f32.mrf.mxu1 }
 0x1b9   :  { %v3171_v61 = vpop.f32.mrf.mxu1 }
 0x1bb   :  { %v675_v7 = vpop.f32.mrf.mxu1 }
 0x1bd   :  { %v3172_v8 = vpop.f32.mrf.mxu1 }
 0x1be   :  { %v3195_v24 = vpop.f32.mrf.mxu0 }
 0x1bf   :  { %v678_v25 = vpop.f32.mrf.mxu1  ;;  %v866_v35 = vadd.f32 %v3195_v24, %v630_v59 }
 0x1c0   :  { %v860_v38 = vpop.f32.mrf.mxu0 }
 0x1c1   :  { %v4211_v39 = vpop.f32.mrf.mxu1  ;;  %v861_v46 = vadd.f32 %v860_v38, %v627_v49 }
 0x1c2   :  { %v3198_v53 = vpop.f32.mrf.mxu0 }
 0x1c3   :  { %v691_v55 = vpop.f32.mrf.mxu1  ;;  %v876_v16 = vadd.f32 %v3198_v53, %v3160_v54 }
 0x1c4   :  { %v870_v47 = vpop.f32.mrf.mxu0 }
 0x1c5   :  { %v3176_v56 = vpop.f32.mrf.mxu1  ;;  %v871_v62 = vadd.f32 %v3159_v45, %v870_v47 }
 0x1c6   :  { %v3201_v63 = vpop.f32.mrf.mxu0 }
 0x1c7   :  { %v694_v2 = vpop.f32.mrf.mxu1  ;;  %v4213_v3 = vadd.f32 %v3201_v63, %v646_v15 }
 0x1c8   :  { %v880_v11 = vpop.f32.mrf.mxu0 }
 0x1c9   :  { %v3179_v22 = vpop.f32.mrf.mxu1  ;;  %v881_v13 = vadd.f32 %v880_v11, %v643_v6 }
 0x1ca   :  { %v3204_v14 = vpop.f32.mrf.mxu0 }
 0x1cb   :  { %v707_v17 = vpop.f32.mrf.mxu1  ;;  %v4215_v29 = vadd.f32 %v3204_v14, %v3164_v12 }
 0x1cc   :  { %v890_v32 = vpop.f32.mrf.mxu0 }
 0x1cd   :  { %v3180_v33 = vpop.f32.mrf.mxu1  ;;  %v891_v27 = vadd.f32 %v3163_v0, %v890_v32 }
 0x1ce   :  { %v3207_v42 = vpop.f32.mrf.mxu0 }
 0x1cf   :  { %v710_v49 = vpop.f32.mrf.mxu1  ;;  %v4217_v54 = vadd.f32 %v3207_v42, %v662_v40 }
 0x1d0   :  { %v900_v59 = vpop.f32.mrf.mxu0 }
 0x1d1   :  { %v3225_v45 = vpop.f32.mrf.mxu1  ;;  %v4219_v24 = vadd.f32 %v900_v59, %v659_v28 }
 0x1d2   :  { %v4221_v15 = vadd.f32 %v3225_v45, %v710_v49 }
 0x1d3   :  { %v3210_v38 = vpop.f32.mrf.mxu0  ;;  %v960_v53 = vpop.f32.mrf.mxu1 }
 0x1d4   :  { %v4223_v6 = vadd.f32 %v3210_v38, %v3168_v34  ;;  %v4225_v47 = vadd.f32 %v960_v53, %v707_v17 }
 0x1d5   :  { %v910_v12 = vpop.f32.mrf.mxu0  ;;  %v3228_v63 = vpop.f32.mrf.mxu1 }
 0x1d6   :  { %v4227_v11 = vadd.f32 %v3167_v19, %v910_v12  ;;  %v4229_v0 = vadd.f32 %v3228_v63, %v3180_v33  ;;  %v4242_v33 = vld [vmem:[%s5353_s8] ss:$0 sm:$0xff] }
 0x1d7   :  { %v3213_v40 = vpop.f32.mrf.mxu0  ;;  %v970_v14 = vpop.f32.mrf.mxu1 }
 0x1d8   :  { %v4231_v32 = vadd.f32 %v3213_v40, %v678_v25  ;;  %v4233_v28 = vadd.f32 %v3179_v22, %v970_v14 }
 0x1d9   :  { %v920_v42 = vpop.f32.mrf.mxu0  ;;  %v3233_v49 = vpop.f32.mrf.mxu1 }
 0x1da   :  { %v4235_v59 = vadd.f32 %v920_v42, %v675_v7  ;;  %v1152_v12 = vadd.f32 %v3233_v49, %v871_v62 }
 0x1db   :  { %v3216_v34 = vpop.f32.mrf.mxu0  ;;  %v1055_v45 = vpop.f32.mrf.mxu1 }
 0x1dc   :  { %v4237_v17 = vadd.f32 %v3216_v34, %v3172_v8  ;;  %v1150_v38 = vadd.f32 %v1055_v45, %v861_v46  ;;  %v4252_v62 = vadd.f32 %v4242_v33, %v1152_v12 }
 0x1dd   :  { %v930_v53 = vpop.f32.mrf.mxu0  ;;  %v3234_v19 = vpop.f32.mrf.mxu1 }
 0x1de   :  { %v4244_v25 = vadd.f32 %v3171_v61, %v930_v53  ;;  %v4247_v22 = vadd.f32 %v4242_v33, %v1150_v38  ;;  %v1153_v40 = vadd.f32 %v3234_v19, %v876_v16 }
 0x1df   :  { %v3219_v7 = vpop.f32.mrf.mxu0  ;;  %v1058_v63 = vpop.f32.mrf.mxu1 }
 0x1e0   :  { %v4249_v14 = vadd.f32 %v3219_v7, %v694_v2  ;;  %v1151_v8 = vadd.f32 %v1058_v63, %v866_v35  ;;  %v1205_v61 = vsel %vm434_vm2, %v4247_v22, 0.0  ;;  %v4262_v16 = vadd.f32 %v4242_v33, %v1153_v40 }
 0x1e1   :  { %v940_v46 = vpop.f32.mrf.mxu0  ;;  %v3237_v42 = vpop.f32.mrf.mxu1 }
 0x1e2   :  { %v4255_v49 = vadd.f32 %v4242_v33, %v1151_v8  ;;  %v4257_v34 = vadd.f32 %v940_v46, %v691_v55  ;;  %v1208_v55 = vsel %vm434_vm2, %v4252_v62, 0.0  ;;  %v1156_v63 = vadd.f32 %v3237_v42, %v891_v27 }
 0x1e3   :  { %v3222_v45 = vpop.f32.mrf.mxu0  ;;  %v1071_v38 = vpop.f32.mrf.mxu1 }
 0x1e4   :  { %v1206_v35 = vsel %vm434_vm2, %v4255_v49, 0.0  ;;  %v4266_v2 = vadd.f32 %v3222_v45, %v3176_v56  ;;  %v1154_v53 = vadd.f32 %v1071_v38, %v881_v13  ;;  %v1210_v56 = vsel %vm434_vm2, %v4262_v16, 0.0 }
 0x1e5   :  { %v1207_v19 = vadd.f32 %v1206_v35, %v1205_v61  ;;  %v950_v12 = vpop.f32.mrf.mxu0  ;;  %v3238_v7 = vpop.f32.mrf.mxu1  ;;  %v4283_v42 = vadd.f32 %v4242_v33, %v1156_v63 }
 0x1e6   :  { %v4271_v8 = vadd.f32 %v4242_v33, %v1154_v53  ;;  %v4274_v46 = vadd.f32 %v4211_v39, %v950_v12  ;;  %v1157_v13 = vadd.f32 %v3238_v7, %v4215_v29 }
 0x1e7   :  { %v1209_v40 = vadd.f32 %v1208_v55, %v1207_v19  ;;  %v4276_v1 = vpop.f32.mrf.mxu0  ;;  %v1074_v60 = vpop.f32.mrf.mxu1 }
 0x1e8   :  { %v1155_v61 = vadd.f32 %v1074_v60, %v4213_v3  ;;  %v1212_v39 = vsel %vm434_vm2, %v4271_v8, 0.0  ;;  %v4293_v29 = vadd.f32 %v4242_v33, %v1157_v13 }
 0x1e9   :  { %v1211_v45 = vadd.f32 %v1210_v56, %v1209_v40  ;;  %v3265_v38 = vpop.f32.mrf.mxu0  ;;  %v3241_v27 = vpop.f32.mrf.mxu1  ;;  %v1216_v40 = vsel %vm434_vm2, %v4283_v42, 0.0 }
 0x1ea   :  { %v4288_v35 = vadd.f32 %v4242_v33, %v1155_v61  ;;  %v1160_v56 = vadd.f32 %v3241_v27, %v4227_v11 }
 0x1eb   :  { %v1213_v53 = vadd.f32 %v1212_v39, %v1211_v45  ;;  %v4290_v19 = vpop.f32.mrf.mxu0  ;;  %v1087_v12 = vpop.f32.mrf.mxu1  ;;  %v1218_v39 = vsel %vm434_vm2, %v4293_v29, 0.0 }
 0x1ec   :  { %v1214_v60 = vsel %vm434_vm2, %v4288_v35, 0.0  ;;  %v1158_v3 = vadd.f32 %v1087_v12, %v4219_v24  ;;  %v4311_v52 = vadd.f32 %v4242_v33, %v1160_v56 }
 0x1ed   :  { %v1215_v7 = vadd.f32 %v1214_v60, %v1213_v53  ;;  %v3266_v55 = vpop.f32.mrf.mxu0  ;;  %v3242_v63 = vpop.f32.mrf.mxu1 }
 0x1ee   :  { %v4302_v61 = vadd.f32 %v4242_v33, %v1158_v3  ;;  %v1161_v24 = vadd.f32 %v3242_v63, %v4223_v6 }
 0x1ef   :  { %v1217_v45 = vadd.f32 %v1216_v40, %v1215_v7  ;;  %v4304_v38 = vpop.f32.mrf.mxu0  ;;  %v1090_v13 = vpop.f32.mrf.mxu1 }
 0x1f0   :  { %v1159_v53 = vadd.f32 %v1090_v13, %v4217_v54  ;;  %v1220_v11 = vsel %vm434_vm2, %v4302_v61, 0.0  ;;  %v4319_v51 = vadd.f32 %v4242_v33, %v1161_v24  ;;  %v1224_v13 = vsel %vm434_vm2, %v4311_v52, 0.0 }
 0x1f1   :  { %v1219_v12 = vadd.f32 %v1218_v39, %v1217_v45  ;;  %v3269_v60 = vpop.f32.mrf.mxu0  ;;  %v3245_v55 = vpop.f32.mrf.mxu1 }
 0x1f2   :  { %v4316_v27 = vadd.f32 %v4242_v33, %v1159_v53  ;;  %v1164_v39 = vadd.f32 %v3245_v55, %v4244_v25 }
 0x1f3   :  { %v1221_v3 = vadd.f32 %v1220_v11, %v1219_v12  ;;  %v1527_v7 = vpop.f32.mrf.mxu0  ;;  %v1103_v40 = vpop.f32.mrf.mxu1  ;;  %v1226_v11 = vsel %vm434_vm2, %v4319_v51, 0.0 }
 0x1f4   :  { %v1222_v54 = vsel %vm434_vm2, %v4316_v27, 0.0  ;;  %v1162_v6 = vadd.f32 %v1103_v40, %v4235_v59 }
 0x1f5   :  { %v1223_v63 = vadd.f32 %v1222_v54, %v1221_v3  ;;  %v3270_v56 = vpop.f32.mrf.mxu0  ;;  %v3246_v45 = vpop.f32.mrf.mxu1 }
 0x1f6   :  { %v4328_v53 = vadd.f32 %v4242_v33, %v1162_v6  ;;  %v1165_v41 = vadd.f32 %v3246_v45, %v4237_v17  ;;  %v4335_v56 = vadd.f32 %v4242_v33, %v1164_v39 }
 0x1f7   :  { %v1225_v12 = vadd.f32 %v1224_v13, %v1223_v63  ;;  %v1532_v60 = vpop.f32.mrf.mxu0  ;;  %v1106_v24 = vpop.f32.mrf.mxu1 }
 0x1f8   :  { %v1163_v59 = vadd.f32 %v1106_v24, %v4231_v32  ;;  %v1228_v25 = vsel %vm434_vm2, %v4328_v53, 0.0  ;;  %v4343_v26 = vadd.f32 %v4242_v33, %v1165_v41  ;;  %v1232_v24 = vsel %vm434_vm2, %v4335_v56, 0.0 }
 0x1f9   :  { %v1227_v3 = vadd.f32 %v1226_v11, %v1225_v12  ;;  %v3273_v40 = vpop.f32.mrf.mxu0  ;;  %v3249_v54 = vpop.f32.mrf.mxu1 }
 0x1fa   :  { %v4340_v55 = vadd.f32 %v4242_v33, %v1163_v59  ;;  %v1168_v11 = vadd.f32 %v3249_v54, %v4274_v46 }
 0x1fb   :  { %v1229_v6 = vadd.f32 %v1228_v25, %v1227_v3  ;;  %v1535_v63 = vpop.f32.mrf.mxu0  ;;  %v1119_v13 = vpop.f32.mrf.mxu1 }
 0x1fc   :  { %v1230_v32 = vsel %vm434_vm2, %v4340_v55, 0.0  ;;  %v1166_v17 = vadd.f32 %v1119_v13, %v4257_v34  ;;  %3307 = vmatprep.subr.mxu1 %v1535_v63  ;;  %v1234_v34 = vsel %vm434_vm2, %v4343_v26, 0.0  ;;  %v4359_v46 = vadd.f32 %v4242_v33, %v1168_v11 }
 0x1fd   :  { %v1231_v45 = vadd.f32 %v1230_v32, %v1229_v6  ;;  %v3274_v39 = vpop.f32.mrf.mxu0  ;;  %3308 = vmatpush3.msra.mxu1 %v1535_v63  ;;  %v3250_v12 = vpop.f32.mrf.mxu1 }
 0x1fe   :  { %v4352_v59 = vadd.f32 %v4242_v33, %v1166_v17  ;;  %3309 = vmatprep.subr.mxu1 %v1532_v60  ;;  %v1169_v40 = vadd.f32 %v3250_v12, %v4266_v2 }
 0x1ff   :  { %v1233_v41 = vadd.f32 %v1232_v24, %v1231_v45  ;;  %3310 = vmatpush3.msra.mxu1 %v1532_v60  ;;  %v1122_v3 = vpop.f32.mrf.mxu1 }
 0x200   :  { %v1167_v25 = vadd.f32 %v1122_v3, %v4249_v14  ;;  %3311 = vmatprep.subr.mxu1 %v1527_v7  ;;  %v1236_v54 = vsel %vm434_vm2, %v4352_v59, 0.0  ;;  %v4369_v14 = vadd.f32 %v4242_v33, %v1169_v40 }
 0x201   :  { %v1235_v6 = vadd.f32 %v1234_v34, %v1233_v41  ;;  %3312 = vmatpush3.msra.mxu1 %v1527_v7  ;;  %v3253_v63 = vpop.f32.mrf.mxu1 }
 0x202   :  { %v4364_v60 = vadd.f32 %v4242_v33, %v1167_v25  ;;  %3313 = vmatprep.subr.mxu1 %v4304_v38  ;;  %v1172_v32 = vadd.f32 %v3253_v63, %v4233_v28  ;;  %v1242_v28 = vsel %vm434_vm2, %v4369_v14, 0.0 }
 0x203   :  { %v1237_v13 = vadd.f32 %v1236_v54, %v1235_v6  ;;  %3314 = vmatpush3.msra.mxu1 %v4304_v38  ;;  %v1135_v2 = vpop.f32.mrf.mxu1  ;;  %v1240_v38 = vsel %vm434_vm2, %v4359_v46, 0.0 }
 0x204   :  { %v1238_v7 = vsel %vm434_vm2, %v4364_v60, 0.0  ;;  %v1170_v17 = vadd.f32 %v1135_v2, %v4225_v47  ;;  %3315 = vmatprep.subr.mxu1 %v4290_v19 }
 0x205   :  { %v1239_v45 = vadd.f32 %v1238_v7, %v1237_v13  ;;  %3316 = vmatpush3.msra.mxu1 %v4290_v19  ;;  %v3254_v39 = vpop.f32.mrf.mxu1  ;;  %v1203_v19 = vadd.f32 %v4242_v33, %v1172_v32  ;;  %v5415_v7 = vld [vmem:[#allocation2_spill] sm:$0xff] }
 0x206   :  { %v4380_v12 = vadd.f32 %v4242_v33, %v1170_v17  ;;  %v1173_v24 = vadd.f32 %v3254_v39, %v4229_v0  ;;  %3317 = vmatprep.subr.mxu1 %v4276_v1  ;;  %v5400_v0 = vmov 0.0   ;;  %v5416_v39 = vld [vmem:[#allocation3_spill] sm:$0xff] }
 0x207   :  { %v1241_v11 = vadd.f32 %v1240_v38, %v1239_v45  ;;  %3318 = vmatpush3.msra.mxu1 %v4276_v1  ;;  %v1138_v47 = vpop.f32.mrf.mxu1  ;;  %v1248_v6 = vsel %vm434_vm2, %v1203_v19, 0.0 }
 0x208   :  { %v1244_v41 = vsel %vm434_vm2, %v4380_v12, 0.0  ;;  %v1171_v3 = vadd.f32 %v1138_v47, %v4221_v15  ;;  %3320 = vmatmul.mubr.msk.f32.vlgmr.msra.gmra.mxu1 %vm96_vm1, %v3839_v21  ;;  %2539 = vmatprep.subr.mxu1 %v5400_v0  ;;  %v1204_v1 = vadd.f32 %v4242_v33, %v1173_v24  ;;  %v5417_v24 = vld [vmem:[#allocation4_spill] sm:$0xff] }
 0x209   :  { %v1243_v34 = vadd.f32 %v1242_v28, %v1241_v11  ;;  %3322 = vmatprep.mubr.msk.f32.mxu1 %vm96_vm1, %v3846_v23 }
 0x20a   :  { %v1202_v40 = vadd.f32 %v4242_v33, %v1171_v3  ;;  %v1250_v21 = vsel %vm434_vm2, %v1204_v1, 0.0 }
 0x20b   :  { %v1245_v25 = vadd.f32 %v1244_v41, %v1243_v34  ;;  %v5418_v41 = vld [vmem:[#allocation5_spill] sm:$0xff] }
 0x20c   :  { %v1246_v63 = vsel %vm434_vm2, %v1202_v40, 0.0  ;;  %3323 = vmatmul.mubr.msk.f32.gmra.mxu1 %vm96_vm1, %v3867_v30 }
 0x20d   :  { %v1247_v15 = vadd.f32 %v1246_v63, %v1245_v25  ;;  %3325 = vmatprep.mubr.msk.f32.mxu1 %vm96_vm1, %v3875_v31  ;;  %v4537_v63 = vpop.f32.mrf.mxu0 }
 0x20f   :  { %v1249_v54 = vadd.f32 %v1248_v6, %v1247_v15 }
 0x210   :  { %3326 = vmatmul.mubr.msk.f32.gmra.mxu1 %vm96_vm1, %v3891_v36 }
 0x211   :  { %v1251_v23 = vadd.f32 %v1250_v21, %v1249_v54  ;;  %3328 = vmatprep.mubr.msk.f32.mxu1 %vm96_vm1, %v3898_v37 }
 0x213   :  { %v1252_v33 = vrot.slane %v1251_v23, 4 }
 0x214   :  { %3329 = vmatmul.mubr.msk.f32.gmra.mxu1 %vm96_vm1, %v3918_v43 }
 0x215   :  { %v1253_v13 = vadd.f32 %v1252_v33, %v1251_v23  ;;  %3331 = vmatprep.mubr.msk.f32.mxu1 %vm96_vm1, %v3925_v44 }
 0x217   :  { %v1254_v30 = vrot.slane %v1253_v13, 2 }
 0x218   :  { %3332 = vmatmul.mubr.msk.f32.gmra.mxu1 %vm96_vm1, %v3945_v48 }
 0x219   :  { %v1255_v31 = vadd.f32 %v1254_v30, %v1253_v13  ;;  %3334 = vmatprep.mubr.msk.f32.mxu1 %vm96_vm1, %v3950_v50  ;;  %v4545_v30 = vpop.f32.mrf.mxu0 }
 0x21b   :  { %v1256_v36 = vrot.slane %v1255_v31, 1 }
 0x21c   :  { %3335 = vmatmul.mubr.msk.f32.gmra.mxu1 %vm96_vm1, %v3977_v57 }
 0x21d   :  { %v1257_v37 = vadd.f32 %v1256_v36, %v1255_v31  ;;  %3337 = vmatprep.mubr.msk.f32.mxu1 %vm96_vm1, %v3984_v58 }
 0x21f   :  { %v1259_v43 = vmul.f32 0.0052083335, %v1257_v37 }
 0x220   :  { %3338 = vmatmul.mubr.msk.f32.gmra.mxu1 %vm96_vm1, %v4014_v4 }
 0x221   :  { %v4424_v44 = vsub.f32 %v4247_v22, %v1259_v43  ;;  %v4427_v48 = vsub.f32 %v4255_v49, %v1259_v43  ;;  %v4430_v50 = vsub.f32 %v4252_v62, %v1259_v43  ;;  %v4433_v2 = vsub.f32 %v4262_v16, %v1259_v43  ;;  %3340 = vmatprep.mubr.msk.f32.mxu1 %vm96_vm1, %v4021_v5 }
 0x222   :  { %v4438_v57 = vsub.f32 %v4271_v8, %v1259_v43  ;;  %v4441_v58 = vsub.f32 %v4288_v35, %v1259_v43  ;;  %v4444_v4 = vsub.f32 %v4283_v42, %v1259_v43  ;;  %v4447_v22 = vsub.f32 %v4293_v29, %v1259_v43 }
 0x223   :  { %5401 = vst [vmem:[#allocation7_spill] sm:$0xff] %v4424_v44  ;;  %5402 = vst [vmem:[#allocation8_spill] sm:$0xff] %v4427_v48  ;;  %v4450_v62 = vsub.f32 %v4302_v61, %v1259_v43  ;;  %v4453_v49 = vsub.f32 %v4316_v27, %v1259_v43  ;;  %v4456_v5 = vsub.f32 %v4311_v52, %v1259_v43 }
 0x224   :  { %5403 = vst [vmem:[#allocation9_spill] sm:$0xff] %v4430_v50  ;;  %5404 = vst [vmem:[#allocation10_spill] sm:$0xff] %v4433_v2  ;;  %v4459_v16 = vsub.f32 %v4319_v51, %v1259_v43  ;;  %v4462_v8 = vsub.f32 %v4328_v53, %v1259_v43  ;;  %v4465_v42 = vsub.f32 %v4340_v55, %v1259_v43  ;;  %3341 = vmatmul.mubr.msk.f32.gmra.mxu1 %vm96_vm1, %v4036_v9 }
 0x225   :  { %5405 = vst [vmem:[#allocation11_spill] sm:$0xff] %v4438_v57  ;;  %5406 = vst [vmem:[#allocation12_spill] sm:$0xff] %v4441_v58  ;;  %v4468_v35 = vsub.f32 %v4335_v56, %v1259_v43  ;;  %v4471_v29 = vsub.f32 %v4343_v26, %v1259_v43  ;;  %v4476_v52 = vsub.f32 %v4352_v59, %v1259_v43  ;;  %3343 = vmatprep.mubr.msk.f32.mxu1 %vm96_vm1, %v4043_v10 }
 0x226   :  { %5407 = vst [vmem:[#allocation13_spill] sm:$0xff] %v4444_v4  ;;  %v4479_v51 = vsub.f32 %v4364_v60, %v1259_v43  ;;  %v4482_v61 = vsub.f32 %v4359_v46, %v1259_v43  ;;  %v4485_v27 = vsub.f32 %v4369_v14, %v1259_v43  ;;  %v4490_v26 = vsub.f32 %v4380_v12, %v1259_v43  ;;  %v5414_v46 = vld [vmem:[#allocation6_spill] sm:$0xff] }
 0x227   :  { %5408 = vst [vmem:[#allocation14_spill] sm:$0xff] %v4476_v52  ;;  %v4492_v53 = vsub.f32 %v1202_v40, %v1259_v43  ;;  %v4494_v9 = vsub.f32 %v1203_v19, %v1259_v43  ;;  %v4496_v56 = vsub.f32 %v1204_v1, %v1259_v43  ;;  %v1284_v55 = vmul.f32 %v4424_v44, %v4424_v44 }
 0x228   :  { %5409 = vst [vmem:[#allocation15_spill] sm:$0xff] %v4479_v51  ;;  %5410 = vst [vmem:[#allocation16_spill] sm:$0xff] %v4482_v61  ;;  %3344 = vmatmul.mubr.msk.f32.gmra.mxu1 %vm96_vm1, %v4066_v18  ;;  %v1285_v59 = vmul.f32 %v4427_v48, %v4427_v48  ;;  %v1286_v10 = vmul.f32 %v4430_v50, %v4430_v50  ;;  %v1287_v60 = vmul.f32 %v4433_v2, %v4433_v2 }
 0x229   :  { %5411 = vst [vmem:[#allocation17_spill] sm:$0xff] %v4485_v27  ;;  %5412 = vst [vmem:[#allocation18_spill] sm:$0xff] %v4494_v9  ;;  %3346 = vmatprep.mubr.msk.f32.mxu1 %vm96_vm1, %v4071_v20  ;;  %v1308_v18 = vsel %vm434_vm2, %v1284_v55, 0.0  ;;  %v1288_v20 = vmul.f32 %v4438_v57, %v4438_v57  ;;  %v1289_v38 = vmul.f32 %v4441_v58, %v4441_v58 }
 0x22a   :  { %5413 = vst [vmem:[#allocation19_spill] sm:$0xff] %v4496_v56  ;;  %v1309_v14 = vsel %vm434_vm2, %v1285_v59, 0.0  ;;  %v1311_v17 = vsel %vm434_vm2, %v1286_v10, 0.0  ;;  %v1313_v12 = vsel %vm434_vm2, %v1287_v60, 0.0  ;;  %v1290_v47 = vmul.f32 %v4444_v4, %v4444_v4  ;;  %v4553_v10 = vpop.f32.mrf.mxu0 }
 0x22b   :  { %v1310_v32 = vadd.f32 %v1309_v14, %v1308_v18  ;;  %v1315_v28 = vsel %vm434_vm2, %v1288_v20, 0.0  ;;  %v1291_v3 = vmul.f32 %v4447_v22, %v4447_v22  ;;  %v1317_v34 = vsel %vm434_vm2, %v1289_v38, 0.0 }
 0x22c   :  { %3347 = vmatmul.mubr.msk.f32.gmra.mxu1 %vm96_vm1, %v5414_v46  ;;  %v1292_v40 = vmul.f32 %v4450_v62, %v4450_v62  ;;  %v1319_v25 = vsel %vm434_vm2, %v1290_v47, 0.0  ;;  %v1293_v15 = vmul.f32 %v4453_v49, %v4453_v49  ;;  %v1294_v23 = vmul.f32 %v4456_v5, %v4456_v5  ;;  %v4561_v20 = vpop.f32.mrf.mxu0 }
 0x22d   :  { %3349 = vmatprep.mubr.msk.f32.mxu1 %vm96_vm1, %v5415_v7  ;;  %v1312_v45 = vadd.f32 %v1311_v17, %v1310_v32  ;;  %v1321_v21 = vsel %vm434_vm2, %v1291_v3, 0.0  ;;  %v1295_v31 = vmul.f32 %v4459_v16, %v4459_v16  ;;  %v1296_v43 = vmul.f32 %v4462_v8, %v4462_v8 }
 0x22e   :  { %v1323_v33 = vsel %vm434_vm2, %v1292_v40, 0.0  ;;  %v1325_v36 = vsel %vm434_vm2, %v1293_v15, 0.0  ;;  %v1327_v55 = vsel %vm434_vm2, %v1294_v23, 0.0  ;;  %v1297_v46 = vmul.f32 %v4465_v42, %v4465_v42 }
 0x22f   :  { %v1314_v11 = vadd.f32 %v1313_v12, %v1312_v45  ;;  %v1329_v60 = vsel %vm434_vm2, %v1295_v31, 0.0  ;;  %v1298_v14 = vmul.f32 %v4468_v35, %v4468_v35  ;;  %v1331_v7 = vsel %vm434_vm2, %v1296_v43, 0.0 }
 0x230   :  { %3350 = vmatmul.mubr.msk.f32.gmra.mxu1 %vm96_vm1, %v5416_v39  ;;  %v1299_v17 = vmul.f32 %v4471_v29, %v4471_v29  ;;  %v1333_v45 = vsel %vm434_vm2, %v1297_v46, 0.0  ;;  %v1300_v38 = vmul.f32 %v4476_v52, %v4476_v52  ;;  %v1301_v47 = vmul.f32 %v4479_v51, %v4479_v51 }
 0x231   :  { %3352 = vmatprep.mubr.msk.f32.mxu1 %vm96_vm1, %v5417_v24  ;;  %v1316_v19 = vadd.f32 %v1315_v28, %v1314_v11  ;;  %v1335_v12 = vsel %vm434_vm2, %v1298_v14, 0.0  ;;  %v4569_v11 = vpop.f32.mrf.mxu0  ;;  %v1303_v40 = vmul.f32 %v4485_v27, %v4485_v27  ;;  %v1304_v15 = vmul.f32 %v4490_v26, %v4490_v26 }
 0x232   :  { %v1337_v28 = vsel %vm434_vm2, %v1299_v17, 0.0  ;;  %v1339_v3 = vsel %vm434_vm2, %v1300_v38, 0.0 }
 0x233   :  { %v1318_v1 = vadd.f32 %v1317_v34, %v1316_v19 }
 0x234   :  { %3353 = vmatmul.mubr.msk.f32.gmra.mxu1 %vm96_vm1, %v5418_v41  ;;  %v1302_v41 = vmul.f32 %v4482_v61, %v4482_v61 }
 0x235   :  { %v1320_v6 = vadd.f32 %v1319_v25, %v1318_v1  ;;  %v4577_v1 = vpop.f32.mrf.mxu0  ;;  %v1341_v25 = vsel %vm434_vm2, %v1301_v47, 0.0 }
 0x237   :  { %v1322_v54 = vadd.f32 %v1321_v21, %v1320_v6  ;;  %v1343_v21 = vsel %vm434_vm2, %v1302_v41, 0.0  ;;  %v4585_v23 = vpop.f32.mrf.mxu0 }
 0x239   :  { %v1324_v13 = vadd.f32 %v1323_v33, %v1322_v54  ;;  %v1305_v33 = vmul.f32 %v4492_v53, %v4492_v53 }
 0x23b   :  { %v1326_v37 = vadd.f32 %v1325_v36, %v1324_v13  ;;  %v1345_v13 = vsel %vm434_vm2, %v1303_v40, 0.0  ;;  %v1306_v36 = vmul.f32 %v4494_v9, %v4494_v9  ;;  %v1349_v46 = vsel %vm434_vm2, %v1305_v33, 0.0 }
 0x23d   :  { %v1328_v59 = vadd.f32 %v1327_v55, %v1326_v37  ;;  %v1347_v37 = vsel %vm434_vm2, %v1304_v15, 0.0  ;;  %v4593_v55 = vpop.f32.mrf.mxu0 }
 0x23f   :  { %v1330_v18 = vadd.f32 %v1329_v60, %v1328_v59  ;;  %v1307_v59 = vmul.f32 %v4496_v56, %v4496_v56  ;;  %v4663_v56 = vld [vmem:[%s5354_s12] ss:$0 sm:$0xff] }
 0x241   :  { %v1332_v32 = vadd.f32 %v1331_v7, %v1330_v18  ;;  %v1351_v18 = vsel %vm434_vm2, %v1306_v36, 0.0  ;;  %v4599_v7 = vpop.f32.mrf.mxu0 }
 0x243   :  { %v1334_v39 = vadd.f32 %v1333_v45, %v1332_v32  ;;  %v1353_v32 = vsel %vm434_vm2, %v1307_v59, 0.0 }
 0x245   :  { %v1336_v24 = vadd.f32 %v1335_v12, %v1334_v39  ;;  %v4602_v39 = vpop.f32.mrf.mxu0 }
 0x247   :  { %v1338_v19 = vadd.f32 %v1337_v28, %v1336_v24  ;;  %v4604_v24 = vpop.f32.mrf.mxu0 }
 0x249   :  { %v1340_v34 = vadd.f32 %v1339_v3, %v1338_v19  ;;  %v4606_v19 = vpop.f32.mrf.mxu0 }
 0x24b   :  { %v1342_v6 = vadd.f32 %v1341_v25, %v1340_v34  ;;  %v4608_v34 = vpop.f32.mrf.mxu0 }
 0x24d   :  { %v1344_v54 = vadd.f32 %v1343_v21, %v1342_v6  ;;  %v4610_v25 = vpop.f32.mrf.mxu0 }
 0x24f   :  { %v1346_v31 = vadd.f32 %v1345_v13, %v1344_v54  ;;  %v4612_v6 = vpop.f32.mrf.mxu0 }
 0x251   :  { %v1348_v43 = vadd.f32 %v1347_v37, %v1346_v31  ;;  %v4614_v15 = vpop.f32.mrf.mxu0 }
 0x253   :  { %v1350_v60 = vadd.f32 %v1349_v46, %v1348_v43  ;;  %v4616_v21 = vpop.f32.mrf.mxu0 }
 0x255   :  { %v1352_v14 = vadd.f32 %v1351_v18, %v1350_v60  ;;  %v4624_v13 = vpop.f32.mrf.mxu0 }
 0x257   :  { %v1354_v17 = vadd.f32 %v1353_v32, %v1352_v14  ;;  %v4634_v37 = vpop.f32.mrf.mxu0 }
 0x259   :  { %v1355_v45 = vrot.slane %v1354_v17, 4  ;;  %v4640_v59 = vpop.f32.mrf.mxu0 }
 0x25b   :  { %v1356_v38 = vadd.f32 %v1355_v45, %v1354_v17 }
 0x25d   :  { %v1357_v12 = vrot.slane %v1356_v38, 2 }
 0x25f   :  { %v1358_v47 = vadd.f32 %v1357_v12, %v1356_v38 }
 0x261   :  { %v1359_v28 = vrot.slane %v1358_v47, 1 }
 0x263   :  { %v1360_v41 = vadd.f32 %v1359_v28, %v1358_v47 }
 0x265   :  { %v1361_v3 = vmul.f32 0.0052083335, %v1360_v41 }
 0x267   :  { %v1362_v40 = vadd.f32 1e-05, %v1361_v3 }
 0x269   :  { %3413 = vrsqrt.f32 %v1362_v40 }
 0x276   :  { %v4618_v54 = vpop.eup %3413 }
 0x277   :  { %v4622_v33 = vmul.f32 %v4618_v54, %v4471_v29  ;;  %v4628_v31 = vmul.f32 %v4618_v54, %v4468_v35  ;;  %v4632_v36 = vmul.f32 %v4618_v54, %v4465_v42  ;;  %v4638_v43 = vmul.f32 %v4618_v54, %v4462_v8  ;;  %v4642_v29 = vpop.f32.mrf.mxu0 }
 0x279   :  { %v4644_v46 = vpop.f32.mrf.mxu0 }
 0x27b   :  { %v4646_v60 = vpop.f32.mrf.mxu0 }
 0x27d   :  { %v4648_v35 = vpop.f32.mrf.mxu0 }
 0x27f   :  { %v3359_v18 = vpop.f32.mrf.mxu0 }
 0x281   :  { %v1923_v14 = vpop.f32.mrf.mxu0 }
 0x283   :  { %v3360_v42 = vpop.f32.mrf.mxu0 }
 0x285   :  { %v1926_v32 = vpop.f32.mrf.mxu0 }
 0x287   :  { %v3363_v17 = vpop.f32.mrf.mxu0 }
 0x289   :  { %v1939_v45 = vpop.f32.mrf.mxu0 }
 0x28b   :  { %v3364_v38 = vpop.f32.mrf.mxu0 }
 0x28d   :  { %v1942_v12 = vpop.f32.mrf.mxu0 }
 0x28f   :  { %v4650_v8 = vpop.f32.mrf.mxu0 }
 0x291   :  { %v1955_v47 = vpop.f32.mrf.mxu0 }
 0x293   :  { %v4652_v28 = vpop.f32.mrf.mxu0 }
 0x295   :  { %v1958_v41 = vpop.f32.mrf.mxu0 }
 0x297   :  { %v4654_v3 = vpop.f32.mrf.mxu0 }
 0x299   :  { %v4657_v51 = vpop.f32.mrf.mxu0 }
 0x29b   :  { %v4666_v57 = vpop.f32.mrf.mxu0 }
 0x2c8   :  { %v3321_v40 = vpop.f32.mrf.mxu1 }
 0x2c9   :  { %v1772_v0 = vadd.f32 %v3321_v40, %v4561_v20 }
 0x2ca   :  { %v1766_v52 = vpop.f32.mrf.mxu1 }
 0x2cb   :  { %v1767_v61 = vadd.f32 %v1766_v52, %v4545_v30  ;;  %v2019_v44 = vadd.f32 %v1926_v32, %v1772_v0 }
 0x2cc   :  { %v3324_v27 = vpop.f32.mrf.mxu1 }
 0x2cd   :  { %v2018_v48 = vadd.f32 %v1923_v14, %v1767_v61  ;;  %v1782_v50 = vadd.f32 %v3324_v27, %v4553_v10  ;;  %v4672_v40 = vadd.f32 %v4663_v56, %v2019_v44  ;;  %v1974_v14 = vpop.f32.mrf.mxu0 }
 0x2ce   :  { %v1776_v2 = vpop.f32.mrf.mxu1 }
 0x2cf   :  { %v4669_v20 = vadd.f32 %v4663_v56, %v2018_v48  ;;  %v2021_v52 = vadd.f32 %v3360_v42, %v1782_v50  ;;  %v1777_v0 = vadd.f32 %v4537_v63, %v1776_v2  ;;  %v2074_v48 = vsel %vm434_vm2, %v4672_v40, 0.0  ;;  %v4692_v4 = vpop.f32.mrf.mxu0 }
 0x2d0   :  { %v3327_v30 = vpop.f32.mrf.mxu1 }
 0x2d1   :  { %v2073_v32 = vsel %vm434_vm2, %v4669_v20, 0.0  ;;  %v2020_v58 = vadd.f32 %v3359_v18, %v1777_v0  ;;  %v1792_v61 = vadd.f32 %v3327_v30, %v4593_v55  ;;  %v4679_v27 = vadd.f32 %v4663_v56, %v2021_v52 }
 0x2d2   :  { %v1786_v10 = vpop.f32.mrf.mxu1  ;;  %v2075_v63 = vadd.f32 %v2074_v48, %v2073_v32 }
 0x2d3   :  { %v4684_v44 = vadd.f32 %v4663_v56, %v2020_v58  ;;  %v1787_v50 = vadd.f32 %v1786_v10, %v4577_v1  ;;  %v2023_v2 = vadd.f32 %v1942_v12, %v1792_v61  ;;  %v2078_v0 = vsel %vm434_vm2, %v4679_v27, 0.0 }
 0x2d4   :  { %v3330_v42 = vpop.f32.mrf.mxu1 }
 0x2d5   :  { %v2076_v18 = vsel %vm434_vm2, %v4684_v44, 0.0  ;;  %v2022_v55 = vadd.f32 %v1939_v45, %v1787_v50  ;;  %v1802_v52 = vadd.f32 %v3330_v42, %v4585_v23  ;;  %v4698_v1 = vadd.f32 %v4663_v56, %v2023_v2 }
 0x2d6   :  { %v2077_v30 = vadd.f32 %v2076_v18, %v2075_v63  ;;  %v1796_v9 = vpop.f32.mrf.mxu1  ;;  %v1987_v18 = vpop.f32.mrf.mxu0 }
 0x2d7   :  { %v4695_v58 = vadd.f32 %v4663_v56, %v2022_v55  ;;  %v2025_v12 = vadd.f32 %v3364_v38, %v1802_v52  ;;  %v1797_v32 = vadd.f32 %v4569_v11, %v1796_v9  ;;  %v2082_v2 = vsel %vm434_vm2, %v4698_v1, 0.0 }
 0x2d8   :  { %v2079_v61 = vadd.f32 %v2078_v0, %v2077_v30  ;;  %v3333_v45 = vpop.f32.mrf.mxu1 }
 0x2d9   :  { %v2080_v23 = vsel %vm434_vm2, %v4695_v58, 0.0  ;;  %v2024_v10 = vadd.f32 %v3363_v17, %v1797_v32  ;;  %v1812_v48 = vadd.f32 %v3333_v45, %v4606_v19  ;;  %v4705_v63 = vadd.f32 %v4663_v56, %v2025_v12 }
 0x2da   :  { %v2081_v50 = vadd.f32 %v2080_v23, %v2079_v61  ;;  %v1806_v42 = vpop.f32.mrf.mxu1  ;;  %v3376_v61 = vpop.f32.mrf.mxu0 }
 0x2db   :  { %v4710_v38 = vadd.f32 %v4663_v56, %v2024_v10  ;;  %v1807_v9 = vadd.f32 %v1806_v42, %v4602_v39  ;;  %v2027_v11 = vadd.f32 %v1958_v41, %v1812_v48  ;;  %v2086_v30 = vsel %vm434_vm2, %v4705_v63, 0.0 }
 0x2dc   :  { %v2083_v55 = vadd.f32 %v2082_v2, %v2081_v50  ;;  %v3336_v52 = vpop.f32.mrf.mxu1 }
 0x2dd   :  { %v2084_v19 = vsel %vm434_vm2, %v4710_v38, 0.0  ;;  %v2026_v17 = vadd.f32 %v1955_v47, %v1807_v9  ;;  %v1822_v0 = vadd.f32 %v3336_v52, %v4604_v24  ;;  %v4722_v39 = vadd.f32 %v4663_v56, %v2027_v11  ;;  %v1990_v11 = vpop.f32.mrf.mxu0 }
 0x2de   :  { %v2085_v12 = vadd.f32 %v2084_v19, %v2083_v55  ;;  %v1816_v32 = vpop.f32.mrf.mxu1 }
 0x2df   :  { %v4719_v45 = vadd.f32 %v4663_v56, %v2026_v17  ;;  %v2029_v41 = vadd.f32 %v4652_v28, %v1822_v0  ;;  %v1817_v23 = vadd.f32 %v4599_v7, %v1816_v32  ;;  %v2090_v28 = vsel %vm434_vm2, %v4722_v39, 0.0 }
 0x2e0   :  { %v2087_v10 = vadd.f32 %v2086_v30, %v2085_v12  ;;  %v3339_v47 = vpop.f32.mrf.mxu1 }
 0x2e1   :  { %v2088_v24 = vsel %vm434_vm2, %v4719_v45, 0.0  ;;  %v2028_v48 = vadd.f32 %v4650_v8, %v1817_v23  ;;  %v1832_v50 = vadd.f32 %v3339_v47, %v4614_v15  ;;  %v4731_v2 = vadd.f32 %v4663_v56, %v2029_v41  ;;  %v3379_v41 = vpop.f32.mrf.mxu0 }
 0x2e2   :  { %v2089_v42 = vadd.f32 %v2088_v24, %v2087_v10  ;;  %v1826_v9 = vpop.f32.mrf.mxu1 }
 0x2e3   :  { %v4736_v7 = vadd.f32 %v4663_v56, %v2028_v48  ;;  %v1827_v55 = vadd.f32 %v1826_v9, %v4610_v25  ;;  %v2031_v52 = vadd.f32 %v1974_v14, %v1832_v50  ;;  %v2094_v30 = vsel %vm434_vm2, %v4731_v2, 0.0 }
 0x2e4   :  { %v2091_v19 = vadd.f32 %v2090_v28, %v2089_v42  ;;  %v3342_v17 = vpop.f32.mrf.mxu1  ;;  %v2003_v28 = vpop.f32.mrf.mxu0 }
 0x2e5   :  { %v2092_v15 = vsel %vm434_vm2, %v4736_v7, 0.0  ;;  %v2030_v8 = vadd.f32 %v4657_v51, %v1827_v55  ;;  %v1842_v0 = vadd.f32 %v3342_v17, %v4612_v6  ;;  %v4749_v25 = vadd.f32 %v4663_v56, %v2031_v52 }
 0x2e6   :  { %v2093_v12 = vadd.f32 %v2092_v15, %v2091_v19  ;;  %v1836_v32 = vpop.f32.mrf.mxu1 }
 0x2e7   :  { %v4746_v23 = vadd.f32 %v4663_v56, %v2030_v8  ;;  %v2033_v14 = vadd.f32 %v4666_v57, %v1842_v0  ;;  %v1837_v10 = vadd.f32 %v4608_v34, %v1836_v32  ;;  %v2098_v57 = vsel %vm434_vm2, %v4749_v25, 0.0 }
 0x2e8   :  { %v2095_v47 = vadd.f32 %v2094_v30, %v2093_v12  ;;  %v3345_v51 = vpop.f32.mrf.mxu1  ;;  %v3380_v12 = vpop.f32.mrf.mxu0 }
 0x2e9   :  { %v2096_v6 = vsel %vm434_vm2, %v4746_v23, 0.0  ;;  %v2032_v24 = vadd.f32 %v4654_v3, %v1837_v10  ;;  %v1852_v48 = vadd.f32 %v3345_v51, %v4640_v59  ;;  %v4758_v42 = vadd.f32 %v4663_v56, %v2033_v14 }
 0x2ea   :  { %v2097_v50 = vadd.f32 %v2096_v6, %v2095_v47  ;;  %v1846_v9 = vpop.f32.mrf.mxu1 }
 0x2eb   :  { %v4763_v34 = vadd.f32 %v4663_v56, %v2032_v24  ;;  %v1847_v55 = vadd.f32 %v1846_v9, %v4624_v13  ;;  %v2035_v52 = vadd.f32 %v1990_v11, %v1852_v48  ;;  %v2102_v8 = vsel %vm434_vm2, %v4758_v42, 0.0 }
 0x2ec   :  { %v2099_v19 = vadd.f32 %v2098_v57, %v2097_v50  ;;  %v3348_v17 = vpop.f32.mrf.mxu1  ;;  %v2006_v50 = vpop.f32.mrf.mxu0 }
 0x2ed   :  { %v2100_v59 = vsel %vm434_vm2, %v4763_v34, 0.0  ;;  %v2034_v3 = vadd.f32 %v1987_v18, %v1847_v55  ;;  %v1862_v15 = vadd.f32 %v3348_v17, %v4634_v37  ;;  %v4775_v13 = vadd.f32 %v4663_v56, %v2035_v52 }
 0x2ee   :  { %v2101_v0 = vadd.f32 %v2100_v59, %v2099_v19  ;;  %v1856_v30 = vpop.f32.mrf.mxu1 }
 0x2ef   :  { %v4772_v32 = vadd.f32 %v4663_v56, %v2034_v3  ;;  %v2037_v11 = vadd.f32 %v3376_v61, %v1862_v15  ;;  %v1857_v14 = vadd.f32 %v4616_v21, %v1856_v30  ;;  %v2106_v61 = vsel %vm434_vm2, %v4775_v13, 0.0 }
 0x2f0   :  { %v2103_v10 = vadd.f32 %v2102_v8, %v2101_v0  ;;  %v3351_v47 = vpop.f32.mrf.mxu1 }
 0x2f1   :  { %v2104_v37 = vsel %vm434_vm2, %v4772_v32, 0.0  ;;  %v2036_v18 = vadd.f32 %v4692_v4, %v1857_v14  ;;  %v1872_v51 = vadd.f32 %v3351_v47, %v4648_v35  ;;  %v4783_v24 = vadd.f32 %v4663_v56, %v2037_v11 }
 0x2f2   :  { %v2105_v6 = vadd.f32 %v2104_v37, %v2103_v10  ;;  %v1866_v48 = vpop.f32.mrf.mxu1 }
 0x2f3   :  { %v4788_v21 = vadd.f32 %v4663_v56, %v2036_v18  ;;  %v1867_v9 = vadd.f32 %v1866_v48, %v4644_v46  ;;  %v2039_v57 = vadd.f32 %v2006_v50, %v1872_v51  ;;  %v2110_v17 = vsel %vm434_vm2, %v4783_v24, 0.0 }
 0x2f4   :  { %v2107_v55 = vadd.f32 %v2106_v61, %v2105_v6  ;;  %v3354_v52 = vpop.f32.mrf.mxu1 }
 0x2f5   :  { %v2108_v4 = vsel %vm434_vm2, %v4788_v21, 0.0  ;;  %v2038_v35 = vadd.f32 %v2003_v28, %v1867_v9  ;;  %v1882_v19 = vadd.f32 %v3354_v52, %v4646_v60  ;;  %v4800_v8 = vadd.f32 %v4663_v56, %v2039_v57 }
 0x2f6   :  { %v2109_v59 = vadd.f32 %v2108_v4, %v2107_v55  ;;  %v1876_v3 = vpop.f32.mrf.mxu1 }
 0x2f7   :  { %v4797_v15 = vadd.f32 %v4663_v56, %v2038_v35  ;;  %v2041_v46 = vadd.f32 %v3380_v12, %v1882_v19  ;;  %v1877_v0 = vadd.f32 %v4642_v29, %v1876_v3  ;;  %v2114_v14 = vsel %vm434_vm2, %v4800_v8, 0.0 }
 0x2f8   :  { %v2111_v30 = vadd.f32 %v2110_v17, %v2109_v59 }
 0x2f9   :  { %v2112_v28 = vsel %vm434_vm2, %v4797_v15, 0.0  ;;  %v2040_v11 = vadd.f32 %v3379_v41, %v1877_v0  ;;  %v4808_v10 = vadd.f32 %v4663_v56, %v2041_v46 }
 0x2fa   :  { %v2113_v60 = vadd.f32 %v2112_v28, %v2111_v30 }
 0x2fb   :  { %v4811_v47 = vadd.f32 %v4663_v56, %v2040_v11  ;;  %v2118_v18 = vsel %vm434_vm2, %v4808_v10, 0.0 }
 0x2fc   :  { %v2115_v37 = vadd.f32 %v2114_v14, %v2113_v60 }
 0x2fd   :  { %v2116_v12 = vsel %vm434_vm2, %v4811_v47, 0.0 }
 0x2fe   :  { %v2117_v29 = vadd.f32 %v2116_v12, %v2115_v37 }
 0x300   :  { %v2119_v51 = vadd.f32 %v2118_v18, %v2117_v29 }
 0x302   :  { %v2120_v41 = vrot.slane %v2119_v51, 4 }
 0x304   :  { %v2121_v6 = vadd.f32 %v2120_v41, %v2119_v51 }
 0x306   :  { %v2122_v48 = vrot.slane %v2121_v6, 2 }
 0x308   :  { %v2123_v50 = vadd.f32 %v2122_v48, %v2121_v6 }
 0x30a   :  { %v2124_v61 = vrot.slane %v2123_v50, 1 }
 0x30c   :  { %v2125_v9 = vadd.f32 %v2124_v61, %v2123_v50 }
 0x30e   :  { %v4817_v57 = vmul.f32 0.0052083335, %v2125_v9 }
 0x310   :  { %v4821_v56 = vsub.f32 %v4669_v20, %v4817_v57  ;;  %v4825_v55 = vsub.f32 %v4672_v40, %v4817_v57  ;;  %v4829_v52 = vsub.f32 %v4684_v44, %v4817_v57  ;;  %v4833_v4 = vsub.f32 %v4679_v27, %v4817_v57 }
 0x311   :  { %v4841_v20 = vsub.f32 %v4695_v58, %v4817_v57  ;;  %v4847_v44 = vsub.f32 %v4698_v1, %v4817_v57  ;;  %v4855_v46 = vsub.f32 %v4710_v38, %v4817_v57  ;;  %v4862_v1 = vsub.f32 %v4705_v63, %v4817_v57  ;;  %v2510_v63 = vld [vmem:[%s5355_s3 + $0x8] sm:$0xff] }
 0x312   :  { %v2151_v35 = vmul.f32 %v4821_v56, %v4821_v56  ;;  %v2152_v19 = vmul.f32 %v4825_v55, %v4825_v55  ;;  %v2153_v40 = vmul.f32 %v4829_v52, %v4829_v52  ;;  %v2154_v27 = vmul.f32 %v4833_v4, %v4833_v4  ;;  %2911 = vmatprep.mubr.msk.f32.mxu1 %vm434_vm2, %v2510_v63 }
 0x313   :  { %v2155_v58 = vmul.f32 %v4841_v20, %v4841_v20  ;;  %v2156_v28 = vmul.f32 %v4847_v44, %v4847_v44  ;;  %v4869_v38 = vsub.f32 %v4719_v45, %v4817_v57  ;;  %v2157_v14 = vmul.f32 %v4855_v46, %v4855_v46 }
 0x314   :  { %v2175_v17 = vsel %vm434_vm2, %v2151_v35, 0.0  ;;  %v2176_v59 = vsel %vm434_vm2, %v2152_v19, 0.0  ;;  %v2178_v0 = vsel %vm434_vm2, %v2153_v40, 0.0  ;;  %v2180_v11 = vsel %vm434_vm2, %v2154_v27, 0.0 }
 0x315   :  { %v2177_v3 = vadd.f32 %v2176_v59, %v2175_v17  ;;  %v2182_v37 = vsel %vm434_vm2, %v2155_v58, 0.0  ;;  %v4880_v29 = vsub.f32 %v4722_v39, %v4817_v57  ;;  %v2158_v45 = vmul.f32 %v4862_v1, %v4862_v1 }
 0x316   :  { %v2184_v18 = vsel %vm434_vm2, %v2156_v28, 0.0  ;;  %v4887_v41 = vsub.f32 %v4736_v7, %v4817_v57  ;;  %v2159_v6 = vmul.f32 %v4869_v38, %v4869_v38  ;;  %v2186_v48 = vsel %vm434_vm2, %v2157_v14, 0.0 }
 0x317   :  { %v2179_v30 = vadd.f32 %v2178_v0, %v2177_v3  ;;  %v4894_v39 = vsub.f32 %v4731_v2, %v4817_v57  ;;  %v2160_v61 = vmul.f32 %v4880_v29, %v4880_v29  ;;  %v2188_v9 = vsel %vm434_vm2, %v2158_v45, 0.0 }
 0x318   :  { %v4901_v7 = vsub.f32 %v4746_v23, %v4817_v57  ;;  %v2161_v19 = vmul.f32 %v4887_v41, %v4887_v41  ;;  %v2190_v40 = vsel %vm434_vm2, %v2159_v6, 0.0  ;;  %v4908_v2 = vsub.f32 %v4749_v25, %v4817_v57 }
 0x319   :  { %v2181_v60 = vadd.f32 %v2180_v11, %v2179_v30  ;;  %v2162_v17 = vmul.f32 %v4894_v39, %v4894_v39  ;;  %v2192_v59 = vsel %vm434_vm2, %v2160_v61, 0.0  ;;  %v4915_v23 = vsub.f32 %v4763_v34, %v4817_v57 }
 0x31a   :  { %v2163_v58 = vmul.f32 %v4901_v7, %v4901_v7  ;;  %v2194_v0 = vsel %vm434_vm2, %v2161_v19, 0.0  ;;  %v4922_v25 = vsub.f32 %v4758_v42, %v4817_v57  ;;  %v2164_v28 = vmul.f32 %v4908_v2, %v4908_v2 }
 0x31b   :  { %v2183_v12 = vadd.f32 %v2182_v37, %v2181_v60  ;;  %v2196_v11 = vsel %vm434_vm2, %v2162_v17, 0.0  ;;  %v4929_v34 = vsub.f32 %v4772_v32, %v4817_v57  ;;  %v2165_v14 = vmul.f32 %v4915_v23, %v4915_v23 }
 0x31c   :  { %v2198_v37 = vsel %vm434_vm2, %v2163_v58, 0.0  ;;  %v4936_v42 = vsub.f32 %v4775_v13, %v4817_v57  ;;  %v2200_v45 = vsel %vm434_vm2, %v2164_v28, 0.0  ;;  %v4943_v32 = vsub.f32 %v4788_v21, %v4817_v57  ;;  %v4986_v28 = vld [vmem:[%s5357_s14] ss:$0 sm:$0xff] }
 0x31d   :  { %v2185_v51 = vadd.f32 %v2184_v18, %v2183_v12  ;;  %v2166_v12 = vmul.f32 %v4922_v25, %v4922_v25  ;;  %v2202_v6 = vsel %vm434_vm2, %v2165_v14, 0.0  ;;  %v4950_v13 = vsub.f32 %v4783_v24, %v4817_v57  ;;  %v4965_v24 = vld [vmem:[%s5356_s13] ss:$0 sm:$0xff] }
 0x31e   :  { %v4957_v21 = vsub.f32 %v4797_v15, %v4817_v57 }
 0x31f   :  { %v2187_v50 = vadd.f32 %v2186_v48, %v2185_v51  ;;  %v2167_v51 = vmul.f32 %v4929_v34, %v4929_v34  ;;  %v2204_v61 = vsel %vm434_vm2, %v2166_v12, 0.0  ;;  %v2170_v17 = vmul.f32 %v4950_v13, %v4950_v13 }
 0x320   :  { %v2171_v58 = vmul.f32 %v4957_v21, %v4957_v21 }
 0x321   :  { %v2189_v35 = vadd.f32 %v2188_v9, %v2187_v50  ;;  %v2168_v50 = vmul.f32 %v4936_v42, %v4936_v42  ;;  %v2206_v19 = vsel %vm434_vm2, %v2167_v51, 0.0 }
 0x322   :  { %v2214_v12 = vsel %vm434_vm2, %v2171_v58, 0.0 }
 0x323   :  { %v2191_v27 = vadd.f32 %v2190_v40, %v2189_v35  ;;  %v2169_v35 = vmul.f32 %v4943_v32, %v4943_v32  ;;  %v2208_v15 = vsel %vm434_vm2, %v2168_v50, 0.0 }
 0x325   :  { %v2193_v3 = vadd.f32 %v2192_v59, %v2191_v27  ;;  %v4969_v27 = vsub.f32 %v4800_v8, %v4817_v57  ;;  %v1410_v8 = vmul.f32 %v4965_v24, %v4622_v33  ;;  %v1375_v33 = vmul.f32 %v4618_v54, %v4459_v16 }
 0x326   :  { %v1407_v16 = vmul.f32 %v4965_v24, %v4638_v43 }
 0x327   :  { %v2195_v30 = vadd.f32 %v2194_v0, %v2193_v3  ;;  %v4976_v3 = vsub.f32 %v4811_v47, %v4817_v57  ;;  %v2210_v0 = vsel %vm434_vm2, %v2169_v35, 0.0  ;;  %v2172_v47 = vmul.f32 %v4969_v27, %v4969_v27 }
 0x328   :  { %v1372_v35 = vmul.f32 %v4618_v54, %v4450_v62 }
 0x329   :  { %v2197_v60 = vadd.f32 %v2196_v11, %v2195_v30  ;;  %v4990_v11 = vsub.f32 %v4808_v10, %v4817_v57  ;;  %v1441_v10 = vadd.f32 %v4986_v28, %v1410_v8  ;;  %v1408_v57 = vmul.f32 %v4965_v24, %v4632_v36 }
 0x32a   :  { %v2216_v51 = vsel %vm434_vm2, %v2172_v47, 0.0  ;;  %v1384_v36 = vmul.f32 %v4618_v54, %v4490_v26  ;;  %v1403_v8 = vmul.f32 %v4965_v24, %v1372_v35  ;;  %v5419_v47 = vld [vmem:[#allocation13_spill] sm:$0xff] }
 0x32b   :  { %v2199_v63 = vadd.f32 %v2198_v37, %v2197_v60  ;;  %v2212_v60 = vsel %vm434_vm2, %v2170_v17, 0.0  ;;  %v1409_v37 = vmul.f32 %v4965_v24, %v4628_v31  ;;  %v2174_v31 = vmul.f32 %v4990_v11, %v4990_v11 }
 0x32c   :  { %v1415_v62 = vmul.f32 %v4965_v24, %v1384_v36 }
 0x32d   :  { %v2201_v18 = vadd.f32 %v2200_v45, %v2199_v63  ;;  %v2173_v63 = vmul.f32 %v4976_v3, %v4976_v3  ;;  %v1440_v50 = vadd.f32 %v4986_v28, %v1409_v37  ;;  %v2220_v17 = vsel %vm434_vm2, %v2174_v31, 0.0 }
 0x32f   :  { %v2203_v48 = vadd.f32 %v2202_v6, %v2201_v18  ;;  %v1374_v18 = vmul.f32 %v4618_v54, %v4456_v5  ;;  %v1373_v6 = vmul.f32 %v4618_v54, %v4453_v49  ;;  %v1385_v5 = vmul.f32 %v4618_v54, %v4492_v53 }
 0x330   :  { %v1439_v49 = vadd.f32 %v4986_v28, %v1408_v57  ;;  %v2901_v58 = vmul.f32 -1.442695, %v1440_v50  ;;  %v5422_v50 = vld [vmem:[#allocation11_spill] sm:$0xff] }
 0x331   :  { %v2205_v9 = vadd.f32 %v2204_v61, %v2203_v48  ;;  %v1406_v61 = vmul.f32 %v4965_v24, %v1375_v33  ;;  %v1404_v26 = vmul.f32 %v4965_v24, %v1373_v6  ;;  %v1434_v6 = vadd.f32 %v4986_v28, %v1403_v8 }
 0x332   :  { %v2900_v37 = vmul.f32 -1.442695, %v1439_v49 }
 0x333   :  { %v2207_v40 = vadd.f32 %v2206_v19, %v2205_v9  ;;  %v2218_v9 = vsel %vm434_vm2, %v2173_v63, 0.0  ;;  %v2902_v19 = vmul.f32 -1.442695, %v1441_v10  ;;  %v1437_v53 = vadd.f32 %v4986_v28, %v1406_v61  ;;  %v5420_v63 = vld [vmem:[#allocation18_spill] sm:$0xff]  ;;  %v5421_v10 = vld [vmem:[#allocation12_spill] sm:$0xff] }
 0x334   :  { %v1369_v57 = vmul.f32 %v4618_v54, %v5421_v10  ;;  %v1368_v61 = vmul.f32 %v4618_v54, %v5422_v50 }
 0x335   :  { %v2209_v59 = vadd.f32 %v2208_v15, %v2207_v40  ;;  %v1405_v40 = vmul.f32 %v4965_v24, %v1374_v18  ;;  %v1438_v15 = vadd.f32 %v4986_v28, %v1407_v16  ;;  %3415 = vpow2.f32 %v2902_v19  ;;  %v5423_v19 = vld [vmem:[#allocation10_spill] sm:$0xff] }
 0x336   :  { %3417 = vpow2.f32 %v2901_v58  ;;  %v2898_v31 = vmul.f32 -1.442695, %v1437_v53  ;;  %v1446_v16 = vadd.f32 %v4986_v28, %v1415_v62  ;;  %v1367_v49 = vmul.f32 %v4618_v54, %v5423_v19  ;;  %v5424_v53 = vld [vmem:[#allocation9_spill] sm:$0xff] }
 0x337   :  { %v2211_v30 = vadd.f32 %v2210_v0, %v2209_v59  ;;  %v1371_v0 = vmul.f32 %v4618_v54, %v4447_v22  ;;  %v1436_v33 = vadd.f32 %v4986_v28, %v1405_v40  ;;  %v1435_v22 = vadd.f32 %v4986_v28, %v1404_v26 }
 0x338   :  { %3419 = vpow2.f32 %v2900_v37  ;;  %v2895_v26 = vmul.f32 -1.442695, %v1434_v6  ;;  %v1399_v58 = vmul.f32 %v4965_v24, %v1368_v61  ;;  %v2907_v62 = vmul.f32 -1.442695, %v1446_v16 }
 0x339   :  { %v2213_v14 = vadd.f32 %v2212_v60, %v2211_v30  ;;  %v1416_v30 = vmul.f32 %v4965_v24, %v1385_v5  ;;  %v1370_v60 = vmul.f32 %v4618_v54, %v5419_v47  ;;  %v2896_v35 = vmul.f32 -1.442695, %v1435_v22 }
 0x33a   :  { %v1430_v22 = vadd.f32 %v4986_v28, %v1399_v58 }
 0x33b   :  { %v2215_v45 = vadd.f32 %v2214_v12, %v2213_v14  ;;  %v1386_v12 = vmul.f32 %v4618_v54, %v5420_v63  ;;  %v1447_v36 = vadd.f32 %v4986_v28, %v1416_v30  ;;  %v5425_v63 = vld [vmem:[#allocation8_spill] sm:$0xff] }
 0x33c   :  { %v2891_v61 = vmul.f32 -1.442695, %v1430_v22 }
 0x33d   :  { %v2217_v48 = vadd.f32 %v2216_v51, %v2215_v45  ;;  %v2899_v45 = vmul.f32 -1.442695, %v1438_v15  ;;  %v1402_v51 = vmul.f32 %v4965_v24, %v1371_v0  ;;  %v1417_v40 = vmul.f32 %v4965_v24, %v1386_v12 }
 0x33e   :  { %v1366_v0 = vmul.f32 %v4618_v54, %v5424_v53  ;;  %v2908_v8 = vmul.f32 -1.442695, %v1447_v36  ;;  %v1365_v12 = vmul.f32 %v4618_v54, %v5425_v63 }
 0x33f   :  { %v2219_v43 = vadd.f32 %v2218_v9, %v2217_v48  ;;  %v1401_v48 = vmul.f32 %v4965_v24, %v1370_v60  ;;  %v2897_v9 = vmul.f32 -1.442695, %v1436_v33  ;;  %3421 = vpow2.f32 %v2899_v45 }
 0x340   :  { %3423 = vpow2.f32 %v2898_v31  ;;  %v1433_v15 = vadd.f32 %v4986_v28, %v1402_v51  ;;  %v1398_v60 = vmul.f32 %v4965_v24, %v1367_v49  ;;  %v1397_v10 = vmul.f32 %v4965_v24, %v1366_v0  ;;  %v5429_v0 = vld [vmem:[#allocation16_spill] sm:$0xff] }
 0x341   :  { %v2221_v59 = vadd.f32 %v2220_v17, %v2219_v43  ;;  %v1400_v43 = vmul.f32 %v4965_v24, %v1369_v57  ;;  %3425 = vpow2.f32 %v2897_v9 }
 0x342   :  { %3427 = vpow2.f32 %v2896_v35  ;;  %v2894_v33 = vmul.f32 -1.442695, %v1433_v15  ;;  %v1429_v51 = vadd.f32 %v4986_v28, %v1398_v60  ;;  %v1428_v36 = vadd.f32 %v4986_v28, %v1397_v10  ;;  %v5427_v35 = vld [vmem:[#allocation19_spill] sm:$0xff]  ;;  %v5431_v10 = vld [vmem:[#allocation14_spill] sm:$0xff] }
 0x343   :  { %v2222_v14 = vrot.slane %v2221_v59, 4  ;;  %v1431_v47 = vadd.f32 %v4986_v28, %v1400_v43  ;;  %3429 = vpow2.f32 %v2895_v26  ;;  %v1387_v43 = vmul.f32 %v4618_v54, %v5427_v35 }
 0x344   :  { %3431 = vpow2.f32 %v2907_v62  ;;  %v1382_v62 = vmul.f32 %v4618_v54, %v5429_v0 }
 0x345   :  { %v2223_v18 = vadd.f32 %v2222_v14, %v2221_v59  ;;  %v1432_v59 = vadd.f32 %v4986_v28, %v1401_v48  ;;  %v1448_v14 = vadd.f32 %v4986_v28, %v1417_v40  ;;  %3433 = vpow2.f32 %v2908_v8 }
 0x346   :  { %v2892_v31 = vmul.f32 -1.442695, %v1431_v47  ;;  %3435 = vpow2.f32 %v2894_v33  ;;  %v1396_v48 = vmul.f32 %v4965_v24, %v1365_v12  ;;  %v2890_v40 = vmul.f32 -1.442695, %v1429_v51 }
 0x347   :  { %v2224_v5 = vrot.slane %v2223_v18, 2  ;;  %v2893_v45 = vmul.f32 -1.442695, %v1432_v59  ;;  %v2909_v16 = vmul.f32 -1.442695, %v1448_v14  ;;  %v1418_v47 = vmul.f32 %v4965_v24, %v1387_v43 }
 0x348   :  { %v1427_v58 = vadd.f32 %v4986_v28, %v1396_v48 }
 0x349   :  { %v2225_v17 = vadd.f32 %v2224_v5, %v2223_v18  ;;  %v3416_v18 = vpop.eup %3415  ;;  %3437 = vpow2.f32 %v2893_v45  ;;  %v5426_v5 = vld [vmem:[#allocation17_spill] sm:$0xff] }
 0x34a   :  { %v3418_v50 = vpop.eup %3417  ;;  %v1383_v9 = vmul.f32 %v4618_v54, %v5426_v5  ;;  %v2404_v19 = vadd.f32 1.0, %v3416_v18  ;;  %v2888_v22 = vmul.f32 -1.442695, %v1427_v58  ;;  %v1413_v18 = vmul.f32 %v4965_v24, %v1382_v62 }
 0x34b   :  { %v2226_v30 = vrot.slane %v2225_v17, 1  ;;  %v3420_v49 = vpop.eup %3419  ;;  %v2403_v59 = vadd.f32 1.0, %v3418_v50 }
 0x34c   :  { %v3422_v26 = vpop.eup %3421  ;;  %v1414_v8 = vmul.f32 %v4965_v24, %v1383_v9  ;;  %v2402_v60 = vadd.f32 1.0, %v3420_v49 }
 0x34d   :  { %v2227_v37 = vadd.f32 %v2226_v30, %v2225_v17  ;;  %v5428_v17 = vld [vmem:[#allocation7_spill] sm:$0xff]  ;;  %v3424_v53 = vpop.eup %3423  ;;  %v2889_v30 = vmul.f32 -1.442695, %v1428_v36  ;;  %v2401_v63 = vadd.f32 1.0, %v3422_v26 }
 0x34e   :  { %v1364_v15 = vmul.f32 %v4618_v54, %v5428_v17  ;;  %v3426_v14 = vpop.eup %3425 }
 0x34f   :  { %v2228_v57 = vmul.f32 0.0052083335, %v2227_v37  ;;  %v5430_v37 = vld [vmem:[#allocation15_spill] sm:$0xff]  ;;  %v3428_v45 = vpop.eup %3427  ;;  %v2399_v48 = vadd.f32 1.0, %v3426_v14 }
 0x350   :  { %v1381_v33 = vmul.f32 %v4618_v54, %v5430_v37  ;;  %v1395_v12 = vmul.f32 %v4965_v24, %v1364_v15  ;;  %v3430_v51 = vpop.eup %3429  ;;  %v2398_v36 = vadd.f32 1.0, %v3428_v45  ;;  %v5103_v15 = vld [vmem:[%s5358_s15] ss:$0 sm:$0xff] }
 0x351   :  { %v2229_v6 = vadd.f32 1e-05, %v2228_v57  ;;  %v1380_v57 = vmul.f32 %v4618_v54, %v5431_v10  ;;  %v5087_v50 = vpop.eup %3431  ;;  %v2397_v35 = vadd.f32 1.0, %v3430_v51 }
 0x352   :  { %v1426_v5 = vadd.f32 %v4986_v28, %v1395_v12  ;;  %v5091_v54 = vpop.eup %3433 }
 0x353   :  { %3439 = vrsqrt.f32 %v2229_v6  ;;  %v1449_v6 = vadd.f32 %v4986_v28, %v1418_v47  ;;  %v3436_v9 = vpop.eup %3435  ;;  %v5109_v58 = vmul.f32 %v4965_v24, %v1380_v57 }
 0x354   :  { %3441 = vpow2.f32 %v2892_v31  ;;  %v2400_v31 = vadd.f32 1.0, %v3424_v53  ;;  %v2887_v26 = vmul.f32 -1.442695, %v1426_v5 }
 0x355   :  { %3443 = vpow2.f32 %v2909_v16  ;;  %v1445_v16 = vadd.f32 %v4986_v28, %v1414_v8  ;;  %v2910_v49 = vmul.f32 -1.442695, %v1449_v6  ;;  %v2396_v8 = vadd.f32 1.0, %v3436_v9 }
 0x356   :  { %3445 = vpow2.f32 %v2891_v61  ;;  %v1412_v61 = vmul.f32 %v4965_v24, %v1381_v33  ;;  %v3438_v43 = vpop.eup %3437 }
 0x357   :  { %3447 = vrcp.f32 %v2404_v19  ;;  %v5093_v19 = vmul.f32 -1.442695, %v1445_v16 }
 0x358   :  { %3449 = vpow2.f32 %v2890_v40  ;;  %v5096_v40 = vadd.f32 %v4986_v28, %v1413_v18 }
 0x359   :  { %3451 = vrcp.f32 %v2403_v59  ;;  %v5106_v59 = vadd.f32 %v4986_v28, %v1412_v61 }
 0x35a   :  { %3453 = vpow2.f32 %v2889_v30 }
 0x35b   :  { %3455 = vrcp.f32 %v2402_v60  ;;  %v5122_v60 = vld [vmem:[%s5359_s16] ss:$0 sm:$0xff] }
 0x35c   :  { %3457 = vrcp.f32 %v2401_v63  ;;  %v2395_v63 = vadd.f32 1.0, %v3438_v43 }
 0x35d   :  { %3459 = vpow2.f32 %v2888_v22 }
 0x35e   :  { %3461 = vrcp.f32 %v2400_v31 }
 0x35f   :  { %3463 = vrcp.f32 %v2399_v48 }
 0x360   :  { %v5098_v17 = vpop.eup %3439  ;;  %3465 = vrcp.f32 %v2398_v36 }
 0x361   :  { %v3442_v53 = vpop.eup %3441  ;;  %v2246_v0 = vmul.f32 %v5098_v17, %v4922_v25  ;;  %v2245_v62 = vmul.f32 %v5098_v17, %v4915_v23  ;;  %v2244_v30 = vmul.f32 %v5098_v17, %v4908_v2  ;;  %v2243_v24 = vmul.f32 %v5098_v17, %v4901_v7 }
 0x362   :  { %v5117_v47 = vpop.eup %3443  ;;  %v2242_v25 = vmul.f32 %v5098_v17, %v4894_v39  ;;  %v2241_v23 = vmul.f32 %v5098_v17, %v4887_v41  ;;  %3467 = vrcp.f32 %v2397_v35  ;;  %v2240_v7 = vmul.f32 %v5098_v17, %v4880_v29 }
 0x363   :  { %v3446_v14 = vpop.eup %3445  ;;  %v2277_v2 = vmul.f32 %v5103_v15, %v2246_v0  ;;  %v2276_v37 = vmul.f32 %v5103_v15, %v2245_v62  ;;  %v2275_v33 = vmul.f32 %v5103_v15, %v2244_v30  ;;  %v2274_v45 = vmul.f32 %v5103_v15, %v2243_v24 }
 0x364   :  { %v3448_v12 = vpop.eup %3447  ;;  %v2394_v22 = vadd.f32 1.0, %v3442_v53  ;;  %3469 = vpow2.f32 %v2887_v26  ;;  %v2273_v18 = vmul.f32 %v5103_v15, %v2242_v25  ;;  %v2272_v16 = vmul.f32 %v5103_v15, %v2241_v23 }
 0x365   :  { %v3450_v39 = vpop.eup %3449  ;;  %v2308_v41 = vadd.f32 %v5122_v60, %v2277_v2  ;;  %v2307_v10 = vadd.f32 %v5122_v60, %v2276_v37  ;;  %v2306_v57 = vadd.f32 %v5122_v60, %v2275_v33  ;;  %v2305_v51 = vadd.f32 %v5122_v60, %v2274_v45 }
 0x366   :  { %v3452_v31 = vpop.eup %3451  ;;  %v2393_v6 = vadd.f32 1.0, %v3446_v14  ;;  %3471 = vpow2.f32 %v2910_v49  ;;  %v2239_v36 = vmul.f32 %v5098_v17, %v4869_v38  ;;  %v2271_v35 = vmul.f32 %v5103_v15, %v2240_v7 }
 0x367   :  { %v3454_v48 = vpop.eup %3453  ;;  %v2476_v29 = vmax.f32 %v2308_v41, 0.0  ;;  %v2475_v61 = vmax.f32 %v2307_v10, 0.0  ;;  %3473 = vrcp.f32 %v2396_v8  ;;  %v2473_v9 = vmax.f32 %v2305_v51, 0.0 }
 0x368   :  { %v3456_v5 = vpop.eup %3455  ;;  %3475 = vrcp.f32 %v2395_v63  ;;  %v2392_v43 = vadd.f32 1.0, %v3450_v39  ;;  %v2474_v0 = vmax.f32 %v2306_v57, 0.0  ;;  %v2304_v62 = vadd.f32 %v5122_v60, %v2273_v18 }
 0x369   :  { %v3458_v26 = vpop.eup %3457  ;;  %v2500_v53 = vmul.f32 %v3448_v12, %v2476_v29  ;;  %3477 = vrcp.f32 %v2394_v22  ;;  %v2303_v24 = vadd.f32 %v5122_v60, %v2272_v16  ;;  %v2391_v25 = vadd.f32 1.0, %v3454_v48 }
 0x36a   :  { %v3460_v49 = vpop.eup %3459  ;;  %v2497_v30 = vmul.f32 %v3458_v26, %v2473_v9  ;;  %3479 = vrcp.f32 %v2393_v6  ;;  %v2499_v8 = vmul.f32 %v3452_v31, %v2475_v61  ;;  %v2270_v23 = vmul.f32 %v5103_v15, %v2239_v36 }
 0x36b   :  { %v3462_v38 = vpop.eup %3461  ;;  %2540 = vmatpush1.msra.mxu1 %v2500_v53  ;;  %v2238_v14 = vmul.f32 %v5098_v17, %v4862_v1  ;;  %v2237_v2 = vmul.f32 %v5098_v17, %v4855_v46  ;;  %v5432_v33 = vmov 0.0   ;;  %v2302_v63 = vadd.f32 %v5122_v60, %v2271_v35 }
 0x36c   :  { %v3464_v37 = vpop.eup %3463  ;;  %2541 = vmatprep.subr.mxu1 %v5432_v33  ;;  %3481 = vrcp.f32 %v2392_v43  ;;  %v2905_v12 = vmul.f32 -1.442695, %v5096_v40  ;;  %v1442_v45 = vadd.f32 %v4986_v28, %v5109_v58  ;;  %v2498_v22 = vmul.f32 %v3456_v5, %v2474_v0 }
 0x36d   :  { %v3466_v7 = vpop.eup %3465  ;;  %2542 = vmatpush1.msra.mxu1 %v2499_v8  ;;  %v2472_v39 = vmax.f32 %v2304_v62, 0.0  ;;  %v2269_v1 = vmul.f32 %v5103_v15, %v2238_v14  ;;  %v2236_v46 = vmul.f32 %v5098_v17, %v4847_v44  ;;  %v2471_v41 = vmax.f32 %v2303_v24, 0.0 }
 0x36e   :  { %2543 = vmatprep.subr.mxu1 %v5432_v33  ;;  %3483 = vpow2.f32 %v5093_v19  ;;  %v2904_v10 = vmul.f32 -1.442695, %v5106_v59  ;;  %v2301_v28 = vadd.f32 %v5122_v60, %v2270_v23  ;;  %v2268_v58 = vmul.f32 %v5103_v15, %v2237_v2 }
 0x36f   :  { %v3468_v40 = vpop.eup %3467  ;;  %2544 = vmatpush1.msra.mxu1 %v2498_v22  ;;  %v2235_v57 = vmul.f32 %v5098_v17, %v4841_v20  ;;  %3485 = vrcp.f32 %v2391_v25  ;;  %v2470_v44 = vmax.f32 %v2302_v63, 0.0  ;;  %v2903_v18 = vmul.f32 -1.442695, %v1442_v45 }
 0x370   :  { %2545 = vmatprep.subr.mxu1 %v5432_v33  ;;  %3487 = vpow2.f32 %v2905_v12  ;;  %v2496_v19 = vmul.f32 %v3462_v38, %v2472_v39  ;;  %v2300_v59 = vadd.f32 %v5122_v60, %v2269_v1  ;;  %v2267_v51 = vmul.f32 %v5103_v15, %v2236_v46 }
 0x371   :  { %v3470_v31 = vpop.eup %3469  ;;  %2546 = vmatpush1.msra.mxu1 %v2497_v30  ;;  %v2234_v16 = vmul.f32 %v5098_v17, %v4833_v4  ;;  %v2495_v6 = vmul.f32 %v3464_v37, %v2471_v41  ;;  %v2390_v20 = vadd.f32 1.0, %v3460_v49  ;;  %3489 = vpow2.f32 %v2904_v10 }
 0x372   :  { %2547 = vmatprep.subr.mxu1 %v5432_v33  ;;  %v2469_v29 = vmax.f32 %v2301_v28, 0.0  ;;  %v2299_v61 = vadd.f32 %v5122_v60, %v2268_v58  ;;  %v2266_v36 = vmul.f32 %v5103_v15, %v2235_v57  ;;  %v2233_v5 = vmul.f32 %v5098_v17, %v4829_v52 }
 0x373   :  { %v3472_v48 = vpop.eup %3471  ;;  %2548 = vmatpush1.msra.mxu1 %v2496_v19  ;;  %v2232_v4 = vmul.f32 %v5098_v17, %v4825_v55  ;;  %v2389_v35 = vadd.f32 1.0, %v3470_v31  ;;  %3491 = vpow2.f32 %v2903_v18  ;;  %v2494_v26 = vmul.f32 %v3466_v7, %v2470_v44 }
 0x374   :  { %v3474_v9 = vpop.eup %3473  ;;  %2549 = vmatprep.subr.mxu1 %v5432_v33  ;;  %v2468_v53 = vmax.f32 %v2300_v59, 0.0  ;;  %v2298_v0 = vadd.f32 %v5122_v60, %v2267_v51  ;;  %v2265_v62 = vmul.f32 %v5103_v15, %v2234_v16  ;;  %3493 = vrcp.f32 %v2390_v20 }
 0x375   :  { %v3476_v43 = vpop.eup %3475  ;;  %2550 = vmatpush1.msra.mxu1 %v2495_v6  ;;  %v2231_v52 = vmul.f32 %v5098_v17, %v4821_v56  ;;  %v2412_v30 = vadd.f32 1.0, %v3472_v48  ;;  %v2493_v55 = vmul.f32 %v3468_v40, %v2469_v29  ;;  %v2467_v25 = vmax.f32 %v2299_v61, 0.0 }
 0x376   :  { %v3478_v49 = vpop.eup %3477  ;;  %2551 = vmatprep.subr.mxu1 %v5432_v33  ;;  %v2297_v38 = vadd.f32 %v5122_v60, %v2266_v36  ;;  %v2264_v8 = vmul.f32 %v5103_v15, %v2233_v5  ;;  %v2263_v23 = vmul.f32 %v5103_v15, %v2232_v4  ;;  %3495 = vrcp.f32 %v2389_v35 }
 0x377   :  { %v3480_v24 = vpop.eup %3479  ;;  %2552 = vmatpush1.msra.mxu1 %v2494_v26  ;;  %v2411_v14 = vadd.f32 1.0, %v5117_v47  ;;  %v2492_v37 = vmul.f32 %v3474_v9, %v2468_v53  ;;  %v2466_v56 = vmax.f32 %v2298_v0, 0.0  ;;  %v2296_v63 = vadd.f32 %v5122_v60, %v2265_v62 }
 0x378   :  { %2553 = vmatprep.subr.mxu1 %v5432_v33  ;;  %v2254_v12 = vmul.f32 %v5098_v17, %v4990_v11  ;;  %v2410_v45 = vadd.f32 1.0, %v5091_v54  ;;  %v2262_v7 = vmul.f32 %v5103_v15, %v2231_v52  ;;  %3497 = vrcp.f32 %v2412_v30 }
 0x379   :  { %v3482_v2 = vpop.eup %3481  ;;  %2554 = vmatpush1.msra.mxu1 %v2493_v55  ;;  %v2253_v47 = vmul.f32 %v5098_v17, %v4976_v3  ;;  %v2491_v39 = vmul.f32 %v3476_v43, %v2467_v25  ;;  %v2465_v1 = vmax.f32 %v2297_v38, 0.0  ;;  %v2295_v46 = vadd.f32 %v5122_v60, %v2264_v8 }
 0x37a   :  { %2555 = vmatprep.subr.mxu1 %v5432_v33  ;;  %v2294_v11 = vadd.f32 %v5122_v60, %v2263_v23  ;;  %3499 = vrcp.f32 %v2411_v14  ;;  %v2409_v54 = vadd.f32 1.0, %v5087_v50  ;;  %v2490_v40 = vmul.f32 %v3478_v49, %v2466_v56 }
 0x37b   :  { %v3484_v22 = vpop.eup %3483  ;;  %2556 = vmatpush1.msra.mxu1 %v2492_v37  ;;  %v2464_v28 = vmax.f32 %v2296_v63, 0.0  ;;  %v2285_v58 = vmul.f32 %v5103_v15, %v2254_v12  ;;  %v2252_v3 = vmul.f32 %v5098_v17, %v4969_v27  ;;  %3501 = vrcp.f32 %v2410_v45 }
 0x37c   :  { %v3486_v41 = vpop.eup %3485  ;;  %2557 = vmatprep.subr.mxu1 %v5432_v33  ;;  %v2293_v57 = vadd.f32 %v5122_v60, %v2262_v7  ;;  %v2408_v44 = vadd.f32 1.0, %v3484_v22  ;;  %v2284_v31 = vmul.f32 %v5103_v15, %v2253_v47  ;;  %v2489_v50 = vmul.f32 %v3480_v24, %v2465_v1 }
 0x37d   :  { %v3488_v10 = vpop.eup %3487  ;;  %2558 = vmatpush1.msra.mxu1 %v2491_v39  ;;  %v2463_v19 = vmax.f32 %v2295_v46, 0.0  ;;  %v2251_v59 = vmul.f32 %v5098_v17, %v4957_v21  ;;  %v2462_v51 = vmax.f32 %v2294_v11, 0.0  ;;  %3503 = vrcp.f32 %v2409_v54 }
 0x37e   :  { %2559 = vmatprep.subr.mxu1 %v5432_v33  ;;  %v3490_v18 = vpop.eup %3489  ;;  %v2407_v27 = vadd.f32 1.0, %v3488_v10  ;;  %v2488_v6 = vmul.f32 %v3482_v2, %v2464_v28  ;;  %v2316_v20 = vadd.f32 %v5122_v60, %v2285_v58  ;;  %v2283_v48 = vmul.f32 %v5103_v15, %v2252_v3  ;;  %v2509_v58 = vld [vmem:[%s5355_s3] sm:$0xff]  ;;  %v2512_v3 = vld [vmem:[%s5355_s3 + $0x18] sm:$0xff] }
 0x37f   :  { %2560 = vmatpush1.msra.mxu1 %v2490_v40  ;;  %v2250_v29 = vmul.f32 %v5098_v17, %v4950_v13  ;;  %v2461_v61 = vmax.f32 %v2293_v57, 0.0  ;;  %3505 = vrcp.f32 %v2408_v44  ;;  %v2406_v21 = vadd.f32 1.0, %v3490_v18  ;;  %v2511_v57 = vld [vmem:[%s5355_s3 + $0x10] sm:$0xff]  ;;  %v2514_v44 = vld [vmem:[%s5355_s3 + $0x28] sm:$0xff]  ;;  %v2516_v18 = vld [vmem:[%s5355_s3 + $0x38] sm:$0xff] }
 0x380   :  { %2561 = vmatprep.subr.mxu1 %v5432_v33  ;;  %v3492_v16 = vpop.eup %3491  ;;  %v2487_v5 = vmul.f32 %v3486_v41, %v2463_v19  ;;  %v2315_v9 = vadd.f32 %v5122_v60, %v2284_v31  ;;  %v2282_v4 = vmul.f32 %v5103_v15, %v2251_v59  ;;  %v2249_v35 = vmul.f32 %v5098_v17, %v4943_v32  ;;  %v2515_v31 = vld [vmem:[%s5355_s3 + $0x30] sm:$0xff]  ;;  %v2517_v19 = vld [vmem:[%s5355_s3 + $0x40] sm:$0xff]  ;;  %v2520_v59 = vld [vmem:[%s5355_s3 + $0x58] sm:$0xff] }
 0x381   :  { %2562 = vmatpush1.msra.mxu1 %v2489_v50  ;;  %v3494_v36 = vpop.eup %3493  ;;  %3507 = vrcp.f32 %v2407_v27  ;;  %v2405_v13 = vadd.f32 1.0, %v3492_v16  ;;  %v2484_v53 = vmax.f32 %v2316_v20, 0.0  ;;  %v2314_v0 = vadd.f32 %v5122_v60, %v2283_v48  ;;  %v2518_v50 = vld [vmem:[%s5355_s3 + $0x48] sm:$0xff] }
 0x382   :  { %2563 = vmatprep.subr.mxu1 %v5432_v33  ;;  %v2486_v43 = vmul.f32 %v3494_v36, %v2462_v51  ;;  %v2281_v62 = vmul.f32 %v5103_v15, %v2250_v29  ;;  %v2248_v49 = vmul.f32 %v5098_v17, %v4936_v42  ;;  %3509 = vrcp.f32 %v2406_v21  ;;  %v2519_v51 = vld [vmem:[%s5355_s3 + $0x50] sm:$0xff] }
 0x383   :  { %2564 = vmatpush1.msra.mxu1 %v2488_v6  ;;  %v3496_v26 = vpop.eup %3495  ;;  %v2483_v30 = vmax.f32 %v2315_v9, 0.0  ;;  %v2313_v24 = vadd.f32 %v5122_v60, %v2282_v4  ;;  %v2280_v55 = vmul.f32 %v5103_v15, %v2249_v35  ;;  %v2247_v25 = vmul.f32 %v5098_v17, %v4929_v34 }
 0x384   :  { %2565 = vmatprep.subr.mxu1 %v5432_v33  ;;  %v2485_v52 = vmul.f32 %v3496_v26, %v2461_v61  ;;  %3511 = vrcp.f32 %v2405_v13  ;;  %v2482_v8 = vmax.f32 %v2314_v0, 0.0  ;;  %v2312_v23 = vadd.f32 %v5122_v60, %v2281_v62 }
 0x385   :  { %2566 = vmatpush1.msra.mxu1 %v2487_v5  ;;  %v3498_v32 = vpop.eup %3497  ;;  %v2279_v14 = vmul.f32 %v5103_v15, %v2248_v49  ;;  %v2481_v56 = vmax.f32 %v2313_v24, 0.0  ;;  %v2311_v63 = vadd.f32 %v5122_v60, %v2280_v55  ;;  %v2278_v34 = vmul.f32 %v5103_v15, %v2247_v25 }
 0x386   :  { %2567 = vmatprep.subr.mxu1 %v5432_v33  ;;  %v2508_v42 = vmul.f32 %v3498_v32, %v2484_v53  ;;  %v2480_v45 = vmax.f32 %v2312_v23, 0.0 }
 0x387   :  { %2568 = vmatpush1.msra.mxu1 %v2486_v43  ;;  %v3500_v38 = vpop.eup %3499  ;;  %v2310_v7 = vadd.f32 %v5122_v60, %v2279_v14  ;;  %v2479_v39 = vmax.f32 %v2311_v63, 0.0  ;;  %v2309_v1 = vadd.f32 %v5122_v60, %v2278_v34 }
 0x388   :  { %2569 = vmatprep.subr.mxu1 %v5432_v33  ;;  %v3502_v2 = vpop.eup %3501  ;;  %v2507_v37 = vmul.f32 %v3500_v38, %v2483_v30 }
 0x389   :  { %2570 = vmatpush1.msra.mxu1 %v2485_v52  ;;  %v2506_v12 = vmul.f32 %v3502_v2, %v2482_v8  ;;  %v2478_v41 = vmax.f32 %v2310_v7, 0.0  ;;  %v2477_v10 = vmax.f32 %v2309_v1, 0.0 }
 0x38a   :  { %2587 = vmatprep.subr.mxu1 %v5432_v33  ;;  %v3504_v17 = vpop.eup %3503 }
 0x38b   :  { %2588 = vmatpush2.msra.mxu1 %v2508_v42  ;;  %v2505_v47 = vmul.f32 %v3504_v17, %v2481_v56 }
 0x38c   :  { %2589 = vmatprep.subr.mxu1 %v5432_v33  ;;  %v3506_v22 = vpop.eup %3505 }
 0x38d   :  { %2590 = vmatpush2.msra.mxu1 %v2507_v37  ;;  %v2504_v15 = vmul.f32 %v3506_v22, %v2480_v45 }
 0x38e   :  { %2591 = vmatprep.subr.mxu1 %v5432_v33  ;;  %v3508_v46 = vpop.eup %3507 }
 0x38f   :  { %2592 = vmatpush2.msra.mxu1 %v2506_v12  ;;  %v3510_v11 = vpop.eup %3509  ;;  %v2503_v54 = vmul.f32 %v3508_v46, %v2479_v39 }
 0x390   :  { %2593 = vmatprep.subr.mxu1 %v5432_v33  ;;  %v2502_v28 = vmul.f32 %v3510_v11, %v2478_v41 }
 0x391   :  { %2594 = vmatpush2.msra.mxu1 %v2505_v47  ;;  %v3512_v40 = vpop.eup %3511 }
 0x392   :  { %2595 = vmatprep.subr.mxu1 %v5432_v33  ;;  %v2501_v60 = vmul.f32 %v3512_v40, %v2477_v10 }
 0x393   :  { %2596 = vmatpush2.msra.mxu1 %v2504_v15 }
 0x394   :  { %2597 = vmatprep.subr.mxu1 %v5432_v33 }
 0x395   :  { %2598 = vmatpush2.msra.mxu1 %v2503_v54 }
 0x396   :  { %2599 = vmatprep.subr.mxu1 %v5432_v33 }
 0x397   :  { %2600 = vmatpush2.msra.mxu1 %v2502_v28 }
 0x398   :  { %2601 = vmatprep.subr.mxu1 %v5432_v33  ;;  %v2513_v33 = vld [vmem:[%s5355_s3 + $0x20] sm:$0xff] }
 0x399   :  { %2602 = vmatpush2.msra.mxu1 %v2501_v60 }
 0x39a   :  { %2604 = vmatmul.mubr.f32.vlgmr.msra.gmra.mxu1 %v2509_v58 }
 0x39b   :  { %2912 = vmatprep.mubr.msk.f32.mxu1 %vm434_vm2, %v2512_v3 }
 0x39e   :  { %2609 = vmatmul.mubr.f32.gmra.mxu1 %v2511_v57 }
 0x39f   :  { %2913 = vmatprep.mubr.msk.f32.mxu1 %vm434_vm2, %v2514_v44 }
 0x3a2   :  { %2614 = vmatmul.mubr.f32.gmra.mxu1 %v2513_v33 }
 0x3a3   :  { %2914 = vmatprep.mubr.msk.f32.mxu1 %vm434_vm2, %v2516_v18 }
 0x3a6   :  { %2619 = vmatmul.mubr.f32.gmra.mxu1 %v2515_v31 }
 0x3a7   :  { %2915 = vmatprep.mubr.msk.f32.mxu1 %vm434_vm2, %v2518_v50 }
 0x3aa   :  { %2624 = vmatmul.mubr.f32.gmra.mxu1 %v2517_v19 }
 0x3ab   :  { %2916 = vmatprep.mubr.msk.f32.mxu1 %vm434_vm2, %v2520_v59  ;;  %v2917_v59 = vld [vmem:[%s5360_s17] ss:$0 sm:$0xff] }
 0x3ae   :  { %2629 = vmatmul.mubr.f32.gmra.mxu1 %v2519_v51 }
 0x45a   :  { %v2605_v27 = vpop.f32.mrf.mxu1 }
 0x45b   :  { %v2634_v36 = vsel %vm434_vm2, %v2605_v27, 0.0 }
 0x45c   :  { %v2607_v16 = vpop.f32.mrf.mxu1 }
 0x45e   :  { %v2610_v6 = vpop.f32.mrf.mxu1 }
 0x45f   :  { %v2635_v61 = vsel %vm434_vm2, %v2610_v6, 0.0 }
 0x460   :  { %v2612_v20 = vpop.f32.mrf.mxu1  ;;  %v2636_v9 = vadd.f32 %v2635_v61, %v2634_v36 }
 0x462   :  { %v2615_v48 = vpop.f32.mrf.mxu1 }
 0x463   :  { %v2637_v5 = vsel %vm434_vm2, %v2615_v48, 0.0 }
 0x464   :  { %v2617_v29 = vpop.f32.mrf.mxu1  ;;  %v2638_v43 = vadd.f32 %v2637_v5, %v2636_v9 }
 0x465   :  { %v2918_v29 = vld [vmem:[%s5361_s18] ss:$0 sm:$0xff] }
 0x466   :  { %v2620_v21 = vpop.f32.mrf.mxu1 }
 0x467   :  { %v2639_v35 = vsel %vm434_vm2, %v2620_v21, 0.0 }
 0x468   :  { %v2622_v4 = vpop.f32.mrf.mxu1  ;;  %v2640_v53 = vadd.f32 %v2639_v35, %v2638_v43 }
 0x46a   :  { %v2625_v13 = vpop.f32.mrf.mxu1 }
 0x46b   :  { %v2641_v26 = vsel %vm434_vm2, %v2625_v13, 0.0 }
 0x46c   :  { %v2627_v0 = vpop.f32.mrf.mxu1  ;;  %v2642_v62 = vadd.f32 %v2641_v26, %v2640_v53 }
 0x46e   :  { %v2630_v49 = vpop.f32.mrf.mxu1 }
 0x46f   :  { %v2643_v52 = vsel %vm434_vm2, %v2630_v49, 0.0 }
 0x470   :  { %v2644_v32 = vadd.f32 %v2643_v52, %v2642_v62  ;;  %v2632_v30 = vpop.f32.mrf.mxu1  ;;  %v3515_v62 = vld [vmem:[%s5391_s20] sm:$0xff]  ;;  %v3516_v52 = vld [vmem:[%s5391_s20 + $0x8] sm:$0xff] }
 0x471   :  { %v3517_v30 = vld [vmem:[%s5391_s20 + $0x10] sm:$0xff] }
 0x472   :  { %v2645_v24 = vrot.slane %v2644_v32, 4 }
 0x474   :  { %v2646_v55 = vadd.f32 %v2645_v24, %v2644_v32 }
 0x476   :  { %v2647_v25 = vrot.slane %v2646_v55, 2 }
 0x478   :  { %v2648_v38 = vadd.f32 %v2647_v25, %v2646_v55  ;;  %v3518_v55 = vld [vmem:[%s5391_s20 + $0x18] sm:$0xff] }
 0x47a   :  { %v2649_v42 = vrot.slane %v2648_v38, 1 }
 0x47c   :  { %v2650_v8 = vadd.f32 %v2649_v42, %v2648_v38  ;;  %v3519_v38 = vld [vmem:[%s5391_s20 + $0x20] sm:$0xff] }
 0x47e   :  { %v2652_v23 = vmul.f32 0.020833334, %v2650_v8  ;;  %v3520_v8 = vld [vmem:[%s5391_s20 + $0x28] sm:$0xff] }
 0x480   :  { %v2653_v14 = vsub.f32 %v2605_v27, %v2652_v23  ;;  %v2654_v2 = vsub.f32 %v2610_v6, %v2652_v23  ;;  %v2655_v37 = vsub.f32 %v2615_v48, %v2652_v23  ;;  %v2656_v56 = vsub.f32 %v2620_v21, %v2652_v23 }
 0x481   :  { %v2657_v63 = vsub.f32 %v2625_v13, %v2652_v23  ;;  %v2658_v45 = vsub.f32 %v2630_v49, %v2652_v23 }
 0x482   :  { %v2659_v34 = vmul.f32 %v2653_v14, %v2653_v14  ;;  %v2660_v17 = vmul.f32 %v2654_v2, %v2654_v2  ;;  %v2661_v12 = vmul.f32 %v2655_v37, %v2655_v37  ;;  %v2662_v7 = vmul.f32 %v2656_v56, %v2656_v56 }
 0x483   :  { %v2663_v1 = vmul.f32 %v2657_v63, %v2657_v63  ;;  %v2664_v41 = vmul.f32 %v2658_v45, %v2658_v45 }
 0x484   :  { %v2665_v22 = vsel %vm434_vm2, %v2659_v34, 0.0  ;;  %v2666_v47 = vsel %vm434_vm2, %v2660_v17, 0.0  ;;  %v2668_v46 = vsel %vm434_vm2, %v2661_v12, 0.0  ;;  %v2670_v11 = vsel %vm434_vm2, %v2662_v7, 0.0 }
 0x485   :  { %v2667_v39 = vadd.f32 %v2666_v47, %v2665_v22  ;;  %v2672_v10 = vsel %vm434_vm2, %v2663_v1, 0.0  ;;  %v2674_v28 = vsel %vm434_vm2, %v2664_v41, 0.0 }
 0x487   :  { %v2669_v15 = vadd.f32 %v2668_v46, %v2667_v39 }
 0x489   :  { %v2671_v54 = vadd.f32 %v2670_v11, %v2669_v15 }
 0x48b   :  { %v2673_v40 = vadd.f32 %v2672_v10, %v2671_v54 }
 0x48d   :  { %v2675_v60 = vadd.f32 %v2674_v28, %v2673_v40 }
 0x48f   :  { %v2676_v58 = vrot.slane %v2675_v60, 4 }
 0x491   :  { %v2677_v3 = vadd.f32 %v2676_v58, %v2675_v60 }
 0x493   :  { %v2678_v57 = vrot.slane %v2677_v3, 2 }
 0x495   :  { %v2679_v44 = vadd.f32 %v2678_v57, %v2677_v3 }
 0x497   :  { %v2680_v33 = vrot.slane %v2679_v44, 1 }
 0x499   :  { %v2681_v18 = vadd.f32 %v2680_v33, %v2679_v44 }
 0x49b   :  { %v2682_v31 = vmul.f32 0.020833334, %v2681_v18 }
 0x49d   :  { %v2683_v50 = vadd.f32 1e-05, %v2682_v31 }
 0x49f   :  { %3513 = vrsqrt.f32 %v2683_v50 }
 0x4ac   :  { %v3514_v19 = vpop.eup %3513 }
 0x4ad   :  { %v2685_v51 = vmul.f32 %v3514_v19, %v2653_v14  ;;  %v2686_v27 = vmul.f32 %v3514_v19, %v2654_v2  ;;  %v2687_v16 = vmul.f32 %v3514_v19, %v2655_v37  ;;  %v2688_v6 = vmul.f32 %v3514_v19, %v2656_v56 }
 0x4ae   :  { %v2689_v20 = vmul.f32 %v3514_v19, %v2657_v63  ;;  %v2690_v48 = vmul.f32 %v3514_v19, %v2658_v45 }
 0x4af   :  { %v2698_v61 = vmul.f32 %v2917_v59, %v2685_v51  ;;  %v2699_v21 = vmul.f32 %v2917_v59, %v2686_v27  ;;  %v2700_v36 = vmul.f32 %v2917_v59, %v2687_v16  ;;  %v2701_v5 = vmul.f32 %v2917_v59, %v2688_v6 }
 0x4b0   :  { %v2702_v9 = vmul.f32 %v2917_v59, %v2689_v20  ;;  %v2703_v4 = vmul.f32 %v2917_v59, %v2690_v48 }
 0x4b1   :  { %v2711_v35 = vadd.f32 %v2918_v29, %v2698_v61  ;;  %v2712_v43 = vadd.f32 %v2918_v29, %v2699_v21  ;;  %v2713_v13 = vadd.f32 %v2918_v29, %v2700_v36  ;;  %v2714_v26 = vadd.f32 %v2918_v29, %v2701_v5 }
 0x4b2   :  { %v2715_v53 = vadd.f32 %v2918_v29, %v2702_v9  ;;  %v2716_v0 = vadd.f32 %v2918_v29, %v2703_v4 }
 0x4b3   :  { %v2717_v49 = vadd.f32 %v3515_v62, %v2711_v35  ;;  %v2718_v32 = vadd.f32 %v3516_v52, %v2712_v43  ;;  %v2719_v24 = vadd.f32 %v3517_v30, %v2713_v13  ;;  %v2720_v25 = vadd.f32 %v3518_v55, %v2714_v26 }
 0x4b4   :  { %v2721_v42 = vadd.f32 %v3519_v38, %v2715_v53  ;;  %v2722_v23 = vadd.f32 %v3520_v8, %v2716_v0 }
 0x4b5   :  { %v2723_v14 = vmax.f32 %v2717_v49, 0.0  ;;  %v2724_v2 = vmax.f32 %v2718_v32, 0.0  ;;  %v2725_v37 = vmax.f32 %v2719_v24, 0.0  ;;  %v2726_v56 = vmax.f32 %v2720_v25, 0.0 }
 0x4b6   :  { %v2727_v63 = vmax.f32 %v2721_v42, 0.0  ;;  %v2728_v34 = vmax.f32 %v2722_v23, 0.0 }
 0x4b7   :  { %2729 = vst.msk [vmem:[%s5362_s19] sm:$0xff] %vm434_vm2, %v2723_v14  ;;  %2730 = vst.msk [vmem:[%s5362_s19 + $0x8] sm:$0xff] %vm434_vm2, %v2724_v2 }
 0x4b8   :  { %2731 = vst.msk [vmem:[%s5362_s19 + $0x10] sm:$0xff] %vm434_vm2, %v2725_v37  ;;  %2732 = vst.msk [vmem:[%s5362_s19 + $0x18] sm:$0xff] %vm434_vm2, %v2726_v56 }
 0x4b9   :  { %2733 = vst.msk [vmem:[%s5362_s19 + $0x20] sm:$0xff] %vm434_vm2, %v2727_v63  ;;  %2734 = vst.msk [vmem:[%s5362_s19 + $0x28] sm:$0xff] %vm434_vm2, %v2728_v34 }

// kernel: phanto_idp_forward.17
= control target key start
LH: loop header
LB: loop body
LE: loop exit
PB: predicated region body
PF: predicated region fallthrough
CT: control target
= control target key end

     0   :  { %s5102_s24 = smov 0   ;;  %s5725_s0 = inlined_call_operand.vmem [shape: f32[2,8,32], index: 0, kind: input, shape index: {}]   ;;  %s5726_s1 = inlined_call_operand.vmem [shape: bf16[8,32,16], index: 1, kind: input, shape index: {}]   ;;  %s5727_s2 = inlined_call_operand.vmem [shape: f32[8,1,16], index: 2, kind: input, shape index: {}]   ;;  %s5728_s3 = inlined_call_operand.vmem [shape: bf16[8,32,16], index: 3, kind: input, shape index: {}]   ;;  %s5729_s4 = inlined_call_operand.vmem [shape: f32[8,1,16], index: 4, kind: input, shape index: {}]   ;;  %s5730_s5 = inlined_call_operand.vmem [shape: bf16[8,32,16], index: 5, kind: input, shape index: {}]   ;;  %s5731_s6 = inlined_call_operand.vmem [shape: f32[8,1,16], index: 6, kind: input, shape index: {}]   ;;  %s5732_s7 = inlined_call_operand.vmem [shape: bf16[8,16,32], index: 7, kind: input, shape index: {}]   ;;  %s5733_s8 = inlined_call_operand.vmem [shape: f32[1,32], index: 8, kind: input, shape index: {}]   ;;  %s5734_s9 = inlined_call_operand.vmem [shape: bf16[32,128], index: 9, kind: input, shape index: {}]   ;;  %s5735_s10 = inlined_call_operand.vmem [shape: f32[1,128], index: 10, kind: input, shape index: {}]   ;;  %s5736_s11 = inlined_call_operand.vmem [shape: bf16[128,32], index: 11, kind: input, shape index: {}]   ;;  %s5737_s12 = inlined_call_operand.vmem [shape: f32[1,32], index: 12, kind: input, shape index: {}]   ;;  %s5738_s13 = inlined_call_operand.vmem [shape: f32[1,32], index: 13, kind: input, shape index: {}]   ;;  %s5739_s14 = inlined_call_operand.vmem [shape: f32[1,32], index: 14, kind: input, shape index: {}]   ;;  %s5740_s15 = inlined_call_operand.vmem [shape: f32[1,32], index: 15, kind: input, shape index: {}]   ;;  %s5741_s16 = inlined_call_operand.vmem [shape: f32[1,32], index: 16, kind: input, shape index: {}]   ;;  %s5742_s17 = inlined_call_operand.vmem [shape: f32[2,8,32], index: 17, kind: output, shape index: {}]  }
   0x1   :  { %5744 = sst [smem:[#allocation2_spill]] %s5725_s0 }
   0x2   :  { %5745 = sst [smem:[#allocation3_spill]] %s5726_s1 }
   0x3 LB: > { %s4127_s25 = sadd.s32 4294967295, %s5008_s24   ;;  %p4131_p0 = scmp.ge.s32.totalorder %s5008_s24, 1  ;;  %s5008_s24 = sphi %s5102_s24, %s27_s24  }
   0x4   : > { %p486_p1 = scmp.lt.s32.totalorder %s5008_s24, 3 }
   0x6   : > { %p487_p2 = pnand %p4131_p0, %p486_p1 }
   0x7   : > { %s5746_s28 = sld [smem:[#allocation3_spill]] (!%p487_p2)  ;;  %p536_p3 = scmp.lt.s32.totalorder (!%p487_p2), %s4127_s25, 1 }
   0x8   : > { %490 = sbr.rel (%p487_p2) target bundleno = 8299 (0x206b), region = 88  ;;  %s5747_s21 = sld [smem:[#allocation2_spill]] (!%p487_p2) }
   0xd   : > { %v4899_v0 = vld [vmem:[%s5746_s28 + $0x8] sm:$0xff]   ;;  %v5010_v1 = vmov 0.0   ;;  %v4900_v2 = vld [vmem:[%s5746_s28] sm:$0xff]   ;;  %vm5011_vm0 = vmmov 0   ;;  %s5749_s25 = smov (!%p536_p3, %s4127_s25), 1  ;;  %vm570_vm1 = vcmask 261120  }
   0xe   : > { %4541 = vmatprep.subr.bf16.mxu1 %v5010_v1  ;;  %4557 = vmatprep.subr.bf16.mxu0 %v5010_v1  ;;  %s4132_s30 = sshll.u32 %s5749_s25, 3  ;;  %v4901_v3 = vld [vmem:[%s5728_s3 + $0x8] sm:$0xff]   ;;  %v4902_v6 = vld [vmem:[%s5728_s3] sm:$0xff]   ;;  %vm740_vm2 = vcmask 130048   ;;  %vm818_vm3 = vcmask 64512   ;;  %v4905_v32 = vld [vmem:[%s5746_s28 + $0x18] sm:$0xff]  }
   0xf   : > { %4542 = vmatpush3.bf16.msra.mxu1 %v4899_v0  ;;  %4545 = vmatprep.mubr.msk.bf16.mxu1 %vm5011_vm0, %v5010_v1  ;;  %s5134_s22 = scalar_lea.vmem %s5747_s21, %s4132_s30  ;;  %v4138_v11 = vld [vmem:[%s5729_s4] ss:$0 sm:$0xff]  ;;  %v4903_v19 = vld [vmem:[%s5730_s5 + $0x8] sm:$0xff]   ;;  %v4907_v37 = vld [vmem:[%s5746_s28 + $0x10] sm:$0xff]   ;;  %s543_s1 = scalar_lea.vmem %s5742_s17, %s4132_s30 }
  0x10   : > { %4543 = vmatprep.subr.bf16.mxu1 %v5010_v1  ;;  %4561 = vmatprep.mubr.msk.bf16.mxu0 %vm5011_vm0, %v5010_v1  ;;  %v545_v4 = vld [vmem:[%s5134_s22] sm:$0xff]  ;;  %v4906_v40 = vld [vmem:[%s5728_s3 + $0x18] sm:$0xff]   ;;  %v4908_v42 = vld [vmem:[%s5728_s3 + $0x10] sm:$0xff]  }
  0x11   : > { %v5138_v5 = vpack.c.bf16 %v545_v4, %v545_v4  ;;  %v4134_v13 = vld [vmem:[%s5727_s2] ss:$0 sm:$0xff]  ;;  %4558 = vmatpush3.bf16.msra.mxu0 %v4903_v19  ;;  %v4163_v49 = vld [vmem:[%s5729_s4 + $0x1] ss:$0 sm:$0xff]  ;;  %v4909_v57 = vld [vmem:[%s5730_s5 + $0x18] sm:$0xff]  }
  0x12   : > { %v4904_v20 = vld [vmem:[%s5730_s5] sm:$0xff]   ;;  %4559 = vmatprep.subr.bf16.mxu0 %v5010_v1  ;;  %v4910_v58 = vld [vmem:[%s5730_s5 + $0x10] sm:$0xff]   ;;  %v4914_v19 = vld [vmem:[%s5732_s7 + $0x8] sm:$0xff]  }
  0x13   : > { %4544 = vmatpush3.bf16.msra.mxu1 %v4900_v2  ;;  %v4142_v30 = vld [vmem:[%s5731_s6] ss:$0 sm:$0xff]  ;;  %v4154_v50 = vld [vmem:[%s5727_s2 + $0x1] ss:$0 sm:$0xff] }
  0x14   : > { %4549 = vmatprep.subr.bf16.mxu1 %v5010_v1 }
  0x15   : > { %4560 = vmatpush3.bf16.msra.mxu0 %v4904_v20 }
  0x16   : > { %4546 = vmatmul.mubr.msk.bf16.vlgmr.msra.gmra.mxu1 %vm570_vm1, %v5138_v5  ;;  %4575 = vmatprep.subr.bf16.mxu0 %v5010_v1 }
  0x17   : > { %4550 = vmatpush3.bf16.msra.mxu1 %v4901_v3  ;;  %4553 = vmatprep.mubr.msk.bf16.mxu1 %vm5011_vm0, %v5010_v1 }
  0x18   : > { %4551 = vmatprep.subr.bf16.mxu1 %v5010_v1  ;;  %4562 = vmatmul.mubr.msk.bf16.vlgmr.msra.gmra.mxu0 %vm570_vm1, %v5138_v5 }
  0x19   : > { %4579 = vmatprep.mubr.msk.bf16.mxu0 %vm5011_vm0, %v5010_v1  ;;  %4576 = vmatpush3.bf16.msra.mxu0 %v4905_v32 }
  0x1a   : > { %4577 = vmatprep.subr.bf16.mxu0 %v5010_v1 }
  0x1b   : > { %4552 = vmatpush3.bf16.msra.mxu1 %v4902_v6  ;;  %v4172_v6 = vld [vmem:[%s5731_s6 + $0x1] ss:$0 sm:$0xff] }
  0x1c   : > { %4565 = vmatprep.subr.mxu1 %v5010_v1 }
  0x1d   : > { %4578 = vmatpush3.bf16.msra.mxu0 %v4907_v37 }
  0x1e   : > { %4554 = vmatmul.mubr.msk.bf16.vlgmr.msra.gmra.mxu1 %vm570_vm1, %v5138_v5  ;;  %4591 = vmatprep.subr.bf16.mxu0 %v5010_v1 }
  0x1f   : > { %4567 = vmatprep.mubr.msk.f32.mxu1 %vm5011_vm0, %v5010_v1 }
  0x20   : > { %4580 = vmatmul.mubr.msk.bf16.vlgmr.msra.gmra.mxu0 %vm570_vm1, %v5138_v5 }
  0x21   : > { %4595 = vmatprep.mubr.msk.bf16.mxu0 %vm5011_vm0, %v5010_v1  ;;  %4592 = vmatpush3.bf16.msra.mxu0 %v4909_v57 }
  0x22   : > { %4593 = vmatprep.subr.bf16.mxu0 %v5010_v1 }
  0x25   : > { %4594 = vmatpush3.bf16.msra.mxu0 %v4910_v58 }
  0x26   : > { %4604 = vmatprep.subr.mxu0 %v5010_v1 }
  0x28   : > { %4596 = vmatmul.mubr.msk.bf16.vlgmr.msra.gmra.mxu0 %vm570_vm1, %v5138_v5 }
  0x29   : > { %4606 = vmatprep.mubr.msk.f32.mxu0 %vm5011_vm0, %v5010_v1 }
  0xd6   : > { %v608_v7 = vpop.f32.mrf.mxu1 }
  0xd7   : > { %v609_v16 = vadd.f32 %v4134_v13, %v608_v7 }
  0xd8   : > { %v4547_v8 = vpop.f32.mrf.mxu1  ;;  %v734_v31 = vpop.f32.mrf.mxu0 }
  0xd9   : > { %v735_v33 = vadd.f32 %v4142_v30, %v734_v31 }
  0xda   : > { %v611_v9 = vpop.f32.mrf.mxu1  ;;  %v4563_v34 = vpop.f32.mrf.mxu0 }
  0xdc   : > { %v4548_v10 = vpop.f32.mrf.mxu1  ;;  %v737_v35 = vpop.f32.mrf.mxu0 }
  0xde   : > { %v671_v12 = vpop.f32.mrf.mxu1  ;;  %v4564_v36 = vpop.f32.mrf.mxu0 }
  0xdf   : > { %v672_v14 = vadd.f32 %v4138_v11, %v671_v12 }
  0xe0   : > { %v4555_v15 = vpop.f32.mrf.mxu1  ;;  %v965_v43 = vpop.f32.mrf.mxu0 }
  0xe1   : > { %4566 = vmatpush3.xpose.msk.msra.mxu1 %vm740_vm2, %v672_v14  ;;  %v966_v53 = vadd.f32 %v4154_v50, %v965_v43  ;;  %v4911_v14 = vld [vmem:[%s5732_s7] sm:$0xff]  }
  0xe2   : > { %v674_v17 = vpop.f32.mrf.mxu1  ;;  %4570 = vmatprep.subr.mxu1 %v5010_v1  ;;  %v4581_v44 = vpop.f32.mrf.mxu0 }
  0xe4   : > { %v4556_v18 = vpop.f32.mrf.mxu1  ;;  %4568 = vmatmul.mubr.msk.f32.vlgmr.msra.gmra.mxu1 %vm740_vm2, %v609_v16  ;;  %v968_v45 = vpop.f32.mrf.mxu0  ;;  %v4912_v16 = vld [vmem:[%s5728_s3 + $0x28] sm:$0xff]  }
  0xe5   : > { %4572 = vmatprep.mubr.msk.f32.mxu1 %vm5011_vm0, %v5010_v1  ;;  %4571 = vmatpush3.msra.mxu1 %v735_v33  ;;  %v4913_v18 = vld [vmem:[%s5728_s3 + $0x20] sm:$0xff]   ;;  %v4917_v45 = vld [vmem:[%s5730_s5 + $0x28] sm:$0xff]  }
  0xe6   : > { %4583 = vmatprep.subr.bf16.mxu1 %v5010_v1  ;;  %v4582_v46 = vpop.f32.mrf.mxu0 }
  0xe7   : > { %v4918_v46 = vld [vmem:[%s5730_s5 + $0x20] sm:$0xff]  }
  0xe8   : > { %v1095_v7 = vpop.f32.mrf.mxu0 }
  0xe9   : > { %v1096_v8 = vadd.f32 %v4172_v6, %v1095_v7  ;;  %v4921_v7 = vld [vmem:[%s5728_s3 + $0x38] sm:$0xff]  }
  0xea   : > { %v4597_v9 = vpop.f32.mrf.mxu0 }
  0xeb   : > { %4605 = vmatpush3.msra.mxu0 %v1096_v8 }
  0xec   : > { %v1098_v10 = vpop.f32.mrf.mxu0  ;;  %4615 = vmatprep.subr.bf16.mxu0 %v5010_v1 }
  0xed   : > { %v4923_v10 = vld [vmem:[%s5728_s3 + $0x30] sm:$0xff]  }
  0xee   : > { %v4598_v11 = vpop.f32.mrf.mxu0 }
 0x1a4   : > { %v813_v21 = vpop.f32.mrf.mxu1 }
 0x1a5   : > { %v817_v22 = vmul.f32 0.088388346, %v813_v21  ;;  %v4915_v21 = vld [vmem:[%s5746_s28 + $0x28] sm:$0xff]  }
 0x1a6   : > { %v4569_v23 = vpop.f32.mrf.mxu1 }
 0x1a7   : > { %v819_v24 = vsel %vm818_vm3, %v817_v22, -inf }
 0x1a8   : > { %820 = vmax.xlane.f32.xlu0 %v819_v24 }
 0x231   : > { %v821_v25 = vpop.xlane.xlu0 %820 }
 0x232   : > { %v822_v26 = vsub.f32 %v817_v22, %v821_v25  ;;  %v4916_v25 = vld [vmem:[%s5746_s28 + $0x20] sm:$0xff]  }
 0x234   : > { %v823_v27 = vmul.f32 1.442695, %v822_v26 }
 0x236   : > { %4965 = vpow2.f32 %v823_v27 }
 0x243   : > { %v4966_v28 = vpop.eup %4965 }
 0x244   : > { %v825_v29 = vsel %vm818_vm3, %v4966_v28, 0.0 }
 0x245   : > { %826 = vadd.xlane.f32.xlu0 %v825_v29  ;;  %v4199_v29 = vld [vmem:[%s5729_s4 + $0x2] ss:$0 sm:$0xff] }
 0x2ce   : > { %v827_v38 = vpop.xlane.xlu0 %826 }
 0x2cf   : > { %4967 = vrcp.f32 %v827_v38 }
 0x2dc   : > { %v4968_v39 = vpop.eup %4967 }
 0x2dd   : > { %v829_v41 = vmul.f32 %v4968_v39, %v4966_v28  ;;  %v4190_v39 = vld [vmem:[%s5727_s2 + $0x2] ss:$0 sm:$0xff] }
 0x2df   : > { %4573 = vmatmul.mubr.msk.f32.vlgmr.msra.gmra.mxu1 %vm818_vm3, %v829_v41 }
 0x2e0   : > { %4584 = vmatpush3.bf16.msra.mxu1 %v4906_v40  ;;  %4587 = vmatprep.mubr.msk.bf16.mxu1 %vm5011_vm0, %v5010_v1 }
 0x2e1   : > { %4585 = vmatprep.subr.bf16.mxu1 %v5010_v1 }
 0x2e4   : > { %4586 = vmatpush3.bf16.msra.mxu1 %v4908_v42 }
 0x2e5   : > { %4599 = vmatprep.subr.mxu1 %v5010_v1 }
 0x2e7   : > { %4588 = vmatmul.mubr.msk.bf16.vlgmr.msra.gmra.mxu1 %vm570_vm1, %v5138_v5 }
 0x2e8   : > { %4601 = vmatprep.mubr.msk.f32.mxu1 %vm5011_vm0, %v5010_v1 }
 0x39f   : > { %v899_v47 = vpop.f32.mrf.mxu1 }
 0x3a0   : > { %v903_v17 = vpack.c.bf16 %v899_v47, %v899_v47 }
 0x3a1   : > { %v4574_v48 = vpop.f32.mrf.mxu1 }
 0x3a7   : > { %v1030_v51 = vpop.f32.mrf.mxu1 }
 0x3a8   : > { %v1031_v52 = vadd.f32 %v4163_v49, %v1030_v51 }
 0x3a9   : > { %v4589_v54 = vpop.f32.mrf.mxu1 }
 0x3aa   : > { %4600 = vmatpush3.xpose.msk.msra.mxu1 %vm740_vm2, %v1031_v52 }
 0x3ab   : > { %v1033_v55 = vpop.f32.mrf.mxu1  ;;  %4609 = vmatprep.subr.bf16.mxu1 %v5010_v1 }
 0x3ad   : > { %v4590_v56 = vpop.f32.mrf.mxu1  ;;  %4602 = vmatmul.mubr.msk.f32.vlgmr.msra.gmra.mxu1 %vm740_vm2, %v966_v53 }
 0x3ae   : > { %4611 = vmatprep.mubr.msk.bf16.mxu1 %vm5011_vm0, %v5010_v1  ;;  %4610 = vmatpush3.bf16.msra.mxu1 %v4914_v19  ;;  %v4208_v56 = vld [vmem:[%s5731_s6 + $0x2] ss:$0 sm:$0xff] }
 0x3af   : > { %4621 = vmatprep.subr.bf16.mxu1 %v5010_v1 }
 0x46d   : > { %v1173_v59 = vpop.f32.mrf.mxu1 }
 0x46e   : > { %v1177_v60 = vmul.f32 0.088388346, %v1173_v59 }
 0x46f   : > { %v4603_v61 = vpop.f32.mrf.mxu1 }
 0x470   : > { %v1178_v62 = vsel %vm818_vm3, %v1177_v60, -inf }
 0x471   : > { %1179 = vmax.xlane.f32.xlu1 %v1178_v62 }
 0x4fa   : > { %v1180_v63 = vpop.xlane.xlu1 %1179 }
 0x4fb   : > { %v1181_v0 = vsub.f32 %v1177_v60, %v1180_v63 }
 0x4fd   : > { %v1182_v2 = vmul.f32 1.442695, %v1181_v0 }
 0x4ff   : > { %4969 = vpow2.f32 %v1182_v2  ;;  %v4919_v2 = vld [vmem:[%s5732_s7 + $0x10] sm:$0xff]  }
 0x50c   : > { %v4970_v3 = vpop.eup %4969 }
 0x50d   : > { %v1184_v4 = vsel %vm818_vm3, %v4970_v3, 0.0 }
 0x50e   : > { %1185 = vadd.xlane.f32.xlu1 %v1184_v4  ;;  %v4922_v4 = vld [vmem:[%s5746_s28 + $0x30] sm:$0xff]  }
 0x597   : > { %v1186_v12 = vpop.xlane.xlu1 %1185 }
 0x598   : > { %4971 = vrcp.f32 %v1186_v12 }
 0x5a5   : > { %v4972_v13 = vpop.eup %4971 }
 0x5a6   : > { %v1188_v15 = vmul.f32 %v4972_v13, %v4970_v3  ;;  %v4920_v3 = vld [vmem:[%s5746_s28 + $0x38] sm:$0xff]  }
 0x5a8   : > { %4607 = vmatmul.mubr.msk.f32.vlgmr.msra.gmra.mxu0 %vm818_vm3, %v1188_v15 }
 0x5a9   : > { %4616 = vmatpush3.bf16.msra.mxu0 %v4911_v14  ;;  %4617 = vmatprep.mubr.msk.bf16.mxu0 %vm5011_vm0, %v5010_v1 }
 0x5aa   : > { %4629 = vmatprep.subr.bf16.mxu0 %v5010_v1 }
 0x5ac   : > { %4618 = vmatmul.mubr.msk.bf16.vlgmr.msra.gmra.mxu0 %vm740_vm2, %v903_v17 }
 0x5ad   : > { %4630 = vmatpush3.bf16.msra.mxu0 %v4912_v16  ;;  %4633 = vmatprep.mubr.msk.bf16.mxu0 %vm5011_vm0, %v5010_v1 }
 0x5ae   : > { %4631 = vmatprep.subr.bf16.mxu0 %v5010_v1 }
 0x5b1   : > { %4632 = vmatpush3.bf16.msra.mxu0 %v4913_v18 }
 0x5b2   : > { %4645 = vmatprep.subr.mxu0 %v5010_v1 }
 0x5b4   : > { %4634 = vmatmul.mubr.msk.bf16.vlgmr.msra.gmra.mxu0 %vm570_vm1, %v5138_v5 }
 0x5b5   : > { %4647 = vmatprep.mubr.msk.f32.mxu0 %vm5011_vm0, %v5010_v1 }
 0x668   : > { %v1258_v20 = vpop.f32.mrf.mxu0 }
 0x669   : > { %v1262_v22 = vpack.c.bf16 %v1258_v20, %v1258_v20 }
 0x66a   : > { %v4608_v23 = vpop.f32.mrf.mxu0 }
 0x66b   : > { %4612 = vmatmul.mubr.msk.bf16.vlgmr.msra.gmra.mxu1 %vm740_vm2, %v1262_v22  ;;  %v4224_v22 = vld [vmem:[%s5727_s2 + $0x3] ss:$0 sm:$0xff] }
 0x66c   : > { %v5268_v24 = vpop.f32.mrf.mxu0  ;;  %4622 = vmatpush3.bf16.msra.mxu1 %v4915_v21  ;;  %4625 = vmatprep.mubr.msk.bf16.mxu1 %vm5011_vm0, %v5010_v1  ;;  %v4233_v21 = vld [vmem:[%s5729_s4 + $0x3] ss:$0 sm:$0xff] }
 0x66d   : > { %4623 = vmatprep.subr.bf16.mxu1 %v5010_v1 }
 0x66e   : > { %v4619_v26 = vpop.f32.mrf.mxu0 }
 0x670   : > { %v1361_v27 = vpop.f32.mrf.mxu0  ;;  %4624 = vmatpush3.bf16.msra.mxu1 %v4916_v25 }
 0x671   : > { %4637 = vmatprep.subr.bf16.mxu1 %v5010_v1 }
 0x672   : > { %v4620_v28 = vpop.f32.mrf.mxu0 }
 0x673   : > { %4626 = vmatmul.mubr.msk.bf16.vlgmr.msra.gmra.mxu1 %vm570_vm1, %v5138_v5 }
 0x674   : > { %v1488_v30 = vpop.f32.mrf.mxu0  ;;  %4641 = vmatprep.mubr.msk.bf16.mxu1 %vm5011_vm0, %v5010_v1  ;;  %4638 = vmatpush3.bf16.msra.mxu1 %v4917_v45 }
 0x675   : > { %v1489_v31 = vadd.f32 %v4199_v29, %v1488_v30  ;;  %4639 = vmatprep.subr.bf16.mxu1 %v5010_v1  ;;  %v4924_v29 = vld [vmem:[%s5730_s5 + $0x38] sm:$0xff]   ;;  %v4925_v30 = vld [vmem:[%s5730_s5 + $0x30] sm:$0xff]  }
 0x676   : > { %v4635_v32 = vpop.f32.mrf.mxu0 }
 0x677   : > { %4646 = vmatpush3.xpose.msk.msra.mxu0 %vm740_vm2, %v1489_v31 }
 0x678   : > { %v1491_v33 = vpop.f32.mrf.mxu0  ;;  %4650 = vmatprep.subr.mxu0 %v5010_v1  ;;  %4640 = vmatpush3.bf16.msra.mxu1 %v4918_v46  ;;  %v4926_v46 = vld [vmem:[%s5728_s3 + $0x48] sm:$0xff]  }
 0x679   : > { %4655 = vmatprep.subr.bf16.mxu1 %v5010_v1 }
 0x67a   : > { %v4636_v34 = vpop.f32.mrf.mxu0 }
 0x67b   : > { %4642 = vmatmul.mubr.msk.bf16.vlgmr.msra.gmra.mxu1 %vm570_vm1, %v5138_v5 }
 0x67c   : > { %4657 = vmatprep.mubr.msk.bf16.mxu1 %vm5011_vm0, %v5010_v1  ;;  %4656 = vmatpush3.bf16.msra.mxu1 %v4919_v2 }
 0x67d   : > { %4669 = vmatprep.subr.bf16.mxu1 %v5010_v1 }
 0x72b   : > { %v5286_v35 = vpop.f32.mrf.mxu1 }
 0x72c   : > { %v1359_v15 = vadd.f32 %v5268_v24, %v5286_v35 }
 0x72d   : > { %v4613_v36 = vpop.f32.mrf.mxu1 }
 0x72f   : > { %v1312_v37 = vpop.f32.mrf.mxu1 }
 0x731   : > { %v4614_v38 = vpop.f32.mrf.mxu1 }
 0x733   : > { %v1423_v40 = vpop.f32.mrf.mxu1 }
 0x734   : > { %v1424_v41 = vadd.f32 %v4190_v39, %v1423_v40  ;;  %v4242_v40 = vld [vmem:[%s5731_s6 + $0x3] ss:$0 sm:$0xff] }
 0x735   : > { %v4627_v42 = vpop.f32.mrf.mxu1 }
 0x736   : > { %4648 = vmatmul.mubr.msk.f32.vlgmr.msra.gmra.mxu0 %vm740_vm2, %v1424_v41 }
 0x737   : > { %v1426_v43 = vpop.f32.mrf.mxu1  ;;  %4652 = vmatprep.mubr.msk.f32.mxu0 %vm5011_vm0, %v5010_v1 }
 0x739   : > { %v4628_v44 = vpop.f32.mrf.mxu1 }
 0x73b   : > { %v1553_v57 = vpop.f32.mrf.mxu1 }
 0x73c   : > { %v1554_v58 = vadd.f32 %v4208_v56, %v1553_v57 }
 0x73d   : > { %v4643_v59 = vpop.f32.mrf.mxu1 }
 0x73e   : > { %4651 = vmatpush3.msra.mxu0 %v1554_v58  ;;  %v4929_v59 = vld [vmem:[%s5746_s28 + $0x48] sm:$0xff]  }
 0x73f   : > { %v1556_v60 = vpop.f32.mrf.mxu1  ;;  %4661 = vmatprep.subr.bf16.mxu0 %v5010_v1 }
 0x741   : > { %v4644_v61 = vpop.f32.mrf.mxu1 }
 0x7f6   : > { %v1631_v47 = vpop.f32.mrf.mxu0 }
 0x7f7   : > { %v1635_v48 = vmul.f32 0.088388346, %v1631_v47  ;;  %v4927_v47 = vld [vmem:[%s5728_s3 + $0x40] sm:$0xff]  }
 0x7f8   : > { %v4649_v49 = vpop.f32.mrf.mxu0 }
 0x7f9   : > { %v1636_v50 = vsel %vm818_vm3, %v1635_v48, -inf }
 0x7fa   : > { %1637 = vmax.xlane.f32.xlu0 %v1636_v50 }
 0x883   : > { %v1638_v51 = vpop.xlane.xlu0 %1637 }
 0x884   : > { %v1639_v52 = vsub.f32 %v1635_v48, %v1638_v51  ;;  %v4928_v51 = vld [vmem:[%s5732_s7 + $0x18] sm:$0xff]  }
 0x886   : > { %v1640_v53 = vmul.f32 1.442695, %v1639_v52  ;;  %v4267_v52 = vld [vmem:[%s5729_s4 + $0x4] ss:$0 sm:$0xff] }
 0x888   : > { %4973 = vpow2.f32 %v1640_v53 }
 0x895   : > { %v4974_v54 = vpop.eup %4973 }
 0x896   : > { %v1642_v55 = vsel %vm818_vm3, %v4974_v54, 0.0 }
 0x897   : > { %1643 = vadd.xlane.f32.xlu1 %v1642_v55 }
 0x920   : > { %v1644_v62 = vpop.xlane.xlu1 %1643 }
 0x921   : > { %4975 = vrcp.f32 %v1644_v62  ;;  %v4930_v62 = vld [vmem:[%s5746_s28 + $0x40] sm:$0xff]  }
 0x92e   : > { %v4976_v63 = vpop.eup %4975 }
 0x92f   : > { %v1646_v0 = vmul.f32 %v4976_v63, %v4974_v54 }
 0x931   : > { %4653 = vmatmul.mubr.msk.f32.vlgmr.msra.gmra.mxu0 %vm818_vm3, %v1646_v0 }
 0x932   : > { %4665 = vmatprep.mubr.msk.bf16.mxu0 %vm5011_vm0, %v5010_v1  ;;  %4662 = vmatpush3.bf16.msra.mxu0 %v4920_v3 }
 0x933   : > { %4663 = vmatprep.subr.bf16.mxu0 %v5010_v1 }
 0x936   : > { %4664 = vmatpush3.bf16.msra.mxu0 %v4922_v4 }
 0x937   : > { %4677 = vmatprep.subr.bf16.mxu0 %v5010_v1 }
 0x939   : > { %4666 = vmatmul.mubr.msk.bf16.vlgmr.msra.gmra.mxu0 %vm570_vm1, %v5138_v5 }
 0x93a   : > { %4681 = vmatprep.mubr.msk.bf16.mxu0 %vm5011_vm0, %v5010_v1  ;;  %4678 = vmatpush3.bf16.msra.mxu0 %v4924_v29 }
 0x93b   : > { %4679 = vmatprep.subr.bf16.mxu0 %v5010_v1 }
 0x93e   : > { %4680 = vmatpush3.bf16.msra.mxu0 %v4925_v30 }
 0x93f   : > { %4709 = vmatprep.subr.bf16.mxu0 %v5010_v1 }
 0x941   : > { %4682 = vmatmul.mubr.msk.bf16.vlgmr.msra.gmra.mxu0 %vm570_vm1, %v5138_v5 }
 0x942   : > { %4713 = vmatprep.mubr.msk.bf16.mxu0 %vm5011_vm0, %v5010_v1  ;;  %4710 = vmatpush3.bf16.msra.mxu0 %v4926_v46 }
 0x943   : > { %4711 = vmatprep.subr.bf16.mxu0 %v5010_v1 }
 0x946   : > { %4712 = vmatpush3.bf16.msra.mxu0 %v4927_v47 }
 0x947   : > { %4725 = vmatprep.subr.mxu0 %v5010_v1 }
 0x949   : > { %4714 = vmatmul.mubr.msk.bf16.vlgmr.msra.gmra.mxu0 %vm570_vm1, %v5138_v5 }
 0x94a   : > { %4727 = vmatprep.mubr.msk.f32.mxu0 %vm5011_vm0, %v5010_v1 }
 0x9f1   : > { %v1716_v6 = vpop.f32.mrf.mxu0 }
 0x9f2   : > { %v1720_v8 = vpack.c.bf16 %v1716_v6, %v1716_v6  ;;  %v4258_v6 = vld [vmem:[%s5727_s2 + $0x4] ss:$0 sm:$0xff] }
 0x9f3   : > { %v4654_v9 = vpop.f32.mrf.mxu0 }
 0x9f4   : > { %4658 = vmatmul.mubr.msk.bf16.vlgmr.msra.gmra.mxu1 %vm740_vm2, %v1720_v8 }
 0x9f5   : > { %4670 = vmatpush3.bf16.msra.mxu1 %v4921_v7  ;;  %4673 = vmatprep.mubr.msk.bf16.mxu1 %vm5011_vm0, %v5010_v1 }
 0x9f6   : > { %4671 = vmatprep.subr.bf16.mxu1 %v5010_v1 }
 0x9f9   : > { %4672 = vmatpush3.bf16.msra.mxu1 %v4923_v10  ;;  %v1833_v11 = vpop.f32.mrf.mxu0 }
 0x9fa   : > { %4685 = vmatprep.subr.mxu1 %v5010_v1  ;;  %v1834_v26 = vadd.f32 %v4224_v22, %v1833_v11 }
 0x9fb   : > { %v4667_v12 = vpop.f32.mrf.mxu0 }
 0x9fc   : > { %4674 = vmatmul.mubr.msk.bf16.vlgmr.msra.gmra.mxu1 %vm570_vm1, %v5138_v5  ;;  %v4931_v12 = vld [vmem:[%s5730_s5 + $0x48] sm:$0xff]  }
 0x9fd   : > { %4687 = vmatprep.mubr.msk.f32.mxu1 %vm5011_vm0, %v5010_v1  ;;  %v1836_v13 = vpop.f32.mrf.mxu0 }
 0x9fe   : > { %v4932_v13 = vld [vmem:[%s5730_s5 + $0x40] sm:$0xff]  }
 0x9ff   : > { %v4668_v14 = vpop.f32.mrf.mxu0 }
 0xa01   : > { %v1963_v41 = vpop.f32.mrf.mxu0 }
 0xa02   : > { %v1964_v42 = vadd.f32 %v4242_v40, %v1963_v41 }
 0xa03   : > { %v4683_v43 = vpop.f32.mrf.mxu0 }
 0xa05   : > { %v1966_v44 = vpop.f32.mrf.mxu0 }
 0xa07   : > { %v4684_v45 = vpop.f32.mrf.mxu0 }
 0xa09   : > { %v2308_v53 = vpop.f32.mrf.mxu0 }
 0xa0a   : > { %v2309_v54 = vadd.f32 %v4267_v52, %v2308_v53 }
 0xa0b   : > { %v4715_v55 = vpop.f32.mrf.mxu0 }
 0xa0c   : > { %4726 = vmatpush3.xpose.msk.msra.mxu0 %vm740_vm2, %v2309_v54 }
 0xa0d   : > { %v2311_v56 = vpop.f32.mrf.mxu0  ;;  %4730 = vmatprep.subr.mxu0 %v5010_v1 }
 0xa0f   : > { %v4716_v57 = vpop.f32.mrf.mxu0 }
 0xa10   : > { %v4938_v57 = vld [vmem:[%s5730_s5 + $0x58] sm:$0xff]  }
 0xab4   : > { %v1767_v16 = vpop.f32.mrf.mxu1 }
 0xab5   : > { %v5348_v17 = vadd.f32 %v1767_v16, %v1359_v15 }
 0xab6   : > { %v4659_v18 = vpop.f32.mrf.mxu1 }
 0xab8   : > { %v1770_v19 = vpop.f32.mrf.mxu1 }
 0xaba   : > { %v4660_v20 = vpop.f32.mrf.mxu1 }
 0xabc   : > { %v1898_v23 = vpop.f32.mrf.mxu1 }
 0xabd   : > { %v1899_v25 = vadd.f32 %v4233_v21, %v1898_v23  ;;  %v4276_v23 = vld [vmem:[%s5731_s6 + $0x4] ss:$0 sm:$0xff] }
 0xabe   : > { %v4675_v27 = vpop.f32.mrf.mxu1 }
 0xabf   : > { %4686 = vmatpush3.xpose.msk.msra.mxu1 %vm740_vm2, %v1899_v25 }
 0xac0   : > { %v1901_v24 = vpop.f32.mrf.mxu1  ;;  %4690 = vmatprep.subr.mxu1 %v5010_v1 }
 0xac2   : > { %v4676_v28 = vpop.f32.mrf.mxu1  ;;  %4688 = vmatmul.mubr.msk.f32.vlgmr.msra.gmra.mxu1 %vm740_vm2, %v1834_v26 }
 0xac3   : > { %4692 = vmatprep.mubr.msk.f32.mxu1 %vm5011_vm0, %v5010_v1  ;;  %4691 = vmatpush3.msra.mxu1 %v1964_v42 }
 0xac4   : > { %4695 = vmatprep.subr.bf16.mxu1 %v5010_v1 }
 0xb82   : > { %v2041_v31 = vpop.f32.mrf.mxu1 }
 0xb83   : > { %v2045_v32 = vmul.f32 0.088388346, %v2041_v31 }
 0xb84   : > { %v4689_v33 = vpop.f32.mrf.mxu1 }
 0xb85   : > { %v2046_v34 = vsel %vm818_vm3, %v2045_v32, -inf  ;;  %v4934_v33 = vld [vmem:[%s5746_s28 + $0x58] sm:$0xff]  }
 0xb86   : > { %2047 = vmax.xlane.f32.xlu0 %v2046_v34  ;;  %v4936_v34 = vld [vmem:[%s5746_s28 + $0x50] sm:$0xff]  }
 0xc0f   : > { %v2048_v35 = vpop.xlane.xlu0 %2047 }
 0xc10   : > { %v2049_v36 = vsub.f32 %v2045_v32, %v2048_v35  ;;  %v4933_v32 = vld [vmem:[%s5732_s7 + $0x20] sm:$0xff]  }
 0xc12   : > { %v2050_v37 = vmul.f32 1.442695, %v2049_v36  ;;  %v4935_v36 = vld [vmem:[%s5728_s3 + $0x58] sm:$0xff]  }
 0xc14   : > { %4977 = vpow2.f32 %v2050_v37 }
 0xc21   : > { %v4978_v38 = vpop.eup %4977 }
 0xc22   : > { %v2052_v39 = vsel %vm818_vm3, %v4978_v38, 0.0 }
 0xc23   : > { %2053 = vadd.xlane.f32.xlu1 %v2052_v39  ;;  %v4937_v39 = vld [vmem:[%s5728_s3 + $0x50] sm:$0xff]  }
 0xcac   : > { %v2054_v48 = vpop.xlane.xlu1 %2053 }
 0xcad   : > { %4979 = vrcp.f32 %v2054_v48 }
 0xcba   : > { %v4980_v49 = vpop.eup %4979 }
 0xcbb   : > { %v2056_v50 = vmul.f32 %v4980_v49, %v4978_v38  ;;  %v4301_v49 = vld [vmem:[%s5729_s4 + $0x5] ss:$0 sm:$0xff] }
 0xcbd   : > { %4693 = vmatmul.mubr.msk.f32.vlgmr.msra.gmra.mxu1 %vm818_vm3, %v2056_v50  ;;  %v4292_v50 = vld [vmem:[%s5727_s2 + $0x5] ss:$0 sm:$0xff] }
 0xcbe   : > { %4697 = vmatprep.mubr.msk.bf16.mxu1 %vm5011_vm0, %v5010_v1  ;;  %4696 = vmatpush3.bf16.msra.mxu1 %v4928_v51 }
 0xcbf   : > { %4701 = vmatprep.subr.bf16.mxu1 %v5010_v1 }
 0xd7d   : > { %v2126_v58 = vpop.f32.mrf.mxu1 }
 0xd7e   : > { %v2130_v60 = vpack.c.bf16 %v2126_v58, %v2126_v58  ;;  %v4939_v58 = vld [vmem:[%s5730_s5 + $0x50] sm:$0xff]  }
 0xd7f   : > { %v4694_v61 = vpop.f32.mrf.mxu1 }
 0xd80   : > { %4698 = vmatmul.mubr.msk.bf16.vlgmr.msra.gmra.mxu1 %vm740_vm2, %v2130_v60 }
 0xd81   : > { %4702 = vmatpush3.bf16.msra.mxu1 %v4929_v59  ;;  %4705 = vmatprep.mubr.msk.bf16.mxu1 %vm5011_vm0, %v5010_v1 }
 0xd82   : > { %4703 = vmatprep.subr.bf16.mxu1 %v5010_v1 }
 0xd85   : > { %4704 = vmatpush3.bf16.msra.mxu1 %v4930_v62 }
 0xd86   : > { %4717 = vmatprep.subr.bf16.mxu1 %v5010_v1 }
 0xd88   : > { %4706 = vmatmul.mubr.msk.bf16.vlgmr.msra.gmra.mxu1 %vm570_vm1, %v5138_v5 }
 0xd89   : > { %4721 = vmatprep.mubr.msk.bf16.mxu1 %vm5011_vm0, %v5010_v1  ;;  %4718 = vmatpush3.bf16.msra.mxu1 %v4931_v12 }
 0xd8a   : > { %4719 = vmatprep.subr.bf16.mxu1 %v5010_v1 }
 0xd8d   : > { %4720 = vmatpush3.bf16.msra.mxu1 %v4932_v13 }
 0xd8e   : > { %4735 = vmatprep.subr.bf16.mxu1 %v5010_v1 }
 0xd90   : > { %4722 = vmatmul.mubr.msk.bf16.vlgmr.msra.gmra.mxu1 %vm570_vm1, %v5138_v5 }
 0xd91   : > { %4737 = vmatprep.mubr.msk.bf16.mxu1 %vm5011_vm0, %v5010_v1  ;;  %4736 = vmatpush3.bf16.msra.mxu1 %v4933_v32  ;;  %v4335_v32 = vld [vmem:[%s5729_s4 + $0x6] ss:$0 sm:$0xff] }
 0xd92   : > { %4749 = vmatprep.subr.bf16.mxu1 %v5010_v1 }
 0xe40   : > { %v2177_v63 = vpop.f32.mrf.mxu1 }
 0xe41   : > { %v5419_v0 = vadd.f32 %v2177_v63, %v5348_v17 }
 0xe42   : > { %v4699_v2 = vpop.f32.mrf.mxu1 }
 0xe44   : > { %v2180_v3 = vpop.f32.mrf.mxu1 }
 0xe46   : > { %v4700_v4 = vpop.f32.mrf.mxu1 }
 0xe48   : > { %v2243_v7 = vpop.f32.mrf.mxu1 }
 0xe49   : > { %v2244_v8 = vadd.f32 %v4258_v6, %v2243_v7  ;;  %v4310_v6 = vld [vmem:[%s5731_s6 + $0x5] ss:$0 sm:$0xff] }
 0xe4a   : > { %v4707_v9 = vpop.f32.mrf.mxu1 }
 0xe4b   : > { %4728 = vmatmul.mubr.msk.f32.vlgmr.msra.gmra.mxu0 %vm740_vm2, %v2244_v8 }
 0xe4c   : > { %v2246_v10 = vpop.f32.mrf.mxu1  ;;  %4732 = vmatprep.mubr.msk.f32.mxu0 %vm5011_vm0, %v5010_v1 }
 0xe4e   : > { %v4708_v11 = vpop.f32.mrf.mxu1 }
 0xe50   : > { %v2373_v25 = vpop.f32.mrf.mxu1 }
 0xe51   : > { %v2374_v26 = vadd.f32 %v4276_v23, %v2373_v25 }
 0xe52   : > { %v4723_v27 = vpop.f32.mrf.mxu1 }
 0xe53   : > { %4731 = vmatpush3.msra.mxu0 %v2374_v26 }
 0xe54   : > { %v2376_v24 = vpop.f32.mrf.mxu1  ;;  %4741 = vmatprep.subr.bf16.mxu0 %v5010_v1 }
 0xe56   : > { %v4724_v28 = vpop.f32.mrf.mxu1 }
 0xf0b   : > { %v2451_v14 = vpop.f32.mrf.mxu0 }
 0xf0c   : > { %v2455_v15 = vmul.f32 0.088388346, %v2451_v14 }
 0xf0d   : > { %v4729_v16 = vpop.f32.mrf.mxu0 }
 0xf0e   : > { %v2456_v17 = vsel %vm818_vm3, %v2455_v15, -inf  ;;  %v4941_v16 = vld [vmem:[%s5746_s28 + $0x68] sm:$0xff]  }
 0xf0f   : > { %2457 = vmax.xlane.f32.xlu0 %v2456_v17  ;;  %v4943_v17 = vld [vmem:[%s5746_s28 + $0x60] sm:$0xff]  }
 0xf98   : > { %v2458_v18 = vpop.xlane.xlu0 %2457 }
 0xf99   : > { %v2459_v19 = vsub.f32 %v2455_v15, %v2458_v18  ;;  %v4940_v15 = vld [vmem:[%s5732_s7 + $0x28] sm:$0xff]  }
 0xf9b   : > { %v2460_v20 = vmul.f32 1.442695, %v2459_v19  ;;  %v4942_v19 = vld [vmem:[%s5728_s3 + $0x68] sm:$0xff]  }
 0xf9d   : > { %4981 = vpow2.f32 %v2460_v20 }
 0xfaa   : > { %v4982_v21 = vpop.eup %4981 }
 0xfab   : > { %v2462_v22 = vsel %vm818_vm3, %v4982_v21, 0.0 }
 0xfac   : > { %2463 = vadd.xlane.f32.xlu1 %v2462_v22  ;;  %v4944_v22 = vld [vmem:[%s5728_s3 + $0x60] sm:$0xff]  }
0x1035   : > { %v2464_v29 = vpop.xlane.xlu1 %2463 }
0x1036   : > { %4983 = vrcp.f32 %v2464_v29 }
0x1043   : > { %v4984_v30 = vpop.eup %4983 }
0x1044   : > { %v2466_v31 = vmul.f32 %v4984_v30, %v4982_v21 }
0x1046   : > { %4733 = vmatmul.mubr.msk.f32.vlgmr.msra.gmra.mxu0 %vm818_vm3, %v2466_v31 }
0x1047   : > { %4745 = vmatprep.mubr.msk.bf16.mxu0 %vm5011_vm0, %v5010_v1  ;;  %4742 = vmatpush3.bf16.msra.mxu0 %v4934_v33  ;;  %v4326_v33 = vld [vmem:[%s5727_s2 + $0x6] ss:$0 sm:$0xff] }
0x1048   : > { %4743 = vmatprep.subr.bf16.mxu0 %v5010_v1 }
0x104b   : > { %4744 = vmatpush3.bf16.msra.mxu0 %v4936_v34 }
0x104c   : > { %4757 = vmatprep.subr.bf16.mxu0 %v5010_v1 }
0x104e   : > { %4746 = vmatmul.mubr.msk.bf16.vlgmr.msra.gmra.mxu0 %vm570_vm1, %v5138_v5 }
0x104f   : > { %4761 = vmatprep.mubr.msk.bf16.mxu0 %vm5011_vm0, %v5010_v1  ;;  %4758 = vmatpush3.bf16.msra.mxu0 %v4938_v57 }
0x1050   : > { %4759 = vmatprep.subr.bf16.mxu0 %v5010_v1 }
0x1053   : > { %4760 = vmatpush3.bf16.msra.mxu0 %v4939_v58 }
0x1054   : > { %4775 = vmatprep.subr.bf16.mxu0 %v5010_v1 }
0x1056   : > { %4762 = vmatmul.mubr.msk.bf16.vlgmr.msra.gmra.mxu0 %vm570_vm1, %v5138_v5 }
0x1057   : > { %4777 = vmatprep.mubr.msk.bf16.mxu0 %vm5011_vm0, %v5010_v1  ;;  %4776 = vmatpush3.bf16.msra.mxu0 %v4940_v15  ;;  %v4369_v15 = vld [vmem:[%s5729_s4 + $0x7] ss:$0 sm:$0xff] }
0x1058   : > { %4789 = vmatprep.subr.bf16.mxu0 %v5010_v1 }
0x1106   : > { %v2536_v35 = vpop.f32.mrf.mxu0 }
0x1107   : > { %v2540_v37 = vpack.c.bf16 %v2536_v35, %v2536_v35 }
0x1108   : > { %v4734_v38 = vpop.f32.mrf.mxu0 }
0x1109   : > { %4738 = vmatmul.mubr.msk.bf16.vlgmr.msra.gmra.mxu1 %vm740_vm2, %v2540_v37 }
0x110a   : > { %4750 = vmatpush3.bf16.msra.mxu1 %v4935_v36  ;;  %4753 = vmatprep.mubr.msk.bf16.mxu1 %vm5011_vm0, %v5010_v1 }
0x110b   : > { %4751 = vmatprep.subr.bf16.mxu1 %v5010_v1 }
0x110e   : > { %4752 = vmatpush3.bf16.msra.mxu1 %v4937_v39  ;;  %v2653_v40 = vpop.f32.mrf.mxu0 }
0x110f   : > { %4765 = vmatprep.subr.mxu1 %v5010_v1  ;;  %v2654_v53 = vadd.f32 %v4292_v50, %v2653_v40  ;;  %v4945_v40 = vld [vmem:[%s5730_s5 + $0x68] sm:$0xff]  }
0x1110   : > { %v4747_v41 = vpop.f32.mrf.mxu0 }
0x1111   : > { %4754 = vmatmul.mubr.msk.bf16.vlgmr.msra.gmra.mxu1 %vm570_vm1, %v5138_v5  ;;  %v4946_v41 = vld [vmem:[%s5730_s5 + $0x60] sm:$0xff]  }
0x1112   : > { %4767 = vmatprep.mubr.msk.f32.mxu1 %vm5011_vm0, %v5010_v1  ;;  %v2656_v42 = vpop.f32.mrf.mxu0 }
0x1114   : > { %v4748_v43 = vpop.f32.mrf.mxu0 }
0x1116   : > { %v2783_v7 = vpop.f32.mrf.mxu0 }
0x1117   : > { %v2784_v8 = vadd.f32 %v4310_v6, %v2783_v7 }
0x1118   : > { %v4763_v9 = vpop.f32.mrf.mxu0 }
0x111a   : > { %v2786_v10 = vpop.f32.mrf.mxu0 }
0x111c   : > { %v4764_v11 = vpop.f32.mrf.mxu0 }
0x11c9   : > { %v2587_v44 = vpop.f32.mrf.mxu1 }
0x11ca   : > { %v5480_v45 = vadd.f32 %v2587_v44, %v5419_v0 }
0x11cb   : > { %v4739_v46 = vpop.f32.mrf.mxu1 }
0x11cd   : > { %v2590_v47 = vpop.f32.mrf.mxu1 }
0x11cf   : > { %v4740_v48 = vpop.f32.mrf.mxu1 }
0x11d1   : > { %v2718_v51 = vpop.f32.mrf.mxu1 }
0x11d2   : > { %v2719_v52 = vadd.f32 %v4301_v49, %v2718_v51  ;;  %v4344_v51 = vld [vmem:[%s5731_s6 + $0x6] ss:$0 sm:$0xff] }
0x11d3   : > { %v4755_v54 = vpop.f32.mrf.mxu1 }
0x11d4   : > { %4766 = vmatpush3.xpose.msk.msra.mxu1 %vm740_vm2, %v2719_v52 }
0x11d5   : > { %v2721_v55 = vpop.f32.mrf.mxu1  ;;  %4770 = vmatprep.subr.mxu1 %v5010_v1 }
0x11d7   : > { %v4756_v56 = vpop.f32.mrf.mxu1  ;;  %4768 = vmatmul.mubr.msk.f32.vlgmr.msra.gmra.mxu1 %vm740_vm2, %v2654_v53 }
0x11d8   : > { %4772 = vmatprep.mubr.msk.f32.mxu1 %vm5011_vm0, %v5010_v1  ;;  %4771 = vmatpush3.msra.mxu1 %v2784_v8 }
0x11d9   : > { %4781 = vmatprep.subr.bf16.mxu1 %v5010_v1 }
0x1297   : > { %v2861_v59 = vpop.f32.mrf.mxu1 }
0x1298   : > { %v2865_v60 = vmul.f32 0.088388346, %v2861_v59 }
0x1299   : > { %v4769_v61 = vpop.f32.mrf.mxu1 }
0x129a   : > { %v2866_v62 = vsel %vm818_vm3, %v2865_v60, -inf  ;;  %v4949_v61 = vld [vmem:[%s5746_s28 + $0x78] sm:$0xff]  }
0x129b   : > { %2867 = vmax.xlane.f32.xlu0 %v2866_v62  ;;  %v4951_v62 = vld [vmem:[%s5746_s28 + $0x70] sm:$0xff]  }
0x1324   : > { %v2868_v63 = vpop.xlane.xlu0 %2867 }
0x1325   : > { %v2869_v0 = vsub.f32 %v2865_v60, %v2868_v63  ;;  %v4947_v60 = vld [vmem:[%s5732_s7 + $0x30] sm:$0xff]  }
0x1327   : > { %v2870_v2 = vmul.f32 1.442695, %v2869_v0  ;;  %v4948_v0 = vld [vmem:[%s5728_s3 + $0x78] sm:$0xff]  }
0x1329   : > { %4985 = vpow2.f32 %v2870_v2 }
0x1336   : > { %v4986_v3 = vpop.eup %4985 }
0x1337   : > { %v2872_v4 = vsel %vm818_vm3, %v4986_v3, 0.0 }
0x1338   : > { %2873 = vadd.xlane.f32.xlu1 %v2872_v4  ;;  %v4950_v4 = vld [vmem:[%s5728_s3 + $0x70] sm:$0xff]  }
0x13c1   : > { %v2874_v12 = vpop.xlane.xlu1 %2873 }
0x13c2   : > { %4987 = vrcp.f32 %v2874_v12 }
0x13cf   : > { %v4988_v13 = vpop.eup %4987 }
0x13d0   : > { %v2876_v14 = vmul.f32 %v4988_v13, %v4986_v3 }
0x13d2   : > { %4773 = vmatmul.mubr.msk.f32.vlgmr.msra.gmra.mxu1 %vm818_vm3, %v2876_v14 }
0x13d3   : > { %4785 = vmatprep.mubr.msk.bf16.mxu1 %vm5011_vm0, %v5010_v1  ;;  %4782 = vmatpush3.bf16.msra.mxu1 %v4941_v16  ;;  %v4360_v16 = vld [vmem:[%s5727_s2 + $0x7] ss:$0 sm:$0xff] }
0x13d4   : > { %4783 = vmatprep.subr.bf16.mxu1 %v5010_v1 }
0x13d7   : > { %4784 = vmatpush3.bf16.msra.mxu1 %v4943_v17 }
0x13d8   : > { %4797 = vmatprep.subr.bf16.mxu1 %v5010_v1 }
0x13da   : > { %4786 = vmatmul.mubr.msk.bf16.vlgmr.msra.gmra.mxu1 %vm570_vm1, %v5138_v5 }
0x13db   : > { %4801 = vmatprep.mubr.msk.bf16.mxu1 %vm5011_vm0, %v5010_v1  ;;  %4798 = vmatpush3.bf16.msra.mxu1 %v4945_v40 }
0x13dc   : > { %4799 = vmatprep.subr.bf16.mxu1 %v5010_v1 }
0x13df   : > { %4800 = vmatpush3.bf16.msra.mxu1 %v4946_v41 }
0x13e0   : > { %4815 = vmatprep.subr.bf16.mxu1 %v5010_v1 }
0x13e2   : > { %4802 = vmatmul.mubr.msk.bf16.vlgmr.msra.gmra.mxu1 %vm570_vm1, %v5138_v5 }
0x13e3   : > { %4817 = vmatprep.mubr.msk.bf16.mxu1 %vm5011_vm0, %v5010_v1  ;;  %4816 = vmatpush3.bf16.msra.mxu1 %v4947_v60 }
0x13e4   : > { %4829 = vmatprep.subr.bf16.mxu1 %v5010_v1 }
0x1492   : > { %v2946_v18 = vpop.f32.mrf.mxu1 }
0x1493   : > { %v2950_v20 = vpack.c.bf16 %v2946_v18, %v2946_v18 }
0x1494   : > { %v4774_v21 = vpop.f32.mrf.mxu1 }
0x1495   : > { %4778 = vmatmul.mubr.msk.bf16.vlgmr.msra.gmra.mxu0 %vm740_vm2, %v2950_v20 }
0x1496   : > { %4790 = vmatpush3.bf16.msra.mxu0 %v4942_v19  ;;  %4793 = vmatprep.mubr.msk.bf16.mxu0 %vm5011_vm0, %v5010_v1 }
0x1497   : > { %4791 = vmatprep.subr.bf16.mxu0 %v5010_v1 }
0x149a   : > { %4792 = vmatpush3.bf16.msra.mxu0 %v4944_v22  ;;  %v3063_v23 = vpop.f32.mrf.mxu1 }
0x149b   : > { %4805 = vmatprep.subr.mxu0 %v5010_v1  ;;  %v3064_v36 = vadd.f32 %v4326_v33, %v3063_v23  ;;  %v4952_v23 = vld [vmem:[%s5730_s5 + $0x78] sm:$0xff]  }
0x149c   : > { %v4787_v25 = vpop.f32.mrf.mxu1 }
0x149d   : > { %4794 = vmatmul.mubr.msk.bf16.vlgmr.msra.gmra.mxu0 %vm570_vm1, %v5138_v5  ;;  %v4953_v25 = vld [vmem:[%s5730_s5 + $0x70] sm:$0xff]  }
0x149e   : > { %4807 = vmatprep.mubr.msk.f32.mxu0 %vm5011_vm0, %v5010_v1  ;;  %v3066_v26 = vpop.f32.mrf.mxu1 }
0x14a0   : > { %v4788_v27 = vpop.f32.mrf.mxu1 }
0x14a2   : > { %v3193_v52 = vpop.f32.mrf.mxu1 }
0x14a3   : > { %v3194_v53 = vadd.f32 %v4344_v51, %v3193_v52  ;;  %v5001_v52 = vld [vmem:[%s5134_s22] sm:$0xff] }
0x14a4   : > { %v4803_v54 = vpop.f32.mrf.mxu1 }
0x14a6   : > { %v3196_v55 = vpop.f32.mrf.mxu1 }
0x14a8   : > { %v4804_v56 = vpop.f32.mrf.mxu1 }
0x1555   : > { %v2997_v24 = vpop.f32.mrf.mxu0 }
0x1556   : > { %v5546_v28 = vadd.f32 %v2997_v24, %v5480_v45 }
0x1557   : > { %v4779_v29 = vpop.f32.mrf.mxu0 }
0x1559   : > { %v3000_v30 = vpop.f32.mrf.mxu0 }
0x155b   : > { %v4780_v31 = vpop.f32.mrf.mxu0 }
0x155d   : > { %v3128_v34 = vpop.f32.mrf.mxu0 }
0x155e   : > { %v3129_v35 = vadd.f32 %v4335_v32, %v3128_v34 }
0x155f   : > { %v4795_v37 = vpop.f32.mrf.mxu0 }
0x1560   : > { %4806 = vmatpush3.xpose.msk.msra.mxu0 %vm740_vm2, %v3129_v35 }
0x1561   : > { %v3131_v38 = vpop.f32.mrf.mxu0  ;;  %4810 = vmatprep.subr.mxu0 %v5010_v1 }
0x1563   : > { %v4796_v39 = vpop.f32.mrf.mxu0  ;;  %4808 = vmatmul.mubr.msk.f32.vlgmr.msra.gmra.mxu0 %vm740_vm2, %v3064_v36 }
0x1564   : > { %4812 = vmatprep.mubr.msk.f32.mxu0 %vm5011_vm0, %v5010_v1  ;;  %4811 = vmatpush3.msra.mxu0 %v3194_v53 }
0x1565   : > { %4821 = vmatprep.subr.bf16.mxu0 %v5010_v1 }
0x1623   : > { %v3271_v42 = vpop.f32.mrf.mxu0 }
0x1624   : > { %v3275_v43 = vmul.f32 0.088388346, %v3271_v42  ;;  %v4954_v42 = vld [vmem:[%s5732_s7 + $0x38] sm:$0xff]  }
0x1625   : > { %v4809_v44 = vpop.f32.mrf.mxu0 }
0x1626   : > { %v3276_v45 = vsel %vm818_vm3, %v3275_v43, -inf }
0x1627   : > { %3277 = vmax.xlane.f32.xlu0 %v3276_v45 }
0x16b0   : > { %v3278_v46 = vpop.xlane.xlu0 %3277 }
0x16b1   : > { %v3279_v47 = vsub.f32 %v3275_v43, %v3278_v46 }
0x16b3   : > { %v3280_v48 = vmul.f32 1.442695, %v3279_v47  ;;  %v4389_v47 = vld [vmem:[%s5733_s8] ss:$0 sm:$0xff] }
0x16b5   : > { %4989 = vpow2.f32 %v3280_v48 }
0x16c2   : > { %v4990_v49 = vpop.eup %4989 }
0x16c3   : > { %v3282_v50 = vsel %vm818_vm3, %v4990_v49, 0.0 }
0x16c4   : > { %3283 = vadd.xlane.f32.xlu1 %v3282_v50 }
0x174d   : > { %v3284_v57 = vpop.xlane.xlu1 %3283 }
0x174e   : > { %4991 = vrcp.f32 %v3284_v57 }
0x175b   : > { %v4992_v58 = vpop.eup %4991 }
0x175c   : > { %v3286_v59 = vmul.f32 %v4992_v58, %v4990_v49 }
0x175e   : > { %4813 = vmatmul.mubr.msk.f32.vlgmr.msra.gmra.mxu0 %vm818_vm3, %v3286_v59 }
0x175f   : > { %4825 = vmatprep.mubr.msk.bf16.mxu0 %vm5011_vm0, %v5010_v1  ;;  %4822 = vmatpush3.bf16.msra.mxu0 %v4949_v61  ;;  %v4955_v61 = vld [vmem:[%s5734_s9 + $0x8] sm:$0xff]  }
0x1760   : > { %4823 = vmatprep.subr.bf16.mxu0 %v5010_v1 }
0x1763   : > { %4824 = vmatpush3.bf16.msra.mxu0 %v4951_v62  ;;  %v4956_v62 = vld [vmem:[%s5734_s9] sm:$0xff]  }
0x1764   : > { %4837 = vmatprep.subr.bf16.mxu0 %v5010_v1 }
0x1766   : > { %4826 = vmatmul.mubr.msk.bf16.vlgmr.msra.gmra.mxu0 %vm570_vm1, %v5138_v5 }
0x1767   : > { %4841 = vmatprep.mubr.msk.bf16.mxu0 %vm5011_vm0, %v5010_v1  ;;  %4838 = vmatpush3.bf16.msra.mxu0 %v4952_v23 }
0x1768   : > { %4839 = vmatprep.subr.bf16.mxu0 %v5010_v1 }
0x176b   : > { %4840 = vmatpush3.bf16.msra.mxu0 %v4953_v25 }
0x176c   : > { %4855 = vmatprep.subr.bf16.mxu0 %v5010_v1 }
0x176e   : > { %4842 = vmatmul.mubr.msk.bf16.vlgmr.msra.gmra.mxu0 %vm570_vm1, %v5138_v5 }
0x176f   : > { %4857 = vmatprep.mubr.msk.bf16.mxu0 %vm5011_vm0, %v5010_v1  ;;  %4856 = vmatpush3.bf16.msra.mxu0 %v4954_v42  ;;  %v4405_v42 = vld [vmem:[%s5740_s15] ss:$0 sm:$0xff] }
0x1770   : > { %4869 = vmatprep.subr.bf16.mxu0 %v5010_v1 }
0x181e   : > { %v3356_v63 = vpop.f32.mrf.mxu0 }
0x181f   : > { %v3360_v2 = vpack.c.bf16 %v3356_v63, %v3356_v63  ;;  %v4957_v63 = vld [vmem:[%s5736_s11 + $0x38] sm:$0xff]  }
0x1820   : > { %v4814_v3 = vpop.f32.mrf.mxu0 }
0x1821   : > { %4818 = vmatmul.mubr.msk.bf16.vlgmr.msra.gmra.mxu1 %vm740_vm2, %v3360_v2  ;;  %v4959_v2 = vld [vmem:[%s5736_s11 + $0x28] sm:$0xff]   ;;  %v4960_v3 = vld [vmem:[%s5736_s11 + $0x20] sm:$0xff]  }
0x1822   : > { %4830 = vmatpush3.bf16.msra.mxu1 %v4948_v0  ;;  %4833 = vmatprep.mubr.msk.bf16.mxu1 %vm5011_vm0, %v5010_v1  ;;  %v4958_v0 = vld [vmem:[%s5736_s11 + $0x30] sm:$0xff]  }
0x1823   : > { %4831 = vmatprep.subr.bf16.mxu1 %v5010_v1 }
0x1826   : > { %4832 = vmatpush3.bf16.msra.mxu1 %v4950_v4  ;;  %v3473_v6 = vpop.f32.mrf.mxu0  ;;  %v4961_v4 = vld [vmem:[%s5736_s11 + $0x18] sm:$0xff]  }
0x1827   : > { %4845 = vmatprep.subr.mxu1 %v5010_v1  ;;  %v3474_v19 = vadd.f32 %v4360_v16, %v3473_v6  ;;  %v4962_v6 = vld [vmem:[%s5736_s11 + $0x10] sm:$0xff]  }
0x1828   : > { %v4827_v7 = vpop.f32.mrf.mxu0 }
0x1829   : > { %4834 = vmatmul.mubr.msk.bf16.vlgmr.msra.gmra.mxu1 %vm570_vm1, %v5138_v5  ;;  %v4378_v5 = vld [vmem:[%s5731_s6 + $0x7] ss:$0 sm:$0xff] }
0x182a   : > { %4847 = vmatprep.mubr.msk.f32.mxu1 %vm5011_vm0, %v5010_v1  ;;  %v3476_v8 = vpop.f32.mrf.mxu0 }
0x182c   : > { %v4828_v9 = vpop.f32.mrf.mxu0 }
0x182e   : > { %v3603_v34 = vpop.f32.mrf.mxu0 }
0x182f   : > { %v3604_v35 = vadd.f32 %v4378_v5, %v3603_v34 }
0x1830   : > { %v4843_v36 = vpop.f32.mrf.mxu0 }
0x1832   : > { %v3606_v37 = vpop.f32.mrf.mxu0 }
0x1834   : > { %v4844_v38 = vpop.f32.mrf.mxu0 }
0x18e1   : > { %v3407_v10 = vpop.f32.mrf.mxu1 }
0x18e2   : > { %v3413_v11 = vadd.f32 %v3407_v10, %v5546_v28 }
0x18e3   : > { %v4819_v12 = vpop.f32.mrf.mxu1 }
0x18e5   : > { %v3410_v13 = vpop.f32.mrf.mxu1 }
0x18e6   : > { %v4391_v13 = vld [vmem:[%s5739_s14] ss:$0 sm:$0xff] }
0x18e7   : > { %v4820_v14 = vpop.f32.mrf.mxu1 }
0x18e9   : > { %v3538_v17 = vpop.f32.mrf.mxu1 }
0x18ea   : > { %v3539_v18 = vadd.f32 %v4369_v15, %v3538_v17  ;;  %v4963_v17 = vld [vmem:[%s5736_s11 + $0x8] sm:$0xff]  }
0x18eb   : > { %v4835_v20 = vpop.f32.mrf.mxu1 }
0x18ec   : > { %4846 = vmatpush3.xpose.msk.msra.mxu1 %vm740_vm2, %v3539_v18  ;;  %v4964_v18 = vld [vmem:[%s5736_s11] sm:$0xff]  }
0x18ed   : > { %v3541_v21 = vpop.f32.mrf.mxu1  ;;  %4850 = vmatprep.subr.mxu1 %v5010_v1 }
0x18ef   : > { %v4836_v22 = vpop.f32.mrf.mxu1  ;;  %4848 = vmatmul.mubr.msk.f32.vlgmr.msra.gmra.mxu1 %vm740_vm2, %v3474_v19  ;;  %v4392_v19 = vld [vmem:[%s5735_s10] ss:$0 sm:$0xff] }
0x18f0   : > { %4852 = vmatprep.mubr.msk.f32.mxu1 %vm5011_vm0, %v5010_v1  ;;  %4851 = vmatpush3.msra.mxu1 %v3604_v35 }
0x18f1   : > { %4861 = vmatprep.subr.bf16.mxu1 %v5010_v1 }
0x19af   : > { %v3681_v26 = vpop.f32.mrf.mxu1 }
0x19b0   : > { %v3685_v27 = vmul.f32 0.088388346, %v3681_v26 }
0x19b1   : > { %v4849_v24 = vpop.f32.mrf.mxu1 }
0x19b2   : > { %v3686_v28 = vsel %vm818_vm3, %v3685_v27, -inf }
0x19b3   : > { %3687 = vmax.xlane.f32.xlu0 %v3686_v28 }
0x1a3c   : > { %v3688_v29 = vpop.xlane.xlu0 %3687 }
0x1a3d   : > { %v3689_v30 = vsub.f32 %v3685_v27, %v3688_v29 }
0x1a3f   : > { %v3690_v31 = vmul.f32 1.442695, %v3689_v30 }
0x1a41   : > { %4993 = vpow2.f32 %v3690_v31 }
0x1a4e   : > { %v4994_v32 = vpop.eup %4993 }
0x1a4f   : > { %v3692_v33 = vsel %vm818_vm3, %v4994_v32, 0.0 }
0x1a50   : > { %3693 = vadd.xlane.f32.xlu1 %v3692_v33 }
0x1ad9   : > { %v3694_v39 = vpop.xlane.xlu1 %3693 }
0x1ada   : > { %4995 = vrcp.f32 %v3694_v39 }
0x1ae7   : > { %v4996_v40 = vpop.eup %4995 }
0x1ae8   : > { %v3696_v41 = vmul.f32 %v4996_v40, %v4994_v32 }
0x1aea   : > { %4853 = vmatmul.mubr.msk.f32.vlgmr.msra.gmra.mxu1 %vm818_vm3, %v3696_v41 }
0x1aeb   : > { %4865 = vmatprep.mubr.msk.bf16.mxu1 %vm5011_vm0, %v5010_v1  ;;  %4862 = vmatpush3.bf16.msra.mxu1 %v4955_v61 }
0x1aec   : > { %4863 = vmatprep.subr.bf16.mxu1 %v5010_v1 }
0x1aef   : > { %4864 = vmatpush3.bf16.msra.mxu1 %v4956_v62 }
0x1baa   : > { %v3766_v43 = vpop.f32.mrf.mxu1 }
0x1bab   : > { %v3770_v44 = vpack.c.bf16 %v3766_v43, %v3766_v43 }
0x1bac   : > { %v4854_v45 = vpop.f32.mrf.mxu1 }
0x1bad   : > { %4858 = vmatmul.mubr.msk.bf16.vlgmr.msra.gmra.mxu0 %vm740_vm2, %v3770_v44  ;;  %v4406_v44 = vld [vmem:[%s5741_s16] ss:$0 sm:$0xff] }
0x1bae   : > { %4885 = vmatprep.mubr.msk.bf16.mxu0 %vm5011_vm0, %v5010_v1  ;;  %4870 = vmatpush3.bf16.msra.mxu0 %v4957_v63 }
0x1baf   : > { %4871 = vmatprep.subr.bf16.mxu0 %v5010_v1 }
0x1bb2   : > { %4872 = vmatpush3.bf16.msra.mxu0 %v4958_v0 }
0x1bb3   : > { %4873 = vmatprep.subr.bf16.mxu0 %v5010_v1 }
0x1bb6   : > { %4874 = vmatpush3.bf16.msra.mxu0 %v4959_v2 }
0x1bb7   : > { %4875 = vmatprep.subr.bf16.mxu0 %v5010_v1 }
0x1bba   : > { %4876 = vmatpush3.bf16.msra.mxu0 %v4960_v3 }
0x1bbb   : > { %4877 = vmatprep.subr.bf16.mxu0 %v5010_v1 }
0x1bbe   : > { %4878 = vmatpush3.bf16.msra.mxu0 %v4961_v4 }
0x1bbf   : > { %4879 = vmatprep.subr.bf16.mxu0 %v5010_v1 }
0x1bc2   : > { %4880 = vmatpush3.bf16.msra.mxu0 %v4962_v6 }
0x1bc3   : > { %4881 = vmatprep.subr.bf16.mxu0 %v5010_v1 }
0x1bc6   : > { %4882 = vmatpush3.bf16.msra.mxu0 %v4963_v17 }
0x1bc7   : > { %4883 = vmatprep.subr.bf16.mxu0 %v5010_v1  ;;  %v4396_v1 = vld [vmem:[%s5737_s12] ss:$0 sm:$0xff] }
0x1bca   : > { %4884 = vmatpush3.bf16.msra.mxu0 %v4964_v18 }
0x1c6d   : > { %v3817_v46 = vpop.f32.mrf.mxu0 }
0x1c6e   : > { %v3823_v48 = vadd.f32 %v3817_v46, %v3413_v11  ;;  %v4390_v11 = vld [vmem:[%s5738_s13] ss:$0 sm:$0xff] }
0x1c6f   : > { %v4859_v49 = vpop.f32.mrf.mxu0 }
0x1c70   : > { %v3831_v50 = vadd.f32 %v4389_v47, %v3823_v48 }
0x1c71   : > { %v3820_v51 = vpop.f32.mrf.mxu0 }
0x1c72   : > { %v3832_v53 = vadd.f32 %v5001_v52, %v3831_v50 }
0x1c73   : > { %v4860_v54 = vpop.f32.mrf.mxu0 }
0x1c74   : > { %v3833_v55 = vsel %vm570_vm1, %v3832_v53, 0.0 }
0x1c75   : > { %3834 = vadd.xlane.f32.xlu0 %v3833_v55 }
0x1cfe   : > { %v3835_v56 = vpop.xlane.xlu0 %3834 }
0x1cff   : > { %v3837_v57 = vmul.f32 0.03125, %v3835_v56 }
0x1d01   : > { %v3838_v58 = vsub.f32 %v3832_v53, %v3837_v57 }
0x1d03   : > { %v3839_v59 = vmul.f32 %v3838_v58, %v3838_v58 }
0x1d05   : > { %v3840_v60 = vsel %vm570_vm1, %v3839_v59, 0.0 }
0x1d06   : > { %3841 = vadd.xlane.f32.xlu1 %v3840_v60 }
0x1d8f   : > { %v3842_v7 = vpop.xlane.xlu1 %3841 }
0x1d90   : > { %v3843_v8 = vmul.f32 0.03125, %v3842_v7 }
0x1d92   : > { %v3844_v9 = vadd.f32 1e-05, %v3843_v8 }
0x1d94   : > { %4997 = vrsqrt.f32 %v3844_v9 }
0x1da1   : > { %v4998_v10 = vpop.eup %4997 }
0x1da2   : > { %v3846_v12 = vmul.f32 %v4998_v10, %v3838_v58 }
0x1da4   : > { %v3854_v14 = vmul.f32 %v4390_v11, %v3846_v12 }
0x1da6   : > { %v3862_v15 = vadd.f32 %v4391_v13, %v3854_v14 }
0x1da8   : > { %v3863_v16 = vpack.c.bf16 %v3862_v15, %v3862_v15 }
0x1daa   : > { %4866 = vmatmul.mubr.msk.bf16.vlgmr.msra.gmra.mxu1 %vm570_vm1, %v3863_v16 }
0x1e6a   : > { %v3924_v20 = vpop.f32.mrf.mxu1 }
0x1e6b   : > { %v3925_v21 = vadd.f32 %v4392_v19, %v3924_v20 }
0x1e6c   : > { %v4867_v22 = vpop.f32.mrf.mxu1 }
0x1e6d   : > { %v3930_v23 = vmax.f32 %v3925_v21, 0.0 }
0x1e6e   : > { %v3927_v25 = vpop.f32.mrf.mxu1 }
0x1e6f   : > { %v3931_v26 = vpack.c.bf16 %v3930_v23, %v3930_v23 }
0x1e70   : > { %v4868_v27 = vpop.f32.mrf.mxu1 }
0x1e71   : > { %4886 = vmatmul.mubr.bf16.vlgmr.msra.gmra.mxu0 %v3931_v26 }
0x1f31   : > { %v4037_v24 = vpop.f32.mrf.mxu0 }
0x1f32   : > { %v4038_v28 = vadd.f32 %v4396_v1, %v4037_v24 }
0x1f33   : > { %v4887_v29 = vpop.f32.mrf.mxu0 }
0x1f34   : > { %v4043_v30 = vadd.f32 %v4038_v28, %v3862_v15 }
0x1f35   : > { %v4040_v31 = vpop.f32.mrf.mxu0 }
0x1f36   : > { %v4044_v32 = vsel %vm570_vm1, %v4043_v30, 0.0 }
0x1f37   : > { %4045 = vadd.xlane.f32.xlu0 %v4044_v32  ;;  %v4888_v33 = vpop.f32.mrf.mxu0 }
0x1fc0   : > { %v4046_v5 = vpop.xlane.xlu0 %4045 }
0x1fc1   : > { %v4047_v34 = vmul.f32 0.03125, %v4046_v5 }
0x1fc3   : > { %v4048_v35 = vsub.f32 %v4043_v30, %v4047_v34 }
0x1fc5   : > { %v4049_v36 = vmul.f32 %v4048_v35, %v4048_v35 }
0x1fc7   : > { %v4050_v37 = vsel %vm570_vm1, %v4049_v36, 0.0 }
0x1fc8   : > { %4051 = vadd.xlane.f32.xlu1 %v4050_v37 }
0x2051   : > { %v4052_v38 = vpop.xlane.xlu1 %4051 }
0x2052   : > { %v4053_v39 = vmul.f32 0.03125, %v4052_v38 }
0x2054   : > { %v4054_v40 = vadd.f32 1e-05, %v4053_v39 }
0x2056   : > { %4999 = vrsqrt.f32 %v4054_v40 }
0x2063   : > { %v5000_v41 = vpop.eup %4999 }
0x2064   : > { %v4056_v43 = vmul.f32 %v5000_v41, %v4048_v35 }
0x2066   : > { %v4064_v45 = vmul.f32 %v4405_v42, %v4056_v43 }
0x2068   : > { %v4072_v46 = vadd.f32 %v4406_v44, %v4064_v45 }
0x206a   : > { %4073 = vst.msk [vmem:[%s543_s1] sm:$0xff] %vm570_vm1, %v4072_v46 }
0x206b PF: > { %s27_s24 = sadd.s32 1, %s5008_s24  }
0x206c   : > { %p24_p4 = scmp.ge.s32.totalorder %s27_s24, 4  }
0x206e   :  { %26 = sbr.rel (!%p24_p4) target bundleno = 3 (0x3), region = 167 }

</bundles_post_ra>
